<compile_context>
chip_gen: v6e
topology: v6e:2x2x1
jax: 0.10.0
libtpu: 0.0.40
codegen_flags: <defaults>
</compile_context>

<pallas_src>
import math

import numpy as np
import jax
import jax.numpy as jnp
from jax.experimental import pallas as pl
from jax.experimental.pallas import tpu as pltpu

# ------------------------- model hyper-parameters (opt) -------------------------
BATCH = 2
INPUT_SIZE = 24
WINDOW_SIZE = [2, 2, 2]
INNER_SIZE = 3
D_MODEL = 16
D_INNER_HID = 32
N_HEAD = 4
D_K = 8
D_V = 8
N_LAYER = 2
COV_SIZE = 3
NUM_SEQ = 4

BN_EPS = 1e-5
LN_EPS_DEFAULT = 1e-5     # nn.LayerNorm default (BottleneckConstruct.norm)
LN_EPS_ATTN = 1e-6        # attention / FFN layer norms

BN_SCALE = 1.0 / math.sqrt(1.0 + BN_EPS)
NEG_INF = -1e9
NUM_FEAT = COV_SIZE + 1 + 3   # covariates, series-id, circular conv taps [x_{t-1}, x_t, x_{t+1}]


# ------------------------- static pyramid structures (numpy) -------------------------
def get_mask(input_size, window_size, inner_size):
    all_size = [input_size]
    for i in range(len(window_size)):
        all_size.append(all_size[i] // window_size[i])
    seq_length = sum(all_size)
    mask = np.zeros((seq_length, seq_length), dtype=np.float32)

    inner_window = inner_size // 2
    for layer_idx in range(len(all_size)):
        start = sum(all_size[:layer_idx])
        for i in range(start, start + all_size[layer_idx]):
            left = max(i - inner_window, start)
            right = min(i + inner_window + 1, start + all_size[layer_idx])
            mask[i, left:right] = 1

    for layer_idx in range(1, len(all_size)):
        start = sum(all_size[:layer_idx])
        for i in range(start, start + all_size[layer_idx]):
            left = (start - all_size[layer_idx - 1]) + (i - start) * window_size[layer_idx - 1]
            if i == start + all_size[layer_idx] - 1:
                right = start
            else:
                right = (start - all_size[layer_idx - 1]) + (i - start + 1) * window_size[layer_idx - 1]
            mask[i, left:right] = 1
            mask[left:right, i] = 1

    # returned mask: 1.0 == masked position (like `(1 - mask).bool()` in torch)
    return (1.0 - mask).astype(np.float32), all_size


def refer_points(all_sizes, window_size):
    input_size = all_sizes[0]
    indexes = np.zeros((input_size, len(all_sizes)), dtype=np.int32)
    for i in range(input_size):
        indexes[i, 0] = i
        former = i
        for j in range(1, len(all_sizes)):
            start = sum(all_sizes[:j])
            inner = former - (start - all_sizes[j - 1])
            former = start + min(inner // window_size[j - 1], all_sizes[j] - 1)
            indexes[i, j] = former
    return indexes


def build_pos_emb(input_size, d_model):
    pos = np.arange(input_size, dtype=np.float64)
    vec = np.array([math.pow(10000.0, 2.0 * (i // 2) / d_model) for i in range(d_model)],
                   dtype=np.float64)
    pe = pos[:, None] / vec[None, :]
    pe[:, 0::2] = np.sin(pe[:, 0::2])
    pe[:, 1::2] = np.cos(pe[:, 1::2])
    return pe.astype(np.float32)


_MASK_NP, ALL_SIZE = get_mask(INPUT_SIZE, WINDOW_SIZE, INNER_SIZE)
L_REAL = sum(ALL_SIZE)                         # 45
L_PAD = ((L_REAL + 7) // 8) * 8                # 48 (multiple of 8 sublanes)
N_SCALES = len(ALL_SIZE)                       # 4
CONV_OFF = [int(sum(WINDOW_SIZE[:i])) for i in range(len(WINDOW_SIZE))]


# ------------------------- the single fused Pallas kernel -------------------------
def _fused_forward_kernel(
    feats_ref, pos_ref, wemb_ref, bemb_ref,
    downw_ref, downb_ref, convw_ref, convb_ref, upw_ref, upb_ref,
    blng_ref, blnb_ref, mask_ref, gmat_ref, predw_ref,
    wq_ref, wk_ref, wv_ref, fcw_ref, fcb_ref, ln1g_ref, ln1b_ref,
    w1_ref, b1_ref, w2_ref, b2_ref, ln2g_ref, ln2b_ref,
    out_ref,
):
    f32 = jnp.float32

    def mm(a, b):
        return jnp.dot(a, b, preferred_element_type=f32)

    def layer_norm(x, g, b, eps):
        mu = jnp.mean(x, axis=-1, keepdims=True)
        xc = x - mu
        var = jnp.mean(xc * xc, axis=-1, keepdims=True)
        return xc * jax.lax.rsqrt(var + eps) * g + b

    def elu(x):
        return jnp.where(x > 0.0, x, jnp.exp(jnp.minimum(x, 0.0)) - 1.0)

    def erf_approx(x):
        # TODO(synk): lax.erf lowering availability in Mosaic is uncertain; use
        # Abramowitz-Stegun 7.1.26 (|err| < 1.5e-7) to keep erf-GELU in-kernel.
        p = 0.3275911
        a1, a2, a3, a4, a5 = (0.254829592, -0.284496736, 1.421413741,
                              -1.453152027, 1.061405429)
        sgn = jnp.where(x < 0.0, -1.0, 1.0)
        ax = jnp.abs(x)
        t = 1.0 / (1.0 + p * ax)
        poly = ((((a5 * t + a4) * t + a3) * t + a2) * t + a1) * t
        return sgn * (1.0 - poly * jnp.exp(-ax * ax))

    def gelu(x):  # matches F.gelu (erf form) up to ~1e-7
        return 0.5 * x * (1.0 + erf_approx(x * (1.0 / math.sqrt(2.0))))

    def softplus(x):
        return jnp.maximum(x, 0.0) + jnp.log(1.0 + jnp.exp(-jnp.abs(x)))

    def one_hot_eq(shape, fn):
        rows = jax.lax.broadcasted_iota(jnp.int32, shape, 0)
        cols = jax.lax.broadcasted_iota(jnp.int32, shape, 1)
        return fn(rows, cols).astype(f32)

    # ---------------- SingleStepEmbedding ----------------
    feats = feats_ref[0]                                           # (L0, NUM_FEAT)
    emb = mm(feats, wemb_ref[...]) + bemb_ref[...] + pos_ref[...]  # (L0, D)

    # ---------------- BottleneckConstruct (CSCM) ----------------
    # seq is assembled as a sum of one-hot placement matmuls; rows >= L_REAL
    # stay zero (padding) and only ever attend to themselves.
    place_emb = one_hot_eq((L_PAD, INPUT_SIZE), lambda r, c: r == c)
    seq = mm(place_emb, emb)                                       # (L_PAD, D)

    cur = mm(emb, downw_ref[...]) + downb_ref[...]                 # (L0, d_k)
    row = INPUT_SIZE
    lc = INPUT_SIZE
    for lvl, win in enumerate(WINDOW_SIZE):
        lo = lc // win
        acc = jnp.zeros((lo, D_K), f32)
        for p in range(win):
            # strided Conv1d(k=win, stride=win) tap p as a one-hot selection matmul
            sel = one_hot_eq((lo, lc), lambda r, c, _p=p, _w=win: c == _w * r + _p)
            acc = acc + mm(sel, mm(cur, convw_ref[CONV_OFF[lvl] + p]))
        # TODO(synk): BatchNorm1d = eval mode w/ default running stats -> rescale.
        y = elu((acc + convb_ref[lvl]) * BN_SCALE)                 # (lo, d_k)
        up = mm(y, upw_ref[...]) + upb_ref[...]                    # (lo, D)
        place = one_hot_eq((L_PAD, lo), lambda r, c, _o=row: r == c + _o)
        seq = seq + mm(place, up)
        row += lo
        lc = lo
        cur = y

    seq = layer_norm(seq, blng_ref[...], blnb_ref[...], LN_EPS_DEFAULT)

    # ---------------- pyramid self-attention encoder (post-norm) ----------------
    add_mask = mask_ref[...]                                       # (L_PAD, L_PAD)
    for li in range(N_LAYER):
        residual = seq
        attn_out = jnp.zeros((L_PAD, D_MODEL), f32)
        for h in range(N_HEAD):
            hi = li * N_HEAD + h
            q = mm(seq, wq_ref[hi])                                # 1/sqrt(d_k) folded into W_q
            k = mm(seq, wk_ref[hi])
            v = mm(seq, wv_ref[hi])
            s = jax.lax.dot_general(q, k, (((1,), (1,)), ((), ())),
                                    preferred_element_type=f32)    # (L_PAD, L_PAD)
            s = s + add_mask
            s = s - jnp.max(s, axis=-1, keepdims=True)
            pexp = jnp.exp(s)
            pexp = pexp * pl.reciprocal(jnp.sum(pexp, axis=-1, keepdims=True),
                                        approx=True)
            attn_out = attn_out + mm(mm(pexp, v), fcw_ref[hi])     # per-head fc, summed
        x = layer_norm(attn_out + fcb_ref[li] + residual,
                       ln1g_ref[li], ln1b_ref[li], LN_EPS_ATTN)
        h1 = gelu(mm(x, w1_ref[li]) + b1_ref[li])
        h2 = mm(h1, w2_ref[li]) + b2_ref[li] + x
        seq = layer_norm(h2, ln2g_ref[li], ln2b_ref[li], LN_EPS_ATTN)

    # ---------------- pyramid node gather + mean/var predictors ----------------
    # torch.gather over the static pyramid indexes is a one-hot matmul per scale,
    # fused directly with the concatenated [4*D, 2] predictor weights.
    mv = jnp.zeros((INPUT_SIZE, 2), f32)
    for j in range(N_SCALES):
        mv = mv + mm(mm(gmat_ref[j], seq), predw_ref[j])
    out_ref[0] = softplus(mv)


# ------------------------- deterministic parameter init -------------------------
def init_params():
    keys = iter(jax.random.split(jax.random.PRNGKey(0), 256))

    def w(shape):
        return jax.random.normal(next(keys), shape, jnp.float32) / math.sqrt(shape[0])

    def b(shape):
        return 0.01 * jax.random.normal(next(keys), shape, jnp.float32)

    params = dict(
        # SingleStepEmbedding
        cov_w=w((COV_SIZE + 1, D_MODEL)), cov_b=b((D_MODEL,)),
        data_w=w((3, D_MODEL)),                 # circular conv1d(k=3) weight as [k, d_model]
        # BottleneckConstruct
        down_w=w((D_MODEL, D_K)), down_b=b((D_K,)),
        up_w=w((D_K, D_MODEL)), up_b=b((D_MODEL,)),
        bneck_ln_g=jnp.ones((D_MODEL,), jnp.float32),
        bneck_ln_b=jnp.zeros((D_MODEL,), jnp.float32),
        # Predictors (Linear(4*d_model, 1, bias=False))
        mean_w=w((4 * D_MODEL, 1)),
        var_w=w((4 * D_MODEL, 1)),
    )
    for i, win in enumerate(WINDOW_SIZE):
        # Conv1d(C, C, kernel=win, stride=win) weight pre-reshaped to [(win, c_in), c_out]
        params[f'conv{i}_w'] = w((win * D_K, D_K))
        params[f'conv{i}_b'] = b((D_K,))

    layers = []
    for _ in range(N_LAYER):
        layers.append(dict(
            wq=w((D_MODEL, N_HEAD * D_K)),
            wk=w((D_MODEL, N_HEAD * D_K)),
            wv=w((D_MODEL, N_HEAD * D_V)),
            fc_w=w((N_HEAD * D_V, D_MODEL)), fc_b=b((D_MODEL,)),
            ln1_g=jnp.ones((D_MODEL,), jnp.float32),
            ln1_b=jnp.zeros((D_MODEL,), jnp.float32),
            w1=w((D_MODEL, D_INNER_HID)), b1=b((D_INNER_HID,)),
            w2=w((D_INNER_HID, D_MODEL)), b2=b((D_MODEL,)),
            ln2_g=jnp.ones((D_MODEL,), jnp.float32),
            ln2_b=jnp.zeros((D_MODEL,), jnp.float32),
        ))
    params['layers'] = layers
    return params


# ------------------------- pack params into kernel-ready arrays -------------------------
PACKED_ORDER = ('pos', 'w_emb', 'b_emb', 'down_w', 'down_b', 'conv_w', 'conv_b',
                'up_w', 'up_b', 'bln_g', 'bln_b', 'mask', 'gmat', 'pred_w',
                'wq', 'wk', 'wv', 'fc_w', 'fc_b', 'ln1_g', 'ln1_b',
                'w1', 'b1', 'w2', 'b2', 'ln2_g', 'ln2_b')


def pack_params(params):
    indexes = refer_points(ALL_SIZE, WINDOW_SIZE)           # (L0, N_SCALES)
    pos = build_pos_emb(INPUT_SIZE, D_MODEL)                 # (L0, D)

    # additive attention mask on the padded pyramid: 0 = attend, -1e9 = masked
    add_mask = np.full((L_PAD, L_PAD), NEG_INF, np.float32)
    add_mask[:L_REAL, :L_REAL] = np.where(_MASK_NP > 0.5, NEG_INF, 0.0)
    for i in range(L_REAL, L_PAD):
        add_mask[i, i] = 0.0                                 # padded rows attend to self only

    # one-hot gather matrices for the static torch.gather indexes
    gmat = np.zeros((N_SCALES, INPUT_SIZE, L_PAD), np.float32)
    for i in range(INPUT_SIZE):
        for j in range(N_SCALES):
            gmat[j, i, indexes[i, j]] = 1.0

    np_ = lambda a: np.asarray(a, np.float32)

    w_emb = np.concatenate([np_(params['cov_w']), np_(params['data_w'])], axis=0)  # (7, D)
    b_emb = np_(params['cov_b']).reshape(1, D_MODEL)

    conv_w = np.concatenate(
        [np_(params[f'conv{i}_w']).reshape(WINDOW_SIZE[i], D_K, D_K)
         for i in range(len(WINDOW_SIZE))], axis=0)          # (sum(win), d_k, d_k)
    conv_b = np.stack([np_(params[f'conv{i}_b']).reshape(1, D_K)
                       for i in range(len(WINDOW_SIZE))], axis=0)

    inv_temp = 1.0 / math.sqrt(D_K)
    layers = params['layers']

    def head_in(name, dh, scale=1.0):   # (D, H*dh) -> (n_layer*H, D, dh)
        return np.concatenate(
            [np_(l[name]).reshape(D_MODEL, N_HEAD, dh).transpose(1, 0, 2) * scale
             for l in layers], axis=0)

    def stacked(name, width):
        return np.stack([np_(l[name]).reshape(1, width) for l in layers], axis=0)

    pred_w = np.concatenate([np_(params['mean_w']), np_(params['var_w'])], axis=1)  # (4D, 2)
    pred_w = pred_w.reshape(N_SCALES, D_MODEL, 2)

    packed = dict(
        pos=pos,
        w_emb=w_emb, b_emb=b_emb,
        down_w=np_(params['down_w']), down_b=np_(params['down_b']).reshape(1, D_K),
        conv_w=conv_w, conv_b=conv_b,
        up_w=np_(params['up_w']), up_b=np_(params['up_b']).reshape(1, D_MODEL),
        bln_g=np_(params['bneck_ln_g']).reshape(1, D_MODEL),
        bln_b=np_(params['bneck_ln_b']).reshape(1, D_MODEL),
        mask=add_mask, gmat=gmat, pred_w=pred_w,
        wq=head_in('wq', D_K, inv_temp),                    # 1/sqrt(d_k) folded into W_q
        wk=head_in('wk', D_K),
        wv=head_in('wv', D_V),
        fc_w=np.concatenate([np_(l['fc_w']).reshape(N_HEAD, D_V, D_MODEL) for l in layers], axis=0),
        fc_b=stacked('fc_b', D_MODEL),
        ln1_g=stacked('ln1_g', D_MODEL), ln1_b=stacked('ln1_b', D_MODEL),
        w1=np.stack([np_(l['w1']) for l in layers], axis=0),
        b1=stacked('b1', D_INNER_HID),
        w2=np.stack([np_(l['w2']) for l in layers], axis=0),
        b2=stacked('b2', D_MODEL),
        ln2_g=stacked('ln2_g', D_MODEL), ln2_b=stacked('ln2_b', D_MODEL),
    )
    return {k: jnp.asarray(v, jnp.float32) for k, v in packed.items()}


# ------------------------- forward pass (one pallas_call) -------------------------
def _fixed_spec(arr):
    nd = arr.ndim
    return pl.BlockSpec(arr.shape, lambda b, _n=nd: (0,) * _n)


def forward(packed, data):
    B, L0, _ = data.shape

    # tiny XLA glue: covariates, series-id feature and circular conv1d(k=3) taps
    covs = data[:, :, 1:1 + COV_SIZE]
    seq_ids = (data[:, :, -1] / NUM_SEQ - 0.5)[..., None]
    x0 = data[:, :, 0]
    nbr = jnp.stack([jnp.roll(x0, 1, axis=1), x0, jnp.roll(x0, -1, axis=1)], axis=-1)
    feats = jnp.concatenate([covs, seq_ids, nbr], axis=-1).astype(jnp.float32)  # (B, L0, 7)

    weights = [packed[k] for k in PACKED_ORDER]
    in_specs = ([pl.BlockSpec((1, L0, NUM_FEAT), lambda b: (b, 0, 0))] +
                [_fixed_spec(w) for w in weights])

    mv = pl.pallas_call(
        _fused_forward_kernel,
        grid=(B,),
        in_specs=in_specs,
        out_specs=pl.BlockSpec((1, L0, 2), lambda b: (b, 0, 0)),
        out_shape=jax.ShapeDtypeStruct((B, L0, 2), jnp.float32),
        compiler_params=pltpu.CompilerParams(
            dimension_semantics=("parallel",)),   # v7x: one batch element per TensorCore
    )(feats, *weights)

    return mv[..., 0], mv[..., 1]


# ------------------------- main -------------------------
if __name__ == "__main__":
    params = init_params()
    packed = pack_params(params)

    k1, k2 = jax.random.split(jax.random.PRNGKey(0), 2)
    target = jax.random.normal(k1, (BATCH, INPUT_SIZE, 1), jnp.float32)
    covariates = jax.random.normal(k2, (BATCH, INPUT_SIZE, COV_SIZE), jnp.float32)
    series_id = jnp.broadcast_to(
        (jnp.arange(BATCH, dtype=jnp.float32) % NUM_SEQ)[:, None, None],
        (BATCH, INPUT_SIZE, 1))
    # data layout: [:, :, 0]=target, [:, :, 1:1+cov]=covariates, [:, :, -1]=series id
    data = jnp.concatenate([target, covariates, series_id], axis=-1)

    fwd = jax.jit(lambda d: forward(packed, d))
    mean_pre, var_pre = fwd(data)
    jax.block_until_ready((mean_pre, var_pre))

    assert mean_pre.shape == (BATCH, INPUT_SIZE)
    assert var_pre.shape == (BATCH, INPUT_SIZE)
    assert bool(jnp.all(jnp.isfinite(mean_pre))) and bool(jnp.all(jnp.isfinite(var_pre)))
    assert bool(jnp.all(mean_pre >= 0.0)) and bool(jnp.all(var_pre >= 0.0))  # softplus outputs

    print("KERNEL_OK")
</pallas_src>

<mosaic_0001>
module attributes {stable_mosaic.version = 11 : i64} {
  func.func @_fused_forward_kernel(%arg0: i32, %arg1: memref<1x24x7xf32, #tpu.memory_space<vmem>>, %arg2: memref<24x16xf32, #tpu.memory_space<vmem>>, %arg3: memref<7x16xf32, #tpu.memory_space<vmem>>, %arg4: memref<1x16xf32, #tpu.memory_space<vmem>>, %arg5: memref<16x8xf32, #tpu.memory_space<vmem>>, %arg6: memref<1x8xf32, #tpu.memory_space<vmem>>, %arg7: memref<6x8x8xf32, #tpu.memory_space<vmem>>, %arg8: memref<3x1x8xf32, #tpu.memory_space<vmem>>, %arg9: memref<8x16xf32, #tpu.memory_space<vmem>>, %arg10: memref<1x16xf32, #tpu.memory_space<vmem>>, %arg11: memref<1x16xf32, #tpu.memory_space<vmem>>, %arg12: memref<1x16xf32, #tpu.memory_space<vmem>>, %arg13: memref<48x48xf32, #tpu.memory_space<vmem>>, %arg14: memref<4x24x48xf32, #tpu.memory_space<vmem>>, %arg15: memref<4x16x2xf32, #tpu.memory_space<vmem>>, %arg16: memref<8x16x8xf32, #tpu.memory_space<vmem>>, %arg17: memref<8x16x8xf32, #tpu.memory_space<vmem>>, %arg18: memref<8x16x8xf32, #tpu.memory_space<vmem>>, %arg19: memref<8x8x16xf32, #tpu.memory_space<vmem>>, %arg20: memref<2x1x16xf32, #tpu.memory_space<vmem>>, %arg21: memref<2x1x16xf32, #tpu.memory_space<vmem>>, %arg22: memref<2x1x16xf32, #tpu.memory_space<vmem>>, %arg23: memref<2x16x32xf32, #tpu.memory_space<vmem>>, %arg24: memref<2x1x32xf32, #tpu.memory_space<vmem>>, %arg25: memref<2x32x16xf32, #tpu.memory_space<vmem>>, %arg26: memref<2x1x16xf32, #tpu.memory_space<vmem>>, %arg27: memref<2x1x16xf32, #tpu.memory_space<vmem>>, %arg28: memref<2x1x16xf32, #tpu.memory_space<vmem>>, %arg29: memref<1x24x2xf32, #tpu.memory_space<vmem>>) attributes {dimension_semantics = [#tpu.dimension_semantics<parallel>], iteration_bounds = array<i64: 2>, scalar_prefetch = 0 : i64, scratch_operands = 0 : i64, tpu.core_type = #tpu.core_type<tc>, window_params = [{transform_indices = @transform_0, window_bounds = array<i64: 1, 24, 7>}, {pipeline_mode = #tpu.pipeline_mode<synchronous>, transform_indices = @transform_1, window_bounds = array<i64: 24, 16>}, {pipeline_mode = #tpu.pipeline_mode<synchronous>, transform_indices = @transform_2, window_bounds = array<i64: 7, 16>}, {pipeline_mode = #tpu.pipeline_mode<synchronous>, transform_indices = @transform_3, window_bounds = array<i64: 1, 16>}, {pipeline_mode = #tpu.pipeline_mode<synchronous>, transform_indices = @transform_4, window_bounds = array<i64: 16, 8>}, {pipeline_mode = #tpu.pipeline_mode<synchronous>, transform_indices = @transform_5, window_bounds = array<i64: 1, 8>}, {pipeline_mode = #tpu.pipeline_mode<synchronous>, transform_indices = @transform_6, window_bounds = array<i64: 6, 8, 8>}, {pipeline_mode = #tpu.pipeline_mode<synchronous>, transform_indices = @transform_7, window_bounds = array<i64: 3, 1, 8>}, {pipeline_mode = #tpu.pipeline_mode<synchronous>, transform_indices = @transform_8, window_bounds = array<i64: 8, 16>}, {pipeline_mode = #tpu.pipeline_mode<synchronous>, transform_indices = @transform_9, window_bounds = array<i64: 1, 16>}, {pipeline_mode = #tpu.pipeline_mode<synchronous>, transform_indices = @transform_10, window_bounds = array<i64: 1, 16>}, {pipeline_mode = #tpu.pipeline_mode<synchronous>, transform_indices = @transform_11, window_bounds = array<i64: 1, 16>}, {pipeline_mode = #tpu.pipeline_mode<synchronous>, transform_indices = @transform_12, window_bounds = array<i64: 48, 48>}, {pipeline_mode = #tpu.pipeline_mode<synchronous>, transform_indices = @transform_13, window_bounds = array<i64: 4, 24, 48>}, {pipeline_mode = #tpu.pipeline_mode<synchronous>, transform_indices = @transform_14, window_bounds = array<i64: 4, 16, 2>}, {pipeline_mode = #tpu.pipeline_mode<synchronous>, transform_indices = @transform_15, window_bounds = array<i64: 8, 16, 8>}, {pipeline_mode = #tpu.pipeline_mode<synchronous>, transform_indices = @transform_16, window_bounds = array<i64: 8, 16, 8>}, {pipeline_mode = #tpu.pipeline_mode<synchronous>, transform_indices = @transform_17, window_bounds = array<i64: 8, 16, 8>}, {pipeline_mode = #tpu.pipeline_mode<synchronous>, transform_indices = @transform_18, window_bounds = array<i64: 8, 8, 16>}, {pipeline_mode = #tpu.pipeline_mode<synchronous>, transform_indices = @transform_19, window_bounds = array<i64: 2, 1, 16>}, {pipeline_mode = #tpu.pipeline_mode<synchronous>, transform_indices = @transform_20, window_bounds = array<i64: 2, 1, 16>}, {pipeline_mode = #tpu.pipeline_mode<synchronous>, transform_indices = @transform_21, window_bounds = array<i64: 2, 1, 16>}, {pipeline_mode = #tpu.pipeline_mode<synchronous>, transform_indices = @transform_22, window_bounds = array<i64: 2, 16, 32>}, {pipeline_mode = #tpu.pipeline_mode<synchronous>, transform_indices = @transform_23, window_bounds = array<i64: 2, 1, 32>}, {pipeline_mode = #tpu.pipeline_mode<synchronous>, transform_indices = @transform_24, window_bounds = array<i64: 2, 32, 16>}, {pipeline_mode = #tpu.pipeline_mode<synchronous>, transform_indices = @transform_25, window_bounds = array<i64: 2, 1, 16>}, {pipeline_mode = #tpu.pipeline_mode<synchronous>, transform_indices = @transform_26, window_bounds = array<i64: 2, 1, 16>}, {pipeline_mode = #tpu.pipeline_mode<synchronous>, transform_indices = @transform_27, window_bounds = array<i64: 2, 1, 16>}, {transform_indices = @transform_28, window_bounds = array<i64: 1, 24, 2>}]} {
    %c0 = arith.constant 0 : index
    %c0_0 = arith.constant 0 : index
    %c0_1 = arith.constant 0 : index
    %0 = vector.load %arg1[%c0, %c0_0, %c0_1] : memref<1x24x7xf32, #tpu.memory_space<vmem>>, vector<1x24x7xf32>
    %1 = vector.shape_cast %0 : vector<1x24x7xf32> to vector<24x7xf32>
    %c0_2 = arith.constant 0 : index
    %c0_3 = arith.constant 0 : index
    %2 = vector.load %arg3[%c0_2, %c0_3] : memref<7x16xf32, #tpu.memory_space<vmem>>, vector<7x16xf32>
    %cst = arith.constant dense<0.000000e+00> : vector<24x16xf32>
    %3 = tpu.matmul %1, %2, %cst {dimension_numbers = #tpu.dot_dimension_numbers<[1], [0], [0], [1], [0, 0, 1, 1], [], []>} : vector<24x7xf32>, vector<7x16xf32>, vector<24x16xf32> -> vector<24x16xf32>
    %c0_4 = arith.constant 0 : index
    %c0_5 = arith.constant 0 : index
    %4 = vector.load %arg4[%c0_4, %c0_5] : memref<1x16xf32, #tpu.memory_space<vmem>>, vector<1x16xf32>
    %5 = vector.broadcast %4 : vector<1x16xf32> to vector<24x16xf32>
    %6 = arith.addf %3, %5 : vector<24x16xf32>
    %c0_6 = arith.constant 0 : index
    %c0_7 = arith.constant 0 : index
    %7 = vector.load %arg2[%c0_6, %c0_7] : memref<24x16xf32, #tpu.memory_space<vmem>>, vector<24x16xf32>
    %8 = arith.addf %6, %7 : vector<24x16xf32>
    %9 = tpu.iota {dimensions = array<i32: 0>} : vector<48x24xi32>
    %10 = tpu.iota {dimensions = array<i32: 1>} : vector<48x24xi32>
    %11 = arith.cmpi eq, %9, %10 : vector<48x24xi32>
    %12 = arith.extui %11 : vector<48x24xi1> to vector<48x24xi32>
    %13 = arith.sitofp %12 : vector<48x24xi32> to vector<48x24xf32>
    %cst_8 = arith.constant dense<0.000000e+00> : vector<48x16xf32>
    %14 = tpu.matmul %13, %8, %cst_8 {dimension_numbers = #tpu.dot_dimension_numbers<[1], [0], [0], [1], [0, 0, 1, 1], [], []>} : vector<48x24xf32>, vector<24x16xf32>, vector<48x16xf32> -> vector<48x16xf32>
    %c0_9 = arith.constant 0 : index
    %c0_10 = arith.constant 0 : index
    %15 = vector.load %arg5[%c0_9, %c0_10] : memref<16x8xf32, #tpu.memory_space<vmem>>, vector<16x8xf32>
    %cst_11 = arith.constant dense<0.000000e+00> : vector<24x8xf32>
    %16 = tpu.matmul %8, %15, %cst_11 {dimension_numbers = #tpu.dot_dimension_numbers<[1], [0], [0], [1], [0, 0, 1, 1], [], []>} : vector<24x16xf32>, vector<16x8xf32>, vector<24x8xf32> -> vector<24x8xf32>
    %c0_12 = arith.constant 0 : index
    %c0_13 = arith.constant 0 : index
    %17 = vector.load %arg6[%c0_12, %c0_13] : memref<1x8xf32, #tpu.memory_space<vmem>>, vector<1x8xf32>
    %18 = vector.broadcast %17 : vector<1x8xf32> to vector<24x8xf32>
    %19 = arith.addf %16, %18 : vector<24x8xf32>
    %cst_14 = arith.constant 0.000000e+00 : f32
    %20 = vector.broadcast %cst_14 : f32 to vector<12x8xf32>
    %21 = tpu.iota {dimensions = array<i32: 0>} : vector<12x24xi32>
    %22 = tpu.iota {dimensions = array<i32: 1>} : vector<12x24xi32>
    %c2_i32 = arith.constant 2 : i32
    %23 = vector.broadcast %c2_i32 : i32 to vector<12x24xi32>
    %24 = arith.muli %23, %21 : vector<12x24xi32>
    %c0_i32 = arith.constant 0 : i32
    %25 = vector.broadcast %c0_i32 : i32 to vector<12x24xi32>
    %26 = arith.addi %24, %25 : vector<12x24xi32>
    %27 = arith.cmpi eq, %22, %26 : vector<12x24xi32>
    %28 = arith.extui %27 : vector<12x24xi1> to vector<12x24xi32>
    %29 = arith.sitofp %28 : vector<12x24xi32> to vector<12x24xf32>
    %c0_15 = arith.constant 0 : index
    %c0_16 = arith.constant 0 : index
    %c0_17 = arith.constant 0 : index
    %30 = vector.load %arg7[%c0_15, %c0_16, %c0_17] : memref<6x8x8xf32, #tpu.memory_space<vmem>>, vector<1x8x8xf32>
    %31 = vector.shape_cast %30 : vector<1x8x8xf32> to vector<8x8xf32>
    %cst_18 = arith.constant dense<0.000000e+00> : vector<24x8xf32>
    %32 = tpu.matmul %19, %31, %cst_18 {dimension_numbers = #tpu.dot_dimension_numbers<[1], [0], [0], [1], [0, 0, 1, 1], [], []>} : vector<24x8xf32>, vector<8x8xf32>, vector<24x8xf32> -> vector<24x8xf32>
    %cst_19 = arith.constant dense<0.000000e+00> : vector<12x8xf32>
    %33 = tpu.matmul %29, %32, %cst_19 {dimension_numbers = #tpu.dot_dimension_numbers<[1], [0], [0], [1], [0, 0, 1, 1], [], []>} : vector<12x24xf32>, vector<24x8xf32>, vector<12x8xf32> -> vector<12x8xf32>
    %34 = arith.addf %20, %33 : vector<12x8xf32>
    %35 = tpu.iota {dimensions = array<i32: 0>} : vector<12x24xi32>
    %36 = tpu.iota {dimensions = array<i32: 1>} : vector<12x24xi32>
    %c2_i32_20 = arith.constant 2 : i32
    %37 = vector.broadcast %c2_i32_20 : i32 to vector<12x24xi32>
    %38 = arith.muli %37, %35 : vector<12x24xi32>
    %c1_i32 = arith.constant 1 : i32
    %39 = vector.broadcast %c1_i32 : i32 to vector<12x24xi32>
    %40 = arith.addi %38, %39 : vector<12x24xi32>
    %41 = arith.cmpi eq, %36, %40 : vector<12x24xi32>
    %42 = arith.extui %41 : vector<12x24xi1> to vector<12x24xi32>
    %43 = arith.sitofp %42 : vector<12x24xi32> to vector<12x24xf32>
    %c1 = arith.constant 1 : index
    %c0_21 = arith.constant 0 : index
    %c0_22 = arith.constant 0 : index
    %44 = vector.load %arg7[%c1, %c0_21, %c0_22] : memref<6x8x8xf32, #tpu.memory_space<vmem>>, vector<1x8x8xf32>
    %45 = vector.shape_cast %44 : vector<1x8x8xf32> to vector<8x8xf32>
    %cst_23 = arith.constant dense<0.000000e+00> : vector<24x8xf32>
    %46 = tpu.matmul %19, %45, %cst_23 {dimension_numbers = #tpu.dot_dimension_numbers<[1], [0], [0], [1], [0, 0, 1, 1], [], []>} : vector<24x8xf32>, vector<8x8xf32>, vector<24x8xf32> -> vector<24x8xf32>
    %cst_24 = arith.constant dense<0.000000e+00> : vector<12x8xf32>
    %47 = tpu.matmul %43, %46, %cst_24 {dimension_numbers = #tpu.dot_dimension_numbers<[1], [0], [0], [1], [0, 0, 1, 1], [], []>} : vector<12x24xf32>, vector<24x8xf32>, vector<12x8xf32> -> vector<12x8xf32>
    %48 = arith.addf %34, %47 : vector<12x8xf32>
    %c0_25 = arith.constant 0 : index
    %c0_26 = arith.constant 0 : index
    %c0_27 = arith.constant 0 : index
    %49 = vector.load %arg8[%c0_25, %c0_26, %c0_27] : memref<3x1x8xf32, #tpu.memory_space<vmem>>, vector<1x1x8xf32>
    %50 = vector.shape_cast %49 : vector<1x1x8xf32> to vector<1x8xf32>
    %51 = vector.broadcast %50 : vector<1x8xf32> to vector<12x8xf32>
    %52 = arith.addf %48, %51 : vector<12x8xf32>
    %cst_28 = arith.constant 0.999994993 : f32
    %53 = vector.broadcast %cst_28 : f32 to vector<12x8xf32>
    %54 = arith.mulf %52, %53 : vector<12x8xf32>
    %cst_29 = arith.constant 0.000000e+00 : f32
    %55 = vector.broadcast %cst_29 : f32 to vector<12x8xf32>
    %56 = arith.cmpf ogt, %54, %55 : vector<12x8xf32>
    %cst_30 = arith.constant 0.000000e+00 : f32
    %57 = vector.broadcast %cst_30 : f32 to vector<12x8xf32>
    %58 = arith.minimumf %54, %57 : vector<12x8xf32>
    %59 = math.exp %58 : vector<12x8xf32>
    %cst_31 = arith.constant 1.000000e+00 : f32
    %60 = vector.broadcast %cst_31 : f32 to vector<12x8xf32>
    %61 = arith.subf %59, %60 : vector<12x8xf32>
    %62 = arith.select %56, %54, %61 : vector<12x8xi1>, vector<12x8xf32>
    %c0_32 = arith.constant 0 : index
    %c0_33 = arith.constant 0 : index
    %63 = vector.load %arg9[%c0_32, %c0_33] : memref<8x16xf32, #tpu.memory_space<vmem>>, vector<8x16xf32>
    %cst_34 = arith.constant dense<0.000000e+00> : vector<12x16xf32>
    %64 = tpu.matmul %62, %63, %cst_34 {dimension_numbers = #tpu.dot_dimension_numbers<[1], [0], [0], [1], [0, 0, 1, 1], [], []>} : vector<12x8xf32>, vector<8x16xf32>, vector<12x16xf32> -> vector<12x16xf32>
    %c0_35 = arith.constant 0 : index
    %c0_36 = arith.constant 0 : index
    %65 = vector.load %arg10[%c0_35, %c0_36] : memref<1x16xf32, #tpu.memory_space<vmem>>, vector<1x16xf32>
    %66 = vector.broadcast %65 : vector<1x16xf32> to vector<12x16xf32>
    %67 = arith.addf %64, %66 : vector<12x16xf32>
    %68 = tpu.iota {dimensions = array<i32: 0>} : vector<48x12xi32>
    %69 = tpu.iota {dimensions = array<i32: 1>} : vector<48x12xi32>
    %c24_i32 = arith.constant 24 : i32
    %70 = vector.broadcast %c24_i32 : i32 to vector<48x12xi32>
    %71 = arith.addi %69, %70 : vector<48x12xi32>
    %72 = arith.cmpi eq, %68, %71 : vector<48x12xi32>
    %73 = arith.extui %72 : vector<48x12xi1> to vector<48x12xi32>
    %74 = arith.sitofp %73 : vector<48x12xi32> to vector<48x12xf32>
    %cst_37 = arith.constant dense<0.000000e+00> : vector<48x16xf32>
    %75 = tpu.matmul %74, %67, %cst_37 {dimension_numbers = #tpu.dot_dimension_numbers<[1], [0], [0], [1], [0, 0, 1, 1], [], []>} : vector<48x12xf32>, vector<12x16xf32>, vector<48x16xf32> -> vector<48x16xf32>
    %76 = arith.addf %14, %75 : vector<48x16xf32>
    %cst_38 = arith.constant 0.000000e+00 : f32
    %77 = vector.broadcast %cst_38 : f32 to vector<6x8xf32>
    %78 = tpu.iota {dimensions = array<i32: 0>} : vector<6x12xi32>
    %79 = tpu.iota {dimensions = array<i32: 1>} : vector<6x12xi32>
    %c2_i32_39 = arith.constant 2 : i32
    %80 = vector.broadcast %c2_i32_39 : i32 to vector<6x12xi32>
    %81 = arith.muli %80, %78 : vector<6x12xi32>
    %c0_i32_40 = arith.constant 0 : i32
    %82 = vector.broadcast %c0_i32_40 : i32 to vector<6x12xi32>
    %83 = arith.addi %81, %82 : vector<6x12xi32>
    %84 = arith.cmpi eq, %79, %83 : vector<6x12xi32>
    %85 = arith.extui %84 : vector<6x12xi1> to vector<6x12xi32>
    %86 = arith.sitofp %85 : vector<6x12xi32> to vector<6x12xf32>
    %c2 = arith.constant 2 : index
    %c0_41 = arith.constant 0 : index
    %c0_42 = arith.constant 0 : index
    %87 = vector.load %arg7[%c2, %c0_41, %c0_42] : memref<6x8x8xf32, #tpu.memory_space<vmem>>, vector<1x8x8xf32>
    %88 = vector.shape_cast %87 : vector<1x8x8xf32> to vector<8x8xf32>
    %cst_43 = arith.constant dense<0.000000e+00> : vector<12x8xf32>
    %89 = tpu.matmul %62, %88, %cst_43 {dimension_numbers = #tpu.dot_dimension_numbers<[1], [0], [0], [1], [0, 0, 1, 1], [], []>} : vector<12x8xf32>, vector<8x8xf32>, vector<12x8xf32> -> vector<12x8xf32>
    %cst_44 = arith.constant dense<0.000000e+00> : vector<6x8xf32>
    %90 = tpu.matmul %86, %89, %cst_44 {dimension_numbers = #tpu.dot_dimension_numbers<[1], [0], [0], [1], [0, 0, 1, 1], [], []>} : vector<6x12xf32>, vector<12x8xf32>, vector<6x8xf32> -> vector<6x8xf32>
    %91 = arith.addf %77, %90 : vector<6x8xf32>
    %92 = tpu.iota {dimensions = array<i32: 0>} : vector<6x12xi32>
    %93 = tpu.iota {dimensions = array<i32: 1>} : vector<6x12xi32>
    %c2_i32_45 = arith.constant 2 : i32
    %94 = vector.broadcast %c2_i32_45 : i32 to vector<6x12xi32>
    %95 = arith.muli %94, %92 : vector<6x12xi32>
    %c1_i32_46 = arith.constant 1 : i32
    %96 = vector.broadcast %c1_i32_46 : i32 to vector<6x12xi32>
    %97 = arith.addi %95, %96 : vector<6x12xi32>
    %98 = arith.cmpi eq, %93, %97 : vector<6x12xi32>
    %99 = arith.extui %98 : vector<6x12xi1> to vector<6x12xi32>
    %100 = arith.sitofp %99 : vector<6x12xi32> to vector<6x12xf32>
    %c3 = arith.constant 3 : index
    %c0_47 = arith.constant 0 : index
    %c0_48 = arith.constant 0 : index
    %101 = vector.load %arg7[%c3, %c0_47, %c0_48] : memref<6x8x8xf32, #tpu.memory_space<vmem>>, vector<1x8x8xf32>
    %102 = vector.shape_cast %101 : vector<1x8x8xf32> to vector<8x8xf32>
    %cst_49 = arith.constant dense<0.000000e+00> : vector<12x8xf32>
    %103 = tpu.matmul %62, %102, %cst_49 {dimension_numbers = #tpu.dot_dimension_numbers<[1], [0], [0], [1], [0, 0, 1, 1], [], []>} : vector<12x8xf32>, vector<8x8xf32>, vector<12x8xf32> -> vector<12x8xf32>
    %cst_50 = arith.constant dense<0.000000e+00> : vector<6x8xf32>
    %104 = tpu.matmul %100, %103, %cst_50 {dimension_numbers = #tpu.dot_dimension_numbers<[1], [0], [0], [1], [0, 0, 1, 1], [], []>} : vector<6x12xf32>, vector<12x8xf32>, vector<6x8xf32> -> vector<6x8xf32>
    %105 = arith.addf %91, %104 : vector<6x8xf32>
    %c1_51 = arith.constant 1 : index
    %c0_52 = arith.constant 0 : index
    %c0_53 = arith.constant 0 : index
    %106 = vector.load %arg8[%c1_51, %c0_52, %c0_53] : memref<3x1x8xf32, #tpu.memory_space<vmem>>, vector<1x1x8xf32>
    %107 = vector.shape_cast %106 : vector<1x1x8xf32> to vector<1x8xf32>
    %108 = vector.broadcast %107 : vector<1x8xf32> to vector<6x8xf32>
    %109 = arith.addf %105, %108 : vector<6x8xf32>
    %cst_54 = arith.constant 0.999994993 : f32
    %110 = vector.broadcast %cst_54 : f32 to vector<6x8xf32>
    %111 = arith.mulf %109, %110 : vector<6x8xf32>
    %cst_55 = arith.constant 0.000000e+00 : f32
    %112 = vector.broadcast %cst_55 : f32 to vector<6x8xf32>
    %113 = arith.cmpf ogt, %111, %112 : vector<6x8xf32>
    %cst_56 = arith.constant 0.000000e+00 : f32
    %114 = vector.broadcast %cst_56 : f32 to vector<6x8xf32>
    %115 = arith.minimumf %111, %114 : vector<6x8xf32>
    %116 = math.exp %115 : vector<6x8xf32>
    %cst_57 = arith.constant 1.000000e+00 : f32
    %117 = vector.broadcast %cst_57 : f32 to vector<6x8xf32>
    %118 = arith.subf %116, %117 : vector<6x8xf32>
    %119 = arith.select %113, %111, %118 : vector<6x8xi1>, vector<6x8xf32>
    %c0_58 = arith.constant 0 : index
    %c0_59 = arith.constant 0 : index
    %120 = vector.load %arg9[%c0_58, %c0_59] : memref<8x16xf32, #tpu.memory_space<vmem>>, vector<8x16xf32>
    %cst_60 = arith.constant dense<0.000000e+00> : vector<6x16xf32>
    %121 = tpu.matmul %119, %120, %cst_60 {dimension_numbers = #tpu.dot_dimension_numbers<[1], [0], [0], [1], [0, 0, 1, 1], [], []>} : vector<6x8xf32>, vector<8x16xf32>, vector<6x16xf32> -> vector<6x16xf32>
    %c0_61 = arith.constant 0 : index
    %c0_62 = arith.constant 0 : index
    %122 = vector.load %arg10[%c0_61, %c0_62] : memref<1x16xf32, #tpu.memory_space<vmem>>, vector<1x16xf32>
    %123 = vector.broadcast %122 : vector<1x16xf32> to vector<6x16xf32>
    %124 = arith.addf %121, %123 : vector<6x16xf32>
    %125 = tpu.iota {dimensions = array<i32: 0>} : vector<48x6xi32>
    %126 = tpu.iota {dimensions = array<i32: 1>} : vector<48x6xi32>
    %c36_i32 = arith.constant 36 : i32
    %127 = vector.broadcast %c36_i32 : i32 to vector<48x6xi32>
    %128 = arith.addi %126, %127 : vector<48x6xi32>
    %129 = arith.cmpi eq, %125, %128 : vector<48x6xi32>
    %130 = arith.extui %129 : vector<48x6xi1> to vector<48x6xi32>
    %131 = arith.sitofp %130 : vector<48x6xi32> to vector<48x6xf32>
    %cst_63 = arith.constant dense<0.000000e+00> : vector<48x16xf32>
    %132 = tpu.matmul %131, %124, %cst_63 {dimension_numbers = #tpu.dot_dimension_numbers<[1], [0], [0], [1], [0, 0, 1, 1], [], []>} : vector<48x6xf32>, vector<6x16xf32>, vector<48x16xf32> -> vector<48x16xf32>
    %133 = arith.addf %76, %132 : vector<48x16xf32>
    %cst_64 = arith.constant 0.000000e+00 : f32
    %134 = vector.broadcast %cst_64 : f32 to vector<3x8xf32>
    %135 = tpu.iota {dimensions = array<i32: 0>} : vector<3x6xi32>
    %136 = tpu.iota {dimensions = array<i32: 1>} : vector<3x6xi32>
    %c2_i32_65 = arith.constant 2 : i32
    %137 = vector.broadcast %c2_i32_65 : i32 to vector<3x6xi32>
    %138 = arith.muli %137, %135 : vector<3x6xi32>
    %c0_i32_66 = arith.constant 0 : i32
    %139 = vector.broadcast %c0_i32_66 : i32 to vector<3x6xi32>
    %140 = arith.addi %138, %139 : vector<3x6xi32>
    %141 = arith.cmpi eq, %136, %140 : vector<3x6xi32>
    %142 = arith.extui %141 : vector<3x6xi1> to vector<3x6xi32>
    %143 = arith.sitofp %142 : vector<3x6xi32> to vector<3x6xf32>
    %c4 = arith.constant 4 : index
    %c0_67 = arith.constant 0 : index
    %c0_68 = arith.constant 0 : index
    %144 = vector.load %arg7[%c4, %c0_67, %c0_68] : memref<6x8x8xf32, #tpu.memory_space<vmem>>, vector<1x8x8xf32>
    %145 = vector.shape_cast %144 : vector<1x8x8xf32> to vector<8x8xf32>
    %cst_69 = arith.constant dense<0.000000e+00> : vector<6x8xf32>
    %146 = tpu.matmul %119, %145, %cst_69 {dimension_numbers = #tpu.dot_dimension_numbers<[1], [0], [0], [1], [0, 0, 1, 1], [], []>} : vector<6x8xf32>, vector<8x8xf32>, vector<6x8xf32> -> vector<6x8xf32>
    %cst_70 = arith.constant dense<0.000000e+00> : vector<3x8xf32>
    %147 = tpu.matmul %143, %146, %cst_70 {dimension_numbers = #tpu.dot_dimension_numbers<[1], [0], [0], [1], [0, 0, 1, 1], [], []>} : vector<3x6xf32>, vector<6x8xf32>, vector<3x8xf32> -> vector<3x8xf32>
    %148 = arith.addf %134, %147 : vector<3x8xf32>
    %149 = tpu.iota {dimensions = array<i32: 0>} : vector<3x6xi32>
    %150 = tpu.iota {dimensions = array<i32: 1>} : vector<3x6xi32>
    %c2_i32_71 = arith.constant 2 : i32
    %151 = vector.broadcast %c2_i32_71 : i32 to vector<3x6xi32>
    %152 = arith.muli %151, %149 : vector<3x6xi32>
    %c1_i32_72 = arith.constant 1 : i32
    %153 = vector.broadcast %c1_i32_72 : i32 to vector<3x6xi32>
    %154 = arith.addi %152, %153 : vector<3x6xi32>
    %155 = arith.cmpi eq, %150, %154 : vector<3x6xi32>
    %156 = arith.extui %155 : vector<3x6xi1> to vector<3x6xi32>
    %157 = arith.sitofp %156 : vector<3x6xi32> to vector<3x6xf32>
    %c5 = arith.constant 5 : index
    %c0_73 = arith.constant 0 : index
    %c0_74 = arith.constant 0 : index
    %158 = vector.load %arg7[%c5, %c0_73, %c0_74] : memref<6x8x8xf32, #tpu.memory_space<vmem>>, vector<1x8x8xf32>
    %159 = vector.shape_cast %158 : vector<1x8x8xf32> to vector<8x8xf32>
    %cst_75 = arith.constant dense<0.000000e+00> : vector<6x8xf32>
    %160 = tpu.matmul %119, %159, %cst_75 {dimension_numbers = #tpu.dot_dimension_numbers<[1], [0], [0], [1], [0, 0, 1, 1], [], []>} : vector<6x8xf32>, vector<8x8xf32>, vector<6x8xf32> -> vector<6x8xf32>
    %cst_76 = arith.constant dense<0.000000e+00> : vector<3x8xf32>
    %161 = tpu.matmul %157, %160, %cst_76 {dimension_numbers = #tpu.dot_dimension_numbers<[1], [0], [0], [1], [0, 0, 1, 1], [], []>} : vector<3x6xf32>, vector<6x8xf32>, vector<3x8xf32> -> vector<3x8xf32>
    %162 = arith.addf %148, %161 : vector<3x8xf32>
    %c2_77 = arith.constant 2 : index
    %c0_78 = arith.constant 0 : index
    %c0_79 = arith.constant 0 : index
    %163 = vector.load %arg8[%c2_77, %c0_78, %c0_79] : memref<3x1x8xf32, #tpu.memory_space<vmem>>, vector<1x1x8xf32>
    %164 = vector.shape_cast %163 : vector<1x1x8xf32> to vector<1x8xf32>
    %165 = vector.broadcast %164 : vector<1x8xf32> to vector<3x8xf32>
    %166 = arith.addf %162, %165 : vector<3x8xf32>
    %cst_80 = arith.constant 0.999994993 : f32
    %167 = vector.broadcast %cst_80 : f32 to vector<3x8xf32>
    %168 = arith.mulf %166, %167 : vector<3x8xf32>
    %cst_81 = arith.constant 0.000000e+00 : f32
    %169 = vector.broadcast %cst_81 : f32 to vector<3x8xf32>
    %170 = arith.cmpf ogt, %168, %169 : vector<3x8xf32>
    %cst_82 = arith.constant 0.000000e+00 : f32
    %171 = vector.broadcast %cst_82 : f32 to vector<3x8xf32>
    %172 = arith.minimumf %168, %171 : vector<3x8xf32>
    %173 = math.exp %172 : vector<3x8xf32>
    %cst_83 = arith.constant 1.000000e+00 : f32
    %174 = vector.broadcast %cst_83 : f32 to vector<3x8xf32>
    %175 = arith.subf %173, %174 : vector<3x8xf32>
    %176 = arith.select %170, %168, %175 : vector<3x8xi1>, vector<3x8xf32>
    %c0_84 = arith.constant 0 : index
    %c0_85 = arith.constant 0 : index
    %177 = vector.load %arg9[%c0_84, %c0_85] : memref<8x16xf32, #tpu.memory_space<vmem>>, vector<8x16xf32>
    %cst_86 = arith.constant dense<0.000000e+00> : vector<3x16xf32>
    %178 = tpu.matmul %176, %177, %cst_86 {dimension_numbers = #tpu.dot_dimension_numbers<[1], [0], [0], [1], [0, 0, 1, 1], [], []>} : vector<3x8xf32>, vector<8x16xf32>, vector<3x16xf32> -> vector<3x16xf32>
    %c0_87 = arith.constant 0 : index
    %c0_88 = arith.constant 0 : index
    %179 = vector.load %arg10[%c0_87, %c0_88] : memref<1x16xf32, #tpu.memory_space<vmem>>, vector<1x16xf32>
    %180 = vector.broadcast %179 : vector<1x16xf32> to vector<3x16xf32>
    %181 = arith.addf %178, %180 : vector<3x16xf32>
    %182 = tpu.iota {dimensions = array<i32: 0>} : vector<48x3xi32>
    %183 = tpu.iota {dimensions = array<i32: 1>} : vector<48x3xi32>
    %c42_i32 = arith.constant 42 : i32
    %184 = vector.broadcast %c42_i32 : i32 to vector<48x3xi32>
    %185 = arith.addi %183, %184 : vector<48x3xi32>
    %186 = arith.cmpi eq, %182, %185 : vector<48x3xi32>
    %187 = arith.extui %186 : vector<48x3xi1> to vector<48x3xi32>
    %188 = arith.sitofp %187 : vector<48x3xi32> to vector<48x3xf32>
    %cst_89 = arith.constant dense<0.000000e+00> : vector<48x16xf32>
    %189 = tpu.matmul %188, %181, %cst_89 {dimension_numbers = #tpu.dot_dimension_numbers<[1], [0], [0], [1], [0, 0, 1, 1], [], []>} : vector<48x3xf32>, vector<3x16xf32>, vector<48x16xf32> -> vector<48x16xf32>
    %190 = arith.addf %133, %189 : vector<48x16xf32>
    %c0_90 = arith.constant 0 : index
    %c0_91 = arith.constant 0 : index
    %191 = vector.load %arg11[%c0_90, %c0_91] : memref<1x16xf32, #tpu.memory_space<vmem>>, vector<1x16xf32>
    %c0_92 = arith.constant 0 : index
    %c0_93 = arith.constant 0 : index
    %192 = vector.load %arg12[%c0_92, %c0_93] : memref<1x16xf32, #tpu.memory_space<vmem>>, vector<1x16xf32>
    %cst_94 = arith.constant dense<0.000000e+00> : vector<48xf32>
    %193 = vector.multi_reduction <add>, %190, %cst_94 [1] : vector<48x16xf32> to vector<48xf32>
    %194 = vector.shape_cast %193 : vector<48xf32> to vector<48x1xf32>
    %cst_95 = arith.constant 1.600000e+01 : f32
    %195 = vector.broadcast %cst_95 : f32 to vector<48x1xf32>
    %196 = arith.divf %194, %195 : vector<48x1xf32>
    %197 = vector.broadcast %196 : vector<48x1xf32> to vector<48x16xf32>
    %198 = arith.subf %190, %197 : vector<48x16xf32>
    %199 = arith.mulf %198, %198 : vector<48x16xf32>
    %cst_96 = arith.constant dense<0.000000e+00> : vector<48xf32>
    %200 = vector.multi_reduction <add>, %199, %cst_96 [1] : vector<48x16xf32> to vector<48xf32>
    %201 = vector.shape_cast %200 : vector<48xf32> to vector<48x1xf32>
    %cst_97 = arith.constant 1.600000e+01 : f32
    %202 = vector.broadcast %cst_97 : f32 to vector<48x1xf32>
    %203 = arith.divf %201, %202 : vector<48x1xf32>
    %cst_98 = arith.constant 9.99999974E-6 : f32
    %204 = vector.broadcast %cst_98 : f32 to vector<48x1xf32>
    %205 = arith.addf %203, %204 : vector<48x1xf32>
    %206 = math.rsqrt %205 : vector<48x1xf32>
    %207 = vector.broadcast %206 : vector<48x1xf32> to vector<48x16xf32>
    %208 = arith.mulf %198, %207 : vector<48x16xf32>
    %209 = vector.broadcast %191 : vector<1x16xf32> to vector<48x16xf32>
    %210 = arith.mulf %208, %209 : vector<48x16xf32>
    %211 = vector.broadcast %192 : vector<1x16xf32> to vector<48x16xf32>
    %212 = arith.addf %210, %211 : vector<48x16xf32>
    %c0_99 = arith.constant 0 : index
    %c0_100 = arith.constant 0 : index
    %213 = vector.load %arg13[%c0_99, %c0_100] : memref<48x48xf32, #tpu.memory_space<vmem>>, vector<48x48xf32>
    %cst_101 = arith.constant 0.000000e+00 : f32
    %214 = vector.broadcast %cst_101 : f32 to vector<48x16xf32>
    %c0_102 = arith.constant 0 : index
    %c0_103 = arith.constant 0 : index
    %c0_104 = arith.constant 0 : index
    %215 = vector.load %arg16[%c0_102, %c0_103, %c0_104] : memref<8x16x8xf32, #tpu.memory_space<vmem>>, vector<1x16x8xf32>
    %216 = vector.shape_cast %215 : vector<1x16x8xf32> to vector<16x8xf32>
    %cst_105 = arith.constant dense<0.000000e+00> : vector<48x8xf32>
    %217 = tpu.matmul %212, %216, %cst_105 {dimension_numbers = #tpu.dot_dimension_numbers<[1], [0], [0], [1], [0, 0, 1, 1], [], []>} : vector<48x16xf32>, vector<16x8xf32>, vector<48x8xf32> -> vector<48x8xf32>
    %c0_106 = arith.constant 0 : index
    %c0_107 = arith.constant 0 : index
    %c0_108 = arith.constant 0 : index
    %218 = vector.load %arg17[%c0_106, %c0_107, %c0_108] : memref<8x16x8xf32, #tpu.memory_space<vmem>>, vector<1x16x8xf32>
    %219 = vector.shape_cast %218 : vector<1x16x8xf32> to vector<16x8xf32>
    %cst_109 = arith.constant dense<0.000000e+00> : vector<48x8xf32>
    %220 = tpu.matmul %212, %219, %cst_109 {dimension_numbers = #tpu.dot_dimension_numbers<[1], [0], [0], [1], [0, 0, 1, 1], [], []>} : vector<48x16xf32>, vector<16x8xf32>, vector<48x8xf32> -> vector<48x8xf32>
    %c0_110 = arith.constant 0 : index
    %c0_111 = arith.constant 0 : index
    %c0_112 = arith.constant 0 : index
    %221 = vector.load %arg18[%c0_110, %c0_111, %c0_112] : memref<8x16x8xf32, #tpu.memory_space<vmem>>, vector<1x16x8xf32>
    %222 = vector.shape_cast %221 : vector<1x16x8xf32> to vector<16x8xf32>
    %cst_113 = arith.constant dense<0.000000e+00> : vector<48x8xf32>
    %223 = tpu.matmul %212, %222, %cst_113 {dimension_numbers = #tpu.dot_dimension_numbers<[1], [0], [0], [1], [0, 0, 1, 1], [], []>} : vector<48x16xf32>, vector<16x8xf32>, vector<48x8xf32> -> vector<48x8xf32>
    %cst_114 = arith.constant dense<0.000000e+00> : vector<48x48xf32>
    %224 = tpu.matmul %217, %220, %cst_114 {dimension_numbers = #tpu.dot_dimension_numbers<[1], [1], [0], [0], [0, 0, 1, 0], [], []>} : vector<48x8xf32>, vector<48x8xf32>, vector<48x48xf32> -> vector<48x48xf32>
    %225 = arith.addf %224, %213 : vector<48x48xf32>
    %cst_115 = arith.constant dense<0xFF800000> : vector<48xf32>
    %226 = vector.multi_reduction <maximumf>, %225, %cst_115 [1] : vector<48x48xf32> to vector<48xf32>
    %227 = vector.shape_cast %226 : vector<48xf32> to vector<48x1xf32>
    %228 = vector.broadcast %227 : vector<48x1xf32> to vector<48x48xf32>
    %229 = arith.subf %225, %228 : vector<48x48xf32>
    %230 = math.exp %229 : vector<48x48xf32>
    %cst_116 = arith.constant dense<0.000000e+00> : vector<48xf32>
    %231 = vector.multi_reduction <add>, %230, %cst_116 [1] : vector<48x48xf32> to vector<48xf32>
    %232 = vector.shape_cast %231 : vector<48xf32> to vector<48x1xf32>
    %233 = tpu.reciprocal %232 {approx = true} : vector<48x1xf32> -> vector<48x1xf32>
    %234 = vector.broadcast %233 : vector<48x1xf32> to vector<48x48xf32>
    %235 = arith.mulf %230, %234 : vector<48x48xf32>
    %cst_117 = arith.constant dense<0.000000e+00> : vector<48x8xf32>
    %236 = tpu.matmul %235, %223, %cst_117 {dimension_numbers = #tpu.dot_dimension_numbers<[1], [0], [0], [1], [0, 0, 1, 1], [], []>} : vector<48x48xf32>, vector<48x8xf32>, vector<48x8xf32> -> vector<48x8xf32>
    %c0_118 = arith.constant 0 : index
    %c0_119 = arith.constant 0 : index
    %c0_120 = arith.constant 0 : index
    %237 = vector.load %arg19[%c0_118, %c0_119, %c0_120] : memref<8x8x16xf32, #tpu.memory_space<vmem>>, vector<1x8x16xf32>
    %238 = vector.shape_cast %237 : vector<1x8x16xf32> to vector<8x16xf32>
    %cst_121 = arith.constant dense<0.000000e+00> : vector<48x16xf32>
    %239 = tpu.matmul %236, %238, %cst_121 {dimension_numbers = #tpu.dot_dimension_numbers<[1], [0], [0], [1], [0, 0, 1, 1], [], []>} : vector<48x8xf32>, vector<8x16xf32>, vector<48x16xf32> -> vector<48x16xf32>
    %240 = arith.addf %214, %239 : vector<48x16xf32>
    %c1_122 = arith.constant 1 : index
    %c0_123 = arith.constant 0 : index
    %c0_124 = arith.constant 0 : index
    %241 = vector.load %arg16[%c1_122, %c0_123, %c0_124] : memref<8x16x8xf32, #tpu.memory_space<vmem>>, vector<1x16x8xf32>
    %242 = vector.shape_cast %241 : vector<1x16x8xf32> to vector<16x8xf32>
    %cst_125 = arith.constant dense<0.000000e+00> : vector<48x8xf32>
    %243 = tpu.matmul %212, %242, %cst_125 {dimension_numbers = #tpu.dot_dimension_numbers<[1], [0], [0], [1], [0, 0, 1, 1], [], []>} : vector<48x16xf32>, vector<16x8xf32>, vector<48x8xf32> -> vector<48x8xf32>
    %c1_126 = arith.constant 1 : index
    %c0_127 = arith.constant 0 : index
    %c0_128 = arith.constant 0 : index
    %244 = vector.load %arg17[%c1_126, %c0_127, %c0_128] : memref<8x16x8xf32, #tpu.memory_space<vmem>>, vector<1x16x8xf32>
    %245 = vector.shape_cast %244 : vector<1x16x8xf32> to vector<16x8xf32>
    %cst_129 = arith.constant dense<0.000000e+00> : vector<48x8xf32>
    %246 = tpu.matmul %212, %245, %cst_129 {dimension_numbers = #tpu.dot_dimension_numbers<[1], [0], [0], [1], [0, 0, 1, 1], [], []>} : vector<48x16xf32>, vector<16x8xf32>, vector<48x8xf32> -> vector<48x8xf32>
    %c1_130 = arith.constant 1 : index
    %c0_131 = arith.constant 0 : index
    %c0_132 = arith.constant 0 : index
    %247 = vector.load %arg18[%c1_130, %c0_131, %c0_132] : memref<8x16x8xf32, #tpu.memory_space<vmem>>, vector<1x16x8xf32>
    %248 = vector.shape_cast %247 : vector<1x16x8xf32> to vector<16x8xf32>
    %cst_133 = arith.constant dense<0.000000e+00> : vector<48x8xf32>
    %249 = tpu.matmul %212, %248, %cst_133 {dimension_numbers = #tpu.dot_dimension_numbers<[1], [0], [0], [1], [0, 0, 1, 1], [], []>} : vector<48x16xf32>, vector<16x8xf32>, vector<48x8xf32> -> vector<48x8xf32>
    %cst_134 = arith.constant dense<0.000000e+00> : vector<48x48xf32>
    %250 = tpu.matmul %243, %246, %cst_134 {dimension_numbers = #tpu.dot_dimension_numbers<[1], [1], [0], [0], [0, 0, 1, 0], [], []>} : vector<48x8xf32>, vector<48x8xf32>, vector<48x48xf32> -> vector<48x48xf32>
    %251 = arith.addf %250, %213 : vector<48x48xf32>
    %cst_135 = arith.constant dense<0xFF800000> : vector<48xf32>
    %252 = vector.multi_reduction <maximumf>, %251, %cst_135 [1] : vector<48x48xf32> to vector<48xf32>
    %253 = vector.shape_cast %252 : vector<48xf32> to vector<48x1xf32>
    %254 = vector.broadcast %253 : vector<48x1xf32> to vector<48x48xf32>
    %255 = arith.subf %251, %254 : vector<48x48xf32>
    %256 = math.exp %255 : vector<48x48xf32>
    %cst_136 = arith.constant dense<0.000000e+00> : vector<48xf32>
    %257 = vector.multi_reduction <add>, %256, %cst_136 [1] : vector<48x48xf32> to vector<48xf32>
    %258 = vector.shape_cast %257 : vector<48xf32> to vector<48x1xf32>
    %259 = tpu.reciprocal %258 {approx = true} : vector<48x1xf32> -> vector<48x1xf32>
    %260 = vector.broadcast %259 : vector<48x1xf32> to vector<48x48xf32>
    %261 = arith.mulf %256, %260 : vector<48x48xf32>
    %cst_137 = arith.constant dense<0.000000e+00> : vector<48x8xf32>
    %262 = tpu.matmul %261, %249, %cst_137 {dimension_numbers = #tpu.dot_dimension_numbers<[1], [0], [0], [1], [0, 0, 1, 1], [], []>} : vector<48x48xf32>, vector<48x8xf32>, vector<48x8xf32> -> vector<48x8xf32>
    %c1_138 = arith.constant 1 : index
    %c0_139 = arith.constant 0 : index
    %c0_140 = arith.constant 0 : index
    %263 = vector.load %arg19[%c1_138, %c0_139, %c0_140] : memref<8x8x16xf32, #tpu.memory_space<vmem>>, vector<1x8x16xf32>
    %264 = vector.shape_cast %263 : vector<1x8x16xf32> to vector<8x16xf32>
    %cst_141 = arith.constant dense<0.000000e+00> : vector<48x16xf32>
    %265 = tpu.matmul %262, %264, %cst_141 {dimension_numbers = #tpu.dot_dimension_numbers<[1], [0], [0], [1], [0, 0, 1, 1], [], []>} : vector<48x8xf32>, vector<8x16xf32>, vector<48x16xf32> -> vector<48x16xf32>
    %266 = arith.addf %240, %265 : vector<48x16xf32>
    %c2_142 = arith.constant 2 : index
    %c0_143 = arith.constant 0 : index
    %c0_144 = arith.constant 0 : index
    %267 = vector.load %arg16[%c2_142, %c0_143, %c0_144] : memref<8x16x8xf32, #tpu.memory_space<vmem>>, vector<1x16x8xf32>
    %268 = vector.shape_cast %267 : vector<1x16x8xf32> to vector<16x8xf32>
    %cst_145 = arith.constant dense<0.000000e+00> : vector<48x8xf32>
    %269 = tpu.matmul %212, %268, %cst_145 {dimension_numbers = #tpu.dot_dimension_numbers<[1], [0], [0], [1], [0, 0, 1, 1], [], []>} : vector<48x16xf32>, vector<16x8xf32>, vector<48x8xf32> -> vector<48x8xf32>
    %c2_146 = arith.constant 2 : index
    %c0_147 = arith.constant 0 : index
    %c0_148 = arith.constant 0 : index
    %270 = vector.load %arg17[%c2_146, %c0_147, %c0_148] : memref<8x16x8xf32, #tpu.memory_space<vmem>>, vector<1x16x8xf32>
    %271 = vector.shape_cast %270 : vector<1x16x8xf32> to vector<16x8xf32>
    %cst_149 = arith.constant dense<0.000000e+00> : vector<48x8xf32>
    %272 = tpu.matmul %212, %271, %cst_149 {dimension_numbers = #tpu.dot_dimension_numbers<[1], [0], [0], [1], [0, 0, 1, 1], [], []>} : vector<48x16xf32>, vector<16x8xf32>, vector<48x8xf32> -> vector<48x8xf32>
    %c2_150 = arith.constant 2 : index
    %c0_151 = arith.constant 0 : index
    %c0_152 = arith.constant 0 : index
    %273 = vector.load %arg18[%c2_150, %c0_151, %c0_152] : memref<8x16x8xf32, #tpu.memory_space<vmem>>, vector<1x16x8xf32>
    %274 = vector.shape_cast %273 : vector<1x16x8xf32> to vector<16x8xf32>
    %cst_153 = arith.constant dense<0.000000e+00> : vector<48x8xf32>
    %275 = tpu.matmul %212, %274, %cst_153 {dimension_numbers = #tpu.dot_dimension_numbers<[1], [0], [0], [1], [0, 0, 1, 1], [], []>} : vector<48x16xf32>, vector<16x8xf32>, vector<48x8xf32> -> vector<48x8xf32>
    %cst_154 = arith.constant dense<0.000000e+00> : vector<48x48xf32>
    %276 = tpu.matmul %269, %272, %cst_154 {dimension_numbers = #tpu.dot_dimension_numbers<[1], [1], [0], [0], [0, 0, 1, 0], [], []>} : vector<48x8xf32>, vector<48x8xf32>, vector<48x48xf32> -> vector<48x48xf32>
    %277 = arith.addf %276, %213 : vector<48x48xf32>
    %cst_155 = arith.constant dense<0xFF800000> : vector<48xf32>
    %278 = vector.multi_reduction <maximumf>, %277, %cst_155 [1] : vector<48x48xf32> to vector<48xf32>
    %279 = vector.shape_cast %278 : vector<48xf32> to vector<48x1xf32>
    %280 = vector.broadcast %279 : vector<48x1xf32> to vector<48x48xf32>
    %281 = arith.subf %277, %280 : vector<48x48xf32>
    %282 = math.exp %281 : vector<48x48xf32>
    %cst_156 = arith.constant dense<0.000000e+00> : vector<48xf32>
    %283 = vector.multi_reduction <add>, %282, %cst_156 [1] : vector<48x48xf32> to vector<48xf32>
    %284 = vector.shape_cast %283 : vector<48xf32> to vector<48x1xf32>
    %285 = tpu.reciprocal %284 {approx = true} : vector<48x1xf32> -> vector<48x1xf32>
    %286 = vector.broadcast %285 : vector<48x1xf32> to vector<48x48xf32>
    %287 = arith.mulf %282, %286 : vector<48x48xf32>
    %cst_157 = arith.constant dense<0.000000e+00> : vector<48x8xf32>
    %288 = tpu.matmul %287, %275, %cst_157 {dimension_numbers = #tpu.dot_dimension_numbers<[1], [0], [0], [1], [0, 0, 1, 1], [], []>} : vector<48x48xf32>, vector<48x8xf32>, vector<48x8xf32> -> vector<48x8xf32>
    %c2_158 = arith.constant 2 : index
    %c0_159 = arith.constant 0 : index
    %c0_160 = arith.constant 0 : index
    %289 = vector.load %arg19[%c2_158, %c0_159, %c0_160] : memref<8x8x16xf32, #tpu.memory_space<vmem>>, vector<1x8x16xf32>
    %290 = vector.shape_cast %289 : vector<1x8x16xf32> to vector<8x16xf32>
    %cst_161 = arith.constant dense<0.000000e+00> : vector<48x16xf32>
    %291 = tpu.matmul %288, %290, %cst_161 {dimension_numbers = #tpu.dot_dimension_numbers<[1], [0], [0], [1], [0, 0, 1, 1], [], []>} : vector<48x8xf32>, vector<8x16xf32>, vector<48x16xf32> -> vector<48x16xf32>
    %292 = arith.addf %266, %291 : vector<48x16xf32>
    %c3_162 = arith.constant 3 : index
    %c0_163 = arith.constant 0 : index
    %c0_164 = arith.constant 0 : index
    %293 = vector.load %arg16[%c3_162, %c0_163, %c0_164] : memref<8x16x8xf32, #tpu.memory_space<vmem>>, vector<1x16x8xf32>
    %294 = vector.shape_cast %293 : vector<1x16x8xf32> to vector<16x8xf32>
    %cst_165 = arith.constant dense<0.000000e+00> : vector<48x8xf32>
    %295 = tpu.matmul %212, %294, %cst_165 {dimension_numbers = #tpu.dot_dimension_numbers<[1], [0], [0], [1], [0, 0, 1, 1], [], []>} : vector<48x16xf32>, vector<16x8xf32>, vector<48x8xf32> -> vector<48x8xf32>
    %c3_166 = arith.constant 3 : index
    %c0_167 = arith.constant 0 : index
    %c0_168 = arith.constant 0 : index
    %296 = vector.load %arg17[%c3_166, %c0_167, %c0_168] : memref<8x16x8xf32, #tpu.memory_space<vmem>>, vector<1x16x8xf32>
    %297 = vector.shape_cast %296 : vector<1x16x8xf32> to vector<16x8xf32>
    %cst_169 = arith.constant dense<0.000000e+00> : vector<48x8xf32>
    %298 = tpu.matmul %212, %297, %cst_169 {dimension_numbers = #tpu.dot_dimension_numbers<[1], [0], [0], [1], [0, 0, 1, 1], [], []>} : vector<48x16xf32>, vector<16x8xf32>, vector<48x8xf32> -> vector<48x8xf32>
    %c3_170 = arith.constant 3 : index
    %c0_171 = arith.constant 0 : index
    %c0_172 = arith.constant 0 : index
    %299 = vector.load %arg18[%c3_170, %c0_171, %c0_172] : memref<8x16x8xf32, #tpu.memory_space<vmem>>, vector<1x16x8xf32>
    %300 = vector.shape_cast %299 : vector<1x16x8xf32> to vector<16x8xf32>
    %cst_173 = arith.constant dense<0.000000e+00> : vector<48x8xf32>
    %301 = tpu.matmul %212, %300, %cst_173 {dimension_numbers = #tpu.dot_dimension_numbers<[1], [0], [0], [1], [0, 0, 1, 1], [], []>} : vector<48x16xf32>, vector<16x8xf32>, vector<48x8xf32> -> vector<48x8xf32>
    %cst_174 = arith.constant dense<0.000000e+00> : vector<48x48xf32>
    %302 = tpu.matmul %295, %298, %cst_174 {dimension_numbers = #tpu.dot_dimension_numbers<[1], [1], [0], [0], [0, 0, 1, 0], [], []>} : vector<48x8xf32>, vector<48x8xf32>, vector<48x48xf32> -> vector<48x48xf32>
    %303 = arith.addf %302, %213 : vector<48x48xf32>
    %cst_175 = arith.constant dense<0xFF800000> : vector<48xf32>
    %304 = vector.multi_reduction <maximumf>, %303, %cst_175 [1] : vector<48x48xf32> to vector<48xf32>
    %305 = vector.shape_cast %304 : vector<48xf32> to vector<48x1xf32>
    %306 = vector.broadcast %305 : vector<48x1xf32> to vector<48x48xf32>
    %307 = arith.subf %303, %306 : vector<48x48xf32>
    %308 = math.exp %307 : vector<48x48xf32>
    %cst_176 = arith.constant dense<0.000000e+00> : vector<48xf32>
    %309 = vector.multi_reduction <add>, %308, %cst_176 [1] : vector<48x48xf32> to vector<48xf32>
    %310 = vector.shape_cast %309 : vector<48xf32> to vector<48x1xf32>
    %311 = tpu.reciprocal %310 {approx = true} : vector<48x1xf32> -> vector<48x1xf32>
    %312 = vector.broadcast %311 : vector<48x1xf32> to vector<48x48xf32>
    %313 = arith.mulf %308, %312 : vector<48x48xf32>
    %cst_177 = arith.constant dense<0.000000e+00> : vector<48x8xf32>
    %314 = tpu.matmul %313, %301, %cst_177 {dimension_numbers = #tpu.dot_dimension_numbers<[1], [0], [0], [1], [0, 0, 1, 1], [], []>} : vector<48x48xf32>, vector<48x8xf32>, vector<48x8xf32> -> vector<48x8xf32>
    %c3_178 = arith.constant 3 : index
    %c0_179 = arith.constant 0 : index
    %c0_180 = arith.constant 0 : index
    %315 = vector.load %arg19[%c3_178, %c0_179, %c0_180] : memref<8x8x16xf32, #tpu.memory_space<vmem>>, vector<1x8x16xf32>
    %316 = vector.shape_cast %315 : vector<1x8x16xf32> to vector<8x16xf32>
    %cst_181 = arith.constant dense<0.000000e+00> : vector<48x16xf32>
    %317 = tpu.matmul %314, %316, %cst_181 {dimension_numbers = #tpu.dot_dimension_numbers<[1], [0], [0], [1], [0, 0, 1, 1], [], []>} : vector<48x8xf32>, vector<8x16xf32>, vector<48x16xf32> -> vector<48x16xf32>
    %318 = arith.addf %292, %317 : vector<48x16xf32>
    %c0_182 = arith.constant 0 : index
    %c0_183 = arith.constant 0 : index
    %c0_184 = arith.constant 0 : index
    %319 = vector.load %arg20[%c0_182, %c0_183, %c0_184] : memref<2x1x16xf32, #tpu.memory_space<vmem>>, vector<1x1x16xf32>
    %320 = vector.shape_cast %319 : vector<1x1x16xf32> to vector<1x16xf32>
    %321 = vector.broadcast %320 : vector<1x16xf32> to vector<48x16xf32>
    %322 = arith.addf %318, %321 : vector<48x16xf32>
    %323 = arith.addf %322, %212 : vector<48x16xf32>
    %c0_185 = arith.constant 0 : index
    %c0_186 = arith.constant 0 : index
    %c0_187 = arith.constant 0 : index
    %324 = vector.load %arg21[%c0_185, %c0_186, %c0_187] : memref<2x1x16xf32, #tpu.memory_space<vmem>>, vector<1x1x16xf32>
    %325 = vector.shape_cast %324 : vector<1x1x16xf32> to vector<1x16xf32>
    %c0_188 = arith.constant 0 : index
    %c0_189 = arith.constant 0 : index
    %c0_190 = arith.constant 0 : index
    %326 = vector.load %arg22[%c0_188, %c0_189, %c0_190] : memref<2x1x16xf32, #tpu.memory_space<vmem>>, vector<1x1x16xf32>
    %327 = vector.shape_cast %326 : vector<1x1x16xf32> to vector<1x16xf32>
    %cst_191 = arith.constant dense<0.000000e+00> : vector<48xf32>
    %328 = vector.multi_reduction <add>, %323, %cst_191 [1] : vector<48x16xf32> to vector<48xf32>
    %329 = vector.shape_cast %328 : vector<48xf32> to vector<48x1xf32>
    %cst_192 = arith.constant 1.600000e+01 : f32
    %330 = vector.broadcast %cst_192 : f32 to vector<48x1xf32>
    %331 = arith.divf %329, %330 : vector<48x1xf32>
    %332 = vector.broadcast %331 : vector<48x1xf32> to vector<48x16xf32>
    %333 = arith.subf %323, %332 : vector<48x16xf32>
    %334 = arith.mulf %333, %333 : vector<48x16xf32>
    %cst_193 = arith.constant dense<0.000000e+00> : vector<48xf32>
    %335 = vector.multi_reduction <add>, %334, %cst_193 [1] : vector<48x16xf32> to vector<48xf32>
    %336 = vector.shape_cast %335 : vector<48xf32> to vector<48x1xf32>
    %cst_194 = arith.constant 1.600000e+01 : f32
    %337 = vector.broadcast %cst_194 : f32 to vector<48x1xf32>
    %338 = arith.divf %336, %337 : vector<48x1xf32>
    %cst_195 = arith.constant 9.99999997E-7 : f32
    %339 = vector.broadcast %cst_195 : f32 to vector<48x1xf32>
    %340 = arith.addf %338, %339 : vector<48x1xf32>
    %341 = math.rsqrt %340 : vector<48x1xf32>
    %342 = vector.broadcast %341 : vector<48x1xf32> to vector<48x16xf32>
    %343 = arith.mulf %333, %342 : vector<48x16xf32>
    %344 = vector.broadcast %325 : vector<1x16xf32> to vector<48x16xf32>
    %345 = arith.mulf %343, %344 : vector<48x16xf32>
    %346 = vector.broadcast %327 : vector<1x16xf32> to vector<48x16xf32>
    %347 = arith.addf %345, %346 : vector<48x16xf32>
    %c0_196 = arith.constant 0 : index
    %c0_197 = arith.constant 0 : index
    %c0_198 = arith.constant 0 : index
    %348 = vector.load %arg23[%c0_196, %c0_197, %c0_198] : memref<2x16x32xf32, #tpu.memory_space<vmem>>, vector<1x16x32xf32>
    %349 = vector.shape_cast %348 : vector<1x16x32xf32> to vector<16x32xf32>
    %cst_199 = arith.constant dense<0.000000e+00> : vector<48x32xf32>
    %350 = tpu.matmul %347, %349, %cst_199 {dimension_numbers = #tpu.dot_dimension_numbers<[1], [0], [0], [1], [0, 0, 1, 1], [], []>} : vector<48x16xf32>, vector<16x32xf32>, vector<48x32xf32> -> vector<48x32xf32>
    %c0_200 = arith.constant 0 : index
    %c0_201 = arith.constant 0 : index
    %c0_202 = arith.constant 0 : index
    %351 = vector.load %arg24[%c0_200, %c0_201, %c0_202] : memref<2x1x32xf32, #tpu.memory_space<vmem>>, vector<1x1x32xf32>
    %352 = vector.shape_cast %351 : vector<1x1x32xf32> to vector<1x32xf32>
    %353 = vector.broadcast %352 : vector<1x32xf32> to vector<48x32xf32>
    %354 = arith.addf %350, %353 : vector<48x32xf32>
    %cst_203 = arith.constant 5.000000e-01 : f32
    %355 = vector.broadcast %cst_203 : f32 to vector<48x32xf32>
    %356 = arith.mulf %355, %354 : vector<48x32xf32>
    %cst_204 = arith.constant 0.707106769 : f32
    %357 = vector.broadcast %cst_204 : f32 to vector<48x32xf32>
    %358 = arith.mulf %354, %357 : vector<48x32xf32>
    %cst_205 = arith.constant 0.000000e+00 : f32
    %359 = vector.broadcast %cst_205 : f32 to vector<48x32xf32>
    %360 = arith.cmpf olt, %358, %359 : vector<48x32xf32>
    %cst_206 = arith.constant -1.000000e+00 : f32
    %cst_207 = arith.constant 1.000000e+00 : f32
    %361 = vector.broadcast %cst_206 : f32 to vector<48x32xf32>
    %362 = vector.broadcast %cst_207 : f32 to vector<48x32xf32>
    %363 = arith.select %360, %361, %362 : vector<48x32xi1>, vector<48x32xf32>
    %364 = math.absf %358 : vector<48x32xf32>
    %cst_208 = arith.constant 0.327591091 : f32
    %365 = vector.broadcast %cst_208 : f32 to vector<48x32xf32>
    %366 = arith.mulf %365, %364 : vector<48x32xf32>
    %cst_209 = arith.constant 1.000000e+00 : f32
    %367 = vector.broadcast %cst_209 : f32 to vector<48x32xf32>
    %368 = arith.addf %367, %366 : vector<48x32xf32>
    %cst_210 = arith.constant 1.000000e+00 : f32
    %369 = vector.broadcast %cst_210 : f32 to vector<48x32xf32>
    %370 = arith.divf %369, %368 : vector<48x32xf32>
    %cst_211 = arith.constant 1.06140542 : f32
    %371 = vector.broadcast %cst_211 : f32 to vector<48x32xf32>
    %372 = arith.mulf %371, %370 : vector<48x32xf32>
    %cst_212 = arith.constant -1.45315206 : f32
    %373 = vector.broadcast %cst_212 : f32 to vector<48x32xf32>
    %374 = arith.addf %372, %373 : vector<48x32xf32>
    %375 = arith.mulf %374, %370 : vector<48x32xf32>
    %cst_213 = arith.constant 1.42141378 : f32
    %376 = vector.broadcast %cst_213 : f32 to vector<48x32xf32>
    %377 = arith.addf %375, %376 : vector<48x32xf32>
    %378 = arith.mulf %377, %370 : vector<48x32xf32>
    %cst_214 = arith.constant -0.284496725 : f32
    %379 = vector.broadcast %cst_214 : f32 to vector<48x32xf32>
    %380 = arith.addf %378, %379 : vector<48x32xf32>
    %381 = arith.mulf %380, %370 : vector<48x32xf32>
    %cst_215 = arith.constant 0.254829586 : f32
    %382 = vector.broadcast %cst_215 : f32 to vector<48x32xf32>
    %383 = arith.addf %381, %382 : vector<48x32xf32>
    %384 = arith.mulf %383, %370 : vector<48x32xf32>
    %cst_216 = arith.constant 0.000000e+00 : f32
    %385 = vector.broadcast %cst_216 : f32 to vector<48x32xf32>
    %386 = arith.subf %385, %364 : vector<48x32xf32>
    %387 = arith.mulf %386, %364 : vector<48x32xf32>
    %388 = math.exp %387 : vector<48x32xf32>
    %389 = arith.mulf %384, %388 : vector<48x32xf32>
    %cst_217 = arith.constant 1.000000e+00 : f32
    %390 = vector.broadcast %cst_217 : f32 to vector<48x32xf32>
    %391 = arith.subf %390, %389 : vector<48x32xf32>
    %392 = arith.mulf %363, %391 : vector<48x32xf32>
    %cst_218 = arith.constant 1.000000e+00 : f32
    %393 = vector.broadcast %cst_218 : f32 to vector<48x32xf32>
    %394 = arith.addf %393, %392 : vector<48x32xf32>
    %395 = arith.mulf %356, %394 : vector<48x32xf32>
    %c0_219 = arith.constant 0 : index
    %c0_220 = arith.constant 0 : index
    %c0_221 = arith.constant 0 : index
    %396 = vector.load %arg25[%c0_219, %c0_220, %c0_221] : memref<2x32x16xf32, #tpu.memory_space<vmem>>, vector<1x32x16xf32>
    %397 = vector.shape_cast %396 : vector<1x32x16xf32> to vector<32x16xf32>
    %cst_222 = arith.constant dense<0.000000e+00> : vector<48x16xf32>
    %398 = tpu.matmul %395, %397, %cst_222 {dimension_numbers = #tpu.dot_dimension_numbers<[1], [0], [0], [1], [0, 0, 1, 1], [], []>} : vector<48x32xf32>, vector<32x16xf32>, vector<48x16xf32> -> vector<48x16xf32>
    %c0_223 = arith.constant 0 : index
    %c0_224 = arith.constant 0 : index
    %c0_225 = arith.constant 0 : index
    %399 = vector.load %arg26[%c0_223, %c0_224, %c0_225] : memref<2x1x16xf32, #tpu.memory_space<vmem>>, vector<1x1x16xf32>
    %400 = vector.shape_cast %399 : vector<1x1x16xf32> to vector<1x16xf32>
    %401 = vector.broadcast %400 : vector<1x16xf32> to vector<48x16xf32>
    %402 = arith.addf %398, %401 : vector<48x16xf32>
    %403 = arith.addf %402, %347 : vector<48x16xf32>
    %c0_226 = arith.constant 0 : index
    %c0_227 = arith.constant 0 : index
    %c0_228 = arith.constant 0 : index
    %404 = vector.load %arg27[%c0_226, %c0_227, %c0_228] : memref<2x1x16xf32, #tpu.memory_space<vmem>>, vector<1x1x16xf32>
    %405 = vector.shape_cast %404 : vector<1x1x16xf32> to vector<1x16xf32>
    %c0_229 = arith.constant 0 : index
    %c0_230 = arith.constant 0 : index
    %c0_231 = arith.constant 0 : index
    %406 = vector.load %arg28[%c0_229, %c0_230, %c0_231] : memref<2x1x16xf32, #tpu.memory_space<vmem>>, vector<1x1x16xf32>
    %407 = vector.shape_cast %406 : vector<1x1x16xf32> to vector<1x16xf32>
    %cst_232 = arith.constant dense<0.000000e+00> : vector<48xf32>
    %408 = vector.multi_reduction <add>, %403, %cst_232 [1] : vector<48x16xf32> to vector<48xf32>
    %409 = vector.shape_cast %408 : vector<48xf32> to vector<48x1xf32>
    %cst_233 = arith.constant 1.600000e+01 : f32
    %410 = vector.broadcast %cst_233 : f32 to vector<48x1xf32>
    %411 = arith.divf %409, %410 : vector<48x1xf32>
    %412 = vector.broadcast %411 : vector<48x1xf32> to vector<48x16xf32>
    %413 = arith.subf %403, %412 : vector<48x16xf32>
    %414 = arith.mulf %413, %413 : vector<48x16xf32>
    %cst_234 = arith.constant dense<0.000000e+00> : vector<48xf32>
    %415 = vector.multi_reduction <add>, %414, %cst_234 [1] : vector<48x16xf32> to vector<48xf32>
    %416 = vector.shape_cast %415 : vector<48xf32> to vector<48x1xf32>
    %cst_235 = arith.constant 1.600000e+01 : f32
    %417 = vector.broadcast %cst_235 : f32 to vector<48x1xf32>
    %418 = arith.divf %416, %417 : vector<48x1xf32>
    %cst_236 = arith.constant 9.99999997E-7 : f32
    %419 = vector.broadcast %cst_236 : f32 to vector<48x1xf32>
    %420 = arith.addf %418, %419 : vector<48x1xf32>
    %421 = math.rsqrt %420 : vector<48x1xf32>
    %422 = vector.broadcast %421 : vector<48x1xf32> to vector<48x16xf32>
    %423 = arith.mulf %413, %422 : vector<48x16xf32>
    %424 = vector.broadcast %405 : vector<1x16xf32> to vector<48x16xf32>
    %425 = arith.mulf %423, %424 : vector<48x16xf32>
    %426 = vector.broadcast %407 : vector<1x16xf32> to vector<48x16xf32>
    %427 = arith.addf %425, %426 : vector<48x16xf32>
    %cst_237 = arith.constant 0.000000e+00 : f32
    %428 = vector.broadcast %cst_237 : f32 to vector<48x16xf32>
    %c4_238 = arith.constant 4 : index
    %c0_239 = arith.constant 0 : index
    %c0_240 = arith.constant 0 : index
    %429 = vector.load %arg16[%c4_238, %c0_239, %c0_240] : memref<8x16x8xf32, #tpu.memory_space<vmem>>, vector<1x16x8xf32>
    %430 = vector.shape_cast %429 : vector<1x16x8xf32> to vector<16x8xf32>
    %cst_241 = arith.constant dense<0.000000e+00> : vector<48x8xf32>
    %431 = tpu.matmul %427, %430, %cst_241 {dimension_numbers = #tpu.dot_dimension_numbers<[1], [0], [0], [1], [0, 0, 1, 1], [], []>} : vector<48x16xf32>, vector<16x8xf32>, vector<48x8xf32> -> vector<48x8xf32>
    %c4_242 = arith.constant 4 : index
    %c0_243 = arith.constant 0 : index
    %c0_244 = arith.constant 0 : index
    %432 = vector.load %arg17[%c4_242, %c0_243, %c0_244] : memref<8x16x8xf32, #tpu.memory_space<vmem>>, vector<1x16x8xf32>
    %433 = vector.shape_cast %432 : vector<1x16x8xf32> to vector<16x8xf32>
    %cst_245 = arith.constant dense<0.000000e+00> : vector<48x8xf32>
    %434 = tpu.matmul %427, %433, %cst_245 {dimension_numbers = #tpu.dot_dimension_numbers<[1], [0], [0], [1], [0, 0, 1, 1], [], []>} : vector<48x16xf32>, vector<16x8xf32>, vector<48x8xf32> -> vector<48x8xf32>
    %c4_246 = arith.constant 4 : index
    %c0_247 = arith.constant 0 : index
    %c0_248 = arith.constant 0 : index
    %435 = vector.load %arg18[%c4_246, %c0_247, %c0_248] : memref<8x16x8xf32, #tpu.memory_space<vmem>>, vector<1x16x8xf32>
    %436 = vector.shape_cast %435 : vector<1x16x8xf32> to vector<16x8xf32>
    %cst_249 = arith.constant dense<0.000000e+00> : vector<48x8xf32>
    %437 = tpu.matmul %427, %436, %cst_249 {dimension_numbers = #tpu.dot_dimension_numbers<[1], [0], [0], [1], [0, 0, 1, 1], [], []>} : vector<48x16xf32>, vector<16x8xf32>, vector<48x8xf32> -> vector<48x8xf32>
    %cst_250 = arith.constant dense<0.000000e+00> : vector<48x48xf32>
    %438 = tpu.matmul %431, %434, %cst_250 {dimension_numbers = #tpu.dot_dimension_numbers<[1], [1], [0], [0], [0, 0, 1, 0], [], []>} : vector<48x8xf32>, vector<48x8xf32>, vector<48x48xf32> -> vector<48x48xf32>
    %439 = arith.addf %438, %213 : vector<48x48xf32>
    %cst_251 = arith.constant dense<0xFF800000> : vector<48xf32>
    %440 = vector.multi_reduction <maximumf>, %439, %cst_251 [1] : vector<48x48xf32> to vector<48xf32>
    %441 = vector.shape_cast %440 : vector<48xf32> to vector<48x1xf32>
    %442 = vector.broadcast %441 : vector<48x1xf32> to vector<48x48xf32>
    %443 = arith.subf %439, %442 : vector<48x48xf32>
    %444 = math.exp %443 : vector<48x48xf32>
    %cst_252 = arith.constant dense<0.000000e+00> : vector<48xf32>
    %445 = vector.multi_reduction <add>, %444, %cst_252 [1] : vector<48x48xf32> to vector<48xf32>
    %446 = vector.shape_cast %445 : vector<48xf32> to vector<48x1xf32>
    %447 = tpu.reciprocal %446 {approx = true} : vector<48x1xf32> -> vector<48x1xf32>
    %448 = vector.broadcast %447 : vector<48x1xf32> to vector<48x48xf32>
    %449 = arith.mulf %444, %448 : vector<48x48xf32>
    %cst_253 = arith.constant dense<0.000000e+00> : vector<48x8xf32>
    %450 = tpu.matmul %449, %437, %cst_253 {dimension_numbers = #tpu.dot_dimension_numbers<[1], [0], [0], [1], [0, 0, 1, 1], [], []>} : vector<48x48xf32>, vector<48x8xf32>, vector<48x8xf32> -> vector<48x8xf32>
    %c4_254 = arith.constant 4 : index
    %c0_255 = arith.constant 0 : index
    %c0_256 = arith.constant 0 : index
    %451 = vector.load %arg19[%c4_254, %c0_255, %c0_256] : memref<8x8x16xf32, #tpu.memory_space<vmem>>, vector<1x8x16xf32>
    %452 = vector.shape_cast %451 : vector<1x8x16xf32> to vector<8x16xf32>
    %cst_257 = arith.constant dense<0.000000e+00> : vector<48x16xf32>
    %453 = tpu.matmul %450, %452, %cst_257 {dimension_numbers = #tpu.dot_dimension_numbers<[1], [0], [0], [1], [0, 0, 1, 1], [], []>} : vector<48x8xf32>, vector<8x16xf32>, vector<48x16xf32> -> vector<48x16xf32>
    %454 = arith.addf %428, %453 : vector<48x16xf32>
    %c5_258 = arith.constant 5 : index
    %c0_259 = arith.constant 0 : index
    %c0_260 = arith.constant 0 : index
    %455 = vector.load %arg16[%c5_258, %c0_259, %c0_260] : memref<8x16x8xf32, #tpu.memory_space<vmem>>, vector<1x16x8xf32>
    %456 = vector.shape_cast %455 : vector<1x16x8xf32> to vector<16x8xf32>
    %cst_261 = arith.constant dense<0.000000e+00> : vector<48x8xf32>
    %457 = tpu.matmul %427, %456, %cst_261 {dimension_numbers = #tpu.dot_dimension_numbers<[1], [0], [0], [1], [0, 0, 1, 1], [], []>} : vector<48x16xf32>, vector<16x8xf32>, vector<48x8xf32> -> vector<48x8xf32>
    %c5_262 = arith.constant 5 : index
    %c0_263 = arith.constant 0 : index
    %c0_264 = arith.constant 0 : index
    %458 = vector.load %arg17[%c5_262, %c0_263, %c0_264] : memref<8x16x8xf32, #tpu.memory_space<vmem>>, vector<1x16x8xf32>
    %459 = vector.shape_cast %458 : vector<1x16x8xf32> to vector<16x8xf32>
    %cst_265 = arith.constant dense<0.000000e+00> : vector<48x8xf32>
    %460 = tpu.matmul %427, %459, %cst_265 {dimension_numbers = #tpu.dot_dimension_numbers<[1], [0], [0], [1], [0, 0, 1, 1], [], []>} : vector<48x16xf32>, vector<16x8xf32>, vector<48x8xf32> -> vector<48x8xf32>
    %c5_266 = arith.constant 5 : index
    %c0_267 = arith.constant 0 : index
    %c0_268 = arith.constant 0 : index
    %461 = vector.load %arg18[%c5_266, %c0_267, %c0_268] : memref<8x16x8xf32, #tpu.memory_space<vmem>>, vector<1x16x8xf32>
    %462 = vector.shape_cast %461 : vector<1x16x8xf32> to vector<16x8xf32>
    %cst_269 = arith.constant dense<0.000000e+00> : vector<48x8xf32>
    %463 = tpu.matmul %427, %462, %cst_269 {dimension_numbers = #tpu.dot_dimension_numbers<[1], [0], [0], [1], [0, 0, 1, 1], [], []>} : vector<48x16xf32>, vector<16x8xf32>, vector<48x8xf32> -> vector<48x8xf32>
    %cst_270 = arith.constant dense<0.000000e+00> : vector<48x48xf32>
    %464 = tpu.matmul %457, %460, %cst_270 {dimension_numbers = #tpu.dot_dimension_numbers<[1], [1], [0], [0], [0, 0, 1, 0], [], []>} : vector<48x8xf32>, vector<48x8xf32>, vector<48x48xf32> -> vector<48x48xf32>
    %465 = arith.addf %464, %213 : vector<48x48xf32>
    %cst_271 = arith.constant dense<0xFF800000> : vector<48xf32>
    %466 = vector.multi_reduction <maximumf>, %465, %cst_271 [1] : vector<48x48xf32> to vector<48xf32>
    %467 = vector.shape_cast %466 : vector<48xf32> to vector<48x1xf32>
    %468 = vector.broadcast %467 : vector<48x1xf32> to vector<48x48xf32>
    %469 = arith.subf %465, %468 : vector<48x48xf32>
    %470 = math.exp %469 : vector<48x48xf32>
    %cst_272 = arith.constant dense<0.000000e+00> : vector<48xf32>
    %471 = vector.multi_reduction <add>, %470, %cst_272 [1] : vector<48x48xf32> to vector<48xf32>
    %472 = vector.shape_cast %471 : vector<48xf32> to vector<48x1xf32>
    %473 = tpu.reciprocal %472 {approx = true} : vector<48x1xf32> -> vector<48x1xf32>
    %474 = vector.broadcast %473 : vector<48x1xf32> to vector<48x48xf32>
    %475 = arith.mulf %470, %474 : vector<48x48xf32>
    %cst_273 = arith.constant dense<0.000000e+00> : vector<48x8xf32>
    %476 = tpu.matmul %475, %463, %cst_273 {dimension_numbers = #tpu.dot_dimension_numbers<[1], [0], [0], [1], [0, 0, 1, 1], [], []>} : vector<48x48xf32>, vector<48x8xf32>, vector<48x8xf32> -> vector<48x8xf32>
    %c5_274 = arith.constant 5 : index
    %c0_275 = arith.constant 0 : index
    %c0_276 = arith.constant 0 : index
    %477 = vector.load %arg19[%c5_274, %c0_275, %c0_276] : memref<8x8x16xf32, #tpu.memory_space<vmem>>, vector<1x8x16xf32>
    %478 = vector.shape_cast %477 : vector<1x8x16xf32> to vector<8x16xf32>
    %cst_277 = arith.constant dense<0.000000e+00> : vector<48x16xf32>
    %479 = tpu.matmul %476, %478, %cst_277 {dimension_numbers = #tpu.dot_dimension_numbers<[1], [0], [0], [1], [0, 0, 1, 1], [], []>} : vector<48x8xf32>, vector<8x16xf32>, vector<48x16xf32> -> vector<48x16xf32>
    %480 = arith.addf %454, %479 : vector<48x16xf32>
    %c6 = arith.constant 6 : index
    %c0_278 = arith.constant 0 : index
    %c0_279 = arith.constant 0 : index
    %481 = vector.load %arg16[%c6, %c0_278, %c0_279] : memref<8x16x8xf32, #tpu.memory_space<vmem>>, vector<1x16x8xf32>
    %482 = vector.shape_cast %481 : vector<1x16x8xf32> to vector<16x8xf32>
    %cst_280 = arith.constant dense<0.000000e+00> : vector<48x8xf32>
    %483 = tpu.matmul %427, %482, %cst_280 {dimension_numbers = #tpu.dot_dimension_numbers<[1], [0], [0], [1], [0, 0, 1, 1], [], []>} : vector<48x16xf32>, vector<16x8xf32>, vector<48x8xf32> -> vector<48x8xf32>
    %c6_281 = arith.constant 6 : index
    %c0_282 = arith.constant 0 : index
    %c0_283 = arith.constant 0 : index
    %484 = vector.load %arg17[%c6_281, %c0_282, %c0_283] : memref<8x16x8xf32, #tpu.memory_space<vmem>>, vector<1x16x8xf32>
    %485 = vector.shape_cast %484 : vector<1x16x8xf32> to vector<16x8xf32>
    %cst_284 = arith.constant dense<0.000000e+00> : vector<48x8xf32>
    %486 = tpu.matmul %427, %485, %cst_284 {dimension_numbers = #tpu.dot_dimension_numbers<[1], [0], [0], [1], [0, 0, 1, 1], [], []>} : vector<48x16xf32>, vector<16x8xf32>, vector<48x8xf32> -> vector<48x8xf32>
    %c6_285 = arith.constant 6 : index
    %c0_286 = arith.constant 0 : index
    %c0_287 = arith.constant 0 : index
    %487 = vector.load %arg18[%c6_285, %c0_286, %c0_287] : memref<8x16x8xf32, #tpu.memory_space<vmem>>, vector<1x16x8xf32>
    %488 = vector.shape_cast %487 : vector<1x16x8xf32> to vector<16x8xf32>
    %cst_288 = arith.constant dense<0.000000e+00> : vector<48x8xf32>
    %489 = tpu.matmul %427, %488, %cst_288 {dimension_numbers = #tpu.dot_dimension_numbers<[1], [0], [0], [1], [0, 0, 1, 1], [], []>} : vector<48x16xf32>, vector<16x8xf32>, vector<48x8xf32> -> vector<48x8xf32>
    %cst_289 = arith.constant dense<0.000000e+00> : vector<48x48xf32>
    %490 = tpu.matmul %483, %486, %cst_289 {dimension_numbers = #tpu.dot_dimension_numbers<[1], [1], [0], [0], [0, 0, 1, 0], [], []>} : vector<48x8xf32>, vector<48x8xf32>, vector<48x48xf32> -> vector<48x48xf32>
    %491 = arith.addf %490, %213 : vector<48x48xf32>
    %cst_290 = arith.constant dense<0xFF800000> : vector<48xf32>
    %492 = vector.multi_reduction <maximumf>, %491, %cst_290 [1] : vector<48x48xf32> to vector<48xf32>
    %493 = vector.shape_cast %492 : vector<48xf32> to vector<48x1xf32>
    %494 = vector.broadcast %493 : vector<48x1xf32> to vector<48x48xf32>
    %495 = arith.subf %491, %494 : vector<48x48xf32>
    %496 = math.exp %495 : vector<48x48xf32>
    %cst_291 = arith.constant dense<0.000000e+00> : vector<48xf32>
    %497 = vector.multi_reduction <add>, %496, %cst_291 [1] : vector<48x48xf32> to vector<48xf32>
    %498 = vector.shape_cast %497 : vector<48xf32> to vector<48x1xf32>
    %499 = tpu.reciprocal %498 {approx = true} : vector<48x1xf32> -> vector<48x1xf32>
    %500 = vector.broadcast %499 : vector<48x1xf32> to vector<48x48xf32>
    %501 = arith.mulf %496, %500 : vector<48x48xf32>
    %cst_292 = arith.constant dense<0.000000e+00> : vector<48x8xf32>
    %502 = tpu.matmul %501, %489, %cst_292 {dimension_numbers = #tpu.dot_dimension_numbers<[1], [0], [0], [1], [0, 0, 1, 1], [], []>} : vector<48x48xf32>, vector<48x8xf32>, vector<48x8xf32> -> vector<48x8xf32>
    %c6_293 = arith.constant 6 : index
    %c0_294 = arith.constant 0 : index
    %c0_295 = arith.constant 0 : index
    %503 = vector.load %arg19[%c6_293, %c0_294, %c0_295] : memref<8x8x16xf32, #tpu.memory_space<vmem>>, vector<1x8x16xf32>
    %504 = vector.shape_cast %503 : vector<1x8x16xf32> to vector<8x16xf32>
    %cst_296 = arith.constant dense<0.000000e+00> : vector<48x16xf32>
    %505 = tpu.matmul %502, %504, %cst_296 {dimension_numbers = #tpu.dot_dimension_numbers<[1], [0], [0], [1], [0, 0, 1, 1], [], []>} : vector<48x8xf32>, vector<8x16xf32>, vector<48x16xf32> -> vector<48x16xf32>
    %506 = arith.addf %480, %505 : vector<48x16xf32>
    %c7 = arith.constant 7 : index
    %c0_297 = arith.constant 0 : index
    %c0_298 = arith.constant 0 : index
    %507 = vector.load %arg16[%c7, %c0_297, %c0_298] : memref<8x16x8xf32, #tpu.memory_space<vmem>>, vector<1x16x8xf32>
    %508 = vector.shape_cast %507 : vector<1x16x8xf32> to vector<16x8xf32>
    %cst_299 = arith.constant dense<0.000000e+00> : vector<48x8xf32>
    %509 = tpu.matmul %427, %508, %cst_299 {dimension_numbers = #tpu.dot_dimension_numbers<[1], [0], [0], [1], [0, 0, 1, 1], [], []>} : vector<48x16xf32>, vector<16x8xf32>, vector<48x8xf32> -> vector<48x8xf32>
    %c7_300 = arith.constant 7 : index
    %c0_301 = arith.constant 0 : index
    %c0_302 = arith.constant 0 : index
    %510 = vector.load %arg17[%c7_300, %c0_301, %c0_302] : memref<8x16x8xf32, #tpu.memory_space<vmem>>, vector<1x16x8xf32>
    %511 = vector.shape_cast %510 : vector<1x16x8xf32> to vector<16x8xf32>
    %cst_303 = arith.constant dense<0.000000e+00> : vector<48x8xf32>
    %512 = tpu.matmul %427, %511, %cst_303 {dimension_numbers = #tpu.dot_dimension_numbers<[1], [0], [0], [1], [0, 0, 1, 1], [], []>} : vector<48x16xf32>, vector<16x8xf32>, vector<48x8xf32> -> vector<48x8xf32>
    %c7_304 = arith.constant 7 : index
    %c0_305 = arith.constant 0 : index
    %c0_306 = arith.constant 0 : index
    %513 = vector.load %arg18[%c7_304, %c0_305, %c0_306] : memref<8x16x8xf32, #tpu.memory_space<vmem>>, vector<1x16x8xf32>
    %514 = vector.shape_cast %513 : vector<1x16x8xf32> to vector<16x8xf32>
    %cst_307 = arith.constant dense<0.000000e+00> : vector<48x8xf32>
    %515 = tpu.matmul %427, %514, %cst_307 {dimension_numbers = #tpu.dot_dimension_numbers<[1], [0], [0], [1], [0, 0, 1, 1], [], []>} : vector<48x16xf32>, vector<16x8xf32>, vector<48x8xf32> -> vector<48x8xf32>
    %cst_308 = arith.constant dense<0.000000e+00> : vector<48x48xf32>
    %516 = tpu.matmul %509, %512, %cst_308 {dimension_numbers = #tpu.dot_dimension_numbers<[1], [1], [0], [0], [0, 0, 1, 0], [], []>} : vector<48x8xf32>, vector<48x8xf32>, vector<48x48xf32> -> vector<48x48xf32>
    %517 = arith.addf %516, %213 : vector<48x48xf32>
    %cst_309 = arith.constant dense<0xFF800000> : vector<48xf32>
    %518 = vector.multi_reduction <maximumf>, %517, %cst_309 [1] : vector<48x48xf32> to vector<48xf32>
    %519 = vector.shape_cast %518 : vector<48xf32> to vector<48x1xf32>
    %520 = vector.broadcast %519 : vector<48x1xf32> to vector<48x48xf32>
    %521 = arith.subf %517, %520 : vector<48x48xf32>
    %522 = math.exp %521 : vector<48x48xf32>
    %cst_310 = arith.constant dense<0.000000e+00> : vector<48xf32>
    %523 = vector.multi_reduction <add>, %522, %cst_310 [1] : vector<48x48xf32> to vector<48xf32>
    %524 = vector.shape_cast %523 : vector<48xf32> to vector<48x1xf32>
    %525 = tpu.reciprocal %524 {approx = true} : vector<48x1xf32> -> vector<48x1xf32>
    %526 = vector.broadcast %525 : vector<48x1xf32> to vector<48x48xf32>
    %527 = arith.mulf %522, %526 : vector<48x48xf32>
    %cst_311 = arith.constant dense<0.000000e+00> : vector<48x8xf32>
    %528 = tpu.matmul %527, %515, %cst_311 {dimension_numbers = #tpu.dot_dimension_numbers<[1], [0], [0], [1], [0, 0, 1, 1], [], []>} : vector<48x48xf32>, vector<48x8xf32>, vector<48x8xf32> -> vector<48x8xf32>
    %c7_312 = arith.constant 7 : index
    %c0_313 = arith.constant 0 : index
    %c0_314 = arith.constant 0 : index
    %529 = vector.load %arg19[%c7_312, %c0_313, %c0_314] : memref<8x8x16xf32, #tpu.memory_space<vmem>>, vector<1x8x16xf32>
    %530 = vector.shape_cast %529 : vector<1x8x16xf32> to vector<8x16xf32>
    %cst_315 = arith.constant dense<0.000000e+00> : vector<48x16xf32>
    %531 = tpu.matmul %528, %530, %cst_315 {dimension_numbers = #tpu.dot_dimension_numbers<[1], [0], [0], [1], [0, 0, 1, 1], [], []>} : vector<48x8xf32>, vector<8x16xf32>, vector<48x16xf32> -> vector<48x16xf32>
    %532 = arith.addf %506, %531 : vector<48x16xf32>
    %c1_316 = arith.constant 1 : index
    %c0_317 = arith.constant 0 : index
    %c0_318 = arith.constant 0 : index
    %533 = vector.load %arg20[%c1_316, %c0_317, %c0_318] : memref<2x1x16xf32, #tpu.memory_space<vmem>>, vector<1x1x16xf32>
    %534 = vector.shape_cast %533 : vector<1x1x16xf32> to vector<1x16xf32>
    %535 = vector.broadcast %534 : vector<1x16xf32> to vector<48x16xf32>
    %536 = arith.addf %532, %535 : vector<48x16xf32>
    %537 = arith.addf %536, %427 : vector<48x16xf32>
    %c1_319 = arith.constant 1 : index
    %c0_320 = arith.constant 0 : index
    %c0_321 = arith.constant 0 : index
    %538 = vector.load %arg21[%c1_319, %c0_320, %c0_321] : memref<2x1x16xf32, #tpu.memory_space<vmem>>, vector<1x1x16xf32>
    %539 = vector.shape_cast %538 : vector<1x1x16xf32> to vector<1x16xf32>
    %c1_322 = arith.constant 1 : index
    %c0_323 = arith.constant 0 : index
    %c0_324 = arith.constant 0 : index
    %540 = vector.load %arg22[%c1_322, %c0_323, %c0_324] : memref<2x1x16xf32, #tpu.memory_space<vmem>>, vector<1x1x16xf32>
    %541 = vector.shape_cast %540 : vector<1x1x16xf32> to vector<1x16xf32>
    %cst_325 = arith.constant dense<0.000000e+00> : vector<48xf32>
    %542 = vector.multi_reduction <add>, %537, %cst_325 [1] : vector<48x16xf32> to vector<48xf32>
    %543 = vector.shape_cast %542 : vector<48xf32> to vector<48x1xf32>
    %cst_326 = arith.constant 1.600000e+01 : f32
    %544 = vector.broadcast %cst_326 : f32 to vector<48x1xf32>
    %545 = arith.divf %543, %544 : vector<48x1xf32>
    %546 = vector.broadcast %545 : vector<48x1xf32> to vector<48x16xf32>
    %547 = arith.subf %537, %546 : vector<48x16xf32>
    %548 = arith.mulf %547, %547 : vector<48x16xf32>
    %cst_327 = arith.constant dense<0.000000e+00> : vector<48xf32>
    %549 = vector.multi_reduction <add>, %548, %cst_327 [1] : vector<48x16xf32> to vector<48xf32>
    %550 = vector.shape_cast %549 : vector<48xf32> to vector<48x1xf32>
    %cst_328 = arith.constant 1.600000e+01 : f32
    %551 = vector.broadcast %cst_328 : f32 to vector<48x1xf32>
    %552 = arith.divf %550, %551 : vector<48x1xf32>
    %cst_329 = arith.constant 9.99999997E-7 : f32
    %553 = vector.broadcast %cst_329 : f32 to vector<48x1xf32>
    %554 = arith.addf %552, %553 : vector<48x1xf32>
    %555 = math.rsqrt %554 : vector<48x1xf32>
    %556 = vector.broadcast %555 : vector<48x1xf32> to vector<48x16xf32>
    %557 = arith.mulf %547, %556 : vector<48x16xf32>
    %558 = vector.broadcast %539 : vector<1x16xf32> to vector<48x16xf32>
    %559 = arith.mulf %557, %558 : vector<48x16xf32>
    %560 = vector.broadcast %541 : vector<1x16xf32> to vector<48x16xf32>
    %561 = arith.addf %559, %560 : vector<48x16xf32>
    %c1_330 = arith.constant 1 : index
    %c0_331 = arith.constant 0 : index
    %c0_332 = arith.constant 0 : index
    %562 = vector.load %arg23[%c1_330, %c0_331, %c0_332] : memref<2x16x32xf32, #tpu.memory_space<vmem>>, vector<1x16x32xf32>
    %563 = vector.shape_cast %562 : vector<1x16x32xf32> to vector<16x32xf32>
    %cst_333 = arith.constant dense<0.000000e+00> : vector<48x32xf32>
    %564 = tpu.matmul %561, %563, %cst_333 {dimension_numbers = #tpu.dot_dimension_numbers<[1], [0], [0], [1], [0, 0, 1, 1], [], []>} : vector<48x16xf32>, vector<16x32xf32>, vector<48x32xf32> -> vector<48x32xf32>
    %c1_334 = arith.constant 1 : index
    %c0_335 = arith.constant 0 : index
    %c0_336 = arith.constant 0 : index
    %565 = vector.load %arg24[%c1_334, %c0_335, %c0_336] : memref<2x1x32xf32, #tpu.memory_space<vmem>>, vector<1x1x32xf32>
    %566 = vector.shape_cast %565 : vector<1x1x32xf32> to vector<1x32xf32>
    %567 = vector.broadcast %566 : vector<1x32xf32> to vector<48x32xf32>
    %568 = arith.addf %564, %567 : vector<48x32xf32>
    %cst_337 = arith.constant 5.000000e-01 : f32
    %569 = vector.broadcast %cst_337 : f32 to vector<48x32xf32>
    %570 = arith.mulf %569, %568 : vector<48x32xf32>
    %cst_338 = arith.constant 0.707106769 : f32
    %571 = vector.broadcast %cst_338 : f32 to vector<48x32xf32>
    %572 = arith.mulf %568, %571 : vector<48x32xf32>
    %cst_339 = arith.constant 0.000000e+00 : f32
    %573 = vector.broadcast %cst_339 : f32 to vector<48x32xf32>
    %574 = arith.cmpf olt, %572, %573 : vector<48x32xf32>
    %cst_340 = arith.constant -1.000000e+00 : f32
    %cst_341 = arith.constant 1.000000e+00 : f32
    %575 = vector.broadcast %cst_340 : f32 to vector<48x32xf32>
    %576 = vector.broadcast %cst_341 : f32 to vector<48x32xf32>
    %577 = arith.select %574, %575, %576 : vector<48x32xi1>, vector<48x32xf32>
    %578 = math.absf %572 : vector<48x32xf32>
    %cst_342 = arith.constant 0.327591091 : f32
    %579 = vector.broadcast %cst_342 : f32 to vector<48x32xf32>
    %580 = arith.mulf %579, %578 : vector<48x32xf32>
    %cst_343 = arith.constant 1.000000e+00 : f32
    %581 = vector.broadcast %cst_343 : f32 to vector<48x32xf32>
    %582 = arith.addf %581, %580 : vector<48x32xf32>
    %cst_344 = arith.constant 1.000000e+00 : f32
    %583 = vector.broadcast %cst_344 : f32 to vector<48x32xf32>
    %584 = arith.divf %583, %582 : vector<48x32xf32>
    %cst_345 = arith.constant 1.06140542 : f32
    %585 = vector.broadcast %cst_345 : f32 to vector<48x32xf32>
    %586 = arith.mulf %585, %584 : vector<48x32xf32>
    %cst_346 = arith.constant -1.45315206 : f32
    %587 = vector.broadcast %cst_346 : f32 to vector<48x32xf32>
    %588 = arith.addf %586, %587 : vector<48x32xf32>
    %589 = arith.mulf %588, %584 : vector<48x32xf32>
    %cst_347 = arith.constant 1.42141378 : f32
    %590 = vector.broadcast %cst_347 : f32 to vector<48x32xf32>
    %591 = arith.addf %589, %590 : vector<48x32xf32>
    %592 = arith.mulf %591, %584 : vector<48x32xf32>
    %cst_348 = arith.constant -0.284496725 : f32
    %593 = vector.broadcast %cst_348 : f32 to vector<48x32xf32>
    %594 = arith.addf %592, %593 : vector<48x32xf32>
    %595 = arith.mulf %594, %584 : vector<48x32xf32>
    %cst_349 = arith.constant 0.254829586 : f32
    %596 = vector.broadcast %cst_349 : f32 to vector<48x32xf32>
    %597 = arith.addf %595, %596 : vector<48x32xf32>
    %598 = arith.mulf %597, %584 : vector<48x32xf32>
    %cst_350 = arith.constant 0.000000e+00 : f32
    %599 = vector.broadcast %cst_350 : f32 to vector<48x32xf32>
    %600 = arith.subf %599, %578 : vector<48x32xf32>
    %601 = arith.mulf %600, %578 : vector<48x32xf32>
    %602 = math.exp %601 : vector<48x32xf32>
    %603 = arith.mulf %598, %602 : vector<48x32xf32>
    %cst_351 = arith.constant 1.000000e+00 : f32
    %604 = vector.broadcast %cst_351 : f32 to vector<48x32xf32>
    %605 = arith.subf %604, %603 : vector<48x32xf32>
    %606 = arith.mulf %577, %605 : vector<48x32xf32>
    %cst_352 = arith.constant 1.000000e+00 : f32
    %607 = vector.broadcast %cst_352 : f32 to vector<48x32xf32>
    %608 = arith.addf %607, %606 : vector<48x32xf32>
    %609 = arith.mulf %570, %608 : vector<48x32xf32>
    %c1_353 = arith.constant 1 : index
    %c0_354 = arith.constant 0 : index
    %c0_355 = arith.constant 0 : index
    %610 = vector.load %arg25[%c1_353, %c0_354, %c0_355] : memref<2x32x16xf32, #tpu.memory_space<vmem>>, vector<1x32x16xf32>
    %611 = vector.shape_cast %610 : vector<1x32x16xf32> to vector<32x16xf32>
    %cst_356 = arith.constant dense<0.000000e+00> : vector<48x16xf32>
    %612 = tpu.matmul %609, %611, %cst_356 {dimension_numbers = #tpu.dot_dimension_numbers<[1], [0], [0], [1], [0, 0, 1, 1], [], []>} : vector<48x32xf32>, vector<32x16xf32>, vector<48x16xf32> -> vector<48x16xf32>
    %c1_357 = arith.constant 1 : index
    %c0_358 = arith.constant 0 : index
    %c0_359 = arith.constant 0 : index
    %613 = vector.load %arg26[%c1_357, %c0_358, %c0_359] : memref<2x1x16xf32, #tpu.memory_space<vmem>>, vector<1x1x16xf32>
    %614 = vector.shape_cast %613 : vector<1x1x16xf32> to vector<1x16xf32>
    %615 = vector.broadcast %614 : vector<1x16xf32> to vector<48x16xf32>
    %616 = arith.addf %612, %615 : vector<48x16xf32>
    %617 = arith.addf %616, %561 : vector<48x16xf32>
    %c1_360 = arith.constant 1 : index
    %c0_361 = arith.constant 0 : index
    %c0_362 = arith.constant 0 : index
    %618 = vector.load %arg27[%c1_360, %c0_361, %c0_362] : memref<2x1x16xf32, #tpu.memory_space<vmem>>, vector<1x1x16xf32>
    %619 = vector.shape_cast %618 : vector<1x1x16xf32> to vector<1x16xf32>
    %c1_363 = arith.constant 1 : index
    %c0_364 = arith.constant 0 : index
    %c0_365 = arith.constant 0 : index
    %620 = vector.load %arg28[%c1_363, %c0_364, %c0_365] : memref<2x1x16xf32, #tpu.memory_space<vmem>>, vector<1x1x16xf32>
    %621 = vector.shape_cast %620 : vector<1x1x16xf32> to vector<1x16xf32>
    %cst_366 = arith.constant dense<0.000000e+00> : vector<48xf32>
    %622 = vector.multi_reduction <add>, %617, %cst_366 [1] : vector<48x16xf32> to vector<48xf32>
    %623 = vector.shape_cast %622 : vector<48xf32> to vector<48x1xf32>
    %cst_367 = arith.constant 1.600000e+01 : f32
    %624 = vector.broadcast %cst_367 : f32 to vector<48x1xf32>
    %625 = arith.divf %623, %624 : vector<48x1xf32>
    %626 = vector.broadcast %625 : vector<48x1xf32> to vector<48x16xf32>
    %627 = arith.subf %617, %626 : vector<48x16xf32>
    %628 = arith.mulf %627, %627 : vector<48x16xf32>
    %cst_368 = arith.constant dense<0.000000e+00> : vector<48xf32>
    %629 = vector.multi_reduction <add>, %628, %cst_368 [1] : vector<48x16xf32> to vector<48xf32>
    %630 = vector.shape_cast %629 : vector<48xf32> to vector<48x1xf32>
    %cst_369 = arith.constant 1.600000e+01 : f32
    %631 = vector.broadcast %cst_369 : f32 to vector<48x1xf32>
    %632 = arith.divf %630, %631 : vector<48x1xf32>
    %cst_370 = arith.constant 9.99999997E-7 : f32
    %633 = vector.broadcast %cst_370 : f32 to vector<48x1xf32>
    %634 = arith.addf %632, %633 : vector<48x1xf32>
    %635 = math.rsqrt %634 : vector<48x1xf32>
    %636 = vector.broadcast %635 : vector<48x1xf32> to vector<48x16xf32>
    %637 = arith.mulf %627, %636 : vector<48x16xf32>
    %638 = vector.broadcast %619 : vector<1x16xf32> to vector<48x16xf32>
    %639 = arith.mulf %637, %638 : vector<48x16xf32>
    %640 = vector.broadcast %621 : vector<1x16xf32> to vector<48x16xf32>
    %641 = arith.addf %639, %640 : vector<48x16xf32>
    %cst_371 = arith.constant 0.000000e+00 : f32
    %642 = vector.broadcast %cst_371 : f32 to vector<24x2xf32>
    %c0_372 = arith.constant 0 : index
    %c0_373 = arith.constant 0 : index
    %c0_374 = arith.constant 0 : index
    %643 = vector.load %arg14[%c0_372, %c0_373, %c0_374] : memref<4x24x48xf32, #tpu.memory_space<vmem>>, vector<1x24x48xf32>
    %644 = vector.shape_cast %643 : vector<1x24x48xf32> to vector<24x48xf32>
    %cst_375 = arith.constant dense<0.000000e+00> : vector<24x16xf32>
    %645 = tpu.matmul %644, %641, %cst_375 {dimension_numbers = #tpu.dot_dimension_numbers<[1], [0], [0], [1], [0, 0, 1, 1], [], []>} : vector<24x48xf32>, vector<48x16xf32>, vector<24x16xf32> -> vector<24x16xf32>
    %c0_376 = arith.constant 0 : index
    %c0_377 = arith.constant 0 : index
    %c0_378 = arith.constant 0 : index
    %646 = vector.load %arg15[%c0_376, %c0_377, %c0_378] : memref<4x16x2xf32, #tpu.memory_space<vmem>>, vector<1x16x2xf32>
    %647 = vector.shape_cast %646 : vector<1x16x2xf32> to vector<16x2xf32>
    %cst_379 = arith.constant dense<0.000000e+00> : vector<24x2xf32>
    %648 = tpu.matmul %645, %647, %cst_379 {dimension_numbers = #tpu.dot_dimension_numbers<[1], [0], [0], [1], [0, 0, 1, 1], [], []>} : vector<24x16xf32>, vector<16x2xf32>, vector<24x2xf32> -> vector<24x2xf32>
    %649 = arith.addf %642, %648 : vector<24x2xf32>
    %c1_380 = arith.constant 1 : index
    %c0_381 = arith.constant 0 : index
    %c0_382 = arith.constant 0 : index
    %650 = vector.load %arg14[%c1_380, %c0_381, %c0_382] : memref<4x24x48xf32, #tpu.memory_space<vmem>>, vector<1x24x48xf32>
    %651 = vector.shape_cast %650 : vector<1x24x48xf32> to vector<24x48xf32>
    %cst_383 = arith.constant dense<0.000000e+00> : vector<24x16xf32>
    %652 = tpu.matmul %651, %641, %cst_383 {dimension_numbers = #tpu.dot_dimension_numbers<[1], [0], [0], [1], [0, 0, 1, 1], [], []>} : vector<24x48xf32>, vector<48x16xf32>, vector<24x16xf32> -> vector<24x16xf32>
    %c1_384 = arith.constant 1 : index
    %c0_385 = arith.constant 0 : index
    %c0_386 = arith.constant 0 : index
    %653 = vector.load %arg15[%c1_384, %c0_385, %c0_386] : memref<4x16x2xf32, #tpu.memory_space<vmem>>, vector<1x16x2xf32>
    %654 = vector.shape_cast %653 : vector<1x16x2xf32> to vector<16x2xf32>
    %cst_387 = arith.constant dense<0.000000e+00> : vector<24x2xf32>
    %655 = tpu.matmul %652, %654, %cst_387 {dimension_numbers = #tpu.dot_dimension_numbers<[1], [0], [0], [1], [0, 0, 1, 1], [], []>} : vector<24x16xf32>, vector<16x2xf32>, vector<24x2xf32> -> vector<24x2xf32>
    %656 = arith.addf %649, %655 : vector<24x2xf32>
    %c2_388 = arith.constant 2 : index
    %c0_389 = arith.constant 0 : index
    %c0_390 = arith.constant 0 : index
    %657 = vector.load %arg14[%c2_388, %c0_389, %c0_390] : memref<4x24x48xf32, #tpu.memory_space<vmem>>, vector<1x24x48xf32>
    %658 = vector.shape_cast %657 : vector<1x24x48xf32> to vector<24x48xf32>
    %cst_391 = arith.constant dense<0.000000e+00> : vector<24x16xf32>
    %659 = tpu.matmul %658, %641, %cst_391 {dimension_numbers = #tpu.dot_dimension_numbers<[1], [0], [0], [1], [0, 0, 1, 1], [], []>} : vector<24x48xf32>, vector<48x16xf32>, vector<24x16xf32> -> vector<24x16xf32>
    %c2_392 = arith.constant 2 : index
    %c0_393 = arith.constant 0 : index
    %c0_394 = arith.constant 0 : index
    %660 = vector.load %arg15[%c2_392, %c0_393, %c0_394] : memref<4x16x2xf32, #tpu.memory_space<vmem>>, vector<1x16x2xf32>
    %661 = vector.shape_cast %660 : vector<1x16x2xf32> to vector<16x2xf32>
    %cst_395 = arith.constant dense<0.000000e+00> : vector<24x2xf32>
    %662 = tpu.matmul %659, %661, %cst_395 {dimension_numbers = #tpu.dot_dimension_numbers<[1], [0], [0], [1], [0, 0, 1, 1], [], []>} : vector<24x16xf32>, vector<16x2xf32>, vector<24x2xf32> -> vector<24x2xf32>
    %663 = arith.addf %656, %662 : vector<24x2xf32>
    %c3_396 = arith.constant 3 : index
    %c0_397 = arith.constant 0 : index
    %c0_398 = arith.constant 0 : index
    %664 = vector.load %arg14[%c3_396, %c0_397, %c0_398] : memref<4x24x48xf32, #tpu.memory_space<vmem>>, vector<1x24x48xf32>
    %665 = vector.shape_cast %664 : vector<1x24x48xf32> to vector<24x48xf32>
    %cst_399 = arith.constant dense<0.000000e+00> : vector<24x16xf32>
    %666 = tpu.matmul %665, %641, %cst_399 {dimension_numbers = #tpu.dot_dimension_numbers<[1], [0], [0], [1], [0, 0, 1, 1], [], []>} : vector<24x48xf32>, vector<48x16xf32>, vector<24x16xf32> -> vector<24x16xf32>
    %c3_400 = arith.constant 3 : index
    %c0_401 = arith.constant 0 : index
    %c0_402 = arith.constant 0 : index
    %667 = vector.load %arg15[%c3_400, %c0_401, %c0_402] : memref<4x16x2xf32, #tpu.memory_space<vmem>>, vector<1x16x2xf32>
    %668 = vector.shape_cast %667 : vector<1x16x2xf32> to vector<16x2xf32>
    %cst_403 = arith.constant dense<0.000000e+00> : vector<24x2xf32>
    %669 = tpu.matmul %666, %668, %cst_403 {dimension_numbers = #tpu.dot_dimension_numbers<[1], [0], [0], [1], [0, 0, 1, 1], [], []>} : vector<24x16xf32>, vector<16x2xf32>, vector<24x2xf32> -> vector<24x2xf32>
    %670 = arith.addf %663, %669 : vector<24x2xf32>
    %cst_404 = arith.constant 0.000000e+00 : f32
    %671 = vector.broadcast %cst_404 : f32 to vector<24x2xf32>
    %672 = arith.maximumf %670, %671 : vector<24x2xf32>
    %673 = math.absf %670 : vector<24x2xf32>
    %cst_405 = arith.constant 0.000000e+00 : f32
    %674 = vector.broadcast %cst_405 : f32 to vector<24x2xf32>
    %675 = arith.subf %674, %673 : vector<24x2xf32>
    %676 = math.exp %675 : vector<24x2xf32>
    %cst_406 = arith.constant 1.000000e+00 : f32
    %677 = vector.broadcast %cst_406 : f32 to vector<24x2xf32>
    %678 = arith.addf %677, %676 : vector<24x2xf32>
    %679 = math.log %678 : vector<24x2xf32>
    %680 = arith.addf %672, %679 : vector<24x2xf32>
    %c0_407 = arith.constant 0 : index
    %c0_408 = arith.constant 0 : index
    %c0_409 = arith.constant 0 : index
    %681 = vector.load %arg29[%c0_407, %c0_408, %c0_409] : memref<1x24x2xf32, #tpu.memory_space<vmem>>, vector<1x24x2xf32>
    %682 = vector.shape_cast %681 : vector<1x24x2xf32> to vector<24x2xf32>
    %683 = vector.shape_cast %680 : vector<24x2xf32> to vector<1x24x2xf32>
    tpu.vector_store %arg29[%c0_407, %c0_408, %c0_409], %683 {strides = array<i32>} : memref<1x24x2xf32, #tpu.memory_space<vmem>>, vector<1x24x2xf32>,
    return
  }
  func.func @transform_0(%arg0: i32) -> (i32, i32, i32) {
    %c0_i32 = arith.constant 0 : i32
    %c0_i32_0 = arith.constant 0 : i32
    %c0_i32_1 = arith.constant 0 : i32
    return %arg0, %c0_i32, %c0_i32_0 : i32, i32, i32
  }
  func.func @transform_1(%arg0: i32) -> (i32, i32) {
    %c0_i32 = arith.constant 0 : i32
    %c0_i32_0 = arith.constant 0 : i32
    %c0_i32_1 = arith.constant 0 : i32
    return %c0_i32, %c0_i32_0 : i32, i32
  }
  func.func @transform_2(%arg0: i32) -> (i32, i32) {
    %c0_i32 = arith.constant 0 : i32
    %c0_i32_0 = arith.constant 0 : i32
    %c0_i32_1 = arith.constant 0 : i32
    return %c0_i32, %c0_i32_0 : i32, i32
  }
  func.func @transform_3(%arg0: i32) -> (i32, i32) {
    %c0_i32 = arith.constant 0 : i32
    %c0_i32_0 = arith.constant 0 : i32
    %c0_i32_1 = arith.constant 0 : i32
    return %c0_i32, %c0_i32_0 : i32, i32
  }
  func.func @transform_4(%arg0: i32) -> (i32, i32) {
    %c0_i32 = arith.constant 0 : i32
    %c0_i32_0 = arith.constant 0 : i32
    %c0_i32_1 = arith.constant 0 : i32
    return %c0_i32, %c0_i32_0 : i32, i32
  }
  func.func @transform_5(%arg0: i32) -> (i32, i32) {
    %c0_i32 = arith.constant 0 : i32
    %c0_i32_0 = arith.constant 0 : i32
    %c0_i32_1 = arith.constant 0 : i32
    return %c0_i32, %c0_i32_0 : i32, i32
  }
  func.func @transform_6(%arg0: i32) -> (i32, i32, i32) {
    %c0_i32 = arith.constant 0 : i32
    %c0_i32_0 = arith.constant 0 : i32
    %c0_i32_1 = arith.constant 0 : i32
    %c0_i32_2 = arith.constant 0 : i32
    return %c0_i32, %c0_i32_0, %c0_i32_1 : i32, i32, i32
  }
  func.func @transform_7(%arg0: i32) -> (i32, i32, i32) {
    %c0_i32 = arith.constant 0 : i32
    %c0_i32_0 = arith.constant 0 : i32
    %c0_i32_1 = arith.constant 0 : i32
    %c0_i32_2 = arith.constant 0 : i32
    return %c0_i32, %c0_i32_0, %c0_i32_1 : i32, i32, i32
  }
  func.func @transform_8(%arg0: i32) -> (i32, i32) {
    %c0_i32 = arith.constant 0 : i32
    %c0_i32_0 = arith.constant 0 : i32
    %c0_i32_1 = arith.constant 0 : i32
    return %c0_i32, %c0_i32_0 : i32, i32
  }
  func.func @transform_9(%arg0: i32) -> (i32, i32) {
    %c0_i32 = arith.constant 0 : i32
    %c0_i32_0 = arith.constant 0 : i32
    %c0_i32_1 = arith.constant 0 : i32
    return %c0_i32, %c0_i32_0 : i32, i32
  }
  func.func @transform_10(%arg0: i32) -> (i32, i32) {
    %c0_i32 = arith.constant 0 : i32
    %c0_i32_0 = arith.constant 0 : i32
    %c0_i32_1 = arith.constant 0 : i32
    return %c0_i32, %c0_i32_0 : i32, i32
  }
  func.func @transform_11(%arg0: i32) -> (i32, i32) {
    %c0_i32 = arith.constant 0 : i32
    %c0_i32_0 = arith.constant 0 : i32
    %c0_i32_1 = arith.constant 0 : i32
    return %c0_i32, %c0_i32_0 : i32, i32
  }
  func.func @transform_12(%arg0: i32) -> (i32, i32) {
    %c0_i32 = arith.constant 0 : i32
    %c0_i32_0 = arith.constant 0 : i32
    %c0_i32_1 = arith.constant 0 : i32
    return %c0_i32, %c0_i32_0 : i32, i32
  }
  func.func @transform_13(%arg0: i32) -> (i32, i32, i32) {
    %c0_i32 = arith.constant 0 : i32
    %c0_i32_0 = arith.constant 0 : i32
    %c0_i32_1 = arith.constant 0 : i32
    %c0_i32_2 = arith.constant 0 : i32
    return %c0_i32, %c0_i32_0, %c0_i32_1 : i32, i32, i32
  }
  func.func @transform_14(%arg0: i32) -> (i32, i32, i32) {
    %c0_i32 = arith.constant 0 : i32
    %c0_i32_0 = arith.constant 0 : i32
    %c0_i32_1 = arith.constant 0 : i32
    %c0_i32_2 = arith.constant 0 : i32
    return %c0_i32, %c0_i32_0, %c0_i32_1 : i32, i32, i32
  }
  func.func @transform_15(%arg0: i32) -> (i32, i32, i32) {
    %c0_i32 = arith.constant 0 : i32
    %c0_i32_0 = arith.constant 0 : i32
    %c0_i32_1 = arith.constant 0 : i32
    %c0_i32_2 = arith.constant 0 : i32
    return %c0_i32, %c0_i32_0, %c0_i32_1 : i32, i32, i32
  }
  func.func @transform_16(%arg0: i32) -> (i32, i32, i32) {
    %c0_i32 = arith.constant 0 : i32
    %c0_i32_0 = arith.constant 0 : i32
    %c0_i32_1 = arith.constant 0 : i32
    %c0_i32_2 = arith.constant 0 : i32
    return %c0_i32, %c0_i32_0, %c0_i32_1 : i32, i32, i32
  }
  func.func @transform_17(%arg0: i32) -> (i32, i32, i32) {
    %c0_i32 = arith.constant 0 : i32
    %c0_i32_0 = arith.constant 0 : i32
    %c0_i32_1 = arith.constant 0 : i32
    %c0_i32_2 = arith.constant 0 : i32
    return %c0_i32, %c0_i32_0, %c0_i32_1 : i32, i32, i32
  }
  func.func @transform_18(%arg0: i32) -> (i32, i32, i32) {
    %c0_i32 = arith.constant 0 : i32
    %c0_i32_0 = arith.constant 0 : i32
    %c0_i32_1 = arith.constant 0 : i32
    %c0_i32_2 = arith.constant 0 : i32
    return %c0_i32, %c0_i32_0, %c0_i32_1 : i32, i32, i32
  }
  func.func @transform_19(%arg0: i32) -> (i32, i32, i32) {
    %c0_i32 = arith.constant 0 : i32
    %c0_i32_0 = arith.constant 0 : i32
    %c0_i32_1 = arith.constant 0 : i32
    %c0_i32_2 = arith.constant 0 : i32
    return %c0_i32, %c0_i32_0, %c0_i32_1 : i32, i32, i32
  }
  func.func @transform_20(%arg0: i32) -> (i32, i32, i32) {
    %c0_i32 = arith.constant 0 : i32
    %c0_i32_0 = arith.constant 0 : i32
    %c0_i32_1 = arith.constant 0 : i32
    %c0_i32_2 = arith.constant 0 : i32
    return %c0_i32, %c0_i32_0, %c0_i32_1 : i32, i32, i32
  }
  func.func @transform_21(%arg0: i32) -> (i32, i32, i32) {
    %c0_i32 = arith.constant 0 : i32
    %c0_i32_0 = arith.constant 0 : i32
    %c0_i32_1 = arith.constant 0 : i32
    %c0_i32_2 = arith.constant 0 : i32
    return %c0_i32, %c0_i32_0, %c0_i32_1 : i32, i32, i32
  }
  func.func @transform_22(%arg0: i32) -> (i32, i32, i32) {
    %c0_i32 = arith.constant 0 : i32
    %c0_i32_0 = arith.constant 0 : i32
    %c0_i32_1 = arith.constant 0 : i32
    %c0_i32_2 = arith.constant 0 : i32
    return %c0_i32, %c0_i32_0, %c0_i32_1 : i32, i32, i32
  }
  func.func @transform_23(%arg0: i32) -> (i32, i32, i32) {
    %c0_i32 = arith.constant 0 : i32
    %c0_i32_0 = arith.constant 0 : i32
    %c0_i32_1 = arith.constant 0 : i32
    %c0_i32_2 = arith.constant 0 : i32
    return %c0_i32, %c0_i32_0, %c0_i32_1 : i32, i32, i32
  }
  func.func @transform_24(%arg0: i32) -> (i32, i32, i32) {
    %c0_i32 = arith.constant 0 : i32
    %c0_i32_0 = arith.constant 0 : i32
    %c0_i32_1 = arith.constant 0 : i32
    %c0_i32_2 = arith.constant 0 : i32
    return %c0_i32, %c0_i32_0, %c0_i32_1 : i32, i32, i32
  }
  func.func @transform_25(%arg0: i32) -> (i32, i32, i32) {
    %c0_i32 = arith.constant 0 : i32
    %c0_i32_0 = arith.constant 0 : i32
    %c0_i32_1 = arith.constant 0 : i32
    %c0_i32_2 = arith.constant 0 : i32
    return %c0_i32, %c0_i32_0, %c0_i32_1 : i32, i32, i32
  }
  func.func @transform_26(%arg0: i32) -> (i32, i32, i32) {
    %c0_i32 = arith.constant 0 : i32
    %c0_i32_0 = arith.constant 0 : i32
    %c0_i32_1 = arith.constant 0 : i32
    %c0_i32_2 = arith.constant 0 : i32
    return %c0_i32, %c0_i32_0, %c0_i32_1 : i32, i32, i32
  }
  func.func @transform_27(%arg0: i32) -> (i32, i32, i32) {
    %c0_i32 = arith.constant 0 : i32
    %c0_i32_0 = arith.constant 0 : i32
    %c0_i32_1 = arith.constant 0 : i32
    %c0_i32_2 = arith.constant 0 : i32
    return %c0_i32, %c0_i32_0, %c0_i32_1 : i32, i32, i32
  }
  func.func @transform_28(%arg0: i32) -> (i32, i32, i32) {
    %c0_i32 = arith.constant 0 : i32
    %c0_i32_0 = arith.constant 0 : i32
    %c0_i32_1 = arith.constant 0 : i32
    return %arg0, %c0_i32, %c0_i32_0 : i32, i32, i32
  }
}

</mosaic_0001>

<bundles_post_ra>
// kernel: _lambda_.1
= control target key start
LH: loop header
LB: loop body
LE: loop exit
PB: predicated region body
PF: predicated region fallthrough
CT: control target
= control target key end

     0   :  { %s16618_s0 = inlined_call_operand.vmem [shape: f32[2,24,7], index: 0, kind: input, shape index: {}]   ;;  %s16619_s1 = inlined_call_operand.hbm [shape: f32[24,16], index: 1, kind: input, shape index: {}]   ;;  %s16620_s2 = inlined_call_operand.hbm [shape: f32[7,16], index: 2, kind: input, shape index: {}]   ;;  %s16621_s3 = inlined_call_operand.hbm [shape: f32[1,16], index: 3, kind: input, shape index: {}]   ;;  %s16622_s4 = inlined_call_operand.hbm [shape: f32[16,8], index: 4, kind: input, shape index: {}]   ;;  %s16623_s5 = inlined_call_operand.hbm [shape: f32[1,8], index: 5, kind: input, shape index: {}]   ;;  %s16624_s6 = inlined_call_operand.hbm [shape: f32[6,8,8], index: 6, kind: input, shape index: {}]   ;;  %s16625_s7 = inlined_call_operand.vmem [shape: f32[3,1,8], index: 7, kind: input, shape index: {}]   ;;  %s16626_s8 = inlined_call_operand.hbm [shape: f32[8,16], index: 8, kind: input, shape index: {}]   ;;  %s16627_s9 = inlined_call_operand.hbm [shape: f32[1,16], index: 9, kind: input, shape index: {}]   ;;  %s16628_s10 = inlined_call_operand.vmem [shape: f32[1,16], index: 10, kind: input, shape index: {}]   ;;  %s16629_s11 = inlined_call_operand.vmem [shape: f32[1,16], index: 11, kind: input, shape index: {}]   ;;  %s16630_s12 = inlined_call_operand.hbm [shape: f32[48,48], index: 12, kind: input, shape index: {}]   ;;  %s16631_s13 = inlined_call_operand.hbm [shape: f32[4,24,48], index: 13, kind: input, shape index: {}]   ;;  %s16632_s14 = inlined_call_operand.hbm [shape: f32[4,16,2], index: 14, kind: input, shape index: {}]   ;;  %s16633_s15 = inlined_call_operand.hbm [shape: f32[8,16,8], index: 15, kind: input, shape index: {}]   ;;  %s16634_s16 = inlined_call_operand.hbm [shape: f32[8,16,8], index: 16, kind: input, shape index: {}]   ;;  %s16635_s17 = inlined_call_operand.vmem [shape: f32[8,16,8], index: 17, kind: input, shape index: {}]   ;;  %s16636_s18 = inlined_call_operand.hbm [shape: f32[8,8,16], index: 18, kind: input, shape index: {}]   ;;  %s16637_s19 = inlined_call_operand.vmem [shape: f32[2,1,16], index: 19, kind: input, shape index: {}]   ;;  %s16638_s20 = inlined_call_operand.vmem [shape: f32[2,1,16], index: 20, kind: input, shape index: {}, may-alias: {20,26}]   ;;  %s16639_s21 = inlined_call_operand.vmem [shape: f32[2,1,16], index: 21, kind: input, shape index: {}, may-alias: {21,27}]   ;;  %s16640_s22 = inlined_call_operand.vmem [shape: f32[2,16,32], index: 22, kind: input, shape index: {}]   ;;  %s16641_s23 = inlined_call_operand.vmem [shape: f32[2,1,32], index: 23, kind: input, shape index: {}]   ;;  %s16642_s24 = inlined_call_operand.hbm [shape: f32[2,32,16], index: 24, kind: input, shape index: {}]   ;;  %s16643_s25 = inlined_call_operand.vmem [shape: f32[2,1,16], index: 25, kind: input, shape index: {}]   ;;  %s16644_s26 = inlined_call_operand.vmem [shape: f32[2,1,16], index: 26, kind: input, shape index: {}, may-alias: {20,26}]   ;;  %s16645_s27 = inlined_call_operand.vmem [shape: f32[2,1,16], index: 27, kind: input, shape index: {}, may-alias: {21,27}]   ;;  %s16646_s28 = inlined_call_operand.vmem [shape: f32[2,24,2], index: 28, kind: output, shape index: {}]  }
   0x1   :  { %16655 = sst [smem:[#allocation34_spill]] %s16618_s0 }
   0x2   :  { %16656 = sst [smem:[#allocation35_spill]] %s16619_s1 }
   0x3   :  { %16657 = sst [smem:[#allocation36_spill]] %s16620_s2 }
   0x4   :  { %16658 = sst [smem:[#allocation37_spill]] %s16621_s3 }
   0x5   :  { %16659 = sst [smem:[#allocation38_spill]] %s16622_s4 }
   0x6   :  { %16660 = sst [smem:[#allocation39_spill]] %s16623_s5 }
   0x7   :  { %16661 = sst [smem:[#allocation40_spill]] %s16624_s6 }
   0x8   :  { %16662 = sst [smem:[#allocation41_spill]] %s16625_s7 }
   0x9   :  { %16663 = sst [smem:[#allocation42_spill]] %s16626_s8 }
   0xa   :  { %16664 = sst [smem:[#allocation43_spill]] %s16627_s9 }
   0xb   :  { %16665 = sst [smem:[#allocation44_spill]] %s16628_s10 }
   0xc   :  { %16666 = sst [smem:[#allocation45_spill]] %s16629_s11 }
   0xd   :  { %16667 = sst [smem:[#allocation46_spill]] %s16630_s12 }
   0xe   :  { %16668 = sst [smem:[#allocation47_spill]] %s16631_s13 }
   0xf   :  { %16669 = sst [smem:[#allocation48_spill]] %s16633_s15 }
  0x10   :  { %33 = vsyncpa [#allocation3], 0 }
  0x11   :  { %34 = vsyncpa [#allocation5], 0 }
  0x12   :  { %35 = vsyncpa [#allocation8], 0 }
  0x13   :  { %36 = vsyncpa [#allocation11], 0 }
  0x14   :  { %37 = vsyncpa [#allocation14], 0 }
  0x15   :  { %38 = vsyncpa [#allocation17], 0 }
  0x16   :  { %39 = vsyncpa [#allocation20], 0 }
  0x17   :  { %40 = vsyncpa [#allocation23], 0  ;;  %s14616_s8 = smov 0  }
  0x18 LB: > { %16670 = sst [smem:[#allocation33_spill]] %s14449_s8  ;;  %s14451_s5 = smov [#allocation4]   ;;  %s14449_s8 = sphi %s14616_s8, %s46_s8  }
  0x19   : > { %s696_s9 = sshll.u32 %s14451_s5, 4  ;;  %s14622_s30 = sadd.s32 4294967295, %s14449_s8   ;;  %s697_s9 = int_to_ptr.vmem [resolvable:$true] %s696_s9 }
  0x1a   : > { %p11256_p0 = scmp.ge.s32.totalorder %s14449_s8, 1  ;;  %p670_p1 = scmp.lt.s32.totalorder %s14449_s8, 3 }
  0x1b   : > { %p16653_p2 = scmp.eq.s32.totalorder %s14622_s30, 0  ;;  %s14452_s6 = smov [#allocation7]  }
  0x1c   : > { %p14627_p3 = pnand %p11256_p0, %p670_p1  ;;  %s717_s10 = sshll.u32 %s14452_s6, 4  ;;  %s14633_s10 = int_to_ptr.vmem [resolvable:$true] %s717_s10 }
  0x1d   : > { %s14453_s11 = smov [#allocation10]   ;;  %s14454_s2 = smov [#allocation13]  }
  0x1e   : > { %s16671_s3 = scalar_select %p14627_p3, 1, 0 }
  0x1f   : > { %p13579_p4 = pneg %p14627_p3  ;;  %s741_s29 = sshll.u32 %s14453_s11, 4  ;;  %s14641_s29 = int_to_ptr.vmem [resolvable:$true] %s741_s29 }
  0x20   : > { %s14643_s7 = sshll.u32 %s14454_s2, 4  ;;  %s14032_s1 = scalar_lea.vmem %s697_s9, 128  ;;  %s770_s7 = int_to_ptr.vmem [resolvable:$true] %s14643_s7 }
  0x21   : > { %p14637_p5 = pnand %p16653_p2, %p13579_p4  ;;  %p14033_p7 = scmp.ne.s32.totalorder %s697_s9, %s14032_s1 }
  0x22   : > { %p14040_p10 = scmp.lt.s32.totalorder %s697_s9, %s697_s9  ;;  %p14041_p11 = scmp.lt.s32.totalorder %s14032_s1, %s14032_s1 }
  0x23   : > { %p14647_p6 = pneg %p14637_p5 }
  0x24   : > { %p14042_p12 = por %p14041_p11, %p14040_p10 }
  0x25   : > { %p14035_p8 = pnand %p14033_p7, %p14647_p6 }
  0x27   : > { %p14036_p9 = pneg %p14035_p8 }
  0x29   : > { %p14043_p13 = pnand %p14042_p12, %p14036_p9 }
  0x2b   : > { %14046 = shalt.err (!%p14043_p13)
}
  0x2c   : > { %s16674_s6 = sld [smem:[#allocation36_spill]]  ;;  %s14058_s11 = scalar_lea.vmem %s14633_s10, 256 }
  0x2d   : > { %p14059_p0 = scmp.ne.s32.totalorder %s14633_s10, %s14058_s11  ;;  %p14066_p7 = scmp.lt.s32.totalorder %s14633_s10, %s14633_s10 }
  0x2e   : > { %p14067_p8 = scmp.lt.s32.totalorder %s14058_s11, %s14058_s11 }
  0x2f   : > { %p14061_p1 = pnand %p14059_p0, %p14647_p6 }
  0x30   : > { %p14068_p9 = por %p14067_p8, %p14066_p7 }
  0x31   : > { %p14062_p4 = pneg %p14061_p1 }
  0x32   : > { %13585 = dma.hbm_to_vmem [thread:$0]  (!%p14637_p5), %s16674_s6, 128, %s697_s9, [#allocation5]  }
  0x33   : > { %p14069_p10 = pnand %p14068_p9, %p14062_p4 }
  0x35   : > { %14072 = shalt.err (!%p14069_p10)
}
  0x36   : > { %s16649_s2 = smov 128   ;;  %s16651_s1 = smov 8  }
  0x37   : > { %s16675_s5 = sld [smem:[#allocation38_spill]]  ;;  %s14084_s6 = scalar_lea.vmem %s14641_s29, 768 }
  0x38   : > { %p14085_p11 = scmp.ne.s32.totalorder %s14641_s29, %s14084_s6  ;;  %p14092_p0 = scmp.lt.s32.totalorder %s14641_s29, %s14641_s29 }
  0x39   : > { %p14093_p1 = scmp.lt.s32.totalorder %s14084_s6, %s14084_s6 }
  0x3a   : > { %p14087_p12 = pnand %p14085_p11, %p14647_p6 }
  0x3b   : > { %p14094_p4 = por %p14093_p1, %p14092_p0 }
  0x3c   : > { %p14088_p13 = pneg %p14087_p12 }
  0x3d   : > { %13591 = dma.hbm_to_vmem [thread:$0]  (!%p14637_p5), %s16675_s5, 256, %s14633_s10, [#allocation8], %s16649_s2, %s16649_s2, %s16651_s1  }
  0x3e   : > { %p14095_p7 = pnand %p14094_p4, %p14088_p13 }
  0x40   : > { %14098 = shalt.err (!%p14095_p7)
}
  0x41   : > { %s16676_s10 = sld [smem:[#allocation40_spill]]  ;;  %s14110_s4 = scalar_lea.vmem %s770_s7, 16 }
  0x42   : > { %p14111_p8 = scmp.ne.s32.totalorder %s770_s7, %s14110_s4  ;;  %s14117_s5 = scalar_lea.vmem %s770_s7, 32 }
  0x43   : > { %p14118_p11 = scmp.lt.s32.totalorder %s770_s7, %s770_s7  ;;  %p14119_p12 = scmp.lt.s32.totalorder %s14117_s5, %s14110_s4 }
  0x44   : > { %p14113_p9 = pnand %p14111_p8, %p14647_p6 }
  0x45   : > { %p14120_p13 = por %p14119_p12, %p14118_p11 }
  0x46   : > { %p14114_p10 = pneg %p14113_p9 }
  0x47   : > { %13597 = dma.hbm_to_vmem [thread:$0]  (!%p14637_p5), %s16676_s10, 768, %s14641_s29, [#allocation11], %s16649_s2, %s16649_s2, %s16651_s1  }
  0x48   : > { %p14121_p0 = pnand %p14120_p13, %p14114_p10 }
  0x4a   : > { %14124 = shalt.err (!%p14121_p0)
}
  0x4b   : > { %s16677_s11 = sld [smem:[#allocation43_spill]]  ;;  %s14457_s29 = smov [#allocation16]  }
  0x4c   : > { %s798_s9 = sshll.u32 %s14457_s29, 4  ;;  %s14458_s10 = smov [#allocation19]   ;;  %s799_s9 = int_to_ptr.vmem [resolvable:$true] %s798_s9 }
  0x4d   : > { %s824_s2 = sshll.u32 %s14458_s10, 4  ;;  %s14136_s1 = scalar_lea.vmem %s799_s9, 1536  ;;  %s825_s2 = int_to_ptr.vmem [resolvable:$true] %s824_s2 }
  0x4e   : > { %p14137_p1 = scmp.ne.s32.totalorder %s799_s9, %s14136_s1  ;;  %p14144_p8 = scmp.lt.s32.totalorder %s799_s9, %s799_s9 }
  0x4f   : > { %p14145_p9 = scmp.lt.s32.totalorder %s14136_s1, %s14136_s1 }
  0x50   : > { %p14139_p4 = pnand %p14137_p1, %p14647_p6 }
  0x51   : > { %13603 = dma.hbm_to_vmem [thread:$0]  (!%p14637_p5), %s16677_s11, 16, %s770_s7, [#allocation14]  }
  0x52   : > { %p14140_p7 = pneg %p14139_p4  ;;  %p14146_p10 = por %p14145_p9, %p14144_p8 }
  0x54   : > { %p14147_p11 = pnand %p14146_p10, %p14140_p7 }
  0x56   : > { %14150 = shalt.err (!%p14147_p11)
}
  0x57   : > { %s16678_s8 = smov 8   ;;  %s16679_s4 = smov 128  }
  0x58   : > { %s16680_s13 = sld [smem:[#allocation47_spill]]  ;;  %s14162_s6 = scalar_lea.vmem %s825_s2, 2048 }
  0x59   : > { %p14163_p12 = scmp.ne.s32.totalorder %s825_s2, %s14162_s6  ;;  %p14170_p1 = scmp.lt.s32.totalorder %s825_s2, %s825_s2 }
  0x5a   : > { %p14171_p4 = scmp.lt.s32.totalorder %s14162_s6, %s14162_s6 }
  0x5b   : > { %p14165_p13 = pnand %p14163_p12, %p14647_p6 }
  0x5c   : > { %p14172_p7 = por %p14171_p4, %p14170_p1 }
  0x5d   : > { %p14166_p0 = pneg %p14165_p13 }
  0x5e   : > { %13609 = dma.hbm_to_vmem [thread:$0]  (!%p14637_p5), %s16680_s13, 1536, %s799_s9, [#allocation17], %s16679_s4, %s16679_s4, %s16678_s8  }
  0x5f   : > { %p14173_p8 = pnand %p14172_p7, %p14166_p0 }
  0x61   : > { %14176 = shalt.err (!%p14173_p8)
}
  0x62   : > { %s16681_s15 = sld [smem:[#allocation48_spill]]  ;;  %s14459_s29 = smov [#allocation22]  }
  0x63   : > { %s853_s9 = sshll.u32 %s14459_s29, 4  ;;  %s14460_s10 = smov [#allocation2]   ;;  %s854_s9 = int_to_ptr.vmem [resolvable:$true] %s853_s9 }
  0x64   : > { %s682_s7 = sshll.u32 %s14460_s10, 4  ;;  %s14188_s5 = scalar_lea.vmem %s854_s9, 1024  ;;  %s683_s7 = int_to_ptr.vmem [resolvable:$true] %s682_s7 }
  0x65   : > { %p14189_p9 = scmp.ne.s32.totalorder %s854_s9, %s14188_s5  ;;  %p14196_p12 = scmp.lt.s32.totalorder %s854_s9, %s854_s9 }
  0x66   : > { %p14197_p13 = scmp.lt.s32.totalorder %s14188_s5, %s14188_s5 }
  0x67   : > { %p14191_p10 = pnand %p14189_p9, %p14647_p6 }
  0x68   : > { %13615 = dma.hbm_to_vmem [thread:$0]  (!%p14637_p5), %s16681_s15, 2048, %s825_s2, [#allocation20], %s16679_s4, %s16679_s4, %s16678_s8  }
  0x69   : > { %p14192_p11 = pneg %p14191_p10  ;;  %p14198_p0 = por %p14197_p13, %p14196_p12 }
  0x6b   : > { %p14199_p1 = pnand %p14198_p0, %p14192_p11 }
  0x6d   : > { %14202 = shalt.err (!%p14199_p1)
}
  0x6e   : > { %13621 = dma.hbm_to_vmem [thread:$0]  (!%p14637_p5), %s16636_s18, 1024, %s854_s9, [#allocation23], %s16679_s4, %s16679_s4, %s16678_s8  }
  0x6f   : > { %s14214_s1 = scalar_lea.vmem %s683_s7, 384  ;;  %p14222_p9 = scmp.lt.s32.totalorder %s683_s7, %s683_s7 }
  0x70   : > { %p14215_p4 = scmp.ne.s32.totalorder %s683_s7, %s14214_s1  ;;  %p14223_p10 = scmp.lt.s32.totalorder %s14214_s1, %s14214_s1 }
  0x72   : > { %p14217_p7 = pnand %p14215_p4, %p14647_p6  ;;  %p14224_p11 = por %p14223_p10, %p14222_p9 }
  0x74   : > { %p14218_p8 = pneg %p14217_p7 }
  0x76   : > { %p14225_p12 = pnand %p14224_p11, %p14218_p8 }
  0x78   : > { %14228 = shalt.err (!%p14225_p12)
}
  0x79   : > { %s16682_s10 = sld [smem:[#allocation35_spill]]  ;;  %s14461_s9 = smov [#allocation6]  }
  0x7a   : > { %s707_s5 = sshll.u32 %s14461_s9, 4  ;;  %s14462_s2 = smov [#allocation9]   ;;  %s708_s5 = int_to_ptr.vmem [resolvable:$true] %s707_s5 }
  0x7b   : > { %s731_s6 = sshll.u32 %s14462_s2, 4  ;;  %s14240_s13 = scalar_lea.vmem %s708_s5, 16  ;;  %s732_s6 = int_to_ptr.vmem [resolvable:$true] %s731_s6 }
  0x7c   : > { %p14241_p13 = scmp.ne.s32.totalorder %s708_s5, %s14240_s13  ;;  %s14247_s1 = scalar_lea.vmem %s708_s5, 32 }
  0x7d   : > { %p14248_p4 = scmp.lt.s32.totalorder %s708_s5, %s708_s5  ;;  %p14249_p7 = scmp.lt.s32.totalorder %s14247_s1, %s14240_s13 }
  0x7e   : > { %p14243_p0 = pnand %p14241_p13, %p14647_p6 }
  0x7f   : > { %13582 = dma.hbm_to_vmem [thread:$0]  (!%p14637_p5), %s16682_s10, 384, %s683_s7, [#allocation3], %s16679_s4, %s16679_s4, %s16678_s8  }
  0x80   : > { %p14244_p1 = pneg %p14243_p0  ;;  %p14250_p8 = por %p14249_p7, %p14248_p4 }
  0x82   : > { %p14251_p9 = pnand %p14250_p8, %p14244_p1 }
  0x84   : > { %14254 = shalt.err (!%p14251_p9)
}
  0x85   : > { %s16683_s29 = sld [smem:[#allocation37_spill]]  ;;  %s14266_s10 = scalar_lea.vmem %s732_s6, 16 }
  0x86   : > { %p14267_p10 = scmp.ne.s32.totalorder %s732_s6, %s14266_s10  ;;  %s14273_s9 = scalar_lea.vmem %s732_s6, 32 }
  0x87   : > { %p14274_p13 = scmp.lt.s32.totalorder %s732_s6, %s732_s6  ;;  %p14275_p0 = scmp.lt.s32.totalorder %s14273_s9, %s14266_s10 }
  0x88   : > { %p14269_p11 = pnand %p14267_p10, %p14647_p6 }
  0x89   : > { %p14276_p2 = por %p14275_p0, %p14274_p13 }
  0x8a   : > { %p14270_p12 = pneg %p14269_p11 }
  0x8b   : > { %13588 = dma.hbm_to_vmem [thread:$0]  (!%p14637_p5), %s16683_s29, 16, %s708_s5, [#allocation5]  }
  0x8c   : > { %p14277_p4 = pnand %p14276_p2, %p14270_p12 }
  0x8e   : > { %14280 = shalt.err (!%p14277_p4)
}
  0x8f   : > { %s16684_s1 = sld [smem:[#allocation39_spill]]  ;;  %s14463_s5 = smov [#allocation12]  }
  0x90   : > { %s758_s11 = sshll.u32 %s14463_s5, 4  ;;  %s14464_s7 = smov [#allocation15]   ;;  %s759_s11 = int_to_ptr.vmem [resolvable:$true] %s758_s11 }
  0x91   : > { %s785_s29 = sshll.u32 %s14464_s7, 4  ;;  %s14292_s15 = scalar_lea.vmem %s759_s11, 128  ;;  %s786_s29 = int_to_ptr.vmem [resolvable:$true] %s785_s29 }
  0x92   : > { %p14293_p1 = scmp.ne.s32.totalorder %s759_s11, %s14292_s15  ;;  %p14300_p9 = scmp.lt.s32.totalorder %s759_s11, %s759_s11 }
  0x93   : > { %p14301_p2 = scmp.lt.s32.totalorder %s14292_s15, %s14292_s15 }
  0x94   : > { %p14295_p7 = pnand %p14293_p1, %p14647_p6 }
  0x95   : > { %13594 = dma.hbm_to_vmem [thread:$0]  (!%p14637_p5), %s16684_s1, 16, %s732_s6, [#allocation8]  }
  0x96   : > { %p14296_p8 = pneg %p14295_p7  ;;  %p14302_p10 = por %p14301_p2, %p14300_p9 }
  0x98   : > { %p14303_p11 = pnand %p14302_p10, %p14296_p8 }
  0x9a   : > { %14306 = shalt.err (!%p14303_p11)
}
  0x9b   : > { %s16685_s6 = sld [smem:[#allocation42_spill]]  ;;  %s14318_s13 = scalar_lea.vmem %s786_s29, 768 }
  0x9c   : > { %p14319_p12 = scmp.ne.s32.totalorder %s786_s29, %s14318_s13  ;;  %p14326_p4 = scmp.lt.s32.totalorder %s786_s29, %s786_s29 }
  0x9d   : > { %p14327_p1 = scmp.lt.s32.totalorder %s14318_s13, %s14318_s13 }
  0x9e   : > { %p14321_p13 = pnand %p14319_p12, %p14647_p6 }
  0x9f   : > { %p14328_p7 = por %p14327_p1, %p14326_p4 }
  0xa0   : > { %p14322_p0 = pneg %p14321_p13 }
  0xa1   : > { %13600 = dma.hbm_to_vmem [thread:$0]  (!%p14637_p5), %s16685_s6, 128, %s759_s11, [#allocation11]  }
  0xa2   : > { %p14329_p3 = pnand %p14328_p7, %p14322_p0 }
  0xa4   : > { %14332 = shalt.err (!%p14329_p3)
}
  0xa5   : > { %s16686_s1 = sld [smem:[#allocation46_spill]]  ;;  %s14465_s5 = smov [#allocation18]  }
  0xa6   : > { %s811_s11 = sshll.u32 %s14465_s5, 4  ;;  %s14466_s7 = smov [#allocation21]   ;;  %s812_s11 = int_to_ptr.vmem [resolvable:$true] %s811_s11 }
  0xa7   : > { %s837_s10 = sshll.u32 %s14466_s7, 4  ;;  %s14344_s9 = scalar_lea.vmem %s812_s11, 1024  ;;  %s838_s10 = int_to_ptr.vmem [resolvable:$true] %s837_s10 }
  0xa8   : > { %p14345_p8 = scmp.ne.s32.totalorder %s812_s11, %s14344_s9  ;;  %p14352_p2 = scmp.lt.s32.totalorder %s812_s11, %s812_s11 }
  0xa9   : > { %p14353_p10 = scmp.lt.s32.totalorder %s14344_s9, %s14344_s9 }
  0xaa   : > { %p14347_p9 = pnand %p14345_p8, %p14647_p6 }
  0xab   : > { %13606 = dma.hbm_to_vmem [thread:$0]  (!%p14637_p5), %s16686_s1, 768, %s786_s29, [#allocation14], %s16679_s4, %s16679_s4, %s16678_s8  }
  0xac   : > { %p14348_p3 = pneg %p14347_p9  ;;  %p14354_p11 = por %p14353_p10, %p14352_p2 }
  0xae   : > { %p14355_p12 = pnand %p14354_p11, %p14348_p3 }
  0xb0   : > { %14358 = shalt.err (!%p14355_p12)
}
  0xb1   : > { %13612 = dma.hbm_to_vmem [thread:$0]  (!%p14637_p5), %s16632_s14, 1024, %s812_s11, [#allocation17], %s16679_s4, %s16679_s4, %s16678_s8  }
  0xb2   : > { %s14370_s13 = scalar_lea.vmem %s838_s10, 2048  ;;  %p14378_p1 = scmp.lt.s32.totalorder %s838_s10, %s838_s10 }
  0xb3   : > { %p14371_p13 = scmp.ne.s32.totalorder %s838_s10, %s14370_s13  ;;  %p14379_p7 = scmp.lt.s32.totalorder %s14370_s13, %s14370_s13 }
  0xb5   : > { %p14373_p0 = pnand %p14371_p13, %p14647_p6  ;;  %p14380_p8 = por %p14379_p7, %p14378_p1 }
  0xb7   : > { %p14374_p4 = pneg %p14373_p0 }
  0xb9   : > { %p14381_p9 = pnand %p14380_p8, %p14374_p4 }
  0xbb   : > { %14384 = shalt.err (!%p14381_p9)
}
  0xbc   : > { %13618 = dma.hbm_to_vmem [thread:$0]  (!%p14637_p5), %s16634_s16, 2048, %s838_s10, [#allocation20], %s16679_s4, %s16679_s4, %s16678_s8  }
  0xbd   : > { %s14467_s1 = smov [#allocation24]  }
  0xbe   : > { %s881_s5 = sshll.u32 %s14467_s1, 4  ;;  %s882_s5 = int_to_ptr.vmem [resolvable:$true] %s881_s5 }
  0xbf   : > { %s14396_s11 = scalar_lea.vmem %s882_s5, 1024  ;;  %p14404_p11 = scmp.lt.s32.totalorder %s882_s5, %s882_s5 }
  0xc0   : > { %p14397_p3 = scmp.ne.s32.totalorder %s882_s5, %s14396_s11  ;;  %p14405_p12 = scmp.lt.s32.totalorder %s14396_s11, %s14396_s11 }
  0xc2   : > { %p14399_p2 = pnand %p14397_p3, %p14647_p6  ;;  %p14406_p13 = por %p14405_p12, %p14404_p11 }
  0xc4   : > { %p14400_p10 = pneg %p14399_p2 }
  0xc6   : > { %p14407_p0 = pnand %p14406_p13, %p14400_p10 }
  0xc8   : > { %14410 = shalt.err (!%p14407_p0)
}
  0xc9   : > { %13624 = dma.hbm_to_vmem [thread:$0]  (!%p14637_p5), %s16642_s24, 1024, %s882_s5, [#allocation23], %s16679_s4, %s16679_s4, %s16678_s8  }
  0xca   : > { %p16687_p4 = scmp.ne.s32.totalorder %s16671_s3, 0 }
  0xcb   : > { %p16688_p6 = scmp.eq.s32.totalorder (!%p16687_p4), %s14622_s30, 0 }
  0xcc   : > { %914 = sbr.rel (%p16687_p4) target bundleno = 13040 (0x32f0), region = 132 }
  0xd1   : > { %14416 = dma.done.wait (%p16688_p6), [#allocation3], 384   ;;  %p16689_p1 = pmov %p16688_p6 }
  0xd3   : > { %14418 = vsyncadd (%p16689_p1), [#allocation3], 4294966912  ;;  %p16690_p7 = pmov %p16689_p1 }
  0xd4   : > { %p16691_p8 = pmov %p16689_p1 }
  0xd5   : > { %14420 = dma.done.wait (%p16690_p7), [#allocation5], 144  }
  0xd6   : > { %14422 = vsyncadd (%p16691_p8), [#allocation5], 4294967152  ;;  %p16692_p9 = pmov %p16689_p1 }
  0xd7   : > { %p16693_p5 = pmov %p16689_p1 }
  0xd8   : > { %14424 = dma.done.wait (%p16692_p9), [#allocation8], 272  }
  0xd9   : > { %14426 = vsyncadd (%p16693_p5), [#allocation8], 4294967024  ;;  %p16694_p3 = pmov %p16689_p1 }
  0xda   : > { %p16695_p2 = pmov %p16689_p1 }
  0xdb   : > { %14428 = dma.done.wait (%p16694_p3), [#allocation11], 896  }
  0xdc   : > { %14430 = vsyncadd (%p16695_p2), [#allocation11], 4294966400  ;;  %p16696_p10 = pmov %p16689_p1 }
  0xdd   : > { %p16697_p11 = pmov %p16689_p1 }
  0xde   : > { %14432 = dma.done.wait (%p16696_p10), [#allocation14], 784  }
  0xdf   : > { %14434 = vsyncadd (%p16697_p11), [#allocation14], 4294966512  ;;  %p16698_p12 = pmov %p16689_p1 }
  0xe0   : > { %p16699_p13 = pmov %p16689_p1 }
  0xe1   : > { %14436 = dma.done.wait (%p16698_p12), [#allocation17], 2560  }
  0xe2   : > { %14438 = vsyncadd (%p16699_p13), [#allocation17], 4294964736  ;;  %p16700_p0 = pmov %p16689_p1 }
  0xe4   : > { %14440 = dma.done.wait (%p16700_p0), [#allocation20], 4096   ;;  %p16701_p4 = pmov %p16700_p0 }
  0xe5   : > { %p16702_p6 = pmov %p16700_p0 }
  0xe6   : > { %14442 = vsyncadd (%p16701_p4), [#allocation20], 4294963200 }
  0xe7   : > { %14444 = dma.done.wait (%p16702_p6), [#allocation23], 2048   ;;  %p16703_p1 = pmov %p16700_p0 }
  0xe8   : > { %p1044_p7 = scmp.lt.s32.totalorder %s14622_s30, 1  ;;  %v14468_v0 = vmov 0.0   ;;  %vm14469_vm0 = vmmov 0   ;;  %vm1075_vm1 = vcmask 1046528   ;;  %s16704_s8 = sld [smem:[#allocation34_spill]]  ;;  %vm1065_vm2 = vcmask 56320  }
  0xe9   : > { %14446 = vsyncadd (%p16703_p1), [#allocation23], 4294965248  ;;  %12411 = vmatprep.subr.mxu0 %v14468_v0  ;;  %12413 = vmatprep.mubr.msk.f32.mxu0 %vm14469_vm0, %v14468_v0  ;;  %v1057_v1 = vld [vmem:[#allocation4] sm:$0x7f]  ;;  %v1193_v5 = vld [vmem:[#allocation7 + $0x8] sm:$0xff]  ;;  %vm1201_vm3 = vcmask 130048   ;;  %v1165_v35 = vlaneseq }
  0xea   : > { %13516 = vmatprep.subr.mxu1 %v14468_v0  ;;  %s16710_s30 = smov (!%p1044_p7, %s14622_s30), 1  ;;  %12416 = vmatprep.mubr.msk.f32.mxu1 %vm14469_vm0, %v14468_v0  ;;  %v1192_v6 = vld [vmem:[#allocation7] sm:$0xff]  ;;  %v11291_v7 = vld [vmem:[#allocation6] ss:$0 sm:$0xff]  ;;  %v1161_v21 = vld [vmem:[#allocation2 + $0x10] sm:$0xff]  ;;  %vm1300_vm4 = vcmask 64512  }
  0xeb   : > { %s13518_s3 = smul.u32 24, %s16710_s30  ;;  %12412 = vmatpush3.msk.msra.mxu0 %vm1075_vm1, %v1057_v1  ;;  %13517 = vmatpush3.msk.msra.mxu1 %vm1075_vm1, %v1057_v1  ;;  %v1159_v9 = vld [vmem:[#allocation2] sm:$0xff]  ;;  %v1160_v14 = vld [vmem:[#allocation2 + $0x8] sm:$0xff]  ;;  %v1299_v24 = vld [vmem:[#allocation10] sm:$0xff]  ;;  %v14889_v36 = vshrl.u32 %v1165_v35, 7  ;;  %v14892_v38 = vand.u32 127, %v1165_v35 }
  0xec   : > { %12422 = vmatprep.subr.mxu1 %v14468_v0  ;;  %12435 = vmatprep.subr.mxu0 %v14468_v0  ;;  %v1399_v17 = vld [vmem:[#allocation10 + $0x8] sm:$0xff]  ;;  %v11302_v25 = vld [vmem:[#allocation9] ss:$0 sm:$0xff]  ;;  %vm1480_vm7 = vcmask 195584   ;;  %v14914_v59 = vld [vmem:[#allocation12] sm:$0xff]  ;;  %s16705_s6 = sld [smem:[#allocation41_spill]] }
  0xed   : > { %v1291_v37 = vmul.u32 2, %v14889_v36  ;;  %v14907_v42 = vadd.s32 8, %v14889_v36  ;;  %vm1174_vm10 = vcmp.eq.s32.totalorder %v14889_v36, %v14892_v38  ;;  %v2006_v35 = vld [vmem:[#allocation10 + $0x10] sm:$0xff]  ;;  %s16706_s0 = sld [smem:[#allocation44_spill]] }
  0xee   : > { %s1048_s4 = scalar_lea.vmem %s16704_s8, %s13518_s3  ;;  %s1053_s8 = scalar_lea.vmem %s16646_s28, %s13518_s3 }
  0xef   : > { %v1054_v2 = vld [vmem:[%s1048_s4] sm:$0xff]  ;;  %v1055_v3 = vld [vmem:[%s1048_s4 + $0x8] sm:$0xff]  ;;  %v1056_v4 = vld [vmem:[%s1048_s4 + $0x10] sm:$0xff]  ;;  %v1390_v39 = vadd.s32 1, %v1291_v37  ;;  %vm1293_vm6 = vcmp.eq.s32.totalorder %v14892_v38, %v1291_v37  ;;  %v1292_v45 = vmul.u32 2, %v14907_v42  ;;  %vm1175_vm13 = vcmp.eq.s32.totalorder %v14907_v42, %v14892_v38  ;;  %s16707_s4 = sld [smem:[#allocation45_spill]] }
  0xf0   : > { %12414 = vmatmul.mubr.msk.f32.vlgmr.msra.gmra.mxu0 %vm1065_vm2, %v1054_v2  ;;  %12417 = vmatmul.mubr.msk.f32.vlgmr.msra.gmra.mxu1 %vm1065_vm2, %v1055_v3  ;;  %v14900_v41 = vsel %vm1293_vm6, 1.0, %v14468_v0 }
  0xf1   : > { %12419 = vmatprep.mubr.msk.f32.mxu1 %vm14469_vm0, %v14468_v0  ;;  %12437 = vmatprep.mubr.msk.f32.mxu0 %vm14469_vm0, %v14468_v0  ;;  %vm1392_vm5 = vcmp.eq.s32.totalorder %v14892_v38, %v1390_v39  ;;  %v1391_v50 = vadd.s32 1, %v1292_v45  ;;  %vm1294_vm9 = vcmp.eq.s32.totalorder %v14892_v38, %v1292_v45 }
  0xf2   : > { %12423 = vmatpush3.msra.mxu1 %v1193_v5  ;;  %12436 = vmatpush3.msra.mxu0 %v1299_v24  ;;  %v14897_v40 = vsel %vm1392_vm5, 1.0, %v14468_v0  ;;  %v11307_v58 = vsel %vm1294_vm9, 1.0, %v14468_v0  ;;  %v11320_v62 = vld [vmem:[%s16705_s6] ss:$0 sm:$0xff]  ;;  %v14944_v24 = vadd.s32 32, %v14889_v36  ;;  %vm1793_vm5 = vcmask 1043456  }
  0xf3   : > { %12424 = vmatprep.subr.mxu1 %v14468_v0  ;;  %vm1393_vm8 = vcmp.eq.s32.totalorder %v14892_v38, %v1391_v50 }
  0xf4   : > { %12420 = vmatmul.mubr.msk.f32.gmra.mxu1 %vm1065_vm2, %v1056_v4  ;;  %v11312_v57 = vsel %vm1393_vm8, 1.0, %v14468_v0  ;;  %vm1178_vm1 = vcmp.eq.s32.totalorder %v14944_v24, %v14892_v38  ;;  %vm1774_vm8 = vcmask 97280  }
  0xf5   : > { %12426 = vmatprep.mubr.msk.f32.mxu1 %vm14469_vm0, %v14468_v0  ;;  %12425 = vmatpush3.msra.mxu1 %v1192_v6 }
  0xf6   : > { %12446 = vmatprep.subr.mxu1 %v14468_v0 }
 0x1b0   : > { %v1145_v8 = vpop.f32.mrf.mxu0  ;;  %v1150_v10 = vpop.f32.mrf.mxu1 }
 0x1b1   : > { %v1146_v11 = vadd.f32 %v11291_v7, %v1145_v8  ;;  %v1151_v12 = vadd.f32 %v11291_v7, %v1150_v10 }
 0x1b2   : > { %v12415_v13 = vpop.f32.mrf.mxu0  ;;  %v12418_v15 = vpop.f32.mrf.mxu1 }
 0x1b3   : > { %v14857_v16 = vadd.f32 %v1159_v9, %v1146_v11  ;;  %v14859_v19 = vadd.f32 %v1160_v14, %v1151_v12 }
 0x1b4   : > { %v1155_v18 = vpop.f32.mrf.mxu1 }
 0x1b5   : > { %12427 = vmatmul.mubr.msk.f32.vlgmr.msra.gmra.mxu1 %vm1201_vm3, %v14857_v16  ;;  %v1156_v20 = vadd.f32 %v11291_v7, %v1155_v18 }
 0x1b6   : > { %v12421_v22 = vpop.f32.mrf.mxu1  ;;  %12429 = vmatprep.mubr.msk.f32.mxu1 %vm14469_vm0, %v14468_v0  ;;  %12447 = vmatpush3.msra.mxu1 %v1399_v17  ;;  %v1168_v17 = vadd.s32 16, %v14889_v36 }
 0x1b7   : > { %v14865_v23 = vadd.f32 %v1161_v21, %v1156_v20  ;;  %v11296_v20 = vsel %vm1174_vm10, 1.0, %v14468_v0  ;;  %v1169_v22 = vadd.s32 24, %v14889_v36 }
 0x1b8   : > { %vm1176_vm14 = vcmp.eq.s32.totalorder %v1168_v17, %v14892_v38 }
 0x1b9   : > { %12430 = vmatmul.mubr.msk.f32.gmra.mxu1 %vm1201_vm3, %v14859_v19  ;;  %vm1177_vm15 = vcmp.eq.s32.totalorder %v1169_v22, %v14892_v38 }
 0x1ba   : > { %12432 = vmatprep.mubr.msk.f32.mxu1 %vm14469_vm0, %v14468_v0 }
 0x1bd   : > { %12433 = vmatmul.mubr.msk.f32.gmra.mxu1 %vm1201_vm3, %v14865_v23 }
 0x1be   : > { %12448 = vmatprep.mubr.msk.f32.mxu1 %vm14469_vm0, %v14468_v0 }
 0x275   : > { %v1277_v26 = vpop.f32.mrf.mxu1 }
 0x276   : > { %v1278_v27 = vadd.f32 %v11302_v25, %v1277_v26  ;;  %v2083_v26 = vld [vmem:[#allocation10 + $0x18] sm:$0xff] }
 0x277   : > { %v12428_v28 = vpop.f32.mrf.mxu1 }
 0x278   : > { %12438 = vmatmul.mubr.msk.f32.vlgmr.msra.gmra.mxu0 %vm1300_vm4, %v1278_v27  ;;  %12449 = vmatmul.mubr.msk.f32.vlgmr.msra.gmra.mxu1 %vm1300_vm4, %v1278_v27  ;;  %v11298_v27 = vsel %vm1176_vm14, 1.0, %v14468_v0  ;;  %v11300_v28 = vsel %vm1178_vm1, 1.0, %v14468_v0  ;;  %vm2962_vm1 = vcmask 1042432  }
 0x279   : > { %v1282_v29 = vpop.f32.mrf.mxu1  ;;  %12440 = vmatprep.mubr.msk.f32.mxu0 %vm14469_vm0, %v14468_v0  ;;  %12451 = vmatprep.mubr.msk.f32.mxu1 %vm14469_vm0, %v14468_v0 }
 0x27a   : > { %v1283_v30 = vadd.f32 %v11302_v25, %v1282_v29  ;;  %v14975_v29 = vld [vmem:[#allocation13] ss:$0 sm:$0xff] }
 0x27b   : > { %v12431_v31 = vpop.f32.mrf.mxu1 }
 0x27c   : > { %12441 = vmatmul.mubr.msk.f32.gmra.mxu0 %vm1300_vm4, %v1283_v30  ;;  %12452 = vmatmul.mubr.msk.f32.gmra.mxu1 %vm1300_vm4, %v1283_v30 }
 0x27d   : > { %v1287_v32 = vpop.f32.mrf.mxu1  ;;  %12443 = vmatprep.mubr.msk.f32.mxu0 %vm14469_vm0, %v14468_v0  ;;  %12454 = vmatprep.mubr.msk.f32.mxu1 %vm14469_vm0, %v14468_v0 }
 0x27e   : > { %v1288_v33 = vadd.f32 %v11302_v25, %v1287_v32  ;;  %v11297_v25 = vsel %vm1175_vm13, 1.0, %v14468_v0  ;;  %v1755_v32 = vadd.s32 24, %v14892_v38  ;;  %vm2417_vm13 = vcmask 48128  }
 0x27f   : > { %v12434_v34 = vpop.f32.mrf.mxu1 }
 0x280   : > { %12444 = vmatmul.mubr.msk.f32.gmra.mxu0 %vm1300_vm4, %v1288_v33  ;;  %12455 = vmatmul.mubr.msk.f32.gmra.mxu1 %vm1300_vm4, %v1288_v33  ;;  %vm1759_vm6 = vcmp.eq.s32.totalorder %v1169_v22, %v1755_v32 }
 0x281   : > { %12463 = vmatprep.mubr.msk.f32.mxu0 %vm1480_vm7, %v14897_v40  ;;  %12472 = vmatprep.mubr.msk.f32.mxu1 %vm1480_vm7, %v14900_v41  ;;  %v11326_v39 = vsel %vm1759_vm6, 1.0, %v14468_v0  ;;  %vm3618_vm6 = vcmask 392192  }
 0x338   : > { %v1376_v43 = vpop.f32.mrf.mxu0  ;;  %v1466_v44 = vpop.f32.mrf.mxu1 }
 0x33a   : > { %v12439_v46 = vpop.f32.mrf.mxu0  ;;  %v12450_v47 = vpop.f32.mrf.mxu1 }
 0x33c   : > { %v1381_v48 = vpop.f32.mrf.mxu0  ;;  %v1471_v49 = vpop.f32.mrf.mxu1 }
 0x33e   : > { %v12442_v51 = vpop.f32.mrf.mxu0  ;;  %v12453_v52 = vpop.f32.mrf.mxu1 }
 0x340   : > { %v1386_v53 = vpop.f32.mrf.mxu0  ;;  %v1476_v54 = vpop.f32.mrf.mxu1 }
 0x341   : > { %12457 = vmatprep.subr.mxu0 %v1476_v54  ;;  %12466 = vmatprep.subr.mxu1 %v1386_v53 }
 0x342   : > { %v12445_v55 = vpop.f32.mrf.mxu0  ;;  %v12456_v56 = vpop.f32.mrf.mxu1  ;;  %12458 = vmatpush3.msra.mxu0 %v1476_v54  ;;  %12467 = vmatpush3.msra.mxu1 %v1386_v53 }
 0x343   : > { %12459 = vmatprep.subr.mxu0 %v1471_v49  ;;  %12468 = vmatprep.subr.mxu1 %v1381_v48 }
 0x344   : > { %12460 = vmatpush3.msra.mxu0 %v1471_v49  ;;  %12469 = vmatpush3.msra.mxu1 %v1381_v48 }
 0x345   : > { %12461 = vmatprep.subr.mxu0 %v1466_v44  ;;  %12470 = vmatprep.subr.mxu1 %v1376_v43 }
 0x346   : > { %12462 = vmatpush3.msra.mxu0 %v1466_v44  ;;  %12471 = vmatpush3.msra.mxu1 %v1376_v43 }
 0x347   : > { %12464 = vmatmul.mubr.msk.f32.vlgmr.msra.gmra.mxu0 %vm1480_vm7, %v11312_v57  ;;  %12473 = vmatmul.mubr.msk.f32.vlgmr.msra.gmra.mxu1 %vm1480_vm7, %v11307_v58 }
 0x348   : > { %12475 = vmatprep.subr.mxu0 %v14914_v59  ;;  %12484 = vmatprep.mubr.f32.mxu1 %v14468_v0 }
 0x349   : > { %12476 = vmatpush3.msra.mxu0 %v14914_v59 }
 0x34a   : > { %12493 = vmatprep.subr.mxu0 %v14865_v23 }
 0x407   : > { %v12465_v60 = vpop.f32.mrf.mxu0  ;;  %v12474_v61 = vpop.f32.mrf.mxu1 }
 0x408   : > { %v1640_v63 = vadd.f32 %v12474_v61, %v12465_v60 }
 0x409   : > { %v1553_v1 = vpop.f32.mrf.mxu0  ;;  %v1634_v2 = vpop.f32.mrf.mxu1 }
 0x40a   : > { %v1651_v3 = vadd.f32 %v11320_v62, %v1640_v63  ;;  %v1635_v4 = vadd.f32 %v1634_v2, %v1553_v1 }
 0x40c   : > { %v1653_v5 = vmul.f32 0.999995, %v1651_v3  ;;  %v1650_v6 = vadd.f32 %v11320_v62, %v1635_v4  ;;  %v11348_v62 = vld [vmem:[%s16705_s6 + $0x1] ss:$0 sm:$0xff] }
 0x40e   : > { %v1657_v7 = vmin.f32 %v1653_v5, 0.0  ;;  %v1652_v8 = vmul.f32 0.999995, %v1650_v6  ;;  %vm1655_vm12 = vcmp.gt.f32.partialorder %v1653_v5, 0.0 }
 0x410   : > { %v1660_v9 = vmul.f32 1.442695, %v1657_v7  ;;  %v1656_v10 = vmin.f32 %v1652_v8, 0.0  ;;  %vm1654_vm11 = vcmp.gt.f32.partialorder %v1652_v8, 0.0 }
 0x412   : > { %13683 = vpow2.f32 %v1660_v9  ;;  %v1658_v11 = vmul.f32 1.442695, %v1656_v10  ;;  %v2614_v10 = vld [vmem:[#allocation10 + $0x28] sm:$0xff] }
 0x414   : > { %13685 = vpow2.f32 %v1658_v11 }
 0x41f   : > { %v13684_v12 = vpop.eup %13683 }
 0x420   : > { %v11322_v14 = vadd.f32 -1.0, %v13684_v12  ;;  %v2398_v12 = vadd.s32 36, %v14892_v38 }
 0x421   : > { %v13686_v13 = vpop.eup %13685 }
 0x422   : > { %v11321_v15 = vadd.f32 -1.0, %v13686_v13  ;;  %v14933_v21 = vsel %vm1655_vm12, %v1653_v5, %v11322_v14  ;;  %vm2403_vm12 = vcmp.eq.s32.totalorder %v14944_v24, %v2398_v12 }
 0x424   : > { %v14928_v18 = vsel %vm1654_vm11, %v1652_v8, %v11321_v15  ;;  %v2542_v8 = vld [vmem:[#allocation10 + $0x20] sm:$0xff]  ;;  %vm2436_vm11 = vcmask 1045504  }
 0x425   : > { %12477 = vmatprep.mubr.msk.f32.mxu0 %vm1300_vm4, %v14928_v18 }
 0x426   : > { %12478 = vmatmul.mubr.msk.f32.vlgmr.msra.gmra.mxu0 %vm1300_vm4, %v14933_v21 }
 0x427   : > { %12494 = vmatpush3.msra.mxu0 %v14865_v23  ;;  %12499 = vmatprep.mubr.msk.f32.mxu0 %vm1480_vm7, %v11296_v20  ;;  %v14953_v23 = vadd.s32 40, %v14889_v36 }
 0x428   : > { %12495 = vmatprep.subr.mxu0 %v14859_v19 }
 0x429   : > { %12496 = vmatpush3.msra.mxu0 %v14859_v19  ;;  %v11299_v19 = vsel %vm1177_vm15, 1.0, %v14468_v0  ;;  %vm1179_vm2 = vcmp.eq.s32.totalorder %v14953_v23, %v14892_v38  ;;  %vm1761_vm9 = vcmp.eq.s32.totalorder %v14953_v23, %v1755_v32  ;;  %vm2404_vm14 = vcmp.eq.s32.totalorder %v14953_v23, %v2398_v12 }
 0x42a   : > { %12497 = vmatprep.subr.mxu0 %v14857_v16  ;;  %v11328_v45 = vsel %vm1761_vm9, 1.0, %v14468_v0  ;;  %v11352_v22 = vsel %vm2404_vm14, 1.0, %v14468_v0 }
 0x42b   : > { %12498 = vmatpush3.msra.mxu0 %v14857_v16  ;;  %v11301_v16 = vsel %vm1179_vm2, 1.0, %v14468_v0 }
 0x42c   : > { %12500 = vmatmul.mubr.msk.f32.vlgmr.msra.gmra.mxu0 %vm1480_vm7, %v11297_v25  ;;  %12513 = vmatprep.subr.mxu0 %v2083_v26 }
 0x42d   : > { %12502 = vmatprep.mubr.msk.f32.mxu0 %vm1480_vm7, %v11298_v27  ;;  %12514 = vmatpush3.msra.mxu0 %v2083_v26 }
 0x42e   : > { %12525 = vmatprep.subr.mxu0 %v14468_v0 }
 0x430   : > { %12503 = vmatmul.mubr.msk.f32.gmra.mxu0 %vm1480_vm7, %v11299_v19 }
 0x431   : > { %12505 = vmatprep.mubr.msk.f32.mxu0 %vm1480_vm7, %v11300_v28 }
 0x434   : > { %12506 = vmatmul.mubr.msk.f32.gmra.mxu0 %vm1480_vm7, %v11301_v16  ;;  %vm1760_vm7 = vcmp.eq.s32.totalorder %v14944_v24, %v1755_v32 }
 0x435   : > { %12515 = vmatprep.mubr.msk.f32.mxu0 %vm1300_vm4, %v14928_v18  ;;  %v11327_v42 = vsel %vm1760_vm7, 1.0, %v14468_v0 }
 0x438   : > { %12516 = vmatmul.mubr.msk.f32.vlgmr.msra.gmra.mxu0 %vm1300_vm4, %v14933_v21 }
 0x439   : > { %12529 = vmatprep.mubr.msk.f32.mxu0 %vm14469_vm0, %v14468_v0 }
 0x4e6   : > { %v12479_v30 = vpop.f32.mrf.mxu0 }
 0x4e7   : > { %v1752_v31 = vadd.f32 %v12479_v30, %v14975_v29 }
 0x4e8   : > { %v1746_v33 = vpop.f32.mrf.mxu0 }
 0x4e9   : > { %v1747_v34 = vadd.f32 %v14975_v29, %v1746_v33  ;;  %12480 = vmatprep.subr.msk.mxu1 %vm1793_vm5, %v1752_v31 }
 0x4ea   : > { %12481 = vmatpush3.msk.msra.mxu1 %vm1793_vm5, %v1752_v31 }
 0x4eb   : > { %12482 = vmatprep.subr.mxu1 %v1747_v34 }
 0x4ec   : > { %v14982_v36 = vpop.f32.mrf.mxu0  ;;  %12483 = vmatpush3.msra.mxu1 %v1747_v34 }
 0x4ed   : > { %12485 = vmatmul.mubr.f32.vlgmr.msra.gmra.mxu1 %v14468_v0  ;;  %12508 = vmatprep.subr.mxu1 %v2006_v35 }
 0x4ee   : > { %v14986_v37 = vpop.f32.mrf.mxu0  ;;  %12487 = vmatprep.mubr.f32.mxu1 %v14468_v0  ;;  %12509 = vmatpush3.msra.mxu1 %v2006_v35  ;;  %v11363_v35 = vld [vmem:[%s16705_s6 + $0x2] ss:$0 sm:$0xff] }
 0x4ef   : > { %12518 = vmatprep.subr.mxu1 %v14468_v0 }
 0x4f0   : > { %v14993_v43 = vpop.f32.mrf.mxu0 }
 0x4f1   : > { %12488 = vmatmul.mubr.msk.f32.gmra.mxu1 %vm1774_vm8, %v11326_v39 }
 0x4f2   : > { %v14996_v44 = vpop.f32.mrf.mxu0  ;;  %12490 = vmatprep.mubr.msk.f32.mxu1 %vm1774_vm8, %v11327_v42 }
 0x4f4   : > { %v15000_v46 = vpop.f32.mrf.mxu0 }
 0x4f5   : > { %12491 = vmatmul.mubr.msk.f32.gmra.mxu1 %vm1774_vm8, %v11328_v45 }
 0x4f6   : > { %v15003_v47 = vpop.f32.mrf.mxu0  ;;  %12510 = vmatprep.mubr.msk.f32.mxu1 %vm1300_vm4, %v14928_v18  ;;  %v11351_v18 = vsel %vm2403_vm12, 1.0, %v14468_v0 }
 0x4f8   : > { %v12517_v48 = vpop.f32.mrf.mxu0 }
 0x4f9   : > { %12511 = vmatmul.mubr.msk.f32.vlgmr.msra.gmra.mxu1 %vm1300_vm4, %v14933_v21 }
 0x4fa   : > { %v2150_v49 = vpop.f32.mrf.mxu0  ;;  %12519 = vmatpush3.msk.msra.mxu1 %vm1793_vm5, %v12517_v48  ;;  %12522 = vmatprep.mubr.msk.f32.mxu1 %vm14469_vm0, %v14468_v0 }
 0x4fb   : > { %12520 = vmatprep.subr.mxu1 %v14468_v0 }
 0x4fc   : > { %12521 = vmatpush3.msra.mxu1 %v2150_v49 }
 0x4fd   : > { %12523 = vmatmul.mubr.msk.f32.vlgmr.msra.gmra.mxu1 %vm1774_vm8, %v14897_v40  ;;  %12532 = vmatprep.subr.mxu1 %v14468_v0 }
 0x4fe   : > { %12533 = vmatpush3.msra.mxu1 %v14914_v59  ;;  %12534 = vmatprep.mubr.msk.f32.mxu1 %vm14469_vm0, %v14468_v0 }
 0x4ff   : > { %12548 = vmatprep.subr.mxu1 %v14468_v0 }
 0x5ad   : > { %v15020_v50 = vpop.f32.mrf.mxu1 }
 0x5ae   : > { %v1982_v24 = vadd.f32 %v14982_v36, %v15020_v50 }
 0x5af   : > { %v15022_v51 = vpop.f32.mrf.mxu1 }
 0x5b1   : > { %v15024_v52 = vpop.f32.mrf.mxu1 }
 0x5b2   : > { %v1992_v27 = vadd.f32 %v14993_v43, %v15024_v52 }
 0x5b3   : > { %v15026_v53 = vpop.f32.mrf.mxu1 }
 0x5b5   : > { %v15028_v54 = vpop.f32.mrf.mxu1 }
 0x5b6   : > { %v2002_v30 = vadd.f32 %v15000_v46, %v15028_v54 }
 0x5b7   : > { %v15030_v55 = vpop.f32.mrf.mxu1 }
 0x5b9   : > { %v12512_v56 = vpop.f32.mrf.mxu1 }
 0x5ba   : > { %12526 = vmatpush3.msk.msra.mxu0 %vm1793_vm5, %v12512_v56  ;;  %vm2943_vm5 = vcmask 23552  }
 0x5bb   : > { %v2073_v57 = vpop.f32.mrf.mxu1  ;;  %12527 = vmatprep.subr.mxu0 %v14468_v0 }
 0x5bc   : > { %12528 = vmatpush3.msra.mxu0 %v2073_v57  ;;  %v2924_v57 = vadd.s32 42, %v14892_v38 }
 0x5bd   : > { %12530 = vmatmul.mubr.msk.f32.vlgmr.msra.gmra.mxu0 %vm1774_vm8, %v14900_v41  ;;  %v2230_v58 = vpop.f32.mrf.mxu1 }
 0x5be   : > { %12539 = vmatprep.mubr.f32.mxu0 %v14468_v0  ;;  %vm2930_vm2 = vcmp.eq.s32.totalorder %v14953_v23, %v2924_v57 }
 0x5bf   : > { %v12524_v60 = vpop.f32.mrf.mxu1 }
 0x67d   : > { %v2305_v61 = vpop.f32.mrf.mxu0 }
 0x67e   : > { %v2306_v63 = vadd.f32 %v2305_v61, %v2230_v58  ;;  %v11366_v58 = vsel %vm2930_vm2, 1.0, %v14468_v0 }
 0x67f   : > { %v12531_v1 = vpop.f32.mrf.mxu0 }
 0x680   : > { %v2317_v2 = vadd.f32 %v11348_v62, %v2306_v63  ;;  %v1987_v62 = vadd.f32 %v14996_v44, %v15026_v53 }
 0x682   : > { %v2318_v3 = vmul.f32 0.999995, %v2317_v2 }
 0x684   : > { %v2320_v4 = vmin.f32 %v2318_v3, 0.0  ;;  %vm2319_vm10 = vcmp.gt.f32.partialorder %v2318_v3, 0.0 }
 0x686   : > { %v2321_v5 = vmul.f32 1.442695, %v2320_v4 }
 0x688   : > { %13687 = vpow2.f32 %v2321_v5  ;;  %v1997_v5 = vadd.f32 %v15003_v47, %v15030_v55 }
 0x695   : > { %v13688_v6 = vpop.eup %13687 }
 0x696   : > { %v11349_v7 = vadd.f32 -1.0, %v13688_v6 }
 0x698   : > { %v2324_v9 = vsel %vm2319_vm10, %v2318_v3, %v11349_v7 }
 0x699   : > { %12535 = vmatmul.mubr.msk.f32.vlgmr.msra.gmra.mxu1 %vm1300_vm4, %v2324_v9 }
 0x69a   : > { %12549 = vmatpush3.msra.mxu1 %v2542_v8  ;;  %12550 = vmatprep.mubr.msk.f32.mxu1 %vm14469_vm0, %v14468_v0 }
 0x69b   : > { %12553 = vmatprep.subr.mxu1 %v14468_v0 }
 0x69d   : > { %12551 = vmatmul.mubr.msk.f32.vlgmr.msra.gmra.mxu1 %vm1300_vm4, %v2324_v9 }
 0x69e   : > { %12554 = vmatpush3.msra.mxu1 %v2614_v10  ;;  %12555 = vmatprep.mubr.msk.f32.mxu1 %vm14469_vm0, %v14468_v0 }
 0x69f   : > { %12558 = vmatprep.subr.mxu1 %v14468_v0 }
 0x6a1   : > { %12556 = vmatmul.mubr.msk.f32.vlgmr.msra.gmra.mxu1 %vm1300_vm4, %v2324_v9 }
 0x6a2   : > { %12560 = vmatprep.mubr.msk.f32.mxu1 %vm14469_vm0, %v14468_v0 }
 0x759   : > { %v2394_v11 = vpop.f32.mrf.mxu1 }
 0x75a   : > { %v2395_v13 = vadd.f32 %v14975_v29, %v2394_v11 }
 0x75b   : > { %v12536_v14 = vpop.f32.mrf.mxu1 }
 0x75c   : > { %12537 = vmatprep.subr.msk.mxu0 %vm2436_vm11, %v2395_v13 }
 0x75d   : > { %12538 = vmatpush3.msk.msra.mxu0 %vm2436_vm11, %v2395_v13  ;;  %v2609_v15 = vpop.f32.mrf.mxu1 }
 0x75e   : > { %12540 = vmatmul.mubr.f32.vlgmr.msra.gmra.mxu0 %v14468_v0  ;;  %12563 = vmatprep.subr.mxu0 %v14468_v0 }
 0x75f   : > { %v12552_v17 = vpop.f32.mrf.mxu1  ;;  %12564 = vmatpush3.msk.msra.mxu0 %vm2436_vm11, %v2609_v15  ;;  %12542 = vmatprep.mubr.f32.mxu0 %v14468_v0 }
 0x761   : > { %v2681_v20 = vpop.f32.mrf.mxu1 }
 0x762   : > { %12543 = vmatmul.mubr.f32.gmra.mxu0 %v14468_v0  ;;  %12559 = vmatpush3.msk.msra.mxu1 %vm2436_vm11, %v2681_v20  ;;  %vm6499_vm11 = vcmask 261120  }
 0x763   : > { %v12557_v21 = vpop.f32.mrf.mxu1  ;;  %12545 = vmatprep.mubr.msk.f32.mxu0 %vm2417_vm13, %v11351_v18  ;;  %12561 = vmatmul.mubr.msk.f32.vlgmr.msra.gmra.mxu1 %vm2417_vm13, %v14897_v40 }
 0x764   : > { %12568 = vmatprep.subr.mxu1 %v14468_v0  ;;  %12570 = vmatprep.mubr.msk.f32.mxu1 %vm14469_vm0, %v14468_v0 }
 0x765   : > { %12569 = vmatpush3.msra.mxu1 %v14914_v59 }
 0x766   : > { %12546 = vmatmul.mubr.msk.f32.gmra.mxu0 %vm2417_vm13, %v11352_v22 }
 0x767   : > { %12565 = vmatprep.mubr.msk.f32.mxu0 %vm14469_vm0, %v14468_v0 }
 0x76a   : > { %12566 = vmatmul.mubr.msk.f32.vlgmr.msra.gmra.mxu0 %vm2417_vm13, %v14900_v41 }
 0x76b   : > { %12575 = vmatprep.mubr.f32.mxu0 %v14468_v0 }
 0x81e   : > { %v12541_v25 = vpop.f32.mrf.mxu0 }
 0x81f   : > { %v2536_v40 = vadd.f32 %v12541_v25, %v1982_v24 }
 0x820   : > { %v2506_v26 = vpop.f32.mrf.mxu0 }
 0x822   : > { %v12544_v19 = vpop.f32.mrf.mxu0 }
 0x823   : > { %v2538_v28 = vadd.f32 %v12544_v19, %v1992_v27  ;;  %v2756_v59 = vpop.f32.mrf.mxu1 }
 0x824   : > { %v2516_v16 = vpop.f32.mrf.mxu0 }
 0x825   : > { %v12562_v31 = vpop.f32.mrf.mxu1  ;;  %v2537_v23 = vadd.f32 %v2516_v16, %v1987_v62 }
 0x826   : > { %v12547_v41 = vpop.f32.mrf.mxu0 }
 0x827   : > { %v2540_v32 = vadd.f32 %v12547_v41, %v2002_v30 }
 0x828   : > { %v2526_v33 = vpop.f32.mrf.mxu0 }
 0x82a   : > { %v2831_v34 = vpop.f32.mrf.mxu0 }
 0x82b   : > { %v2832_v36 = vadd.f32 %v2831_v34, %v2756_v59 }
 0x82c   : > { %v12567_v39 = vpop.f32.mrf.mxu0 }
 0x82d   : > { %v2843_v42 = vadd.f32 %v11363_v35, %v2832_v36 }
 0x82f   : > { %v2844_v43 = vmul.f32 0.999995, %v2843_v42 }
 0x831   : > { %v2846_v45 = vmin.f32 %v2844_v43, 0.0  ;;  %vm2845_vm15 = vcmp.gt.f32.partialorder %v2844_v43, 0.0 }
 0x833   : > { %v2847_v48 = vmul.f32 1.442695, %v2846_v45 }
 0x835   : > { %13689 = vpow2.f32 %v2847_v48  ;;  %v3294_v48 = vld [vmem:[#allocation21 + $0x8] sm:$0xff] }
 0x842   : > { %v13690_v49 = vpop.eup %13689 }
 0x843   : > { %v11364_v50 = vadd.f32 -1.0, %v13690_v49  ;;  %v3179_v49 = vld [vmem:[#allocation19 + $0x8] sm:$0xff] }
 0x844   : > { %12584 = vmatprep.subr.mxu1 %v3179_v49 }
 0x845   : > { %v2850_v46 = vsel %vm2845_vm15, %v2844_v43, %v11364_v50  ;;  %v3178_v50 = vld [vmem:[#allocation19] sm:$0xff] }
 0x846   : > { %12571 = vmatmul.mubr.msk.f32.vlgmr.msra.gmra.mxu1 %vm1300_vm4, %v2850_v46  ;;  %v3293_v46 = vld [vmem:[#allocation21] sm:$0xff] }
 0x847   : > { %12585 = vmatpush3.msra.mxu1 %v3179_v49 }
 0x848   : > { %12586 = vmatprep.subr.mxu1 %v3178_v50 }
 0x849   : > { %12587 = vmatpush3.msra.mxu1 %v3178_v50 }
 0x906   : > { %v2920_v52 = vpop.f32.mrf.mxu1 }
 0x907   : > { %v2921_v54 = vadd.f32 %v14975_v29, %v2920_v52  ;;  %v1977_v29 = vadd.f32 %v14986_v37, %v15022_v51  ;;  %v2539_v37 = vadd.f32 %v2526_v33, %v1997_v5  ;;  %v3391_v52 = vld [vmem:[%s16635_s17 + $0x8] sm:$0xff] }
 0x908   : > { %v12572_v56 = vpop.f32.mrf.mxu1  ;;  %12610 = vmatprep.subr.mxu1 %v3391_v52 }
 0x909   : > { %12573 = vmatprep.subr.msk.mxu0 %vm2962_vm1, %v2921_v54  ;;  %v2535_v38 = vadd.f32 %v2506_v26, %v1977_v29 }
 0x90a   : > { %12574 = vmatpush3.msk.msra.mxu0 %vm2962_vm1, %v2921_v54 }
 0x90b   : > { %12576 = vmatmul.mubr.f32.vlgmr.msra.gmra.mxu0 %v14468_v0  ;;  %12597 = vmatprep.subr.mxu0 %v3294_v48 }
 0x90c   : > { %12578 = vmatprep.mubr.f32.mxu0 %v14468_v0  ;;  %12598 = vmatpush3.msra.mxu0 %v3294_v48 }
 0x90d   : > { %12599 = vmatprep.subr.mxu0 %v3293_v46 }
 0x90e   : > { %12600 = vmatpush3.msra.mxu0 %v3293_v46 }
 0x90f   : > { %12579 = vmatmul.mubr.f32.gmra.mxu0 %v14468_v0 }
 0x910   : > { %12581 = vmatprep.mubr.f32.mxu0 %v14468_v0 }
 0x913   : > { %12582 = vmatmul.mubr.msk.f32.gmra.mxu0 %vm2943_vm5, %v11366_v58 }
 0x9cb   : > { %v12577_v60 = vpop.f32.mrf.mxu0 }
 0x9cc   : > { %v3062_v2 = vadd.f32 %v12577_v60, %v2536_v40 }
 0x9cd   : > { %v3032_v61 = vpop.f32.mrf.mxu0 }
 0x9ce   : > { %v3061_v63 = vadd.f32 %v3032_v61, %v2535_v38  ;;  %v3072_v8 = vsel %vm1201_vm3, %v3062_v2, 0.0 }
 0x9cf   : > { %v12580_v1 = vpop.f32.mrf.mxu0 }
 0x9d0   : > { %v3069_v3 = vsel %vm1201_vm3, %v3061_v63, 0.0  ;;  %v3064_v51 = vadd.f32 %v12580_v1, %v2538_v28 }
 0x9d1   : > { %3070 = vadd.xlane.f32.xlu0 %v3069_v3  ;;  %v3042_v4 = vpop.f32.mrf.mxu0 }
 0x9d2   : > { %v3063_v6 = vadd.f32 %v3042_v4, %v2537_v23  ;;  %v3078_v11 = vsel %vm1201_vm3, %v3064_v51, 0.0 }
 0x9d3   : > { %v12583_v7 = vpop.f32.mrf.mxu0 }
 0x9d4   : > { %v3075_v9 = vsel %vm1201_vm3, %v3063_v6, 0.0  ;;  %v3066_v10 = vadd.f32 %v12583_v7, %v2540_v32 }
 0x9d5   : > { %3073 = vadd.xlane.f32.xlu0 %v3072_v8  ;;  %3076 = vadd.xlane.f32.xlu1 %v3075_v9  ;;  %v3052_v44 = vpop.f32.mrf.mxu0  ;;  %v11370_v9 = vld [vmem:[%s16707_s4] ss:$0 sm:$0xff] }
 0x9d6   : > { %v3065_v53 = vadd.f32 %v3052_v44, %v2539_v37  ;;  %v3084_v47 = vsel %vm1201_vm3, %v3066_v10, 0.0 }
 0x9d8   : > { %v3081_v12 = vsel %vm1201_vm3, %v3065_v53, 0.0 }
 0x9d9   : > { %3079 = vadd.xlane.f32.xlu1 %v3078_v11  ;;  %3082 = vadd.xlane.f32.xlu0 %v3081_v12 }
 0x9dd   : > { %3085 = vadd.xlane.f32.xlu1 %v3084_v47 }
 0xa5a   : > { %v3071_v55 = vpop.xlane.xlu0 %3070 }
 0xa5b   : > { %v3088_v13 = vmul.f32 0.0625, %v3071_v55 }
 0xa5d   : > { %v15104_v14 = vsub.f32 %v3061_v63, %v3088_v13 }
 0xa5e   : > { %v3074_v15 = vpop.xlane.xlu0 %3073  ;;  %v3077_v17 = vpop.xlane.xlu1 %3076 }
 0xa5f   : > { %v3089_v18 = vmul.f32 0.0625, %v3074_v15  ;;  %v3090_v20 = vmul.f32 0.0625, %v3077_v17  ;;  %v3100_v21 = vmul.f32 %v15104_v14, %v15104_v14 }
 0xa61   : > { %v15108_v22 = vsub.f32 %v3062_v2, %v3089_v18  ;;  %v15110_v24 = vsub.f32 %v3063_v6, %v3090_v20  ;;  %v3106_v25 = vsel %vm1201_vm3, %v3100_v21, 0.0 }
 0xa62   : > { %v3080_v40 = vpop.xlane.xlu1 %3079  ;;  %3107 = vadd.xlane.f32.xlu0 %v3106_v25  ;;  %v3083_v26 = vpop.xlane.xlu0 %3082 }
 0xa63   : > { %v3091_v27 = vmul.f32 0.0625, %v3080_v40  ;;  %v3092_v19 = vmul.f32 0.0625, %v3083_v26  ;;  %v3101_v28 = vmul.f32 %v15108_v22, %v15108_v22  ;;  %v3102_v59 = vmul.f32 %v15110_v24, %v15110_v24 }
 0xa65   : > { %v15117_v16 = vsub.f32 %v3064_v51, %v3091_v27  ;;  %v15119_v30 = vsub.f32 %v3065_v53, %v3092_v19  ;;  %v3109_v31 = vsel %vm1201_vm3, %v3101_v28, 0.0  ;;  %v3112_v41 = vsel %vm1201_vm3, %v3102_v59, 0.0  ;;  %v11369_v51 = vld [vmem:[%s16706_s0] ss:$0 sm:$0xff] }
 0xa66   : > { %3110 = vadd.xlane.f32.xlu1 %v3109_v31  ;;  %v3086_v32 = vpop.xlane.xlu1 %3085  ;;  %3113 = vadd.xlane.f32.xlu0 %v3112_v41 }
 0xa67   : > { %v3093_v33 = vmul.f32 0.0625, %v3086_v32  ;;  %v3103_v34 = vmul.f32 %v15117_v16, %v15117_v16  ;;  %v3104_v35 = vmul.f32 %v15119_v30, %v15119_v30 }
 0xa69   : > { %v15127_v36 = vsub.f32 %v3066_v10, %v3093_v33  ;;  %v3115_v39 = vsel %vm1201_vm3, %v3103_v34, 0.0  ;;  %v3118_v42 = vsel %vm1201_vm3, %v3104_v35, 0.0 }
 0xa6a   : > { %3116 = vadd.xlane.f32.xlu1 %v3115_v39  ;;  %3119 = vadd.xlane.f32.xlu0 %v3118_v42 }
 0xa6b   : > { %v3105_v43 = vmul.f32 %v15127_v36, %v15127_v36 }
 0xa6d   : > { %v3121_v45 = vsel %vm1201_vm3, %v3105_v43, 0.0 }
 0xa6e   : > { %3122 = vadd.xlane.f32.xlu1 %v3121_v45 }
 0xaeb   : > { %v3108_v54 = vpop.xlane.xlu0 %3107 }
 0xaec   : > { %v3124_v56 = vmul.f32 0.0625, %v3108_v54  ;;  %v3899_v54 = vld [vmem:[#allocation21 + $0x18] sm:$0xff] }
 0xaee   : > { %v3130_v57 = vadd.f32 1e-05, %v3124_v56  ;;  %v3898_v56 = vld [vmem:[#allocation21 + $0x10] sm:$0xff] }
 0xaef   : > { %v3111_v58 = vpop.xlane.xlu1 %3110  ;;  %v3114_v29 = vpop.xlane.xlu0 %3113 }
 0xaf0   : > { %13691 = vrsqrt.f32 %v3130_v57  ;;  %v3125_v60 = vmul.f32 0.0625, %v3111_v58  ;;  %v3126_v38 = vmul.f32 0.0625, %v3114_v29  ;;  %v15230_v57 = vld [vmem:[#allocation15 + $0x8] sm:$0xff]  ;;  %v15232_v29 = vld [vmem:[#allocation15] sm:$0xff] }
 0xaf2   : > { %v3131_v61 = vadd.f32 1e-05, %v3125_v60  ;;  %v3132_v62 = vadd.f32 1e-05, %v3126_v38 }
 0xaf3   : > { %v3117_v63 = vpop.xlane.xlu1 %3116  ;;  %v3120_v1 = vpop.xlane.xlu0 %3119 }
 0xaf4   : > { %13693 = vrsqrt.f32 %v3131_v61  ;;  %v3127_v23 = vmul.f32 0.0625, %v3117_v63  ;;  %v3128_v2 = vmul.f32 0.0625, %v3120_v1  ;;  %v15235_v61 = vld [vmem:[#allocation15 + $0x18] sm:$0xff] }
 0xaf5   : > { %13695 = vrsqrt.f32 %v3132_v62 }
 0xaf6   : > { %v3133_v3 = vadd.f32 1e-05, %v3127_v23  ;;  %v3134_v4 = vadd.f32 1e-05, %v3128_v2  ;;  %v15239_v23 = vld [vmem:[#allocation15 + $0x10] sm:$0xff] }
 0xaf7   : > { %v3123_v5 = vpop.xlane.xlu1 %3122 }
 0xaf8   : > { %13697 = vrsqrt.f32 %v3133_v3  ;;  %v3129_v6 = vmul.f32 0.0625, %v3123_v5  ;;  %v15243_v5 = vld [vmem:[#allocation15 + $0x28] sm:$0xff] }
 0xaf9   : > { %13699 = vrsqrt.f32 %v3134_v4 }
 0xafa   : > { %v3135_v7 = vadd.f32 1e-05, %v3129_v6 }
 0xafc   : > { %13701 = vrsqrt.f32 %v3135_v7 }
 0xafd   : > { %v13692_v37 = vpop.eup %13691 }
 0xafe   : > { %v3142_v8 = vmul.f32 %v13692_v37, %v15104_v14 }
 0xb00   : > { %v3154_v44 = vmul.f32 %v11369_v51, %v3142_v8 }
 0xb01   : > { %v13694_v53 = vpop.eup %13693 }
 0xb02   : > { %v13696_v10 = vpop.eup %13695  ;;  %v15144_v11 = vadd.f32 %v11370_v9, %v3154_v44  ;;  %v3143_v12 = vmul.f32 %v13694_v53, %v15108_v22 }
 0xb03   : > { %v3144_v47 = vmul.f32 %v13696_v10, %v15110_v24  ;;  %v3390_v24 = vld [vmem:[%s16635_s17] sm:$0xff] }
 0xb04   : > { %v3155_v55 = vmul.f32 %v11369_v51, %v3143_v12  ;;  %12588 = vmatprep.mubr.msk.f32.mxu1 %vm1201_vm3, %v15144_v11  ;;  %12601 = vmatprep.mubr.msk.f32.mxu0 %vm1201_vm3, %v15144_v11 }
 0xb05   : > { %v13698_v13 = vpop.eup %13697  ;;  %v3156_v14 = vmul.f32 %v11369_v51, %v3144_v47 }
 0xb06   : > { %v13700_v15 = vpop.eup %13699  ;;  %v15152_v17 = vadd.f32 %v11370_v9, %v3155_v55  ;;  %v3145_v18 = vmul.f32 %v13698_v13, %v15117_v16 }
 0xb07   : > { %v15155_v20 = vadd.f32 %v11370_v9, %v3156_v14  ;;  %v3146_v21 = vmul.f32 %v13700_v15, %v15119_v30 }
 0xb08   : > { %v3157_v22 = vmul.f32 %v11369_v51, %v3145_v18  ;;  %12589 = vmatmul.mubr.msk.f32.vlgmr.msra.gmra.mxu1 %vm1201_vm3, %v15152_v17  ;;  %12602 = vmatmul.mubr.msk.f32.vlgmr.msra.gmra.mxu0 %vm1201_vm3, %v15152_v17 }
 0xb09   : > { %v13702_v25 = vpop.eup %13701  ;;  %v3158_v40 = vmul.f32 %v11369_v51, %v3146_v21  ;;  %12591 = vmatprep.mubr.msk.f32.mxu1 %vm1201_vm3, %v15155_v20  ;;  %12604 = vmatprep.mubr.msk.f32.mxu0 %vm1201_vm3, %v15155_v20 }
 0xb0a   : > { %v15169_v26 = vadd.f32 %v11370_v9, %v3157_v22  ;;  %v3147_v27 = vmul.f32 %v13702_v25, %v15127_v36  ;;  %12611 = vmatpush3.msra.mxu1 %v3391_v52 }
 0xb0b   : > { %v15172_v19 = vadd.f32 %v11370_v9, %v3158_v40  ;;  %12612 = vmatprep.subr.mxu1 %v3390_v24 }
 0xb0c   : > { %v3159_v28 = vmul.f32 %v11369_v51, %v3147_v27  ;;  %12592 = vmatmul.mubr.msk.f32.gmra.mxu1 %vm1201_vm3, %v15169_v26  ;;  %12605 = vmatmul.mubr.msk.f32.gmra.mxu0 %vm1201_vm3, %v15169_v26  ;;  %v15247_v51 = vld [vmem:[#allocation15 + $0x20] sm:$0xff] }
 0xb0d   : > { %12594 = vmatprep.mubr.msk.f32.mxu1 %vm1201_vm3, %v15172_v19  ;;  %12607 = vmatprep.mubr.msk.f32.mxu0 %vm1201_vm3, %v15172_v19 }
 0xb0e   : > { %v15182_v59 = vadd.f32 %v11370_v9, %v3159_v28  ;;  %12613 = vmatpush3.msra.mxu1 %v3390_v24 }
 0xb10   : > { %12595 = vmatmul.mubr.msk.f32.gmra.mxu1 %vm1201_vm3, %v15182_v59  ;;  %12608 = vmatmul.mubr.msk.f32.gmra.mxu0 %vm1201_vm3, %v15182_v59 }
 0xb11   : > { %12614 = vmatprep.mubr.msk.f32.mxu1 %vm1201_vm3, %v15144_v11 }
 0xb14   : > { %12615 = vmatmul.mubr.msk.f32.vlgmr.msra.gmra.mxu1 %vm1201_vm3, %v15152_v17 }
 0xb15   : > { %12617 = vmatprep.mubr.msk.f32.mxu1 %vm1201_vm3, %v15155_v20 }
 0xb18   : > { %12618 = vmatmul.mubr.msk.f32.gmra.mxu1 %vm1201_vm3, %v15169_v26 }
 0xb19   : > { %12620 = vmatprep.mubr.msk.f32.mxu1 %vm1201_vm3, %v15172_v19 }
 0xb1c   : > { %12621 = vmatmul.mubr.msk.f32.gmra.mxu1 %vm1201_vm3, %v15182_v59 }
 0xbc8   : > { %v12590_v16 = vpop.f32.mrf.mxu1  ;;  %v12603_v30 = vpop.f32.mrf.mxu0 }
 0xbca   : > { %v3264_v31 = vpop.f32.mrf.mxu1  ;;  %v3361_v41 = vpop.f32.mrf.mxu0 }
 0xbcb   : > { %12635 = vmatprep.mubr.msk.f32.mxu0 %vm1300_vm4, %v3264_v31 }
 0xbcc   : > { %v12593_v32 = vpop.f32.mrf.mxu1  ;;  %v12606_v33 = vpop.f32.mrf.mxu0 }
 0xbce   : > { %v3274_v34 = vpop.f32.mrf.mxu1  ;;  %v3371_v35 = vpop.f32.mrf.mxu0 }
 0xbd0   : > { %v12596_v36 = vpop.f32.mrf.mxu1  ;;  %v12609_v39 = vpop.f32.mrf.mxu0 }
 0xbd1   : > { %12623 = vmatprep.subr.msk.mxu0 %vm1300_vm4, %v12609_v39 }
 0xbd2   : > { %v3284_v42 = vpop.f32.mrf.mxu1  ;;  %v3381_v43 = vpop.f32.mrf.mxu0  ;;  %12624 = vmatpush3.xpose.msk.msra.mxu0 %vm1300_vm4, %v12609_v39 }
 0xbd3   : > { %12625 = vmatprep.subr.msk.mxu0 %vm1300_vm4, %v3381_v43 }
 0xbd4   : > { %v12616_v45 = vpop.f32.mrf.mxu1 }
 0xbd6   : > { %v3458_v48 = vpop.f32.mrf.mxu1  ;;  %12626 = vmatpush3.xpose.msk.msra.mxu0 %vm1300_vm4, %v3381_v43 }
 0xbd7   : > { %12627 = vmatprep.subr.msk.mxu0 %vm1300_vm4, %v12606_v33 }
 0xbd8   : > { %v12619_v49 = vpop.f32.mrf.mxu1 }
 0xbda   : > { %v3468_v50 = vpop.f32.mrf.mxu1  ;;  %12628 = vmatpush3.xpose.msk.msra.mxu0 %vm1300_vm4, %v12606_v33 }
 0xbdb   : > { %12629 = vmatprep.subr.msk.mxu0 %vm1300_vm4, %v3371_v35 }
 0xbdc   : > { %v12622_v46 = vpop.f32.mrf.mxu1 }
 0xbdd   : > { %12644 = vmatprep.subr.mxu1 %v12622_v46 }
 0xbde   : > { %v3478_v52 = vpop.f32.mrf.mxu1  ;;  %12630 = vmatpush3.xpose.msk.msra.mxu0 %vm1300_vm4, %v3371_v35  ;;  %12645 = vmatpush3.msra.mxu1 %v12622_v46 }
 0xbdf   : > { %12631 = vmatprep.subr.msk.mxu0 %vm1300_vm4, %v12603_v30  ;;  %12646 = vmatprep.subr.mxu1 %v3478_v52 }
 0xbe0   : > { %12647 = vmatpush3.msra.mxu1 %v3478_v52 }
 0xbe1   : > { %12648 = vmatprep.subr.mxu1 %v12619_v49 }
 0xbe2   : > { %12632 = vmatpush3.xpose.msk.msra.mxu0 %vm1300_vm4, %v12603_v30  ;;  %12649 = vmatpush3.msra.mxu1 %v12619_v49 }
 0xbe3   : > { %12633 = vmatprep.subr.msk.mxu0 %vm1300_vm4, %v3361_v41  ;;  %12650 = vmatprep.subr.mxu1 %v3468_v50 }
 0xbe4   : > { %12651 = vmatpush3.msra.mxu1 %v3468_v50 }
 0xbe5   : > { %12652 = vmatprep.subr.mxu1 %v12616_v45 }
 0xbe6   : > { %12634 = vmatpush3.xpose.msk.msra.mxu0 %vm1300_vm4, %v3361_v41  ;;  %12653 = vmatpush3.msra.mxu1 %v12616_v45 }
 0xbe7   : > { %12654 = vmatprep.subr.mxu1 %v3458_v48  ;;  %12678 = vmatprep.subr.mxu0 %v3899_v54 }
 0xbe8   : > { %12655 = vmatpush3.msra.mxu1 %v3458_v48 }
 0xbe9   : > { %12636 = vmatmul.mubr.msk.f32.vlgmr.msra.gmra.mxu0 %vm1300_vm4, %v12590_v16 }
 0xbea   : > { %12638 = vmatprep.mubr.msk.f32.mxu0 %vm1300_vm4, %v3274_v34  ;;  %12679 = vmatpush3.msra.mxu0 %v3899_v54 }
 0xbeb   : > { %12680 = vmatprep.subr.mxu0 %v3898_v56 }
 0xbec   : > { %12681 = vmatpush3.msra.mxu0 %v3898_v56 }
 0xbed   : > { %12639 = vmatmul.mubr.msk.f32.gmra.mxu0 %vm1300_vm4, %v12593_v32 }
 0xbee   : > { %12641 = vmatprep.mubr.msk.f32.mxu0 %vm1300_vm4, %v3284_v42 }
 0xbf1   : > { %12642 = vmatmul.mubr.msk.f32.gmra.mxu0 %vm1300_vm4, %v12596_v36 }
 0xbf2   : > { %12682 = vmatprep.mubr.msk.f32.mxu0 %vm1201_vm3, %v15144_v11 }
 0xbf5   : > { %12683 = vmatmul.mubr.msk.f32.vlgmr.msra.gmra.mxu0 %vm1201_vm3, %v15152_v17 }
 0xbf6   : > { %12685 = vmatprep.mubr.msk.f32.mxu0 %vm1201_vm3, %v15155_v20 }
 0xbf9   : > { %12686 = vmatmul.mubr.msk.f32.gmra.mxu0 %vm1201_vm3, %v15169_v26 }
 0xbfa   : > { %12688 = vmatprep.mubr.msk.f32.mxu0 %vm1201_vm3, %v15172_v19 }
 0xbfd   : > { %12689 = vmatmul.mubr.msk.f32.gmra.mxu0 %vm1201_vm3, %v15182_v59 }
 0xca9   : > { %v12637_v58 = vpop.f32.mrf.mxu0 }
 0xcaa   : > { %v3595_v60 = vadd.f32 %v12637_v58, %v15230_v57 }
 0xcab   : > { %v3589_v38 = vpop.f32.mrf.mxu0 }
 0xcac   : > { %v3590_v62 = vadd.f32 %v3589_v38, %v15232_v29  ;;  %v3622_v63 = vsel %vm3618_vm6, %v3595_v60, -inf }
 0xcad   : > { %3623 = vmax.xlane.f32.xlu1 %v3622_v63  ;;  %v12640_v1 = vpop.f32.mrf.mxu0 }
 0xcae   : > { %v3605_v2 = vadd.f32 %v12640_v1, %v15235_v61  ;;  %v3619_v3 = vsel %vm3618_vm6, %v3590_v62, -inf }
 0xcaf   : > { %v3599_v4 = vpop.f32.mrf.mxu0  ;;  %3620 = vmax.xlane.f32.xlu0 %v3619_v3 }
 0xcb0   : > { %v3600_v6 = vadd.f32 %v3599_v4, %v15239_v23  ;;  %v3628_v7 = vsel %vm3618_vm6, %v3605_v2, -inf }
 0xcb1   : > { %3629 = vmax.xlane.f32.xlu1 %v3628_v7  ;;  %v12643_v37 = vpop.f32.mrf.mxu0 }
 0xcb2   : > { %v3615_v8 = vadd.f32 %v12643_v37, %v15243_v5  ;;  %v3625_v9 = vsel %vm3618_vm6, %v3600_v6, -inf }
 0xcb3   : > { %3626 = vmax.xlane.f32.xlu0 %v3625_v9  ;;  %v3609_v44 = vpop.f32.mrf.mxu0 }
 0xcb4   : > { %v3610_v53 = vadd.f32 %v3609_v44, %v15247_v51  ;;  %v3634_v10 = vsel %vm3618_vm6, %v3615_v8, -inf }
 0xcb5   : > { %3635 = vmax.xlane.f32.xlu1 %v3634_v10  ;;  %v12684_v12 = vpop.f32.mrf.mxu0 }
 0xcb6   : > { %v3631_v47 = vsel %vm3618_vm6, %v3610_v53, -inf }
 0xcb7   : > { %v3966_v55 = vpop.f32.mrf.mxu0  ;;  %3632 = vmax.xlane.f32.xlu0 %v3631_v47  ;;  %v11420_v47 = vld [vmem:[%s16635_s17 + $0x18] sm:$0xff] }
 0xcb9   : > { %v12687_v13 = vpop.f32.mrf.mxu0 }
 0xcbb   : > { %v3976_v14 = vpop.f32.mrf.mxu0 }
 0xcbd   : > { %v12690_v15 = vpop.f32.mrf.mxu0 }
 0xcbe   : > { %12704 = vmatprep.subr.msk.mxu0 %vm1300_vm4, %v12690_v15 }
 0xcbf   : > { %v3986_v18 = vpop.f32.mrf.mxu0  ;;  %12705 = vmatpush3.xpose.msk.msra.mxu0 %vm1300_vm4, %v12690_v15 }
 0xcc0   : > { %12706 = vmatprep.subr.msk.mxu0 %vm1300_vm4, %v3986_v18 }
 0xcc3   : > { %12707 = vmatpush3.xpose.msk.msra.mxu0 %vm1300_vm4, %v3986_v18 }
 0xcc4   : > { %12708 = vmatprep.subr.msk.mxu0 %vm1300_vm4, %v12687_v13 }
 0xcc7   : > { %12709 = vmatpush3.xpose.msk.msra.mxu0 %vm1300_vm4, %v12687_v13 }
 0xcc8   : > { %12710 = vmatprep.subr.msk.mxu0 %vm1300_vm4, %v3976_v14 }
 0xccb   : > { %12711 = vmatpush3.xpose.msk.msra.mxu0 %vm1300_vm4, %v3976_v14 }
 0xccc   : > { %12712 = vmatprep.subr.msk.mxu0 %vm1300_vm4, %v12684_v12 }
 0xccf   : > { %12713 = vmatpush3.xpose.msk.msra.mxu0 %vm1300_vm4, %v12684_v12 }
 0xcd0   : > { %12714 = vmatprep.subr.msk.mxu0 %vm1300_vm4, %v3966_v55 }
 0xcd3   : > { %12715 = vmatpush3.xpose.msk.msra.mxu0 %vm1300_vm4, %v3966_v55 }
 0xd36   : > { %v3624_v21 = vpop.xlane.xlu1 %3623 }
 0xd37   : > { %v3638_v22 = vsub.f32 %v3595_v60, %v3624_v21  ;;  %v11419_v21 = vld [vmem:[%s16635_s17 + $0x10] sm:$0xff] }
 0xd38   : > { %v3621_v24 = vpop.xlane.xlu0 %3620 }
 0xd39   : > { %v3645_v25 = vmul.f32 1.442695, %v3638_v22  ;;  %v3637_v40 = vsub.f32 %v3590_v62, %v3621_v24  ;;  %v3801_v62 = vld [vmem:[#allocation19 + $0x18] sm:$0xff]  ;;  %v3798_v22 = vld [vmem:[#allocation22] sm:$0xff] }
 0xd3a   : > { %v3630_v27 = vpop.xlane.xlu1 %3629  ;;  %12665 = vmatprep.subr.mxu1 %v3801_v62  ;;  %12757 = vmatprep.subr.mxu0 %v3798_v22 }
 0xd3b   : > { %13703 = vpow2.f32 %v3645_v25  ;;  %v3643_v28 = vmul.f32 1.442695, %v3637_v40  ;;  %v3640_v16 = vsub.f32 %v3605_v2, %v3630_v27 }
 0xd3c   : > { %v3627_v30 = vpop.xlane.xlu0 %3626 }
 0xd3d   : > { %13705 = vpow2.f32 %v3643_v28  ;;  %v3649_v31 = vmul.f32 1.442695, %v3640_v16  ;;  %v3639_v41 = vsub.f32 %v3600_v6, %v3627_v30 }
 0xd3e   : > { %v3636_v32 = vpop.xlane.xlu1 %3635 }
 0xd3f   : > { %13707 = vpow2.f32 %v3649_v31  ;;  %v3647_v33 = vmul.f32 1.442695, %v3639_v41  ;;  %v3642_v34 = vsub.f32 %v3615_v8, %v3636_v32  ;;  %v4731_v41 = vld [vmem:[#allocation21 + $0x28] sm:$0xff] }
 0xd40   : > { %v3633_v35 = vpop.xlane.xlu0 %3632 }
 0xd41   : > { %13709 = vpow2.f32 %v3647_v33  ;;  %v3653_v36 = vmul.f32 1.442695, %v3642_v34  ;;  %v3641_v39 = vsub.f32 %v3610_v53, %v3633_v35  ;;  %v3800_v53 = vld [vmem:[#allocation19 + $0x10] sm:$0xff] }
 0xd43   : > { %13711 = vpow2.f32 %v3653_v36  ;;  %v3651_v42 = vmul.f32 1.442695, %v3641_v39 }
 0xd45   : > { %13713 = vpow2.f32 %v3651_v42  ;;  %v4730_v42 = vld [vmem:[#allocation21 + $0x20] sm:$0xff] }
 0xd48   : > { %v13704_v43 = vpop.eup %13703 }
 0xd49   : > { %v3658_v45 = vsel %vm3618_vm6, %v13704_v43, 0.0 }
 0xd4a   : > { %v13706_v48 = vpop.eup %13705  ;;  %3659 = vadd.xlane.f32.xlu1 %v3658_v45 }
 0xd4b   : > { %v3655_v49 = vsel %vm3618_vm6, %v13706_v48, 0.0 }
 0xd4c   : > { %v13708_v50 = vpop.eup %13707  ;;  %3656 = vadd.xlane.f32.xlu0 %v3655_v49 }
 0xd4d   : > { %v3664_v46 = vsel %vm3618_vm6, %v13708_v50, 0.0 }
 0xd4e   : > { %v13710_v52 = vpop.eup %13709  ;;  %3665 = vadd.xlane.f32.xlu1 %v3664_v46 }
 0xd4f   : > { %v3661_v54 = vsel %vm3618_vm6, %v13710_v52, 0.0 }
 0xd50   : > { %v13712_v56 = vpop.eup %13711  ;;  %3662 = vadd.xlane.f32.xlu0 %v3661_v54 }
 0xd51   : > { %v3670_v58 = vsel %vm3618_vm6, %v13712_v56, 0.0 }
 0xd52   : > { %v13714_v60 = vpop.eup %13713  ;;  %3671 = vadd.xlane.f32.xlu1 %v3670_v58 }
 0xd53   : > { %v3667_v38 = vsel %vm3618_vm6, %v13714_v60, 0.0 }
 0xd54   : > { %3668 = vadd.xlane.f32.xlu0 %v3667_v38 }
 0xdd3   : > { %v3660_v63 = vpop.xlane.xlu1 %3659 }
 0xdd4   : > { %13715 = vrcp.f32 %v3660_v63 }
 0xdd5   : > { %v3657_v1 = vpop.xlane.xlu0 %3656 }
 0xdd6   : > { %13717 = vrcp.f32 %v3657_v1 }
 0xdd7   : > { %v3666_v2 = vpop.xlane.xlu1 %3665 }
 0xdd8   : > { %13719 = vrcp.f32 %v3666_v2 }
 0xdd9   : > { %v3663_v3 = vpop.xlane.xlu0 %3662 }
 0xdda   : > { %13721 = vrcp.f32 %v3663_v3 }
 0xddb   : > { %v3672_v4 = vpop.xlane.xlu1 %3671 }
 0xddc   : > { %13723 = vrcp.f32 %v3672_v4 }
 0xddd   : > { %v3669_v6 = vpop.xlane.xlu0 %3668 }
 0xdde   : > { %13725 = vrcp.f32 %v3669_v6 }
 0xde1   : > { %v13716_v7 = vpop.eup %13715 }
 0xde2   : > { %v3680_v9 = vmul.f32 %v13716_v7, %v13704_v43 }
 0xde3   : > { %v13718_v37 = vpop.eup %13717 }
 0xde4   : > { %v3679_v8 = vmul.f32 %v13718_v37, %v13706_v48 }
 0xde5   : > { %v13720_v44 = vpop.eup %13719 }
 0xde6   : > { %12656 = vmatprep.mubr.msk.f32.mxu1 %vm3618_vm6, %v3679_v8  ;;  %v3682_v55 = vmul.f32 %v13720_v44, %v13708_v50 }
 0xde7   : > { %v13722_v10 = vpop.eup %13721  ;;  %12657 = vmatmul.mubr.msk.f32.vlgmr.msra.gmra.mxu1 %vm3618_vm6, %v3680_v9 }
 0xde8   : > { %v3681_v12 = vmul.f32 %v13722_v10, %v13710_v52  ;;  %12666 = vmatpush3.msra.mxu1 %v3801_v62 }
 0xde9   : > { %12667 = vmatprep.subr.mxu1 %v3800_v53  ;;  %v13724_v13 = vpop.eup %13723 }
 0xdea   : > { %12659 = vmatprep.mubr.msk.f32.mxu1 %vm3618_vm6, %v3681_v12  ;;  %12668 = vmatpush3.msra.mxu1 %v3800_v53  ;;  %v3684_v18 = vmul.f32 %v13724_v13, %v13712_v56 }
 0xdeb   : > { %v13726_v14 = vpop.eup %13725  ;;  %12660 = vmatmul.mubr.msk.f32.gmra.mxu1 %vm3618_vm6, %v3682_v55  ;;  %12691 = vmatprep.subr.mxu1 %v11420_v47 }
 0xdec   : > { %v3683_v15 = vmul.f32 %v13726_v14, %v13714_v60 }
 0xdee   : > { %12662 = vmatprep.mubr.msk.f32.mxu1 %vm3618_vm6, %v3683_v15 }
 0xdef   : > { %12663 = vmatmul.mubr.msk.f32.gmra.mxu1 %vm3618_vm6, %v3684_v18 }
 0xdf0   : > { %12669 = vmatprep.mubr.msk.f32.mxu1 %vm1201_vm3, %v15144_v11 }
 0xdf3   : > { %12670 = vmatmul.mubr.msk.f32.vlgmr.msra.gmra.mxu1 %vm1201_vm3, %v15152_v17 }
 0xdf4   : > { %12672 = vmatprep.mubr.msk.f32.mxu1 %vm1201_vm3, %v15155_v20  ;;  %12692 = vmatpush3.msra.mxu1 %v11420_v47 }
 0xdf5   : > { %12693 = vmatprep.subr.mxu1 %v11419_v21 }
 0xdf6   : > { %12694 = vmatpush3.msra.mxu1 %v11419_v21 }
 0xdf7   : > { %12673 = vmatmul.mubr.msk.f32.gmra.mxu1 %vm1201_vm3, %v15169_v26 }
 0xdf8   : > { %12675 = vmatprep.mubr.msk.f32.mxu1 %vm1201_vm3, %v15172_v19 }
 0xdfb   : > { %12676 = vmatmul.mubr.msk.f32.gmra.mxu1 %vm1201_vm3, %v15182_v59 }
 0xdfc   : > { %12695 = vmatprep.mubr.msk.f32.mxu1 %vm1201_vm3, %v15144_v11 }
 0xdff   : > { %12696 = vmatmul.mubr.msk.f32.vlgmr.msra.gmra.mxu1 %vm1201_vm3, %v15152_v17 }
 0xe00   : > { %12698 = vmatprep.mubr.msk.f32.mxu1 %vm1201_vm3, %v15155_v20 }
 0xe03   : > { %12699 = vmatmul.mubr.msk.f32.gmra.mxu1 %vm1201_vm3, %v15169_v26 }
 0xe04   : > { %12701 = vmatprep.mubr.msk.f32.mxu1 %vm1201_vm3, %v15172_v19 }
 0xe07   : > { %12702 = vmatmul.mubr.msk.f32.gmra.mxu1 %vm1201_vm3, %v15182_v59 }
 0xea7   : > { %v12658_v24 = vpop.f32.mrf.mxu1 }
 0xea9   : > { %v3769_v25 = vpop.f32.mrf.mxu1 }
 0xeab   : > { %v12661_v40 = vpop.f32.mrf.mxu1 }
 0xead   : > { %v3779_v27 = vpop.f32.mrf.mxu1 }
 0xeaf   : > { %v12664_v28 = vpop.f32.mrf.mxu1 }
 0xeb1   : > { %v3789_v16 = vpop.f32.mrf.mxu1 }
 0xeb3   : > { %v12671_v30 = vpop.f32.mrf.mxu1 }
 0xeb5   : > { %v3868_v31 = vpop.f32.mrf.mxu1 }
 0xeb6   : > { %12716 = vmatprep.mubr.msk.f32.mxu0 %vm1300_vm4, %v3868_v31 }
 0xeb7   : > { %v12674_v32 = vpop.f32.mrf.mxu1  ;;  %12717 = vmatmul.mubr.msk.f32.vlgmr.msra.gmra.mxu0 %vm1300_vm4, %v12671_v30 }
 0xeb8   : > { %12758 = vmatpush3.msra.mxu0 %v3798_v22 }
 0xeb9   : > { %v3878_v33 = vpop.f32.mrf.mxu1  ;;  %12781 = vmatprep.subr.mxu0 %v4731_v41 }
 0xeba   : > { %12719 = vmatprep.mubr.msk.f32.mxu0 %vm1300_vm4, %v3878_v33 }
 0xebb   : > { %v12677_v34 = vpop.f32.mrf.mxu1  ;;  %12720 = vmatmul.mubr.msk.f32.gmra.mxu0 %vm1300_vm4, %v12674_v32 }
 0xebd   : > { %v3888_v35 = vpop.f32.mrf.mxu1 }
 0xebe   : > { %12722 = vmatprep.mubr.msk.f32.mxu0 %vm1300_vm4, %v3888_v35 }
 0xebf   : > { %v12697_v36 = vpop.f32.mrf.mxu1  ;;  %12723 = vmatmul.mubr.msk.f32.gmra.mxu0 %vm1300_vm4, %v12677_v34 }
 0xec0   : > { %12759 = vmatprep.mubr.msk.f32.mxu0 %vm1300_vm4, %v3769_v25 }
 0xec1   : > { %v4064_v39 = vpop.f32.mrf.mxu1 }
 0xec3   : > { %v12700_v43 = vpop.f32.mrf.mxu1  ;;  %12760 = vmatmul.mubr.msk.f32.vlgmr.msra.gmra.mxu0 %vm1300_vm4, %v12658_v24 }
 0xec4   : > { %12762 = vmatprep.mubr.msk.f32.mxu0 %vm1300_vm4, %v3779_v27  ;;  %12782 = vmatpush3.msra.mxu0 %v4731_v41 }
 0xec5   : > { %v4074_v45 = vpop.f32.mrf.mxu1  ;;  %12783 = vmatprep.subr.mxu0 %v4730_v42 }
 0xec6   : > { %12784 = vmatpush3.msra.mxu0 %v4730_v42 }
 0xec7   : > { %v12703_v48 = vpop.f32.mrf.mxu1  ;;  %12763 = vmatmul.mubr.msk.f32.gmra.mxu0 %vm1300_vm4, %v12661_v40 }
 0xec8   : > { %12725 = vmatprep.subr.mxu1 %v12703_v48  ;;  %12765 = vmatprep.mubr.msk.f32.mxu0 %vm1300_vm4, %v3789_v16 }
 0xec9   : > { %v4084_v49 = vpop.f32.mrf.mxu1  ;;  %12726 = vmatpush3.msra.mxu1 %v12703_v48 }
 0xeca   : > { %12727 = vmatprep.subr.mxu1 %v4084_v49 }
 0xecb   : > { %12728 = vmatpush3.msra.mxu1 %v4084_v49  ;;  %12766 = vmatmul.mubr.msk.f32.gmra.mxu0 %vm1300_vm4, %v12664_v28 }
 0xecc   : > { %12729 = vmatprep.subr.mxu1 %v12700_v43  ;;  %12785 = vmatprep.mubr.msk.f32.mxu0 %vm1201_vm3, %v15144_v11 }
 0xecd   : > { %12730 = vmatpush3.msra.mxu1 %v12700_v43 }
 0xece   : > { %12731 = vmatprep.subr.mxu1 %v4074_v45 }
 0xecf   : > { %12732 = vmatpush3.msra.mxu1 %v4074_v45  ;;  %12786 = vmatmul.mubr.msk.f32.vlgmr.msra.gmra.mxu0 %vm1201_vm3, %v15152_v17 }
 0xed0   : > { %12733 = vmatprep.subr.mxu1 %v12697_v36  ;;  %12788 = vmatprep.mubr.msk.f32.mxu0 %vm1201_vm3, %v15155_v20 }
 0xed1   : > { %12734 = vmatpush3.msra.mxu1 %v12697_v36 }
 0xed2   : > { %12735 = vmatprep.subr.mxu1 %v4064_v39 }
 0xed3   : > { %12736 = vmatpush3.msra.mxu1 %v4064_v39  ;;  %12789 = vmatmul.mubr.msk.f32.gmra.mxu0 %vm1201_vm3, %v15169_v26 }
 0xed4   : > { %12791 = vmatprep.mubr.msk.f32.mxu0 %vm1201_vm3, %v15172_v19 }
 0xed7   : > { %12792 = vmatmul.mubr.msk.f32.gmra.mxu0 %vm1201_vm3, %v15182_v59 }
 0xf77   : > { %v12718_v50 = vpop.f32.mrf.mxu0 }
 0xf78   : > { %v4201_v46 = vadd.f32 %v12718_v50, %v15230_v57 }
 0xf79   : > { %v4195_v52 = vpop.f32.mrf.mxu0 }
 0xf7a   : > { %v4196_v54 = vadd.f32 %v4195_v52, %v15232_v29  ;;  %v4227_v56 = vsel %vm3618_vm6, %v4201_v46, -inf }
 0xf7b   : > { %4228 = vmax.xlane.f32.xlu1 %v4227_v56  ;;  %v12721_v58 = vpop.f32.mrf.mxu0 }
 0xf7c   : > { %v4211_v60 = vadd.f32 %v12721_v58, %v15235_v61  ;;  %v4224_v38 = vsel %vm3618_vm6, %v4196_v54, -inf }
 0xf7d   : > { %4225 = vmax.xlane.f32.xlu0 %v4224_v38  ;;  %v4205_v62 = vpop.f32.mrf.mxu0 }
 0xf7e   : > { %v4206_v63 = vadd.f32 %v4205_v62, %v15239_v23  ;;  %v4233_v1 = vsel %vm3618_vm6, %v4211_v60, -inf }
 0xf7f   : > { %4234 = vmax.xlane.f32.xlu1 %v4233_v1  ;;  %v12724_v2 = vpop.f32.mrf.mxu0 }
 0xf80   : > { %v4221_v3 = vadd.f32 %v12724_v2, %v15243_v5  ;;  %v4230_v4 = vsel %vm3618_vm6, %v4206_v63, -inf }
 0xf81   : > { %4231 = vmax.xlane.f32.xlu0 %v4230_v4  ;;  %v4215_v6 = vpop.f32.mrf.mxu0 }
 0xf82   : > { %v4216_v7 = vadd.f32 %v4215_v6, %v15247_v51  ;;  %v4239_v37 = vsel %vm3618_vm6, %v4221_v3, -inf }
 0xf83   : > { %4240 = vmax.xlane.f32.xlu1 %v4239_v37  ;;  %v15343_v8 = vpop.f32.mrf.mxu0 }
 0xf84   : > { %v4236_v9 = vsel %vm3618_vm6, %v4216_v7, -inf }
 0xf85   : > { %v15346_v44 = vpop.f32.mrf.mxu0  ;;  %4237 = vmax.xlane.f32.xlu0 %v4236_v9 }
 0xf87   : > { %v15348_v53 = vpop.f32.mrf.mxu0 }
 0xf89   : > { %v15350_v10 = vpop.f32.mrf.mxu0 }
 0xf8b   : > { %v15352_v12 = vpop.f32.mrf.mxu0 }
 0xf8d   : > { %v15354_v47 = vpop.f32.mrf.mxu0 }
 0xf8f   : > { %v12787_v55 = vpop.f32.mrf.mxu0 }
 0xf91   : > { %v4798_v13 = vpop.f32.mrf.mxu0 }
 0xf93   : > { %v12790_v14 = vpop.f32.mrf.mxu0 }
 0xf95   : > { %v4808_v15 = vpop.f32.mrf.mxu0 }
 0xf97   : > { %v12793_v18 = vpop.f32.mrf.mxu0 }
 0xf98   : > { %12807 = vmatprep.subr.msk.mxu0 %vm1300_vm4, %v12793_v18 }
 0xf99   : > { %v4818_v21 = vpop.f32.mrf.mxu0  ;;  %12808 = vmatpush3.xpose.msk.msra.mxu0 %vm1300_vm4, %v12793_v18 }
 0xf9a   : > { %12809 = vmatprep.subr.msk.mxu0 %vm1300_vm4, %v4818_v21 }
 0xf9d   : > { %12810 = vmatpush3.xpose.msk.msra.mxu0 %vm1300_vm4, %v4818_v21 }
 0xf9e   : > { %12811 = vmatprep.subr.msk.mxu0 %vm1300_vm4, %v12790_v14 }
 0xfa1   : > { %12812 = vmatpush3.xpose.msk.msra.mxu0 %vm1300_vm4, %v12790_v14 }
 0xfa2   : > { %12813 = vmatprep.subr.msk.mxu0 %vm1300_vm4, %v4808_v15 }
 0xfa5   : > { %12814 = vmatpush3.xpose.msk.msra.mxu0 %vm1300_vm4, %v4808_v15 }
 0xfa6   : > { %12815 = vmatprep.subr.msk.mxu0 %vm1300_vm4, %v12787_v55 }
 0xfa9   : > { %12816 = vmatpush3.xpose.msk.msra.mxu0 %vm1300_vm4, %v12787_v55 }
 0xfaa   : > { %12817 = vmatprep.subr.msk.mxu0 %vm1300_vm4, %v4798_v13 }
 0xfad   : > { %12818 = vmatpush3.xpose.msk.msra.mxu0 %vm1300_vm4, %v4798_v13 }
0x1004   : > { %v4229_v22 = vpop.xlane.xlu1 %4228 }
0x1005   : > { %v4243_v24 = vsub.f32 %v4201_v46, %v4229_v22 }
0x1006   : > { %v4226_v25 = vpop.xlane.xlu0 %4225 }
0x1007   : > { %v4250_v40 = vmul.f32 1.442695, %v4243_v24  ;;  %v4242_v27 = vsub.f32 %v4196_v54, %v4226_v25 }
0x1008   : > { %v4235_v28 = vpop.xlane.xlu1 %4234 }
0x1009   : > { %13727 = vpow2.f32 %v4250_v40  ;;  %v4248_v16 = vmul.f32 1.442695, %v4242_v27  ;;  %v4245_v30 = vsub.f32 %v4211_v60, %v4235_v28  ;;  %v4633_v27 = vld [vmem:[#allocation19 + $0x28] sm:$0xff] }
0x100a   : > { %v4232_v31 = vpop.xlane.xlu0 %4231 }
0x100b   : > { %13729 = vpow2.f32 %v4248_v16  ;;  %v4254_v41 = vmul.f32 1.442695, %v4245_v30  ;;  %v4244_v32 = vsub.f32 %v4206_v63, %v4232_v31  ;;  %v4404_v63 = vld [vmem:[#allocation22 + $0x8] sm:$0xff]  ;;  %v4632_v30 = vld [vmem:[#allocation19 + $0x20] sm:$0xff] }
0x100c   : > { %v4241_v33 = vpop.xlane.xlu1 %4240  ;;  %12746 = vmatprep.subr.mxu1 %v4404_v63 }
0x100d   : > { %13731 = vpow2.f32 %v4254_v41  ;;  %v4252_v34 = vmul.f32 1.442695, %v4244_v32  ;;  %v4247_v35 = vsub.f32 %v4221_v3, %v4241_v33  ;;  %v11470_v41 = vld [vmem:[%s16635_s17 + $0x28] sm:$0xff] }
0x100e   : > { %v4238_v36 = vpop.xlane.xlu0 %4237 }
0x100f   : > { %13733 = vpow2.f32 %v4252_v34  ;;  %v4258_v39 = vmul.f32 1.442695, %v4247_v35  ;;  %v4246_v42 = vsub.f32 %v4216_v7, %v4238_v36  ;;  %v11469_v35 = vld [vmem:[%s16635_s17 + $0x20] sm:$0xff]  ;;  %v5358_v36 = vld [vmem:[#allocation19 + $0x38] sm:$0xff] }
0x1010   : > { %12860 = vmatprep.subr.mxu0 %v5358_v36 }
0x1011   : > { %13735 = vpow2.f32 %v4258_v39  ;;  %v4256_v43 = vmul.f32 1.442695, %v4246_v42 }
0x1013   : > { %13737 = vpow2.f32 %v4256_v43 }
0x1016   : > { %v13728_v45 = vpop.eup %13727 }
0x1017   : > { %v4263_v48 = vsel %vm3618_vm6, %v13728_v45, 0.0 }
0x1018   : > { %v13730_v49 = vpop.eup %13729  ;;  %4264 = vadd.xlane.f32.xlu1 %v4263_v48 }
0x1019   : > { %v4260_v50 = vsel %vm3618_vm6, %v13730_v49, 0.0 }
0x101a   : > { %v13732_v46 = vpop.eup %13731  ;;  %4261 = vadd.xlane.f32.xlu0 %v4260_v50 }
0x101b   : > { %v4269_v52 = vsel %vm3618_vm6, %v13732_v46, 0.0 }
0x101c   : > { %v13734_v54 = vpop.eup %13733  ;;  %4270 = vadd.xlane.f32.xlu1 %v4269_v52  ;;  %v5357_v52 = vld [vmem:[#allocation19 + $0x30] sm:$0xff] }
0x101d   : > { %v4266_v56 = vsel %vm3618_vm6, %v13734_v54, 0.0 }
0x101e   : > { %v13736_v58 = vpop.eup %13735  ;;  %4267 = vadd.xlane.f32.xlu0 %v4266_v56  ;;  %v11514_v56 = vld [vmem:[%s16635_s17 + $0x38] sm:$0xff] }
0x101f   : > { %v4275_v60 = vsel %vm3618_vm6, %v13736_v58, 0.0 }
0x1020   : > { %v13738_v38 = vpop.eup %13737  ;;  %4276 = vadd.xlane.f32.xlu1 %v4275_v60 }
0x1021   : > { %v4272_v62 = vsel %vm3618_vm6, %v13738_v38, 0.0 }
0x1022   : > { %4273 = vadd.xlane.f32.xlu0 %v4272_v62 }
0x10a1   : > { %v4265_v1 = vpop.xlane.xlu1 %4264 }
0x10a2   : > { %13739 = vrcp.f32 %v4265_v1  ;;  %v11513_v1 = vld [vmem:[%s16635_s17 + $0x30] sm:$0xff] }
0x10a3   : > { %v4262_v2 = vpop.xlane.xlu0 %4261 }
0x10a4   : > { %13741 = vrcp.f32 %v4262_v2 }
0x10a5   : > { %v4271_v3 = vpop.xlane.xlu1 %4270 }
0x10a6   : > { %13743 = vrcp.f32 %v4271_v3 }
0x10a7   : > { %v4268_v4 = vpop.xlane.xlu0 %4267 }
0x10a8   : > { %13745 = vrcp.f32 %v4268_v4 }
0x10a9   : > { %v4277_v6 = vpop.xlane.xlu1 %4276 }
0x10aa   : > { %13747 = vrcp.f32 %v4277_v6 }
0x10ab   : > { %v4274_v7 = vpop.xlane.xlu0 %4273 }
0x10ac   : > { %13749 = vrcp.f32 %v4274_v7 }
0x10af   : > { %v13740_v37 = vpop.eup %13739 }
0x10b0   : > { %v4285_v13 = vmul.f32 %v13740_v37, %v13728_v45 }
0x10b1   : > { %v13742_v9 = vpop.eup %13741 }
0x10b2   : > { %v4284_v55 = vmul.f32 %v13742_v9, %v13730_v49 }
0x10b3   : > { %v13744_v14 = vpop.eup %13743 }
0x10b4   : > { %12737 = vmatprep.mubr.msk.f32.mxu1 %vm3618_vm6, %v4284_v55  ;;  %v4287_v21 = vmul.f32 %v13744_v14, %v13732_v46 }
0x10b5   : > { %v13746_v15 = vpop.eup %13745  ;;  %12738 = vmatmul.mubr.msk.f32.vlgmr.msra.gmra.mxu1 %vm3618_vm6, %v4285_v13 }
0x10b6   : > { %v4286_v18 = vmul.f32 %v13746_v15, %v13734_v54  ;;  %12747 = vmatpush3.msra.mxu1 %v4404_v63 }
0x10b7   : > { %v13748_v22 = vpop.eup %13747  ;;  %12768 = vmatprep.subr.mxu1 %v4633_v27 }
0x10b8   : > { %12740 = vmatprep.mubr.msk.f32.mxu1 %vm3618_vm6, %v4286_v18  ;;  %v4289_v40 = vmul.f32 %v13748_v22, %v13736_v58 }
0x10b9   : > { %v13750_v24 = vpop.eup %13749  ;;  %12741 = vmatmul.mubr.msk.f32.gmra.mxu1 %vm3618_vm6, %v4287_v21 }
0x10ba   : > { %v4288_v25 = vmul.f32 %v13750_v24, %v13738_v38 }
0x10bc   : > { %12743 = vmatprep.mubr.msk.f32.mxu1 %vm3618_vm6, %v4288_v25 }
0x10bd   : > { %12744 = vmatmul.mubr.msk.f32.gmra.mxu1 %vm3618_vm6, %v4289_v40 }
0x1175   : > { %v12739_v28 = vpop.f32.mrf.mxu1 }
0x1177   : > { %v4374_v16 = vpop.f32.mrf.mxu1 }
0x1178   : > { %12748 = vmatprep.mubr.msk.f32.mxu1 %vm1300_vm4, %v4374_v16 }
0x1179   : > { %v12742_v31 = vpop.f32.mrf.mxu1  ;;  %12749 = vmatmul.mubr.msk.f32.vlgmr.msra.gmra.mxu1 %vm1300_vm4, %v12739_v28 }
0x117a   : > { %12769 = vmatpush3.msra.mxu1 %v4633_v27 }
0x117b   : > { %v4384_v32 = vpop.f32.mrf.mxu1  ;;  %12770 = vmatprep.subr.mxu1 %v4632_v30 }
0x117c   : > { %12751 = vmatprep.mubr.msk.f32.mxu1 %vm1300_vm4, %v4384_v32  ;;  %12771 = vmatpush3.msra.mxu1 %v4632_v30 }
0x117d   : > { %v12745_v33 = vpop.f32.mrf.mxu1  ;;  %12752 = vmatmul.mubr.msk.f32.gmra.mxu1 %vm1300_vm4, %v12742_v31  ;;  %12794 = vmatprep.subr.mxu1 %v11470_v41 }
0x117f   : > { %v4394_v34 = vpop.f32.mrf.mxu1 }
0x1180   : > { %12754 = vmatprep.mubr.msk.f32.mxu1 %vm1300_vm4, %v4394_v34 }
0x1181   : > { %12755 = vmatmul.mubr.msk.f32.gmra.mxu1 %vm1300_vm4, %v12745_v33 }
0x1182   : > { %12772 = vmatprep.mubr.msk.f32.mxu1 %vm1201_vm3, %v15144_v11 }
0x1185   : > { %12773 = vmatmul.mubr.msk.f32.vlgmr.msra.gmra.mxu1 %vm1201_vm3, %v15152_v17 }
0x1186   : > { %12775 = vmatprep.mubr.msk.f32.mxu1 %vm1201_vm3, %v15155_v20  ;;  %12795 = vmatpush3.msra.mxu1 %v11470_v41 }
0x1187   : > { %12796 = vmatprep.subr.mxu1 %v11469_v35 }
0x1188   : > { %12797 = vmatpush3.msra.mxu1 %v11469_v35 }
0x1189   : > { %12776 = vmatmul.mubr.msk.f32.gmra.mxu1 %vm1201_vm3, %v15169_v26 }
0x118a   : > { %12778 = vmatprep.mubr.msk.f32.mxu1 %vm1201_vm3, %v15172_v19 }
0x118d   : > { %12779 = vmatmul.mubr.msk.f32.gmra.mxu1 %vm1201_vm3, %v15182_v59 }
0x118e   : > { %12798 = vmatprep.mubr.msk.f32.mxu1 %vm1201_vm3, %v15144_v11 }
0x1191   : > { %12799 = vmatmul.mubr.msk.f32.vlgmr.msra.gmra.mxu1 %vm1201_vm3, %v15152_v17 }
0x1192   : > { %12801 = vmatprep.mubr.msk.f32.mxu1 %vm1201_vm3, %v15155_v20 }
0x1195   : > { %12802 = vmatmul.mubr.msk.f32.gmra.mxu1 %vm1201_vm3, %v15169_v26 }
0x1196   : > { %12804 = vmatprep.mubr.msk.f32.mxu1 %vm1201_vm3, %v15172_v19 }
0x1199   : > { %12805 = vmatmul.mubr.msk.f32.gmra.mxu1 %vm1201_vm3, %v15182_v59 }
0x1239   : > { %v15416_v39 = vpop.f32.mrf.mxu1 }
0x123b   : > { %v15418_v42 = vpop.f32.mrf.mxu1 }
0x123d   : > { %v15420_v43 = vpop.f32.mrf.mxu1 }
0x123f   : > { %v15422_v45 = vpop.f32.mrf.mxu1 }
0x1241   : > { %v15424_v48 = vpop.f32.mrf.mxu1 }
0x1243   : > { %v15426_v49 = vpop.f32.mrf.mxu1 }
0x1245   : > { %v12774_v50 = vpop.f32.mrf.mxu1 }
0x1247   : > { %v4700_v46 = vpop.f32.mrf.mxu1 }
0x1248   : > { %12819 = vmatprep.mubr.msk.f32.mxu0 %vm1300_vm4, %v4700_v46 }
0x1249   : > { %v12777_v54 = vpop.f32.mrf.mxu1  ;;  %12820 = vmatmul.mubr.msk.f32.vlgmr.msra.gmra.mxu0 %vm1300_vm4, %v12774_v50 }
0x124a   : > { %12861 = vmatpush3.msra.mxu0 %v5358_v36 }
0x124b   : > { %v4710_v58 = vpop.f32.mrf.mxu1  ;;  %12862 = vmatprep.subr.mxu0 %v5357_v52 }
0x124c   : > { %12822 = vmatprep.mubr.msk.f32.mxu0 %vm1300_vm4, %v4710_v58  ;;  %12863 = vmatpush3.msra.mxu0 %v5357_v52 }
0x124d   : > { %v12780_v60 = vpop.f32.mrf.mxu1  ;;  %12823 = vmatmul.mubr.msk.f32.gmra.mxu0 %vm1300_vm4, %v12777_v54  ;;  %12886 = vmatprep.subr.mxu0 %v11514_v56 }
0x124f   : > { %v4720_v38 = vpop.f32.mrf.mxu1 }
0x1250   : > { %12825 = vmatprep.mubr.msk.f32.mxu0 %vm1300_vm4, %v4720_v38 }
0x1251   : > { %v12800_v62 = vpop.f32.mrf.mxu1  ;;  %12826 = vmatmul.mubr.msk.f32.gmra.mxu0 %vm1300_vm4, %v12780_v60 }
0x1252   : > { %12864 = vmatprep.mubr.msk.f32.mxu0 %vm1201_vm3, %v15144_v11 }
0x1253   : > { %v4896_v63 = vpop.f32.mrf.mxu1 }
0x1255   : > { %v12803_v2 = vpop.f32.mrf.mxu1  ;;  %12865 = vmatmul.mubr.msk.f32.vlgmr.msra.gmra.mxu0 %vm1201_vm3, %v15152_v17 }
0x1256   : > { %12867 = vmatprep.mubr.msk.f32.mxu0 %vm1201_vm3, %v15155_v20  ;;  %12887 = vmatpush3.msra.mxu0 %v11514_v56 }
0x1257   : > { %v4906_v3 = vpop.f32.mrf.mxu1  ;;  %12888 = vmatprep.subr.mxu0 %v11513_v1 }
0x1258   : > { %12889 = vmatpush3.msra.mxu0 %v11513_v1 }
0x1259   : > { %v12806_v4 = vpop.f32.mrf.mxu1  ;;  %12868 = vmatmul.mubr.msk.f32.gmra.mxu0 %vm1201_vm3, %v15169_v26 }
0x125a   : > { %12828 = vmatprep.subr.mxu1 %v12806_v4  ;;  %12870 = vmatprep.mubr.msk.f32.mxu0 %vm1201_vm3, %v15172_v19 }
0x125b   : > { %v4916_v6 = vpop.f32.mrf.mxu1  ;;  %12829 = vmatpush3.msra.mxu1 %v12806_v4 }
0x125c   : > { %12830 = vmatprep.subr.mxu1 %v4916_v6 }
0x125d   : > { %12831 = vmatpush3.msra.mxu1 %v4916_v6  ;;  %12871 = vmatmul.mubr.msk.f32.gmra.mxu0 %vm1201_vm3, %v15182_v59 }
0x125e   : > { %12832 = vmatprep.subr.mxu1 %v12803_v2  ;;  %12890 = vmatprep.mubr.msk.f32.mxu0 %vm1201_vm3, %v15144_v11 }
0x125f   : > { %12833 = vmatpush3.msra.mxu1 %v12803_v2 }
0x1260   : > { %12834 = vmatprep.subr.mxu1 %v4906_v3 }
0x1261   : > { %12835 = vmatpush3.msra.mxu1 %v4906_v3  ;;  %12891 = vmatmul.mubr.msk.f32.vlgmr.msra.gmra.mxu0 %vm1201_vm3, %v15152_v17 }
0x1262   : > { %12836 = vmatprep.subr.mxu1 %v12800_v62  ;;  %12893 = vmatprep.mubr.msk.f32.mxu0 %vm1201_vm3, %v15155_v20 }
0x1263   : > { %12837 = vmatpush3.msra.mxu1 %v12800_v62 }
0x1264   : > { %12838 = vmatprep.subr.mxu1 %v4896_v63 }
0x1265   : > { %12839 = vmatpush3.msra.mxu1 %v4896_v63  ;;  %12894 = vmatmul.mubr.msk.f32.gmra.mxu0 %vm1201_vm3, %v15169_v26 }
0x1266   : > { %12896 = vmatprep.mubr.msk.f32.mxu0 %vm1201_vm3, %v15172_v19 }
0x1269   : > { %12897 = vmatmul.mubr.msk.f32.gmra.mxu0 %vm1201_vm3, %v15182_v59 }
0x1309   : > { %v12821_v7 = vpop.f32.mrf.mxu0 }
0x130a   : > { %v5033_v37 = vadd.f32 %v12821_v7, %v15230_v57 }
0x130b   : > { %v5027_v9 = vpop.f32.mrf.mxu0 }
0x130c   : > { %v5028_v55 = vadd.f32 %v5027_v9, %v15232_v29  ;;  %v5059_v13 = vsel %vm3618_vm6, %v5033_v37, -inf }
0x130d   : > { %5060 = vmax.xlane.f32.xlu1 %v5059_v13  ;;  %v12824_v14 = vpop.f32.mrf.mxu0 }
0x130e   : > { %v5043_v15 = vadd.f32 %v12824_v14, %v15235_v61  ;;  %v5056_v18 = vsel %vm3618_vm6, %v5028_v55, -inf }
0x130f   : > { %5057 = vmax.xlane.f32.xlu0 %v5056_v18  ;;  %v5037_v21 = vpop.f32.mrf.mxu0 }
0x1310   : > { %v5038_v22 = vadd.f32 %v5037_v21, %v15239_v23  ;;  %v5065_v24 = vsel %vm3618_vm6, %v5043_v15, -inf }
0x1311   : > { %5066 = vmax.xlane.f32.xlu1 %v5065_v24  ;;  %v12827_v25 = vpop.f32.mrf.mxu0 }
0x1312   : > { %v5053_v57 = vadd.f32 %v12827_v25, %v15243_v5  ;;  %v5062_v29 = vsel %vm3618_vm6, %v5038_v22, -inf }
0x1313   : > { %5063 = vmax.xlane.f32.xlu0 %v5062_v29  ;;  %v5047_v40 = vpop.f32.mrf.mxu0 }
0x1314   : > { %v5048_v27 = vadd.f32 %v5047_v40, %v15247_v51  ;;  %v5071_v61 = vsel %vm3618_vm6, %v5053_v57, -inf }
0x1315   : > { %5072 = vmax.xlane.f32.xlu1 %v5071_v61  ;;  %v15475_v28 = vpop.f32.mrf.mxu0 }
0x1316   : > { %v5068_v16 = vsel %vm3618_vm6, %v5048_v27, -inf }
0x1317   : > { %v15478_v23 = vpop.f32.mrf.mxu0  ;;  %5069 = vmax.xlane.f32.xlu0 %v5068_v16 }
0x1319   : > { %v15480_v30 = vpop.f32.mrf.mxu0 }
0x131b   : > { %v15482_v31 = vpop.f32.mrf.mxu0 }
0x131d   : > { %v15484_v5 = vpop.f32.mrf.mxu0 }
0x131f   : > { %v15486_v41 = vpop.f32.mrf.mxu0 }
0x1321   : > { %v12892_v32 = vpop.f32.mrf.mxu0 }
0x1323   : > { %v5621_v51 = vpop.f32.mrf.mxu0 }
0x1325   : > { %v12895_v33 = vpop.f32.mrf.mxu0 }
0x1327   : > { %v5631_v34 = vpop.f32.mrf.mxu0 }
0x1329   : > { %v12898_v35 = vpop.f32.mrf.mxu0 }
0x132a   : > { %12920 = vmatprep.subr.mxu0 %v12898_v35 }
0x132b   : > { %v5641_v36 = vpop.f32.mrf.mxu0  ;;  %12921 = vmatpush3.msra.mxu0 %v12898_v35 }
0x132c   : > { %12922 = vmatprep.subr.mxu0 %v5641_v36 }
0x132d   : > { %12923 = vmatpush3.msra.mxu0 %v5641_v36 }
0x132e   : > { %12924 = vmatprep.subr.mxu0 %v12895_v33 }
0x132f   : > { %12925 = vmatpush3.msra.mxu0 %v12895_v33 }
0x1330   : > { %12926 = vmatprep.subr.mxu0 %v5631_v34 }
0x1331   : > { %12927 = vmatpush3.msra.mxu0 %v5631_v34 }
0x1332   : > { %12928 = vmatprep.subr.mxu0 %v12892_v32 }
0x1333   : > { %12929 = vmatpush3.msra.mxu0 %v12892_v32 }
0x1334   : > { %12930 = vmatprep.subr.mxu0 %v5621_v51 }
0x1335   : > { %12931 = vmatpush3.msra.mxu0 %v5621_v51 }
0x1396   : > { %v5061_v50 = vpop.xlane.xlu1 %5060 }
0x1397   : > { %v5075_v46 = vsub.f32 %v5033_v37, %v5061_v50 }
0x1398   : > { %v5058_v52 = vpop.xlane.xlu0 %5057 }
0x1399   : > { %v5082_v54 = vmul.f32 1.442695, %v5075_v46  ;;  %v5074_v56 = vsub.f32 %v5028_v55, %v5058_v52 }
0x139a   : > { %v5067_v58 = vpop.xlane.xlu1 %5066 }
0x139b   : > { %13751 = vpow2.f32 %v5082_v54  ;;  %v5080_v60 = vmul.f32 1.442695, %v5074_v56  ;;  %v5077_v38 = vsub.f32 %v5043_v15, %v5067_v58 }
0x139c   : > { %v5064_v62 = vpop.xlane.xlu0 %5063 }
0x139d   : > { %13753 = vpow2.f32 %v5080_v60  ;;  %v5086_v63 = vmul.f32 1.442695, %v5077_v38  ;;  %v5076_v1 = vsub.f32 %v5038_v22, %v5064_v62 }
0x139e   : > { %v5073_v2 = vpop.xlane.xlu1 %5072 }
0x139f   : > { %13755 = vpow2.f32 %v5086_v63  ;;  %v5084_v3 = vmul.f32 1.442695, %v5076_v1  ;;  %v5079_v4 = vsub.f32 %v5053_v57, %v5073_v2  ;;  %v5456_v1 = vld [vmem:[#allocation21 + $0x38] sm:$0xff] }
0x13a0   : > { %v5070_v6 = vpop.xlane.xlu0 %5069 }
0x13a1   : > { %13757 = vpow2.f32 %v5084_v3  ;;  %v5090_v7 = vmul.f32 1.442695, %v5079_v4  ;;  %v5078_v9 = vsub.f32 %v5048_v27, %v5070_v6  ;;  %v5236_v27 = vld [vmem:[#allocation22 + $0x10] sm:$0xff] }
0x13a2   : > { %12849 = vmatprep.subr.mxu1 %v5236_v27  ;;  %v5455_v4 = vld [vmem:[#allocation21 + $0x30] sm:$0xff] }
0x13a3   : > { %13759 = vpow2.f32 %v5090_v7  ;;  %v5088_v37 = vmul.f32 1.442695, %v5078_v9 }
0x13a5   : > { %13761 = vpow2.f32 %v5088_v37 }
0x13a8   : > { %v13752_v55 = vpop.eup %13751 }
0x13a9   : > { %v5095_v13 = vsel %vm3618_vm6, %v13752_v55, 0.0 }
0x13aa   : > { %v13754_v14 = vpop.eup %13753  ;;  %5096 = vadd.xlane.f32.xlu1 %v5095_v13 }
0x13ab   : > { %v5092_v15 = vsel %vm3618_vm6, %v13754_v14, 0.0 }
0x13ac   : > { %v13756_v18 = vpop.eup %13755  ;;  %5093 = vadd.xlane.f32.xlu0 %v5092_v15 }
0x13ad   : > { %v5101_v21 = vsel %vm3618_vm6, %v13756_v18, 0.0 }
0x13ae   : > { %v13758_v22 = vpop.eup %13757  ;;  %5102 = vadd.xlane.f32.xlu1 %v5101_v21 }
0x13af   : > { %v5098_v24 = vsel %vm3618_vm6, %v13758_v22, 0.0 }
0x13b0   : > { %v13760_v25 = vpop.eup %13759  ;;  %5099 = vadd.xlane.f32.xlu0 %v5098_v24 }
0x13b1   : > { %v5107_v57 = vsel %vm3618_vm6, %v13760_v25, 0.0 }
0x13b2   : > { %v13762_v29 = vpop.eup %13761  ;;  %5108 = vadd.xlane.f32.xlu1 %v5107_v57 }
0x13b3   : > { %v5104_v40 = vsel %vm3618_vm6, %v13762_v29, 0.0 }
0x13b4   : > { %5105 = vadd.xlane.f32.xlu0 %v5104_v40 }
0x1433   : > { %v5097_v61 = vpop.xlane.xlu1 %5096 }
0x1434   : > { %13763 = vrcp.f32 %v5097_v61 }
0x1435   : > { %v5094_v16 = vpop.xlane.xlu0 %5093 }
0x1436   : > { %13765 = vrcp.f32 %v5094_v16 }
0x1437   : > { %v5103_v32 = vpop.xlane.xlu1 %5102 }
0x1438   : > { %13767 = vrcp.f32 %v5103_v32  ;;  %v14004_v32 = vld [vmem:[#allocation15] sm:$0xff] }
0x1439   : > { %v5100_v51 = vpop.xlane.xlu0 %5099 }
0x143a   : > { %13769 = vrcp.f32 %v5100_v51 }
0x143b   : > { %v5109_v33 = vpop.xlane.xlu1 %5108 }
0x143c   : > { %13771 = vrcp.f32 %v5109_v33 }
0x143d   : > { %v5106_v34 = vpop.xlane.xlu0 %5105 }
0x143e   : > { %13773 = vrcp.f32 %v5106_v34 }
0x1441   : > { %v13764_v35 = vpop.eup %13763 }
0x1442   : > { %v5117_v46 = vmul.f32 %v13764_v35, %v13752_v55  ;;  %v4608_v55 = vadd.f32 %v15343_v8, %v15416_v39 }
0x1443   : > { %v13766_v36 = vpop.eup %13765 }
0x1444   : > { %v5116_v50 = vmul.f32 %v13766_v36, %v13754_v14 }
0x1445   : > { %v13768_v52 = vpop.eup %13767 }
0x1446   : > { %12840 = vmatprep.mubr.msk.f32.mxu1 %vm3618_vm6, %v5116_v50  ;;  %v5119_v58 = vmul.f32 %v13768_v52, %v13756_v18  ;;  %v4618_v18 = vadd.f32 %v15348_v53, %v15420_v43  ;;  %v14003_v43 = vld [vmem:[#allocation15 + $0x8] sm:$0xff] }
0x1447   : > { %v13770_v54 = vpop.eup %13769  ;;  %12841 = vmatmul.mubr.msk.f32.vlgmr.msra.gmra.mxu1 %vm3618_vm6, %v5117_v46  ;;  %v14007_v46 = vld [vmem:[#allocation15 + $0x28] sm:$0xff] }
0x1448   : > { %v5118_v56 = vmul.f32 %v13770_v54, %v13758_v22  ;;  %12850 = vmatpush3.msra.mxu1 %v5236_v27 }
0x1449   : > { %v13772_v60 = vpop.eup %13771  ;;  %12873 = vmatprep.subr.mxu1 %v5456_v1 }
0x144a   : > { %12843 = vmatprep.mubr.msk.f32.mxu1 %vm3618_vm6, %v5118_v56  ;;  %v5121_v63 = vmul.f32 %v13772_v60, %v13760_v25  ;;  %v4628_v25 = vadd.f32 %v15352_v12, %v15424_v48 }
0x144b   : > { %v13774_v38 = vpop.eup %13773  ;;  %12844 = vmatmul.mubr.msk.f32.gmra.mxu1 %vm3618_vm6, %v5119_v58  ;;  %v14008_v58 = vld [vmem:[#allocation15 + $0x20] sm:$0xff] }
0x144c   : > { %v5120_v62 = vmul.f32 %v13774_v38, %v13762_v29 }
0x144e   : > { %12846 = vmatprep.mubr.msk.f32.mxu1 %vm3618_vm6, %v5120_v62 }
0x144f   : > { %12847 = vmatmul.mubr.msk.f32.gmra.mxu1 %vm3618_vm6, %v5121_v63 }
0x1507   : > { %v12842_v2 = vpop.f32.mrf.mxu1 }
0x1509   : > { %v5206_v3 = vpop.f32.mrf.mxu1 }
0x150a   : > { %12851 = vmatprep.mubr.msk.f32.mxu1 %vm1300_vm4, %v5206_v3 }
0x150b   : > { %v12845_v6 = vpop.f32.mrf.mxu1  ;;  %12852 = vmatmul.mubr.msk.f32.vlgmr.msra.gmra.mxu1 %vm1300_vm4, %v12842_v2 }
0x150c   : > { %12874 = vmatpush3.msra.mxu1 %v5456_v1 }
0x150d   : > { %v5216_v7 = vpop.f32.mrf.mxu1  ;;  %12875 = vmatprep.subr.mxu1 %v5455_v4 }
0x150e   : > { %12854 = vmatprep.mubr.msk.f32.mxu1 %vm1300_vm4, %v5216_v7  ;;  %12876 = vmatpush3.msra.mxu1 %v5455_v4 }
0x150f   : > { %v12848_v9 = vpop.f32.mrf.mxu1  ;;  %12855 = vmatmul.mubr.msk.f32.gmra.mxu1 %vm1300_vm4, %v12845_v6 }
0x1511   : > { %v5226_v37 = vpop.f32.mrf.mxu1 }
0x1512   : > { %12857 = vmatprep.mubr.msk.f32.mxu1 %vm1300_vm4, %v5226_v37 }
0x1513   : > { %12858 = vmatmul.mubr.msk.f32.gmra.mxu1 %vm1300_vm4, %v12848_v9 }
0x1514   : > { %12877 = vmatprep.mubr.msk.f32.mxu1 %vm1201_vm3, %v15144_v11 }
0x1517   : > { %12878 = vmatmul.mubr.msk.f32.vlgmr.msra.gmra.mxu1 %vm1201_vm3, %v15152_v17 }
0x1518   : > { %12880 = vmatprep.mubr.msk.f32.mxu1 %vm1201_vm3, %v15155_v20 }
0x151b   : > { %12881 = vmatmul.mubr.msk.f32.gmra.mxu1 %vm1201_vm3, %v15169_v26 }
0x151c   : > { %12883 = vmatprep.mubr.msk.f32.mxu1 %vm1201_vm3, %v15172_v19 }
0x151f   : > { %12884 = vmatmul.mubr.msk.f32.gmra.mxu1 %vm1201_vm3, %v15182_v59 }
0x1520   : > { %12911 = vmatprep.mubr.msk.f32.mxu1 %vm1300_vm4, %v15478_v23 }
0x15cb   : > { %v12853_v13 = vpop.f32.mrf.mxu1 }
0x15cc   : > { %v15522_v14 = vadd.f32 %v12853_v13, %v4608_v55 }
0x15cd   : > { %v15524_v15 = vpop.f32.mrf.mxu1 }
0x15cf   : > { %v12856_v21 = vpop.f32.mrf.mxu1 }
0x15d0   : > { %v15528_v22 = vadd.f32 %v12856_v21, %v4618_v18 }
0x15d1   : > { %v15530_v24 = vpop.f32.mrf.mxu1 }
0x15d3   : > { %v12859_v23 = vpop.f32.mrf.mxu1 }
0x15d4   : > { %v15534_v57 = vadd.f32 %v12859_v23, %v4628_v25 }
0x15d5   : > { %v15536_v8 = vpop.f32.mrf.mxu1 }
0x15d7   : > { %v12879_v39 = vpop.f32.mrf.mxu1 }
0x15d9   : > { %v5523_v29 = vpop.f32.mrf.mxu1 }
0x15db   : > { %v12882_v40 = vpop.f32.mrf.mxu1 }
0x15dd   : > { %v5533_v27 = vpop.f32.mrf.mxu1 }
0x15df   : > { %v12885_v61 = vpop.f32.mrf.mxu1 }
0x15e0   : > { %12899 = vmatprep.subr.msk.mxu1 %vm1300_vm4, %v12885_v61 }
0x15e1   : > { %v5543_v53 = vpop.f32.mrf.mxu1  ;;  %12900 = vmatpush3.xpose.msk.msra.mxu1 %vm1300_vm4, %v12885_v61 }
0x15e2   : > { %12901 = vmatprep.subr.msk.mxu1 %vm1300_vm4, %v5543_v53 }
0x15e5   : > { %12902 = vmatpush3.xpose.msk.msra.mxu1 %vm1300_vm4, %v5543_v53 }
0x15e6   : > { %12903 = vmatprep.subr.msk.mxu1 %vm1300_vm4, %v12882_v40 }
0x15e9   : > { %12904 = vmatpush3.xpose.msk.msra.mxu1 %vm1300_vm4, %v12882_v40 }
0x15ea   : > { %12905 = vmatprep.subr.msk.mxu1 %vm1300_vm4, %v5533_v27 }
0x15ed   : > { %12906 = vmatpush3.xpose.msk.msra.mxu1 %vm1300_vm4, %v5533_v27 }
0x15ee   : > { %12907 = vmatprep.subr.msk.mxu1 %vm1300_vm4, %v12879_v39 }
0x15f1   : > { %12908 = vmatpush3.xpose.msk.msra.mxu1 %vm1300_vm4, %v12879_v39 }
0x15f2   : > { %12909 = vmatprep.subr.msk.mxu1 %vm1300_vm4, %v5523_v29 }
0x15f5   : > { %12910 = vmatpush3.xpose.msk.msra.mxu1 %vm1300_vm4, %v5523_v29 }
0x15f8   : > { %12912 = vmatmul.mubr.msk.f32.vlgmr.msra.gmra.mxu1 %vm1300_vm4, %v15475_v28 }
0x15f9   : > { %12914 = vmatprep.mubr.msk.f32.mxu1 %vm1300_vm4, %v15482_v31  ;;  %v14005_v31 = vld [vmem:[#allocation15 + $0x18] sm:$0xff] }
0x15fc   : > { %12915 = vmatmul.mubr.msk.f32.gmra.mxu1 %vm1300_vm4, %v15480_v30 }
0x15fd   : > { %12917 = vmatprep.mubr.msk.f32.mxu1 %vm1300_vm4, %v15486_v41  ;;  %v14006_v41 = vld [vmem:[#allocation15 + $0x10] sm:$0xff] }
0x1600   : > { %12918 = vmatmul.mubr.msk.f32.gmra.mxu1 %vm1300_vm4, %v15484_v5 }
0x16b8   : > { %v12913_v12 = vpop.f32.mrf.mxu1 }
0x16b9   : > { %v5758_v48 = vadd.f32 %v14003_v43, %v12913_v12 }
0x16ba   : > { %v5752_v16 = vpop.f32.mrf.mxu1 }
0x16bb   : > { %v5753_v51 = vadd.f32 %v14004_v32, %v5752_v16  ;;  %v5784_v28 = vsel %vm3618_vm6, %v5758_v48, -inf }
0x16bc   : > { %5785 = vmax.xlane.f32.xlu1 %v5784_v28  ;;  %v12916_v33 = vpop.f32.mrf.mxu1 }
0x16bd   : > { %v5768_v34 = vadd.f32 %v14005_v31, %v12916_v33  ;;  %v5781_v30 = vsel %vm3618_vm6, %v5753_v51, -inf }
0x16be   : > { %v5762_v35 = vpop.f32.mrf.mxu1  ;;  %5782 = vmax.xlane.f32.xlu0 %v5781_v30 }
0x16bf   : > { %v5763_v36 = vadd.f32 %v14006_v41, %v5762_v35  ;;  %v5790_v5 = vsel %vm3618_vm6, %v5768_v34, -inf }
0x16c0   : > { %5791 = vmax.xlane.f32.xlu1 %v5790_v5  ;;  %v12919_v50 = vpop.f32.mrf.mxu1 }
0x16c1   : > { %v5778_v52 = vadd.f32 %v14007_v46, %v12919_v50  ;;  %v5787_v54 = vsel %vm3618_vm6, %v5763_v36, -inf }
0x16c2   : > { %v5772_v56 = vpop.f32.mrf.mxu1  ;;  %5788 = vmax.xlane.f32.xlu0 %v5787_v54 }
0x16c3   : > { %v5773_v60 = vadd.f32 %v14008_v58, %v5772_v56  ;;  %v5796_v38 = vsel %vm3618_vm6, %v5778_v52, -inf }
0x16c4   : > { %5797 = vmax.xlane.f32.xlu1 %v5796_v38 }
0x16c5   : > { %v5793_v62 = vsel %vm3618_vm6, %v5773_v60, -inf }
0x16c6   : > { %5794 = vmax.xlane.f32.xlu0 %v5793_v62 }
0x1745   : > { %v5786_v63 = vpop.xlane.xlu1 %5785 }
0x1746   : > { %v5800_v1 = vsub.f32 %v5758_v48, %v5786_v63 }
0x1747   : > { %v5783_v2 = vpop.xlane.xlu0 %5782 }
0x1748   : > { %v5807_v3 = vmul.f32 1.442695, %v5800_v1  ;;  %v5799_v4 = vsub.f32 %v5753_v51, %v5783_v2 }
0x1749   : > { %v5792_v6 = vpop.xlane.xlu1 %5791 }
0x174a   : > { %13775 = vpow2.f32 %v5807_v3  ;;  %v5805_v7 = vmul.f32 1.442695, %v5799_v4  ;;  %v5802_v9 = vsub.f32 %v5768_v34, %v5792_v6  ;;  %v5961_v34 = vld [vmem:[#allocation22 + $0x18] sm:$0xff] }
0x174b   : > { %v5789_v37 = vpop.xlane.xlu0 %5788  ;;  %12941 = vmatprep.subr.mxu0 %v5961_v34 }
0x174c   : > { %13777 = vpow2.f32 %v5805_v7  ;;  %v5811_v55 = vmul.f32 1.442695, %v5802_v9  ;;  %v5801_v13 = vsub.f32 %v5763_v36, %v5789_v37 }
0x174d   : > { %v5798_v18 = vpop.xlane.xlu1 %5797 }
0x174e   : > { %13779 = vpow2.f32 %v5811_v55  ;;  %v5809_v21 = vmul.f32 1.442695, %v5801_v13  ;;  %v5804_v25 = vsub.f32 %v5778_v52, %v5798_v18  ;;  %v4603_v13 = vadd.f32 %v15346_v44, %v15418_v42 }
0x174f   : > { %v5795_v23 = vpop.xlane.xlu0 %5794 }
0x1750   : > { %13781 = vpow2.f32 %v5809_v21  ;;  %v5815_v39 = vmul.f32 1.442695, %v5804_v25  ;;  %v5803_v29 = vsub.f32 %v5773_v60, %v5795_v23  ;;  %v11545_v21 = vld [vmem:[%s16637_s19] ss:$0 sm:$0xff]  ;;  %v5350_v25 = vadd.f32 %v15524_v15, %v4603_v13 }
0x1752   : > { %13783 = vpow2.f32 %v5815_v39  ;;  %v5813_v40 = vmul.f32 1.442695, %v5803_v29  ;;  %v4613_v29 = vadd.f32 %v15350_v10, %v15422_v45 }
0x1754   : > { %13785 = vpow2.f32 %v5813_v40 }
0x1757   : > { %v13776_v27 = vpop.eup %13775 }
0x1758   : > { %v5820_v61 = vsel %vm3618_vm6, %v13776_v27, 0.0 }
0x1759   : > { %v13778_v53 = vpop.eup %13777  ;;  %5821 = vadd.xlane.f32.xlu1 %v5820_v61 }
0x175a   : > { %v5817_v12 = vsel %vm3618_vm6, %v13778_v53, 0.0 }
0x175b   : > { %v13780_v43 = vpop.eup %13779  ;;  %5818 = vadd.xlane.f32.xlu0 %v5817_v12 }
0x175c   : > { %v5826_v48 = vsel %vm3618_vm6, %v13780_v43, 0.0 }
0x175d   : > { %v13782_v16 = vpop.eup %13781  ;;  %5827 = vadd.xlane.f32.xlu1 %v5826_v48 }
0x175e   : > { %v5823_v32 = vsel %vm3618_vm6, %v13782_v16, 0.0 }
0x175f   : > { %v13784_v51 = vpop.eup %13783  ;;  %5824 = vadd.xlane.f32.xlu0 %v5823_v32 }
0x1760   : > { %v5832_v28 = vsel %vm3618_vm6, %v13784_v51, 0.0 }
0x1761   : > { %v13786_v33 = vpop.eup %13785  ;;  %5833 = vadd.xlane.f32.xlu1 %v5832_v28 }
0x1762   : > { %v5829_v31 = vsel %vm3618_vm6, %v13786_v33, 0.0 }
0x1763   : > { %5830 = vadd.xlane.f32.xlu0 %v5829_v31 }
0x17e2   : > { %v5822_v30 = vpop.xlane.xlu1 %5821 }
0x17e3   : > { %13787 = vrcp.f32 %v5822_v30 }
0x17e4   : > { %v5819_v35 = vpop.xlane.xlu0 %5818 }
0x17e5   : > { %13789 = vrcp.f32 %v5819_v35 }
0x17e6   : > { %v5828_v41 = vpop.xlane.xlu1 %5827 }
0x17e7   : > { %13791 = vrcp.f32 %v5828_v41 }
0x17e8   : > { %v5825_v36 = vpop.xlane.xlu0 %5824 }
0x17e9   : > { %13793 = vrcp.f32 %v5825_v36 }
0x17ea   : > { %v5834_v5 = vpop.xlane.xlu1 %5833 }
0x17eb   : > { %13795 = vrcp.f32 %v5834_v5 }
0x17ec   : > { %v5831_v50 = vpop.xlane.xlu0 %5830 }
0x17ed   : > { %13797 = vrcp.f32 %v5831_v50 }
0x17f0   : > { %v13788_v46 = vpop.eup %13787 }
0x17f1   : > { %v5842_v56 = vmul.f32 %v13788_v46, %v13776_v27 }
0x17f2   : > { %v13790_v52 = vpop.eup %13789 }
0x17f3   : > { %v5841_v54 = vmul.f32 %v13790_v52, %v13778_v53  ;;  %v5352_v53 = vadd.f32 %v15530_v24, %v4613_v29 }
0x17f4   : > { %v13792_v58 = vpop.eup %13791 }
0x17f5   : > { %12932 = vmatprep.mubr.msk.f32.mxu0 %vm3618_vm6, %v5841_v54  ;;  %v5844_v62 = vmul.f32 %v13792_v58, %v13780_v43  ;;  %v4623_v43 = vadd.f32 %v15354_v47, %v15426_v49 }
0x17f6   : > { %v13794_v60 = vpop.eup %13793  ;;  %12933 = vmatmul.mubr.msk.f32.vlgmr.msra.gmra.mxu0 %vm3618_vm6, %v5842_v56 }
0x17f7   : > { %v5843_v38 = vmul.f32 %v13794_v60, %v13782_v16  ;;  %12942 = vmatpush3.msra.mxu0 %v5961_v34  ;;  %v5354_v45 = vadd.f32 %v15536_v8, %v4623_v43 }
0x17f8   : > { %v13796_v63 = vpop.eup %13795 }
0x17f9   : > { %12935 = vmatprep.mubr.msk.f32.mxu0 %vm3618_vm6, %v5843_v38  ;;  %v5846_v3 = vmul.f32 %v13796_v63, %v13784_v51 }
0x17fa   : > { %v13798_v1 = vpop.eup %13797  ;;  %12936 = vmatmul.mubr.msk.f32.gmra.mxu0 %vm3618_vm6, %v5844_v62 }
0x17fb   : > { %v5845_v2 = vmul.f32 %v13798_v1, %v13786_v33 }
0x17fd   : > { %12938 = vmatprep.mubr.msk.f32.mxu0 %vm3618_vm6, %v5845_v2 }
0x17fe   : > { %12939 = vmatmul.mubr.msk.f32.gmra.mxu0 %vm3618_vm6, %v5846_v3 }
0x18b6   : > { %v12934_v4 = vpop.f32.mrf.mxu0 }
0x18b8   : > { %v5931_v6 = vpop.f32.mrf.mxu0 }
0x18b9   : > { %12943 = vmatprep.mubr.msk.f32.mxu0 %vm1300_vm4, %v5931_v6 }
0x18ba   : > { %v12937_v7 = vpop.f32.mrf.mxu0  ;;  %12944 = vmatmul.mubr.msk.f32.vlgmr.msra.gmra.mxu0 %vm1300_vm4, %v12934_v4 }
0x18bc   : > { %v5941_v9 = vpop.f32.mrf.mxu0 }
0x18bd   : > { %12946 = vmatprep.mubr.msk.f32.mxu0 %vm1300_vm4, %v5941_v9 }
0x18be   : > { %v12940_v37 = vpop.f32.mrf.mxu0  ;;  %12947 = vmatmul.mubr.msk.f32.gmra.mxu0 %vm1300_vm4, %v12937_v7 }
0x18c0   : > { %v5951_v55 = vpop.f32.mrf.mxu0 }
0x18c1   : > { %12949 = vmatprep.mubr.msk.f32.mxu0 %vm1300_vm4, %v5951_v55 }
0x18c2   : > { %12950 = vmatmul.mubr.msk.f32.gmra.mxu0 %vm1300_vm4, %v12940_v37 }
0x197a   : > { %v12945_v18 = vpop.f32.mrf.mxu0 }
0x197b   : > { %v6076_v23 = vadd.f32 %v12945_v18, %v15522_v14 }
0x197c   : > { %v6046_v39 = vpop.f32.mrf.mxu0 }
0x197d   : > { %v6089_v40 = vadd.f32 %v11545_v21, %v6076_v23  ;;  %v6075_v27 = vadd.f32 %v6046_v39, %v5350_v25  ;;  %v6205_v23 = vld [vmem:[%s16640_s22 + $0x8] sm:$0xff]  ;;  %v6204_v39 = vld [vmem:[%s16640_s22] sm:$0xff] }
0x197e   : > { %v12948_v61 = vpop.f32.mrf.mxu0  ;;  %12952 = vmatprep.subr.mxu1 %v6205_v23 }
0x197f   : > { %v6088_v12 = vadd.f32 %v11545_v21, %v6075_v27  ;;  %v6078_v44 = vadd.f32 %v12948_v61, %v15528_v22  ;;  %v6095_v42 = vadd.f32 %v6089_v40, %v15152_v17  ;;  %12953 = vmatpush3.msra.mxu1 %v6205_v23 }
0x1980   : > { %v6056_v15 = vpop.f32.mrf.mxu0  ;;  %12954 = vmatprep.subr.mxu1 %v6204_v39 }
0x1981   : > { %v6091_v48 = vadd.f32 %v11545_v21, %v6078_v44  ;;  %v6077_v14 = vadd.f32 %v6056_v15, %v5352_v53  ;;  %v6105_v16 = vsel %vm1201_vm3, %v6095_v42, 0.0  ;;  %v6094_v10 = vadd.f32 %v6088_v12, %v15144_v11  ;;  %12955 = vmatpush3.msra.mxu1 %v6204_v39 }
0x1982   : > { %6106 = vadd.xlane.f32.xlu1 %v6105_v16  ;;  %v12951_v32 = vpop.f32.mrf.mxu0 }
0x1983   : > { %v6090_v24 = vadd.f32 %v11545_v21, %v6077_v14  ;;  %v6080_v51 = vadd.f32 %v12951_v32, %v15534_v57  ;;  %v6102_v22 = vsel %vm1201_vm3, %v6094_v10, 0.0  ;;  %v6097_v17 = vadd.f32 %v6091_v48, %v15169_v26 }
0x1984   : > { %6103 = vadd.xlane.f32.xlu0 %v6102_v22  ;;  %v6066_v47 = vpop.f32.mrf.mxu0 }
0x1985   : > { %v6093_v49 = vadd.f32 %v11545_v21, %v6080_v51  ;;  %v6079_v28 = vadd.f32 %v6066_v47, %v5354_v45  ;;  %v6111_v33 = vsel %vm1201_vm3, %v6097_v17, 0.0  ;;  %v6096_v31 = vadd.f32 %v6090_v24, %v15155_v20 }
0x1986   : > { %6112 = vadd.xlane.f32.xlu1 %v6111_v33 }
0x1987   : > { %v6092_v11 = vadd.f32 %v11545_v21, %v6079_v28  ;;  %v6108_v8 = vsel %vm1201_vm3, %v6096_v31, 0.0  ;;  %v6099_v34 = vadd.f32 %v6093_v49, %v15182_v59 }
0x1988   : > { %6109 = vadd.xlane.f32.xlu0 %v6108_v8  ;;  %v11547_v8 = vld [vmem:[%s16639_s21] ss:$0 sm:$0xff] }
0x1989   : > { %v6117_v57 = vsel %vm1201_vm3, %v6099_v34, 0.0  ;;  %v6098_v30 = vadd.f32 %v6092_v11, %v15172_v19 }
0x198a   : > { %6118 = vadd.xlane.f32.xlu1 %v6117_v57 }
0x198b   : > { %v6114_v26 = vsel %vm1201_vm3, %v6098_v30, 0.0 }
0x198c   : > { %6115 = vadd.xlane.f32.xlu0 %v6114_v26 }
0x1a0b   : > { %v6107_v35 = vpop.xlane.xlu1 %6106 }
0x1a0c   : > { %v6121_v41 = vmul.f32 0.0625, %v6107_v35 }
0x1a0d   : > { %v6104_v36 = vpop.xlane.xlu0 %6103 }
0x1a0e   : > { %v15611_v5 = vsub.f32 %v6095_v42, %v6121_v41  ;;  %v6120_v20 = vmul.f32 0.0625, %v6104_v36 }
0x1a0f   : > { %v6113_v50 = vpop.xlane.xlu1 %6112 }
0x1a10   : > { %v15613_v46 = vsub.f32 %v6094_v10, %v6120_v20  ;;  %v6123_v52 = vmul.f32 0.0625, %v6113_v50  ;;  %v6133_v59 = vmul.f32 %v15611_v5, %v15611_v5 }
0x1a11   : > { %v6110_v54 = vpop.xlane.xlu0 %6109 }
0x1a12   : > { %v15617_v56 = vsub.f32 %v6097_v17, %v6123_v52  ;;  %v6122_v19 = vmul.f32 0.0625, %v6110_v54  ;;  %v6141_v58 = vsel %vm1201_vm3, %v6133_v59, 0.0  ;;  %v6132_v60 = vmul.f32 %v15613_v46, %v15613_v46  ;;  %v11546_v17 = vld [vmem:[%s16638_s20] ss:$0 sm:$0xff] }
0x1a13   : > { %6142 = vadd.xlane.f32.xlu1 %v6141_v58  ;;  %v6119_v38 = vpop.xlane.xlu1 %6118 }
0x1a14   : > { %v6128_v62 = vsub.f32 %v6096_v31, %v6122_v19  ;;  %v6125_v63 = vmul.f32 0.0625, %v6119_v38  ;;  %v6138_v1 = vsel %vm1201_vm3, %v6132_v60, 0.0  ;;  %v6135_v2 = vmul.f32 %v15617_v56, %v15617_v56  ;;  %v6491_v60 = vld [vmem:[#allocation24 + $0x18] sm:$0xff]  ;;  %v6490_v38 = vld [vmem:[#allocation24 + $0x10] sm:$0xff] }
0x1a15   : > { %6139 = vadd.xlane.f32.xlu0 %v6138_v1  ;;  %v6116_v3 = vpop.xlane.xlu0 %6115  ;;  %12965 = vmatprep.subr.mxu0 %v6491_v60  ;;  %v11548_v1 = vld [vmem:[%s16641_s23] ss:$0 sm:$0xff] }
0x1a16   : > { %v6131_v4 = vsub.f32 %v6099_v34, %v6125_v63  ;;  %v6124_v6 = vmul.f32 0.0625, %v6116_v3  ;;  %v6147_v7 = vsel %vm1201_vm3, %v6135_v2, 0.0  ;;  %v6134_v9 = vmul.f32 %v6128_v62, %v6128_v62  ;;  %12966 = vmatpush3.msra.mxu0 %v6491_v60  ;;  %v6488_v63 = vld [vmem:[#allocation24] sm:$0xff] }
0x1a17   : > { %6148 = vadd.xlane.f32.xlu1 %v6147_v7  ;;  %12967 = vmatprep.subr.mxu0 %v6490_v38 }
0x1a18   : > { %v6130_v37 = vsub.f32 %v6098_v30, %v6124_v6  ;;  %v6144_v55 = vsel %vm1201_vm3, %v6134_v9, 0.0  ;;  %v6137_v13 = vmul.f32 %v6131_v4, %v6131_v4  ;;  %12968 = vmatpush3.msra.mxu0 %v6490_v38 }
0x1a19   : > { %6145 = vadd.xlane.f32.xlu0 %v6144_v55 }
0x1a1a   : > { %v6153_v18 = vsel %vm1201_vm3, %v6137_v13, 0.0  ;;  %v6136_v21 = vmul.f32 %v6130_v37, %v6130_v37 }
0x1a1b   : > { %6154 = vadd.xlane.f32.xlu1 %v6153_v18 }
0x1a1c   : > { %v6150_v25 = vsel %vm1201_vm3, %v6136_v21, 0.0 }
0x1a1d   : > { %6151 = vadd.xlane.f32.xlu0 %v6150_v25 }
0x1a9c   : > { %v6143_v29 = vpop.xlane.xlu1 %6142 }
0x1a9d   : > { %v6157_v40 = vmul.f32 0.0625, %v6143_v29 }
0x1a9e   : > { %v6140_v27 = vpop.xlane.xlu0 %6139 }
0x1a9f   : > { %v6163_v61 = vadd.f32 1e-06, %v6157_v40  ;;  %v6156_v53 = vmul.f32 0.0625, %v6140_v27 }
0x1aa0   : > { %v6149_v12 = vpop.xlane.xlu1 %6148 }
0x1aa1   : > { %13799 = vrsqrt.f32 %v6163_v61  ;;  %v6162_v44 = vadd.f32 1e-06, %v6156_v53  ;;  %v6159_v42 = vmul.f32 0.0625, %v6149_v12 }
0x1aa2   : > { %v6146_v43 = vpop.xlane.xlu0 %6145 }
0x1aa3   : > { %13801 = vrsqrt.f32 %v6162_v44  ;;  %v6165_v15 = vadd.f32 1e-06, %v6159_v42  ;;  %v6158_v48 = vmul.f32 0.0625, %v6146_v43 }
0x1aa4   : > { %v6155_v14 = vpop.xlane.xlu1 %6154 }
0x1aa5   : > { %13803 = vrsqrt.f32 %v6165_v15  ;;  %v6164_v16 = vadd.f32 1e-06, %v6158_v48  ;;  %v6161_v10 = vmul.f32 0.0625, %v6155_v14 }
0x1aa6   : > { %v6152_v45 = vpop.xlane.xlu0 %6151 }
0x1aa7   : > { %13805 = vrsqrt.f32 %v6164_v16  ;;  %v6167_v32 = vadd.f32 1e-06, %v6161_v10  ;;  %v6160_v24 = vmul.f32 0.0625, %v6152_v45 }
0x1aa9   : > { %13807 = vrsqrt.f32 %v6167_v32  ;;  %v6166_v51 = vadd.f32 1e-06, %v6160_v24 }
0x1aab   : > { %13809 = vrsqrt.f32 %v6166_v51 }
0x1aae   : > { %v13800_v22 = vpop.eup %13799 }
0x1aaf   : > { %v6175_v47 = vmul.f32 %v13800_v22, %v15611_v5 }
0x1ab0   : > { %v13802_v49 = vpop.eup %13801 }
0x1ab1   : > { %v6174_v28 = vmul.f32 %v13802_v49, %v15613_v46  ;;  %v6187_v31 = vmul.f32 %v11546_v17, %v6175_v47 }
0x1ab2   : > { %v13804_v33 = vpop.eup %13803 }
0x1ab3   : > { %v6177_v11 = vmul.f32 %v13804_v33, %v15617_v56  ;;  %v6186_v34 = vmul.f32 %v11546_v17, %v6174_v28  ;;  %v15646_v41 = vadd.f32 %v11547_v8, %v6187_v31 }
0x1ab4   : > { %v13806_v57 = vpop.eup %13805 }
0x1ab5   : > { %v15644_v30 = vadd.f32 %v11547_v8, %v6186_v34  ;;  %v6176_v26 = vmul.f32 %v13806_v57, %v6128_v62  ;;  %v6189_v36 = vmul.f32 %v11546_v17, %v6177_v11  ;;  %v6489_v62 = vld [vmem:[#allocation24 + $0x8] sm:$0xff] }
0x1ab6   : > { %v13808_v35 = vpop.eup %13807  ;;  %12969 = vmatprep.subr.mxu0 %v6489_v62 }
0x1ab7   : > { %v6179_v5 = vmul.f32 %v13808_v35, %v6131_v4  ;;  %12956 = vmatprep.mubr.msk.f32.mxu1 %vm1201_vm3, %v15644_v30  ;;  %v6188_v20 = vmul.f32 %v11546_v17, %v6176_v26  ;;  %v15654_v59 = vadd.f32 %v11547_v8, %v6189_v36  ;;  %12970 = vmatpush3.msra.mxu0 %v6489_v62 }
0x1ab8   : > { %v13810_v50 = vpop.eup %13809  ;;  %12957 = vmatmul.mubr.msk.f32.vlgmr.msra.gmra.mxu1 %vm1201_vm3, %v15646_v41  ;;  %12971 = vmatprep.subr.mxu0 %v6488_v63 }
0x1ab9   : > { %v15652_v46 = vadd.f32 %v11547_v8, %v6188_v20  ;;  %v6178_v52 = vmul.f32 %v13810_v50, %v6130_v37  ;;  %v6191_v54 = vmul.f32 %v11546_v17, %v6179_v5  ;;  %12972 = vmatpush3.msra.mxu0 %v6488_v63 }
0x1abb   : > { %12959 = vmatprep.mubr.msk.f32.mxu1 %vm1201_vm3, %v15652_v46  ;;  %v6190_v56 = vmul.f32 %v11546_v17, %v6178_v52  ;;  %v15662_v58 = vadd.f32 %v11547_v8, %v6191_v54 }
0x1abc   : > { %12960 = vmatmul.mubr.msk.f32.gmra.mxu1 %vm1201_vm3, %v15654_v59 }
0x1abd   : > { %v15660_v19 = vadd.f32 %v11547_v8, %v6190_v56 }
0x1abf   : > { %12962 = vmatprep.mubr.msk.f32.mxu1 %vm1201_vm3, %v15660_v19 }
0x1ac0   : > { %12963 = vmatmul.mubr.msk.f32.gmra.mxu1 %vm1201_vm3, %v15662_v58 }
0x1b78   : > { %v12958_v2 = vpop.f32.mrf.mxu1 }
0x1b79   : > { %v15671_v3 = vadd.f32 %v12958_v2, %v11548_v1 }
0x1b7a   : > { %v6297_v4 = vpop.f32.mrf.mxu1 }
0x1b7b   : > { %v15674_v6 = vmul.f32 0.70710677, %v15671_v3  ;;  %v15676_v7 = vadd.f32 %v11548_v1, %v6297_v4 }
0x1b7c   : > { %v12961_v9 = vpop.f32.mrf.mxu1 }
0x1b7d   : > { %v6351_v37 = vand.u32 2147483647, %v15674_v6  ;;  %v15680_v55 = vmul.f32 0.70710677, %v15676_v7  ;;  %v15682_v13 = vadd.f32 %v12961_v9, %v11548_v1  ;;  %vm6339_vm7 = vcmp.lt.f32.partialorder %v15674_v6, 0.0 }
0x1b7e   : > { %v6307_v18 = vpop.f32.mrf.mxu1 }
0x1b7f   : > { %v6357_v21 = vmul.f32 0.3275911, %v6351_v37  ;;  %v6350_v25 = vand.u32 2147483647, %v15680_v55  ;;  %v15686_v23 = vmul.f32 0.70710677, %v15682_v13  ;;  %v15688_v39 = vadd.f32 %v11548_v1, %v6307_v18 }
0x1b80   : > { %v12964_v29 = vpop.f32.mrf.mxu1  ;;  %v6435_v45 = vsub.f32 0.0, %v6351_v37  ;;  %vm6338_vm8 = vcmp.lt.f32.partialorder %v15680_v55, 0.0 }
0x1b81   : > { %v6363_v40 = vadd.f32 1.0, %v6357_v21  ;;  %v6356_v27 = vmul.f32 0.3275911, %v6350_v25  ;;  %v6353_v61 = vand.u32 2147483647, %v15686_v23  ;;  %v15695_v48 = vadd.f32 %v12964_v29, %v11548_v1 }
0x1b82   : > { %v15692_v53 = vmul.f32 0.70710677, %v15688_v39  ;;  %v6317_v42 = vpop.f32.mrf.mxu1  ;;  %v6434_v22 = vsub.f32 0.0, %v6350_v25  ;;  %v6441_v49 = vmul.f32 %v6435_v45, %v6351_v37  ;;  %vm6341_vm9 = vcmp.lt.f32.partialorder %v15686_v23, 0.0 }
0x1b83   : > { %13811 = vrcp.f32 %v6363_v40  ;;  %v6362_v12 = vadd.f32 1.0, %v6356_v27  ;;  %v6359_v44 = vmul.f32 0.3275911, %v6353_v61  ;;  %v15697_v16 = vadd.f32 %v11548_v1, %v6317_v42 }
0x1b84   : > { %v6352_v43 = vand.u32 2147483647, %v15692_v53  ;;  %v15700_v10 = vmul.f32 0.70710677, %v15695_v48  ;;  %v6437_v28 = vsub.f32 0.0, %v6353_v61  ;;  %v6440_v8 = vmul.f32 %v6434_v22, %v6350_v25 }
0x1b85   : > { %13813 = vrcp.f32 %v6362_v12  ;;  %v6365_v15 = vadd.f32 1.0, %v6359_v44  ;;  %v15703_v24 = vmul.f32 0.70710677, %v15697_v16  ;;  %v6448_v26 = vmul.f32 1.442695, %v6441_v49 }
0x1b86   : > { %v6358_v14 = vmul.f32 0.3275911, %v6352_v43  ;;  %v6355_v51 = vand.u32 2147483647, %v15700_v10  ;;  %v6443_v35 = vmul.f32 %v6437_v28, %v6353_v61  ;;  %v6436_v36 = vsub.f32 0.0, %v6352_v43 }
0x1b87   : > { %13815 = vrcp.f32 %v6365_v15  ;;  %v6354_v47 = vand.u32 2147483647, %v15703_v24  ;;  %v6446_v52 = vmul.f32 1.442695, %v6440_v8  ;;  %vm6340_vm10 = vcmp.lt.f32.partialorder %v15692_v53, 0.0 }
0x1b88   : > { %v6364_v32 = vadd.f32 1.0, %v6358_v14  ;;  %v6361_v17 = vmul.f32 0.3275911, %v6355_v51  ;;  %v6452_v60 = vmul.f32 1.442695, %v6443_v35  ;;  %v6442_v38 = vmul.f32 %v6436_v36, %v6352_v43 }
0x1b89   : > { %v6360_v31 = vmul.f32 0.3275911, %v6354_v47  ;;  %v6439_v1 = vsub.f32 0.0, %v6355_v51  ;;  %v6438_v29 = vsub.f32 0.0, %v6354_v47  ;;  %vm6343_vm12 = vcmp.lt.f32.partialorder %v15700_v10, 0.0 }
0x1b8a   : > { %13817 = vrcp.f32 %v6364_v32  ;;  %v6367_v33 = vadd.f32 1.0, %v6361_v17  ;;  %v6450_v25 = vmul.f32 1.442695, %v6442_v38  ;;  %vm6342_vm13 = vcmp.lt.f32.partialorder %v15703_v24, 0.0  ;;  %v11555_v24 = vld [vmem:[%s16643_s25] ss:$0 sm:$0xff] }
0x1b8b   : > { %v6366_v34 = vadd.f32 1.0, %v6360_v31  ;;  %v6445_v61 = vmul.f32 %v6439_v1, %v6355_v51  ;;  %v6444_v32 = vmul.f32 %v6438_v29, %v6354_v47 }
0x1b8c   : > { %13819 = vrcp.f32 %v6367_v33 }
0x1b8d   : > { %13821 = vrcp.f32 %v6366_v34  ;;  %v6456_v28 = vmul.f32 1.442695, %v6445_v61  ;;  %v6454_v36 = vmul.f32 1.442695, %v6444_v32 }
0x1b8e   : > { %13823 = vpow2.f32 %v6448_v26 }
0x1b8f   : > { %13825 = vpow2.f32 %v6446_v52 }
0x1b90   : > { %v13812_v11 = vpop.eup %13811  ;;  %13827 = vpow2.f32 %v6452_v60 }
0x1b91   : > { %v6381_v57 = vmul.f32 1.0614054, %v13812_v11  ;;  %13829 = vpow2.f32 %v6450_v25 }
0x1b92   : > { %v13814_v5 = vpop.eup %13813  ;;  %13831 = vpow2.f32 %v6456_v28 }
0x1b93   : > { %v6387_v20 = vadd.f32 -1.4531521, %v6381_v57  ;;  %v6380_v50 = vmul.f32 1.0614054, %v13814_v5  ;;  %13833 = vpow2.f32 %v6454_v36 }
0x1b94   : > { %v15707_v54 = vpop.eup %13815 }
0x1b95   : > { %v6393_v56 = vmul.f32 %v13812_v11, %v6387_v20  ;;  %v6386_v62 = vadd.f32 -1.4531521, %v6380_v50  ;;  %v6383_v63 = vmul.f32 1.0614054, %v15707_v54 }
0x1b97   : > { %v6399_v2 = vadd.f32 1.4214138, %v6393_v56  ;;  %v15710_v4 = vpop.eup %13817  ;;  %v6392_v9 = vmul.f32 %v13814_v5, %v6386_v62  ;;  %v6389_v37 = vadd.f32 -1.4531521, %v6383_v63  ;;  %v14470_v63 = vmov 1.0  }
0x1b98   : > { %v6382_v21 = vmul.f32 1.0614054, %v15710_v4  ;;  %v6346_v36 = vsel %vm6340_vm10, -1.0, %v14470_v63 }
0x1b99   : > { %v6405_v18 = vmul.f32 %v13812_v11, %v6399_v2  ;;  %v6398_v40 = vadd.f32 1.4214138, %v6392_v9  ;;  %v6395_v27 = vmul.f32 %v15707_v54, %v6389_v37  ;;  %v15714_v15 = vpop.eup %13819 }
0x1b9a   : > { %v6388_v44 = vadd.f32 -1.4531521, %v6382_v21  ;;  %v6385_v49 = vmul.f32 1.0614054, %v15714_v15  ;;  %v15719_v51 = vpop.eup %13821 }
0x1b9b   : > { %v6411_v12 = vadd.f32 -0.28449672, %v6405_v18  ;;  %v6404_v42 = vmul.f32 %v13814_v5, %v6398_v40  ;;  %v6401_v43 = vadd.f32 1.4214138, %v6395_v27  ;;  %v6384_v47 = vmul.f32 1.0614054, %v15719_v51  ;;  %v13824_v20 = vpop.eup %13823 }
0x1b9c   : > { %v6394_v45 = vmul.f32 %v15710_v4, %v6388_v44  ;;  %v6391_v57 = vadd.f32 -1.4531521, %v6385_v49  ;;  %v13826_v37 = vpop.eup %13825 }
0x1b9d   : > { %v6417_v14 = vmul.f32 %v13812_v11, %v6411_v12  ;;  %v6410_v22 = vadd.f32 -0.28449672, %v6404_v42  ;;  %v6407_v17 = vmul.f32 %v15707_v54, %v6401_v43  ;;  %v6390_v62 = vadd.f32 -1.4531521, %v6384_v47  ;;  %v13828_v61 = vpop.eup %13827 }
0x1b9e   : > { %v6400_v31 = vadd.f32 1.4214138, %v6394_v45  ;;  %v6397_v56 = vmul.f32 %v15714_v15, %v6391_v57  ;;  %v13830_v32 = vpop.eup %13829 }
0x1b9f   : > { %v6423_v33 = vadd.f32 0.2548296, %v6417_v14  ;;  %v6416_v8 = vmul.f32 %v13814_v5, %v6410_v22  ;;  %v6413_v34 = vadd.f32 -0.28449672, %v6407_v17  ;;  %v6396_v25 = vmul.f32 %v15719_v51, %v6390_v62 }
0x1ba0   : > { %v6406_v35 = vmul.f32 %v15710_v4, %v6400_v31  ;;  %v6403_v9 = vadd.f32 1.4214138, %v6397_v56  ;;  %v6344_v14 = vsel %vm6338_vm8, -1.0, %v14470_v63  ;;  %v6326_v31 = vmul.f32 0.5, %v15676_v7 }
0x1ba1   : > { %v6429_v26 = vmul.f32 %v13812_v11, %v6423_v33  ;;  %v6422_v50 = vadd.f32 0.2548296, %v6416_v8  ;;  %v6419_v52 = vmul.f32 %v15707_v54, %v6413_v34  ;;  %v6345_v11 = vsel %vm6339_vm7, -1.0, %v14470_v63 }
0x1ba2   : > { %v6412_v38 = vadd.f32 -0.28449672, %v6406_v35  ;;  %v6409_v27 = vmul.f32 %v15714_v15, %v6403_v9  ;;  %v6402_v12 = vadd.f32 1.4214138, %v6396_v25  ;;  %v6349_v9 = vsel %vm6343_vm12, -1.0, %v14470_v63 }
0x1ba3   : > { %v6459_v60 = vmul.f32 %v13824_v20, %v6429_v26  ;;  %v6428_v1 = vmul.f32 %v13814_v5, %v6422_v50  ;;  %v6425_v2 = vadd.f32 0.2548296, %v6419_v52  ;;  %v13832_v50 = vpop.eup %13831 }
0x1ba4   : > { %v6418_v21 = vmul.f32 %v15710_v4, %v6412_v38  ;;  %v6415_v43 = vadd.f32 -0.28449672, %v6409_v27  ;;  %v6408_v55 = vmul.f32 %v15719_v51, %v6402_v12 }
0x1ba5   : > { %v6465_v18 = vsub.f32 1.0, %v6459_v60  ;;  %v6458_v29 = vmul.f32 %v13826_v37, %v6428_v1  ;;  %v6431_v40 = vmul.f32 %v15707_v54, %v6425_v2  ;;  %v6347_v54 = vsel %vm6341_vm9, -1.0, %v14470_v63 }
0x1ba6   : > { %v6424_v5 = vadd.f32 0.2548296, %v6418_v21  ;;  %v6421_v49 = vmul.f32 %v15714_v15, %v6415_v43  ;;  %v6414_v33 = vadd.f32 -0.28449672, %v6408_v55 }
0x1ba7   : > { %v6471_v6 = vmul.f32 %v6465_v18, %v6345_v11  ;;  %v6464_v44 = vsub.f32 1.0, %v6458_v29  ;;  %v6461_v42 = vmul.f32 %v13828_v61, %v6431_v40  ;;  %v13834_v11 = vpop.eup %13833  ;;  %v6331_v40 = vmul.f32 0.5, %v15695_v48 }
0x1ba8   : > { %v6430_v45 = vmul.f32 %v15710_v4, %v6424_v5  ;;  %v6427_v57 = vadd.f32 0.2548296, %v6421_v49  ;;  %v6327_v4 = vmul.f32 0.5, %v15671_v3  ;;  %v6420_v35 = vmul.f32 %v15719_v51, %v6414_v33 }
0x1ba9   : > { %v6470_v22 = vmul.f32 %v6464_v44, %v6344_v14  ;;  %v6467_v17 = vsub.f32 1.0, %v6461_v42  ;;  %v6477_v28 = vadd.f32 1.0, %v6471_v6  ;;  %v6328_v3 = vmul.f32 0.5, %v15688_v39 }
0x1baa   : > { %v6460_v23 = vmul.f32 %v13830_v32, %v6430_v45  ;;  %v6433_v20 = vmul.f32 %v15714_v15, %v6427_v57  ;;  %v6426_v56 = vadd.f32 0.2548296, %v6420_v35  ;;  %v6329_v15 = vmul.f32 0.5, %v15682_v13 }
0x1bab   : > { %v6476_v8 = vadd.f32 1.0, %v6470_v22  ;;  %v6473_v34 = vmul.f32 %v6467_v17, %v6347_v54  ;;  %v6483_v53 = vmul.f32 %v6477_v28, %v6327_v4  ;;  %v6348_v39 = vsel %vm6342_vm13, -1.0, %v14470_v63 }
0x1bac   : > { %v6466_v26 = vsub.f32 1.0, %v6460_v23  ;;  %v6463_v7 = vmul.f32 %v13832_v50, %v6433_v20  ;;  %v6432_v62 = vmul.f32 %v15719_v51, %v6426_v56  ;;  %v6330_v13 = vmul.f32 0.5, %v15697_v16 }
0x1bad   : > { %v6482_v47 = vmul.f32 %v6476_v8, %v6326_v31  ;;  %v6479_v60 = vadd.f32 1.0, %v6473_v34 }
0x1bae   : > { %v6472_v52 = vmul.f32 %v6466_v26, %v6346_v36  ;;  %v6469_v1 = vsub.f32 1.0, %v6463_v7  ;;  %v6462_v10 = vmul.f32 %v13834_v11, %v6432_v62 }
0x1baf   : > { %12973 = vmatprep.mubr.msk.f32.mxu0 %vm6499_vm11, %v6482_v47  ;;  %v6485_v37 = vmul.f32 %v6479_v60, %v6329_v15 }
0x1bb0   : > { %v6478_v38 = vadd.f32 1.0, %v6472_v52  ;;  %12974 = vmatmul.mubr.msk.f32.vlgmr.msra.gmra.mxu0 %vm6499_vm11, %v6483_v53  ;;  %v6475_v18 = vmul.f32 %v6469_v1, %v6349_v9  ;;  %v6468_v21 = vsub.f32 1.0, %v6462_v10 }
0x1bb2   : > { %v6484_v2 = vmul.f32 %v6478_v38, %v6328_v3  ;;  %v6474_v51 = vmul.f32 %v6468_v21, %v6348_v39  ;;  %v6481_v25 = vadd.f32 1.0, %v6475_v18 }
0x1bb4   : > { %12976 = vmatprep.mubr.msk.f32.mxu0 %vm6499_vm11, %v6484_v2  ;;  %v6480_v29 = vadd.f32 1.0, %v6474_v51  ;;  %v6487_v61 = vmul.f32 %v6481_v25, %v6331_v40  ;;  %v6841_v51 = vld [vmem:[#allocation21 + $0x48] sm:$0xff] }
0x1bb5   : > { %12977 = vmatmul.mubr.msk.f32.gmra.mxu0 %vm6499_vm11, %v6485_v37  ;;  %v6725_v25 = vld [vmem:[#allocation19 + $0x48] sm:$0xff]  ;;  %12995 = vmatprep.subr.mxu0 %v6841_v51 }
0x1bb6   : > { %v6486_v27 = vmul.f32 %v6480_v29, %v6330_v13  ;;  %12982 = vmatprep.subr.mxu1 %v6725_v25  ;;  %12996 = vmatpush3.msra.mxu0 %v6841_v51  ;;  %v6724_v13 = vld [vmem:[#allocation19 + $0x40] sm:$0xff]  ;;  %v11577_v40 = vld [vmem:[%s16635_s17 + $0x48] sm:$0xff] }
0x1bb7   : > { %12983 = vmatpush3.msra.mxu1 %v6725_v25  ;;  %v6840_v29 = vld [vmem:[#allocation21 + $0x40] sm:$0xff] }
0x1bb8   : > { %12979 = vmatprep.mubr.msk.f32.mxu0 %vm6499_vm11, %v6486_v27  ;;  %12984 = vmatprep.subr.mxu1 %v6724_v13 }
0x1bb9   : > { %12980 = vmatmul.mubr.msk.f32.gmra.mxu0 %vm6499_vm11, %v6487_v61  ;;  %12997 = vmatprep.subr.mxu0 %v6840_v29 }
0x1bba   : > { %12985 = vmatpush3.msra.mxu1 %v6724_v13  ;;  %12998 = vmatpush3.msra.mxu0 %v6840_v29 }
0x1bbb   : > { %13008 = vmatprep.subr.mxu1 %v11577_v40 }
0x1c70   : > { %v12975_v6 = vpop.f32.mrf.mxu0 }
0x1c71   : > { %v6590_v5 = vadd.f32 %v12975_v6, %v11555_v24 }
0x1c72   : > { %v6584_v12 = vpop.f32.mrf.mxu0 }
0x1c73   : > { %v6585_v44 = vadd.f32 %v11555_v24, %v6584_v12  ;;  %v6614_v42 = vadd.f32 %v6590_v5, %v15646_v41 }
0x1c75   : > { %v12978_v16 = vpop.f32.mrf.mxu0  ;;  %v6624_v43 = vsel %vm1201_vm3, %v6614_v42, 0.0  ;;  %v6613_v48 = vadd.f32 %v6585_v44, %v15644_v30 }
0x1c76   : > { %v6600_v14 = vadd.f32 %v12978_v16, %v11555_v24  ;;  %6625 = vadd.xlane.f32.xlu1 %v6624_v43 }
0x1c77   : > { %v6594_v45 = vpop.f32.mrf.mxu0  ;;  %v6621_v55 = vsel %vm1201_vm3, %v6613_v48, 0.0 }
0x1c78   : > { %v6595_v32 = vadd.f32 %v11555_v24, %v6594_v45  ;;  %6622 = vadd.xlane.f32.xlu0 %v6621_v55  ;;  %v6616_v22 = vadd.f32 %v6600_v14, %v15654_v59 }
0x1c79   : > { %v12981_v49 = vpop.f32.mrf.mxu0 }
0x1c7a   : > { %v6630_v54 = vsel %vm1201_vm3, %v6616_v22, 0.0  ;;  %v6615_v17 = vadd.f32 %v6595_v32, %v15652_v46  ;;  %v6610_v28 = vadd.f32 %v12981_v49, %v11555_v24  ;;  %v11562_v49 = vld [vmem:[%s16644_s26] ss:$0 sm:$0xff] }
0x1c7b   : > { %6631 = vadd.xlane.f32.xlu1 %v6630_v54  ;;  %v6604_v30 = vpop.f32.mrf.mxu0 }
0x1c7c   : > { %v6627_v41 = vsel %vm1201_vm3, %v6615_v17, 0.0  ;;  %v6605_v23 = vadd.f32 %v11555_v24, %v6604_v30  ;;  %v6618_v33 = vadd.f32 %v6610_v28, %v15662_v58 }
0x1c7d   : > { %6628 = vadd.xlane.f32.xlu0 %v6627_v41 }
0x1c7e   : > { %v6636_v31 = vsel %vm1201_vm3, %v6618_v33, 0.0  ;;  %v6617_v8 = vadd.f32 %v6605_v23, %v15660_v19 }
0x1c7f   : > { %6637 = vadd.xlane.f32.xlu1 %v6636_v31 }
0x1c80   : > { %v6633_v59 = vsel %vm1201_vm3, %v6617_v8, 0.0 }
0x1c81   : > { %6634 = vadd.xlane.f32.xlu0 %v6633_v59 }
0x1cff   : > { %v6626_v34 = vpop.xlane.xlu1 %6625 }
0x1d00   : > { %v6640_v46 = vmul.f32 0.0625, %v6626_v34 }
0x1d01   : > { %v6623_v57 = vpop.xlane.xlu0 %6622 }
0x1d02   : > { %v15776_v4 = vsub.f32 %v6614_v42, %v6640_v46  ;;  %v6639_v26 = vmul.f32 0.0625, %v6623_v57 }
0x1d04   : > { %v15778_v35 = vsub.f32 %v6613_v48, %v6639_v26  ;;  %v6632_v47 = vpop.xlane.xlu1 %6631  ;;  %v6652_v58 = vmul.f32 %v15776_v4, %v15776_v4 }
0x1d05   : > { %v6642_v36 = vmul.f32 0.0625, %v6632_v47 }
0x1d06   : > { %v6629_v20 = vpop.xlane.xlu0 %6628  ;;  %v6660_v19 = vsel %vm1201_vm3, %v6652_v58, 0.0  ;;  %v6651_v50 = vmul.f32 %v15778_v35, %v15778_v35 }
0x1d07   : > { %v15785_v53 = vsub.f32 %v6616_v22, %v6642_v36  ;;  %v6641_v52 = vmul.f32 0.0625, %v6629_v20  ;;  %6661 = vadd.xlane.f32.xlu1 %v6660_v19 }
0x1d08   : > { %v6657_v56 = vsel %vm1201_vm3, %v6651_v50, 0.0  ;;  %v6638_v62 = vpop.xlane.xlu1 %6637 }
0x1d09   : > { %v15788_v60 = vsub.f32 %v6615_v17, %v6641_v52  ;;  %6658 = vadd.xlane.f32.xlu0 %v6657_v56  ;;  %v6654_v7 = vmul.f32 %v15785_v53, %v15785_v53  ;;  %v6644_v11 = vmul.f32 0.0625, %v6638_v62 }
0x1d0a   : > { %v6635_v1 = vpop.xlane.xlu0 %6634 }
0x1d0b   : > { %v6666_v3 = vsel %vm1201_vm3, %v6654_v7, 0.0  ;;  %v6653_v38 = vmul.f32 %v15788_v60, %v15788_v60  ;;  %v15796_v2 = vsub.f32 %v6618_v33, %v6644_v11  ;;  %v6643_v9 = vmul.f32 0.0625, %v6635_v1 }
0x1d0c   : > { %6667 = vadd.xlane.f32.xlu1 %v6666_v3 }
0x1d0d   : > { %v6663_v15 = vsel %vm1201_vm3, %v6653_v38, 0.0  ;;  %v15798_v10 = vsub.f32 %v6617_v8, %v6643_v9  ;;  %v6656_v37 = vmul.f32 %v15796_v2, %v15796_v2  ;;  %v11563_v8 = vld [vmem:[%s16645_s27] ss:$0 sm:$0xff] }
0x1d0e   : > { %6664 = vadd.xlane.f32.xlu0 %v6663_v15 }
0x1d0f   : > { %v6672_v18 = vsel %vm1201_vm3, %v6656_v37, 0.0  ;;  %v6655_v21 = vmul.f32 %v15798_v10, %v15798_v10 }
0x1d10   : > { %6673 = vadd.xlane.f32.xlu1 %v6672_v18 }
0x1d11   : > { %v6669_v39 = vsel %vm1201_vm3, %v6655_v21, 0.0 }
0x1d12   : > { %6670 = vadd.xlane.f32.xlu0 %v6669_v39 }
0x1d90   : > { %v6662_v27 = vpop.xlane.xlu1 %6661 }
0x1d91   : > { %v6676_v61 = vmul.f32 0.0625, %v6662_v27 }
0x1d92   : > { %v6659_v24 = vpop.xlane.xlu0 %6658 }
0x1d93   : > { %v6682_v6 = vadd.f32 1e-06, %v6676_v61  ;;  %v6675_v5 = vmul.f32 0.0625, %v6659_v24  ;;  %v7447_v61 = vld [vmem:[#allocation21 + $0x58] sm:$0xff]  ;;  %v7446_v24 = vld [vmem:[#allocation21 + $0x50] sm:$0xff] }
0x1d95   : > { %13835 = vrsqrt.f32 %v6682_v6  ;;  %v6681_v12 = vadd.f32 1e-06, %v6675_v5  ;;  %v6668_v44 = vpop.xlane.xlu1 %6667  ;;  %v15902_v5 = vld [vmem:[#allocation15 + $0x8] sm:$0xff] }
0x1d96   : > { %v6678_v42 = vmul.f32 0.0625, %v6668_v44 }
0x1d97   : > { %13837 = vrsqrt.f32 %v6681_v12  ;;  %v6665_v16 = vpop.xlane.xlu0 %6664 }
0x1d98   : > { %v6684_v43 = vadd.f32 1e-06, %v6678_v42  ;;  %v6677_v48 = vmul.f32 0.0625, %v6665_v16  ;;  %v15905_v42 = vld [vmem:[#allocation15] sm:$0xff] }
0x1d99   : > { %v6674_v45 = vpop.xlane.xlu1 %6673 }
0x1d9a   : > { %13839 = vrsqrt.f32 %v6684_v43  ;;  %v6683_v14 = vadd.f32 1e-06, %v6677_v48  ;;  %v6680_v55 = vmul.f32 0.0625, %v6674_v45 }
0x1d9b   : > { %v6671_v32 = vpop.xlane.xlu0 %6670 }
0x1d9c   : > { %13841 = vrsqrt.f32 %v6683_v14  ;;  %v6686_v22 = vadd.f32 1e-06, %v6680_v55  ;;  %v6679_v54 = vmul.f32 0.0625, %v6671_v32  ;;  %v15909_v14 = vld [vmem:[#allocation15 + $0x18] sm:$0xff] }
0x1d9e   : > { %13843 = vrsqrt.f32 %v6686_v22  ;;  %v6685_v41 = vadd.f32 1e-06, %v6679_v54  ;;  %v15913_v22 = vld [vmem:[#allocation15 + $0x10] sm:$0xff] }
0x1da0   : > { %13845 = vrsqrt.f32 %v6685_v41 }
0x1da2   : > { %v13836_v17 = vpop.eup %13835 }
0x1da3   : > { %v6694_v28 = vmul.f32 %v13836_v17, %v15776_v4 }
0x1da4   : > { %v13838_v30 = vpop.eup %13837 }
0x1da5   : > { %v6693_v23 = vmul.f32 %v13838_v30, %v15778_v35  ;;  %v6706_v33 = vmul.f32 %v11562_v49, %v6694_v28  ;;  %v11576_v35 = vld [vmem:[%s16635_s17 + $0x40] sm:$0xff] }
0x1da7   : > { %v13840_v31 = vpop.eup %13839  ;;  %v6705_v59 = vmul.f32 %v11562_v49, %v6693_v23  ;;  %v15820_v26 = vadd.f32 %v11563_v8, %v6706_v33  ;;  %v15921_v33 = vld [vmem:[#allocation15 + $0x20] sm:$0xff] }
0x1da8   : > { %v6696_v34 = vmul.f32 %v13840_v31, %v15785_v53 }
0x1da9   : > { %v13842_v46 = vpop.eup %13841  ;;  %v15818_v57 = vadd.f32 %v11563_v8, %v6705_v59 }
0x1daa   : > { %v6695_v4 = vmul.f32 %v13842_v46, %v15788_v60  ;;  %v6708_v47 = vmul.f32 %v11562_v49, %v6696_v34 }
0x1dab   : > { %12986 = vmatprep.mubr.msk.f32.mxu1 %vm1201_vm3, %v15818_v57  ;;  %12999 = vmatprep.mubr.msk.f32.mxu0 %vm1201_vm3, %v15818_v57  ;;  %v13844_v20 = vpop.eup %13843 }
0x1dac   : > { %v6707_v58 = vmul.f32 %v11562_v49, %v6695_v4  ;;  %12987 = vmatmul.mubr.msk.f32.vlgmr.msra.gmra.mxu1 %vm1201_vm3, %v15820_v26  ;;  %13000 = vmatmul.mubr.msk.f32.vlgmr.msra.gmra.mxu0 %vm1201_vm3, %v15820_v26  ;;  %v15836_v19 = vadd.f32 %v11563_v8, %v6708_v47  ;;  %v6698_v50 = vmul.f32 %v13844_v20, %v15796_v2 }
0x1dad   : > { %13009 = vmatpush3.msra.mxu1 %v11577_v40  ;;  %v13846_v53 = vpop.eup %13845 }
0x1dae   : > { %v15834_v36 = vadd.f32 %v11563_v8, %v6707_v58  ;;  %13010 = vmatprep.subr.mxu1 %v11576_v35  ;;  %v6697_v52 = vmul.f32 %v13846_v53, %v15798_v10  ;;  %v6710_v56 = vmul.f32 %v11562_v49, %v6698_v50 }
0x1daf   : > { %13011 = vmatpush3.msra.mxu1 %v11576_v35 }
0x1db0   : > { %12989 = vmatprep.mubr.msk.f32.mxu1 %vm1201_vm3, %v15834_v36  ;;  %13002 = vmatprep.mubr.msk.f32.mxu0 %vm1201_vm3, %v15834_v36  ;;  %v6709_v60 = vmul.f32 %v11562_v49, %v6697_v52  ;;  %v15850_v3 = vadd.f32 %v11563_v8, %v6710_v56  ;;  %v15917_v49 = vld [vmem:[#allocation15 + $0x28] sm:$0xff] }
0x1db1   : > { %12990 = vmatmul.mubr.msk.f32.gmra.mxu1 %vm1201_vm3, %v15836_v19  ;;  %13003 = vmatmul.mubr.msk.f32.gmra.mxu0 %vm1201_vm3, %v15836_v19 }
0x1db2   : > { %v15848_v7 = vadd.f32 %v11563_v8, %v6709_v60 }
0x1db4   : > { %12992 = vmatprep.mubr.msk.f32.mxu1 %vm1201_vm3, %v15848_v7  ;;  %13005 = vmatprep.mubr.msk.f32.mxu0 %vm1201_vm3, %v15848_v7 }
0x1db5   : > { %12993 = vmatmul.mubr.msk.f32.gmra.mxu1 %vm1201_vm3, %v15850_v3  ;;  %13006 = vmatmul.mubr.msk.f32.gmra.mxu0 %vm1201_vm3, %v15850_v3 }
0x1db6   : > { %13012 = vmatprep.mubr.msk.f32.mxu1 %vm1201_vm3, %v15818_v57 }
0x1db9   : > { %13013 = vmatmul.mubr.msk.f32.vlgmr.msra.gmra.mxu1 %vm1201_vm3, %v15820_v26 }
0x1dba   : > { %13015 = vmatprep.mubr.msk.f32.mxu1 %vm1201_vm3, %v15834_v36 }
0x1dbd   : > { %13016 = vmatmul.mubr.msk.f32.gmra.mxu1 %vm1201_vm3, %v15836_v19 }
0x1dbe   : > { %13018 = vmatprep.mubr.msk.f32.mxu1 %vm1201_vm3, %v15848_v7 }
0x1dc1   : > { %13019 = vmatmul.mubr.msk.f32.gmra.mxu1 %vm1201_vm3, %v15850_v3 }
0x1e6c   : > { %v12988_v38 = vpop.f32.mrf.mxu1  ;;  %v13001_v62 = vpop.f32.mrf.mxu0 }
0x1e6e   : > { %v6810_v11 = vpop.f32.mrf.mxu1  ;;  %v6908_v15 = vpop.f32.mrf.mxu0 }
0x1e6f   : > { %13033 = vmatprep.mubr.msk.f32.mxu0 %vm1300_vm4, %v6810_v11 }
0x1e71   : > { %v12991_v1 = vpop.f32.mrf.mxu1  ;;  %v13004_v2 = vpop.f32.mrf.mxu0 }
0x1e73   : > { %v6820_v9 = vpop.f32.mrf.mxu1  ;;  %v6918_v10 = vpop.f32.mrf.mxu0 }
0x1e75   : > { %v12994_v37 = vpop.f32.mrf.mxu1  ;;  %v13007_v18 = vpop.f32.mrf.mxu0 }
0x1e76   : > { %13021 = vmatprep.subr.msk.mxu0 %vm1300_vm4, %v13007_v18 }
0x1e77   : > { %v6830_v21 = vpop.f32.mrf.mxu1  ;;  %v6928_v39 = vpop.f32.mrf.mxu0  ;;  %13022 = vmatpush3.xpose.msk.msra.mxu0 %vm1300_vm4, %v13007_v18 }
0x1e78   : > { %13023 = vmatprep.subr.msk.mxu0 %vm1300_vm4, %v6928_v39 }
0x1e79   : > { %v13014_v51 = vpop.f32.mrf.mxu1 }
0x1e7b   : > { %v7006_v25 = vpop.f32.mrf.mxu1  ;;  %13024 = vmatpush3.xpose.msk.msra.mxu0 %vm1300_vm4, %v6928_v39 }
0x1e7c   : > { %13025 = vmatprep.subr.msk.mxu0 %vm1300_vm4, %v13004_v2 }
0x1e7d   : > { %v13017_v13 = vpop.f32.mrf.mxu1 }
0x1e7f   : > { %v7016_v29 = vpop.f32.mrf.mxu1  ;;  %13026 = vmatpush3.xpose.msk.msra.mxu0 %vm1300_vm4, %v13004_v2 }
0x1e80   : > { %13027 = vmatprep.subr.msk.mxu0 %vm1300_vm4, %v6918_v10 }
0x1e81   : > { %v13020_v40 = vpop.f32.mrf.mxu1 }
0x1e82   : > { %13042 = vmatprep.subr.mxu1 %v13020_v40 }
0x1e83   : > { %v7026_v27 = vpop.f32.mrf.mxu1  ;;  %13028 = vmatpush3.xpose.msk.msra.mxu0 %vm1300_vm4, %v6918_v10  ;;  %13043 = vmatpush3.msra.mxu1 %v13020_v40 }
0x1e84   : > { %13029 = vmatprep.subr.msk.mxu0 %vm1300_vm4, %v13001_v62  ;;  %13044 = vmatprep.subr.mxu1 %v7026_v27 }
0x1e85   : > { %13045 = vmatpush3.msra.mxu1 %v7026_v27 }
0x1e86   : > { %13046 = vmatprep.subr.mxu1 %v13017_v13 }
0x1e87   : > { %13030 = vmatpush3.xpose.msk.msra.mxu0 %vm1300_vm4, %v13001_v62  ;;  %13047 = vmatpush3.msra.mxu1 %v13017_v13 }
0x1e88   : > { %13031 = vmatprep.subr.msk.mxu0 %vm1300_vm4, %v6908_v15  ;;  %13048 = vmatprep.subr.mxu1 %v7016_v29 }
0x1e89   : > { %13049 = vmatpush3.msra.mxu1 %v7016_v29 }
0x1e8a   : > { %13050 = vmatprep.subr.mxu1 %v13014_v51 }
0x1e8b   : > { %13032 = vmatpush3.xpose.msk.msra.mxu0 %vm1300_vm4, %v6908_v15  ;;  %13051 = vmatpush3.msra.mxu1 %v13014_v51 }
0x1e8c   : > { %13052 = vmatprep.subr.mxu1 %v7006_v25  ;;  %13076 = vmatprep.subr.mxu0 %v7447_v61 }
0x1e8d   : > { %13053 = vmatpush3.msra.mxu1 %v7006_v25 }
0x1e8e   : > { %13034 = vmatmul.mubr.msk.f32.vlgmr.msra.gmra.mxu0 %vm1300_vm4, %v12988_v38 }
0x1e8f   : > { %13036 = vmatprep.mubr.msk.f32.mxu0 %vm1300_vm4, %v6820_v9  ;;  %13077 = vmatpush3.msra.mxu0 %v7447_v61 }
0x1e90   : > { %13078 = vmatprep.subr.mxu0 %v7446_v24 }
0x1e91   : > { %13079 = vmatpush3.msra.mxu0 %v7446_v24 }
0x1e92   : > { %13037 = vmatmul.mubr.msk.f32.gmra.mxu0 %vm1300_vm4, %v12991_v1 }
0x1e93   : > { %13039 = vmatprep.mubr.msk.f32.mxu0 %vm1300_vm4, %v6830_v21 }
0x1e96   : > { %13040 = vmatmul.mubr.msk.f32.gmra.mxu0 %vm1300_vm4, %v12994_v37 }
0x1e97   : > { %13080 = vmatprep.mubr.msk.f32.mxu0 %vm1201_vm3, %v15818_v57 }
0x1e9a   : > { %13081 = vmatmul.mubr.msk.f32.vlgmr.msra.gmra.mxu0 %vm1201_vm3, %v15820_v26 }
0x1e9b   : > { %13083 = vmatprep.mubr.msk.f32.mxu0 %vm1201_vm3, %v15834_v36 }
0x1e9e   : > { %13084 = vmatmul.mubr.msk.f32.gmra.mxu0 %vm1201_vm3, %v15836_v19 }
0x1e9f   : > { %13086 = vmatprep.mubr.msk.f32.mxu0 %vm1201_vm3, %v15848_v7 }
0x1ea2   : > { %13087 = vmatmul.mubr.msk.f32.gmra.mxu0 %vm1201_vm3, %v15850_v3 }
0x1f4e   : > { %v13035_v6 = vpop.f32.mrf.mxu0 }
0x1f4f   : > { %v7143_v12 = vadd.f32 %v15902_v5, %v13035_v6 }
0x1f50   : > { %v7137_v44 = vpop.f32.mrf.mxu0 }
0x1f51   : > { %v7138_v16 = vadd.f32 %v15905_v42, %v7137_v44  ;;  %v7169_v43 = vsel %vm3618_vm6, %v7143_v12, -inf }
0x1f52   : > { %7170 = vmax.xlane.f32.xlu1 %v7169_v43  ;;  %v13038_v48 = vpop.f32.mrf.mxu0  ;;  %v7349_v43 = vld [vmem:[#allocation19 + $0x58] sm:$0xff] }
0x1f53   : > { %v7153_v45 = vadd.f32 %v15909_v14, %v13038_v48  ;;  %v7166_v55 = vsel %vm3618_vm6, %v7138_v16, -inf  ;;  %13063 = vmatprep.subr.mxu1 %v7349_v43 }
0x1f54   : > { %v7147_v32 = vpop.f32.mrf.mxu0  ;;  %7167 = vmax.xlane.f32.xlu0 %v7166_v55 }
0x1f55   : > { %v7148_v54 = vadd.f32 %v15913_v22, %v7147_v32  ;;  %v7175_v17 = vsel %vm3618_vm6, %v7153_v45, -inf }
0x1f56   : > { %7176 = vmax.xlane.f32.xlu1 %v7175_v17  ;;  %v13041_v41 = vpop.f32.mrf.mxu0 }
0x1f57   : > { %v7163_v28 = vadd.f32 %v15917_v49, %v13041_v41  ;;  %v7172_v30 = vsel %vm3618_vm6, %v7148_v54, -inf }
0x1f58   : > { %7173 = vmax.xlane.f32.xlu0 %v7172_v30  ;;  %v7157_v23 = vpop.f32.mrf.mxu0 }
0x1f59   : > { %v7158_v31 = vadd.f32 %v15921_v33, %v7157_v23  ;;  %v7181_v8 = vsel %vm3618_vm6, %v7163_v28, -inf }
0x1f5a   : > { %7182 = vmax.xlane.f32.xlu1 %v7181_v8  ;;  %v13082_v59 = vpop.f32.mrf.mxu0  ;;  %v7348_v8 = vld [vmem:[#allocation19 + $0x50] sm:$0xff] }
0x1f5b   : > { %v7178_v34 = vsel %vm3618_vm6, %v7158_v31, -inf }
0x1f5c   : > { %v7514_v46 = vpop.f32.mrf.mxu0  ;;  %7179 = vmax.xlane.f32.xlu0 %v7178_v34 }
0x1f5e   : > { %v13085_v4 = vpop.f32.mrf.mxu0 }
0x1f60   : > { %v7524_v47 = vpop.f32.mrf.mxu0 }
0x1f62   : > { %v13088_v35 = vpop.f32.mrf.mxu0 }
0x1f63   : > { %13102 = vmatprep.subr.msk.mxu0 %vm1300_vm4, %v13088_v35 }
0x1f64   : > { %v7534_v58 = vpop.f32.mrf.mxu0  ;;  %13103 = vmatpush3.xpose.msk.msra.mxu0 %vm1300_vm4, %v13088_v35 }
0x1f65   : > { %13104 = vmatprep.subr.msk.mxu0 %vm1300_vm4, %v7534_v58 }
0x1f68   : > { %13105 = vmatpush3.xpose.msk.msra.mxu0 %vm1300_vm4, %v7534_v58 }
0x1f69   : > { %13106 = vmatprep.subr.msk.mxu0 %vm1300_vm4, %v13085_v4 }
0x1f6c   : > { %13107 = vmatpush3.xpose.msk.msra.mxu0 %vm1300_vm4, %v13085_v4 }
0x1f6d   : > { %13108 = vmatprep.subr.msk.mxu0 %vm1300_vm4, %v7524_v47 }
0x1f70   : > { %13109 = vmatpush3.xpose.msk.msra.mxu0 %vm1300_vm4, %v7524_v47 }
0x1f71   : > { %13110 = vmatprep.subr.msk.mxu0 %vm1300_vm4, %v13082_v59 }
0x1f74   : > { %13111 = vmatpush3.xpose.msk.msra.mxu0 %vm1300_vm4, %v13082_v59 }
0x1f75   : > { %13112 = vmatprep.subr.msk.mxu0 %vm1300_vm4, %v7514_v46 }
0x1f78   : > { %13113 = vmatpush3.xpose.msk.msra.mxu0 %vm1300_vm4, %v7514_v46  ;;  %v11615_v46 = vld [vmem:[%s16635_s17 + $0x58] sm:$0xff] }
0x1fdb   : > { %v7171_v20 = vpop.xlane.xlu1 %7170 }
0x1fdc   : > { %v7185_v50 = vsub.f32 %v7143_v12, %v7171_v20 }
0x1fdd   : > { %v7168_v53 = vpop.xlane.xlu0 %7167 }
0x1fde   : > { %v7192_v52 = vmul.f32 1.442695, %v7185_v50  ;;  %v7184_v56 = vsub.f32 %v7138_v16, %v7168_v53  ;;  %v11614_v50 = vld [vmem:[%s16635_s17 + $0x50] sm:$0xff]  ;;  %v7346_v53 = vld [vmem:[#allocation22 + $0x20] sm:$0xff] }
0x1fdf   : > { %v7177_v60 = vpop.xlane.xlu1 %7176  ;;  %13155 = vmatprep.subr.mxu0 %v7346_v53 }
0x1fe0   : > { %13847 = vpow2.f32 %v7192_v52  ;;  %v7190_v38 = vmul.f32 1.442695, %v7184_v56  ;;  %v7187_v62 = vsub.f32 %v7153_v45, %v7177_v60 }
0x1fe1   : > { %v7174_v11 = vpop.xlane.xlu0 %7173 }
0x1fe2   : > { %13849 = vpow2.f32 %v7190_v38  ;;  %v7196_v15 = vmul.f32 1.442695, %v7187_v62  ;;  %v7186_v1 = vsub.f32 %v7148_v54, %v7174_v11 }
0x1fe3   : > { %v7183_v2 = vpop.xlane.xlu1 %7182 }
0x1fe4   : > { %13851 = vpow2.f32 %v7196_v15  ;;  %v7194_v9 = vmul.f32 1.442695, %v7186_v1  ;;  %v7189_v10 = vsub.f32 %v7163_v28, %v7183_v2  ;;  %v8279_v2 = vld [vmem:[#allocation21 + $0x68] sm:$0xff] }
0x1fe5   : > { %v7180_v37 = vpop.xlane.xlu0 %7179 }
0x1fe6   : > { %13853 = vpow2.f32 %v7194_v9  ;;  %v7200_v18 = vmul.f32 1.442695, %v7189_v10  ;;  %v7188_v21 = vsub.f32 %v7158_v31, %v7180_v37 }
0x1fe8   : > { %13855 = vpow2.f32 %v7200_v18  ;;  %v7198_v39 = vmul.f32 1.442695, %v7188_v21 }
0x1fea   : > { %13857 = vpow2.f32 %v7198_v39 }
0x1fed   : > { %v13848_v51 = vpop.eup %13847 }
0x1fee   : > { %v7205_v25 = vsel %vm3618_vm6, %v13848_v51, 0.0 }
0x1fef   : > { %v13850_v13 = vpop.eup %13849  ;;  %7206 = vadd.xlane.f32.xlu1 %v7205_v25 }
0x1ff0   : > { %v7202_v29 = vsel %vm3618_vm6, %v13850_v13, 0.0 }
0x1ff1   : > { %v13852_v40 = vpop.eup %13851  ;;  %7203 = vadd.xlane.f32.xlu0 %v7202_v29 }
0x1ff2   : > { %v7211_v27 = vsel %vm3618_vm6, %v13852_v40, 0.0 }
0x1ff3   : > { %v13854_v61 = vpop.eup %13853  ;;  %7212 = vadd.xlane.f32.xlu1 %v7211_v27 }
0x1ff4   : > { %v7208_v24 = vsel %vm3618_vm6, %v13854_v61, 0.0 }
0x1ff5   : > { %v13856_v6 = vpop.eup %13855  ;;  %7209 = vadd.xlane.f32.xlu0 %v7208_v24 }
0x1ff6   : > { %v7217_v12 = vsel %vm3618_vm6, %v13856_v6, 0.0 }
0x1ff7   : > { %v13858_v44 = vpop.eup %13857  ;;  %7218 = vadd.xlane.f32.xlu1 %v7217_v12 }
0x1ff8   : > { %v7214_v16 = vsel %vm3618_vm6, %v13858_v44, 0.0 }
0x1ff9   : > { %7215 = vadd.xlane.f32.xlu0 %v7214_v16 }
0x2078   : > { %v7207_v48 = vpop.xlane.xlu1 %7206 }
0x2079   : > { %13859 = vrcp.f32 %v7207_v48 }
0x207a   : > { %v7204_v45 = vpop.xlane.xlu0 %7203 }
0x207b   : > { %13861 = vrcp.f32 %v7204_v45 }
0x207c   : > { %v7213_v55 = vpop.xlane.xlu1 %7212 }
0x207d   : > { %13863 = vrcp.f32 %v7213_v55 }
0x207e   : > { %v7210_v32 = vpop.xlane.xlu0 %7209 }
0x207f   : > { %13865 = vrcp.f32 %v7210_v32 }
0x2080   : > { %v7219_v54 = vpop.xlane.xlu1 %7218 }
0x2081   : > { %13867 = vrcp.f32 %v7219_v54 }
0x2082   : > { %v7216_v17 = vpop.xlane.xlu0 %7215 }
0x2083   : > { %13869 = vrcp.f32 %v7216_v17 }
0x2086   : > { %v13860_v41 = vpop.eup %13859 }
0x2087   : > { %v7227_v23 = vmul.f32 %v13860_v41, %v13848_v51  ;;  %v8278_v51 = vld [vmem:[#allocation21 + $0x60] sm:$0xff] }
0x2088   : > { %v13862_v28 = vpop.eup %13861 }
0x2089   : > { %v7226_v30 = vmul.f32 %v13862_v28, %v13850_v13 }
0x208a   : > { %v13864_v31 = vpop.eup %13863 }
0x208b   : > { %13054 = vmatprep.mubr.msk.f32.mxu1 %vm3618_vm6, %v7226_v30  ;;  %v7229_v4 = vmul.f32 %v13864_v31, %v13852_v40 }
0x208c   : > { %v13866_v59 = vpop.eup %13865  ;;  %13055 = vmatmul.mubr.msk.f32.vlgmr.msra.gmra.mxu1 %vm3618_vm6, %v7227_v23 }
0x208d   : > { %v7228_v34 = vmul.f32 %v13866_v59, %v13854_v61  ;;  %13064 = vmatpush3.msra.mxu1 %v7349_v43 }
0x208e   : > { %13065 = vmatprep.subr.mxu1 %v7348_v8  ;;  %v13868_v47 = vpop.eup %13867 }
0x208f   : > { %13057 = vmatprep.mubr.msk.f32.mxu1 %vm3618_vm6, %v7228_v34  ;;  %13066 = vmatpush3.msra.mxu1 %v7348_v8  ;;  %v7231_v20 = vmul.f32 %v13868_v47, %v13856_v6 }
0x2090   : > { %v13870_v35 = vpop.eup %13869  ;;  %13058 = vmatmul.mubr.msk.f32.gmra.mxu1 %vm3618_vm6, %v7229_v4  ;;  %13089 = vmatprep.subr.mxu1 %v11615_v46 }
0x2091   : > { %v7230_v58 = vmul.f32 %v13870_v35, %v13858_v44 }
0x2093   : > { %13060 = vmatprep.mubr.msk.f32.mxu1 %vm3618_vm6, %v7230_v58 }
0x2094   : > { %13061 = vmatmul.mubr.msk.f32.gmra.mxu1 %vm3618_vm6, %v7231_v20 }
0x2095   : > { %13067 = vmatprep.mubr.msk.f32.mxu1 %vm1201_vm3, %v15818_v57 }
0x2098   : > { %13068 = vmatmul.mubr.msk.f32.vlgmr.msra.gmra.mxu1 %vm1201_vm3, %v15820_v26 }
0x2099   : > { %13070 = vmatprep.mubr.msk.f32.mxu1 %vm1201_vm3, %v15834_v36  ;;  %13090 = vmatpush3.msra.mxu1 %v11615_v46 }
0x209a   : > { %13091 = vmatprep.subr.mxu1 %v11614_v50 }
0x209b   : > { %13092 = vmatpush3.msra.mxu1 %v11614_v50 }
0x209c   : > { %13071 = vmatmul.mubr.msk.f32.gmra.mxu1 %vm1201_vm3, %v15836_v19 }
0x209d   : > { %13073 = vmatprep.mubr.msk.f32.mxu1 %vm1201_vm3, %v15848_v7 }
0x20a0   : > { %13074 = vmatmul.mubr.msk.f32.gmra.mxu1 %vm1201_vm3, %v15850_v3 }
0x20a1   : > { %13093 = vmatprep.mubr.msk.f32.mxu1 %vm1201_vm3, %v15818_v57 }
0x20a4   : > { %13094 = vmatmul.mubr.msk.f32.vlgmr.msra.gmra.mxu1 %vm1201_vm3, %v15820_v26 }
0x20a5   : > { %13096 = vmatprep.mubr.msk.f32.mxu1 %vm1201_vm3, %v15834_v36 }
0x20a8   : > { %13097 = vmatmul.mubr.msk.f32.gmra.mxu1 %vm1201_vm3, %v15836_v19 }
0x20a9   : > { %13099 = vmatprep.mubr.msk.f32.mxu1 %vm1201_vm3, %v15848_v7 }
0x20ac   : > { %13100 = vmatmul.mubr.msk.f32.gmra.mxu1 %vm1201_vm3, %v15850_v3 }
0x214c   : > { %v13056_v52 = vpop.f32.mrf.mxu1 }
0x214e   : > { %v7316_v56 = vpop.f32.mrf.mxu1 }
0x2150   : > { %v13059_v60 = vpop.f32.mrf.mxu1 }
0x2152   : > { %v7326_v38 = vpop.f32.mrf.mxu1 }
0x2154   : > { %v13062_v62 = vpop.f32.mrf.mxu1 }
0x2156   : > { %v7336_v11 = vpop.f32.mrf.mxu1 }
0x2158   : > { %v13069_v15 = vpop.f32.mrf.mxu1 }
0x215a   : > { %v7416_v1 = vpop.f32.mrf.mxu1 }
0x215b   : > { %13114 = vmatprep.mubr.msk.f32.mxu0 %vm1300_vm4, %v7416_v1 }
0x215c   : > { %v13072_v9 = vpop.f32.mrf.mxu1  ;;  %13115 = vmatmul.mubr.msk.f32.vlgmr.msra.gmra.mxu0 %vm1300_vm4, %v13069_v15 }
0x215d   : > { %13156 = vmatpush3.msra.mxu0 %v7346_v53 }
0x215e   : > { %v7426_v10 = vpop.f32.mrf.mxu1  ;;  %13179 = vmatprep.subr.mxu0 %v8279_v2 }
0x215f   : > { %13117 = vmatprep.mubr.msk.f32.mxu0 %vm1300_vm4, %v7426_v10 }
0x2160   : > { %v13075_v37 = vpop.f32.mrf.mxu1  ;;  %13118 = vmatmul.mubr.msk.f32.gmra.mxu0 %vm1300_vm4, %v13072_v9 }
0x2162   : > { %v7436_v18 = vpop.f32.mrf.mxu1 }
0x2163   : > { %13120 = vmatprep.mubr.msk.f32.mxu0 %vm1300_vm4, %v7436_v18 }
0x2164   : > { %v13095_v21 = vpop.f32.mrf.mxu1  ;;  %13121 = vmatmul.mubr.msk.f32.gmra.mxu0 %vm1300_vm4, %v13075_v37 }
0x2165   : > { %13157 = vmatprep.mubr.msk.f32.mxu0 %vm1300_vm4, %v7316_v56 }
0x2166   : > { %v7612_v39 = vpop.f32.mrf.mxu1 }
0x2168   : > { %v13098_v25 = vpop.f32.mrf.mxu1  ;;  %13158 = vmatmul.mubr.msk.f32.vlgmr.msra.gmra.mxu0 %vm1300_vm4, %v13056_v52 }
0x2169   : > { %13160 = vmatprep.mubr.msk.f32.mxu0 %vm1300_vm4, %v7326_v38  ;;  %13180 = vmatpush3.msra.mxu0 %v8279_v2 }
0x216a   : > { %v7622_v13 = vpop.f32.mrf.mxu1  ;;  %13181 = vmatprep.subr.mxu0 %v8278_v51 }
0x216b   : > { %13182 = vmatpush3.msra.mxu0 %v8278_v51 }
0x216c   : > { %v13101_v29 = vpop.f32.mrf.mxu1  ;;  %13161 = vmatmul.mubr.msk.f32.gmra.mxu0 %vm1300_vm4, %v13059_v60 }
0x216d   : > { %13123 = vmatprep.subr.mxu1 %v13101_v29  ;;  %13163 = vmatprep.mubr.msk.f32.mxu0 %vm1300_vm4, %v7336_v11 }
0x216e   : > { %v7632_v40 = vpop.f32.mrf.mxu1  ;;  %13124 = vmatpush3.msra.mxu1 %v13101_v29 }
0x216f   : > { %13125 = vmatprep.subr.mxu1 %v7632_v40 }
0x2170   : > { %13126 = vmatpush3.msra.mxu1 %v7632_v40  ;;  %13164 = vmatmul.mubr.msk.f32.gmra.mxu0 %vm1300_vm4, %v13062_v62 }
0x2171   : > { %13127 = vmatprep.subr.mxu1 %v13098_v25  ;;  %13183 = vmatprep.mubr.msk.f32.mxu0 %vm1201_vm3, %v15818_v57 }
0x2172   : > { %13128 = vmatpush3.msra.mxu1 %v13098_v25 }
0x2173   : > { %13129 = vmatprep.subr.mxu1 %v7622_v13 }
0x2174   : > { %13130 = vmatpush3.msra.mxu1 %v7622_v13  ;;  %13184 = vmatmul.mubr.msk.f32.vlgmr.msra.gmra.mxu0 %vm1201_vm3, %v15820_v26 }
0x2175   : > { %13131 = vmatprep.subr.mxu1 %v13095_v21  ;;  %13186 = vmatprep.mubr.msk.f32.mxu0 %vm1201_vm3, %v15834_v36 }
0x2176   : > { %13132 = vmatpush3.msra.mxu1 %v13095_v21 }
0x2177   : > { %13133 = vmatprep.subr.mxu1 %v7612_v39 }
0x2178   : > { %13134 = vmatpush3.msra.mxu1 %v7612_v39  ;;  %13187 = vmatmul.mubr.msk.f32.gmra.mxu0 %vm1201_vm3, %v15836_v19 }
0x2179   : > { %13189 = vmatprep.mubr.msk.f32.mxu0 %vm1201_vm3, %v15848_v7 }
0x217c   : > { %13190 = vmatmul.mubr.msk.f32.gmra.mxu0 %vm1201_vm3, %v15850_v3 }
0x221c   : > { %v13116_v27 = vpop.f32.mrf.mxu0 }
0x221d   : > { %v7749_v61 = vadd.f32 %v15902_v5, %v13116_v27 }
0x221e   : > { %v7743_v24 = vpop.f32.mrf.mxu0 }
0x221f   : > { %v7744_v6 = vadd.f32 %v15905_v42, %v7743_v24  ;;  %v7775_v12 = vsel %vm3618_vm6, %v7749_v61, -inf }
0x2220   : > { %7776 = vmax.xlane.f32.xlu1 %v7775_v12  ;;  %v13119_v44 = vpop.f32.mrf.mxu0 }
0x2221   : > { %v7759_v16 = vadd.f32 %v15909_v14, %v13119_v44  ;;  %v7772_v43 = vsel %vm3618_vm6, %v7744_v6, -inf }
0x2222   : > { %7773 = vmax.xlane.f32.xlu0 %v7772_v43  ;;  %v7753_v48 = vpop.f32.mrf.mxu0 }
0x2223   : > { %v7754_v45 = vadd.f32 %v15913_v22, %v7753_v48  ;;  %v7781_v55 = vsel %vm3618_vm6, %v7759_v16, -inf }
0x2224   : > { %7782 = vmax.xlane.f32.xlu1 %v7781_v55  ;;  %v13122_v32 = vpop.f32.mrf.mxu0  ;;  %v7952_v55 = vld [vmem:[#allocation22 + $0x28] sm:$0xff] }
0x2225   : > { %v7769_v54 = vadd.f32 %v15917_v49, %v13122_v32  ;;  %v7778_v17 = vsel %vm3618_vm6, %v7754_v45, -inf  ;;  %13144 = vmatprep.subr.mxu1 %v7952_v55 }
0x2226   : > { %7779 = vmax.xlane.f32.xlu0 %v7778_v17  ;;  %v7763_v41 = vpop.f32.mrf.mxu0 }
0x2227   : > { %v7764_v28 = vadd.f32 %v15921_v33, %v7763_v41  ;;  %v7787_v30 = vsel %vm3618_vm6, %v7769_v54, -inf }
0x2228   : > { %7788 = vmax.xlane.f32.xlu1 %v7787_v30  ;;  %v16015_v23 = vpop.f32.mrf.mxu0 }
0x2229   : > { %v7784_v31 = vsel %vm3618_vm6, %v7764_v28, -inf }
0x222a   : > { %v16018_v8 = vpop.f32.mrf.mxu0  ;;  %7785 = vmax.xlane.f32.xlu0 %v7784_v31 }
0x222c   : > { %v16020_v59 = vpop.f32.mrf.mxu0 }
0x222e   : > { %v16022_v34 = vpop.f32.mrf.mxu0 }
0x2230   : > { %v16024_v46 = vpop.f32.mrf.mxu0 }
0x2232   : > { %v16026_v4 = vpop.f32.mrf.mxu0 }
0x2234   : > { %v13185_v47 = vpop.f32.mrf.mxu0 }
0x2236   : > { %v8346_v35 = vpop.f32.mrf.mxu0 }
0x2238   : > { %v13188_v58 = vpop.f32.mrf.mxu0 }
0x223a   : > { %v8356_v20 = vpop.f32.mrf.mxu0 }
0x223c   : > { %v13191_v50 = vpop.f32.mrf.mxu0 }
0x223d   : > { %13205 = vmatprep.subr.msk.mxu0 %vm1300_vm4, %v13191_v50 }
0x223e   : > { %v8366_v53 = vpop.f32.mrf.mxu0  ;;  %13206 = vmatpush3.xpose.msk.msra.mxu0 %vm1300_vm4, %v13191_v50 }
0x223f   : > { %13207 = vmatprep.subr.msk.mxu0 %vm1300_vm4, %v8366_v53 }
0x2242   : > { %13208 = vmatpush3.xpose.msk.msra.mxu0 %vm1300_vm4, %v8366_v53 }
0x2243   : > { %13209 = vmatprep.subr.msk.mxu0 %vm1300_vm4, %v13188_v58 }
0x2246   : > { %13210 = vmatpush3.xpose.msk.msra.mxu0 %vm1300_vm4, %v13188_v58 }
0x2247   : > { %13211 = vmatprep.subr.msk.mxu0 %vm1300_vm4, %v8356_v20 }
0x224a   : > { %13212 = vmatpush3.xpose.msk.msra.mxu0 %vm1300_vm4, %v8356_v20 }
0x224b   : > { %13213 = vmatprep.subr.msk.mxu0 %vm1300_vm4, %v13185_v47 }
0x224e   : > { %13214 = vmatpush3.xpose.msk.msra.mxu0 %vm1300_vm4, %v13185_v47 }
0x224f   : > { %13215 = vmatprep.subr.msk.mxu0 %vm1300_vm4, %v8346_v35 }
0x2252   : > { %13216 = vmatpush3.xpose.msk.msra.mxu0 %vm1300_vm4, %v8346_v35 }
0x22a9   : > { %v7777_v52 = vpop.xlane.xlu1 %7776 }
0x22aa   : > { %v7791_v56 = vsub.f32 %v7749_v61, %v7777_v52 }
0x22ab   : > { %v7774_v60 = vpop.xlane.xlu0 %7773 }
0x22ac   : > { %v7798_v38 = vmul.f32 1.442695, %v7791_v56  ;;  %v7790_v62 = vsub.f32 %v7744_v6, %v7774_v60 }
0x22ad   : > { %v7783_v11 = vpop.xlane.xlu1 %7782 }
0x22ae   : > { %13871 = vpow2.f32 %v7798_v38  ;;  %v7796_v15 = vmul.f32 1.442695, %v7790_v62  ;;  %v7793_v1 = vsub.f32 %v7759_v16, %v7783_v11  ;;  %v8181_v11 = vld [vmem:[#allocation19 + $0x68] sm:$0xff] }
0x22af   : > { %v7780_v2 = vpop.xlane.xlu0 %7779 }
0x22b0   : > { %13873 = vpow2.f32 %v7796_v15  ;;  %v7802_v9 = vmul.f32 1.442695, %v7793_v1  ;;  %v7792_v10 = vsub.f32 %v7754_v45, %v7780_v2  ;;  %v8180_v2 = vld [vmem:[#allocation19 + $0x60] sm:$0xff] }
0x22b1   : > { %v7789_v37 = vpop.xlane.xlu1 %7788 }
0x22b2   : > { %13875 = vpow2.f32 %v7802_v9  ;;  %v7800_v18 = vmul.f32 1.442695, %v7792_v10  ;;  %v7795_v21 = vsub.f32 %v7769_v54, %v7789_v37  ;;  %v11665_v10 = vld [vmem:[%s16635_s17 + $0x68] sm:$0xff] }
0x22b3   : > { %v7786_v39 = vpop.xlane.xlu0 %7785 }
0x22b4   : > { %13877 = vpow2.f32 %v7800_v18  ;;  %v7806_v51 = vmul.f32 1.442695, %v7795_v21  ;;  %v7794_v25 = vsub.f32 %v7764_v28, %v7786_v39  ;;  %v11664_v39 = vld [vmem:[%s16635_s17 + $0x60] sm:$0xff] }
0x22b6   : > { %13879 = vpow2.f32 %v7806_v51  ;;  %v7804_v13 = vmul.f32 1.442695, %v7794_v25  ;;  %v8906_v51 = vld [vmem:[#allocation19 + $0x78] sm:$0xff] }
0x22b7   : > { %13258 = vmatprep.subr.mxu0 %v8906_v51 }
0x22b8   : > { %13881 = vpow2.f32 %v7804_v13 }
0x22bb   : > { %v13872_v29 = vpop.eup %13871 }
0x22bc   : > { %v7811_v40 = vsel %vm3618_vm6, %v13872_v29, 0.0 }
0x22bd   : > { %v13874_v27 = vpop.eup %13873  ;;  %7812 = vadd.xlane.f32.xlu1 %v7811_v40 }
0x22be   : > { %v7808_v61 = vsel %vm3618_vm6, %v13874_v27, 0.0 }
0x22bf   : > { %v13876_v24 = vpop.eup %13875  ;;  %7809 = vadd.xlane.f32.xlu0 %v7808_v61 }
0x22c0   : > { %v7817_v6 = vsel %vm3618_vm6, %v13876_v24, 0.0 }
0x22c1   : > { %v13878_v12 = vpop.eup %13877  ;;  %7818 = vadd.xlane.f32.xlu1 %v7817_v6 }
0x22c2   : > { %v7814_v44 = vsel %vm3618_vm6, %v13878_v12, 0.0 }
0x22c3   : > { %v13880_v16 = vpop.eup %13879  ;;  %7815 = vadd.xlane.f32.xlu0 %v7814_v44 }
0x22c4   : > { %v7823_v43 = vsel %vm3618_vm6, %v13880_v16, 0.0 }
0x22c5   : > { %v13882_v48 = vpop.eup %13881  ;;  %7824 = vadd.xlane.f32.xlu1 %v7823_v43 }
0x22c6   : > { %v7820_v45 = vsel %vm3618_vm6, %v13882_v48, 0.0 }
0x22c7   : > { %7821 = vadd.xlane.f32.xlu0 %v7820_v45 }
0x2346   : > { %v7813_v32 = vpop.xlane.xlu1 %7812 }
0x2347   : > { %13883 = vrcp.f32 %v7813_v32 }
0x2348   : > { %v7810_v54 = vpop.xlane.xlu0 %7809 }
0x2349   : > { %13885 = vrcp.f32 %v7810_v54  ;;  %v11708_v54 = vld [vmem:[%s16635_s17 + $0x70] sm:$0xff] }
0x234a   : > { %v7819_v17 = vpop.xlane.xlu1 %7818 }
0x234b   : > { %13887 = vrcp.f32 %v7819_v17 }
0x234c   : > { %v7816_v41 = vpop.xlane.xlu0 %7815 }
0x234d   : > { %13889 = vrcp.f32 %v7816_v41 }
0x234e   : > { %v7825_v28 = vpop.xlane.xlu1 %7824 }
0x234f   : > { %13891 = vrcp.f32 %v7825_v28 }
0x2350   : > { %v7822_v30 = vpop.xlane.xlu0 %7821 }
0x2351   : > { %13893 = vrcp.f32 %v7822_v30 }
0x2354   : > { %v13884_v31 = vpop.eup %13883 }
0x2355   : > { %v7833_v58 = vmul.f32 %v13884_v31, %v13872_v29 }
0x2356   : > { %v13886_v47 = vpop.eup %13885 }
0x2357   : > { %v7832_v35 = vmul.f32 %v13886_v47, %v13874_v27 }
0x2358   : > { %v13888_v20 = vpop.eup %13887 }
0x2359   : > { %13135 = vmatprep.mubr.msk.f32.mxu1 %vm3618_vm6, %v7832_v35  ;;  %v7835_v52 = vmul.f32 %v13888_v20, %v13876_v24 }
0x235a   : > { %v13890_v50 = vpop.eup %13889  ;;  %13136 = vmatmul.mubr.msk.f32.vlgmr.msra.gmra.mxu1 %vm3618_vm6, %v7833_v58 }
0x235b   : > { %v7834_v53 = vmul.f32 %v13890_v50, %v13878_v12  ;;  %13145 = vmatpush3.msra.mxu1 %v7952_v55  ;;  %v8905_v12 = vld [vmem:[#allocation19 + $0x70] sm:$0xff] }
0x235c   : > { %v13892_v56 = vpop.eup %13891  ;;  %13166 = vmatprep.subr.mxu1 %v8181_v11 }
0x235d   : > { %13138 = vmatprep.mubr.msk.f32.mxu1 %vm3618_vm6, %v7834_v53  ;;  %v7837_v62 = vmul.f32 %v13892_v56, %v13880_v16  ;;  %v11709_v16 = vld [vmem:[%s16635_s17 + $0x78] sm:$0xff] }
0x235e   : > { %v13894_v60 = vpop.eup %13893  ;;  %13139 = vmatmul.mubr.msk.f32.gmra.mxu1 %vm3618_vm6, %v7835_v52 }
0x235f   : > { %v7836_v38 = vmul.f32 %v13894_v60, %v13882_v48 }
0x2361   : > { %13141 = vmatprep.mubr.msk.f32.mxu1 %vm3618_vm6, %v7836_v38 }
0x2362   : > { %13142 = vmatmul.mubr.msk.f32.gmra.mxu1 %vm3618_vm6, %v7837_v62 }
0x241a   : > { %v13137_v15 = vpop.f32.mrf.mxu1 }
0x241c   : > { %v7922_v1 = vpop.f32.mrf.mxu1 }
0x241d   : > { %13146 = vmatprep.mubr.msk.f32.mxu1 %vm1300_vm4, %v7922_v1 }
0x241e   : > { %v13140_v9 = vpop.f32.mrf.mxu1  ;;  %13147 = vmatmul.mubr.msk.f32.vlgmr.msra.gmra.mxu1 %vm1300_vm4, %v13137_v15 }
0x241f   : > { %13167 = vmatpush3.msra.mxu1 %v8181_v11 }
0x2420   : > { %v7932_v37 = vpop.f32.mrf.mxu1  ;;  %13168 = vmatprep.subr.mxu1 %v8180_v2 }
0x2421   : > { %13149 = vmatprep.mubr.msk.f32.mxu1 %vm1300_vm4, %v7932_v37  ;;  %13169 = vmatpush3.msra.mxu1 %v8180_v2 }
0x2422   : > { %v13143_v18 = vpop.f32.mrf.mxu1  ;;  %13150 = vmatmul.mubr.msk.f32.gmra.mxu1 %vm1300_vm4, %v13140_v9  ;;  %13192 = vmatprep.subr.mxu1 %v11665_v10 }
0x2424   : > { %v7942_v21 = vpop.f32.mrf.mxu1 }
0x2425   : > { %13152 = vmatprep.mubr.msk.f32.mxu1 %vm1300_vm4, %v7942_v21 }
0x2426   : > { %13153 = vmatmul.mubr.msk.f32.gmra.mxu1 %vm1300_vm4, %v13143_v18 }
0x2427   : > { %13170 = vmatprep.mubr.msk.f32.mxu1 %vm1201_vm3, %v15818_v57 }
0x242a   : > { %13171 = vmatmul.mubr.msk.f32.vlgmr.msra.gmra.mxu1 %vm1201_vm3, %v15820_v26 }
0x242b   : > { %13173 = vmatprep.mubr.msk.f32.mxu1 %vm1201_vm3, %v15834_v36  ;;  %13193 = vmatpush3.msra.mxu1 %v11665_v10 }
0x242c   : > { %13194 = vmatprep.subr.mxu1 %v11664_v39 }
0x242d   : > { %13195 = vmatpush3.msra.mxu1 %v11664_v39 }
0x242e   : > { %13174 = vmatmul.mubr.msk.f32.gmra.mxu1 %vm1201_vm3, %v15836_v19 }
0x242f   : > { %13176 = vmatprep.mubr.msk.f32.mxu1 %vm1201_vm3, %v15848_v7 }
0x2432   : > { %13177 = vmatmul.mubr.msk.f32.gmra.mxu1 %vm1201_vm3, %v15850_v3 }
0x2433   : > { %13196 = vmatprep.mubr.msk.f32.mxu1 %vm1201_vm3, %v15818_v57 }
0x2436   : > { %13197 = vmatmul.mubr.msk.f32.vlgmr.msra.gmra.mxu1 %vm1201_vm3, %v15820_v26 }
0x2437   : > { %13199 = vmatprep.mubr.msk.f32.mxu1 %vm1201_vm3, %v15834_v36 }
0x243a   : > { %13200 = vmatmul.mubr.msk.f32.gmra.mxu1 %vm1201_vm3, %v15836_v19 }
0x243b   : > { %13202 = vmatprep.mubr.msk.f32.mxu1 %vm1201_vm3, %v15848_v7 }
0x243e   : > { %13203 = vmatmul.mubr.msk.f32.gmra.mxu1 %vm1201_vm3, %v15850_v3 }
0x24de   : > { %v16088_v25 = vpop.f32.mrf.mxu1 }
0x24e0   : > { %v16090_v13 = vpop.f32.mrf.mxu1 }
0x24e2   : > { %v16092_v29 = vpop.f32.mrf.mxu1 }
0x24e4   : > { %v16094_v40 = vpop.f32.mrf.mxu1 }
0x24e6   : > { %v16096_v27 = vpop.f32.mrf.mxu1 }
0x24e8   : > { %v16098_v61 = vpop.f32.mrf.mxu1 }
0x24ea   : > { %v13172_v24 = vpop.f32.mrf.mxu1 }
0x24ec   : > { %v8248_v6 = vpop.f32.mrf.mxu1 }
0x24ed   : > { %13217 = vmatprep.mubr.msk.f32.mxu0 %vm1300_vm4, %v8248_v6 }
0x24ee   : > { %v13175_v44 = vpop.f32.mrf.mxu1  ;;  %13218 = vmatmul.mubr.msk.f32.vlgmr.msra.gmra.mxu0 %vm1300_vm4, %v13172_v24 }
0x24ef   : > { %13259 = vmatpush3.msra.mxu0 %v8906_v51 }
0x24f0   : > { %v8258_v43 = vpop.f32.mrf.mxu1  ;;  %13260 = vmatprep.subr.mxu0 %v8905_v12 }
0x24f1   : > { %13220 = vmatprep.mubr.msk.f32.mxu0 %vm1300_vm4, %v8258_v43  ;;  %13261 = vmatpush3.msra.mxu0 %v8905_v12 }
0x24f2   : > { %v13178_v48 = vpop.f32.mrf.mxu1  ;;  %13221 = vmatmul.mubr.msk.f32.gmra.mxu0 %vm1300_vm4, %v13175_v44  ;;  %13284 = vmatprep.subr.mxu0 %v11709_v16 }
0x24f4   : > { %v8268_v45 = vpop.f32.mrf.mxu1 }
0x24f5   : > { %13223 = vmatprep.mubr.msk.f32.mxu0 %vm1300_vm4, %v8268_v45 }
0x24f6   : > { %v13198_v55 = vpop.f32.mrf.mxu1  ;;  %13224 = vmatmul.mubr.msk.f32.gmra.mxu0 %vm1300_vm4, %v13178_v48 }
0x24f7   : > { %13262 = vmatprep.mubr.msk.f32.mxu0 %vm1201_vm3, %v15818_v57 }
0x24f8   : > { %v8444_v32 = vpop.f32.mrf.mxu1 }
0x24fa   : > { %v13201_v17 = vpop.f32.mrf.mxu1  ;;  %13263 = vmatmul.mubr.msk.f32.vlgmr.msra.gmra.mxu0 %vm1201_vm3, %v15820_v26 }
0x24fb   : > { %13265 = vmatprep.mubr.msk.f32.mxu0 %vm1201_vm3, %v15834_v36  ;;  %13285 = vmatpush3.msra.mxu0 %v11709_v16 }
0x24fc   : > { %v8454_v41 = vpop.f32.mrf.mxu1  ;;  %13286 = vmatprep.subr.mxu0 %v11708_v54 }
0x24fd   : > { %13287 = vmatpush3.msra.mxu0 %v11708_v54 }
0x24fe   : > { %v13204_v28 = vpop.f32.mrf.mxu1  ;;  %13266 = vmatmul.mubr.msk.f32.gmra.mxu0 %vm1201_vm3, %v15836_v19 }
0x24ff   : > { %13226 = vmatprep.subr.mxu1 %v13204_v28  ;;  %13268 = vmatprep.mubr.msk.f32.mxu0 %vm1201_vm3, %v15848_v7 }
0x2500   : > { %v8464_v30 = vpop.f32.mrf.mxu1  ;;  %13227 = vmatpush3.msra.mxu1 %v13204_v28 }
0x2501   : > { %13228 = vmatprep.subr.mxu1 %v8464_v30 }
0x2502   : > { %13229 = vmatpush3.msra.mxu1 %v8464_v30  ;;  %13269 = vmatmul.mubr.msk.f32.gmra.mxu0 %vm1201_vm3, %v15850_v3 }
0x2503   : > { %13230 = vmatprep.subr.mxu1 %v13201_v17  ;;  %13288 = vmatprep.mubr.msk.f32.mxu0 %vm1201_vm3, %v15818_v57 }
0x2504   : > { %13231 = vmatpush3.msra.mxu1 %v13201_v17 }
0x2505   : > { %13232 = vmatprep.subr.mxu1 %v8454_v41 }
0x2506   : > { %13233 = vmatpush3.msra.mxu1 %v8454_v41  ;;  %13289 = vmatmul.mubr.msk.f32.vlgmr.msra.gmra.mxu0 %vm1201_vm3, %v15820_v26 }
0x2507   : > { %13234 = vmatprep.subr.mxu1 %v13198_v55  ;;  %13291 = vmatprep.mubr.msk.f32.mxu0 %vm1201_vm3, %v15834_v36 }
0x2508   : > { %13235 = vmatpush3.msra.mxu1 %v13198_v55 }
0x2509   : > { %13236 = vmatprep.subr.mxu1 %v8444_v32 }
0x250a   : > { %13237 = vmatpush3.msra.mxu1 %v8444_v32  ;;  %13292 = vmatmul.mubr.msk.f32.gmra.mxu0 %vm1201_vm3, %v15836_v19 }
0x250b   : > { %13294 = vmatprep.mubr.msk.f32.mxu0 %vm1201_vm3, %v15848_v7 }
0x250e   : > { %13295 = vmatmul.mubr.msk.f32.gmra.mxu0 %vm1201_vm3, %v15850_v3 }
0x25ae   : > { %v13219_v31 = vpop.f32.mrf.mxu0 }
0x25af   : > { %v8581_v47 = vadd.f32 %v15902_v5, %v13219_v31 }
0x25b0   : > { %v8575_v35 = vpop.f32.mrf.mxu0 }
0x25b1   : > { %v8576_v58 = vadd.f32 %v15905_v42, %v8575_v35  ;;  %v8607_v20 = vsel %vm3618_vm6, %v8581_v47, -inf }
0x25b2   : > { %8608 = vmax.xlane.f32.xlu1 %v8607_v20  ;;  %v13222_v50 = vpop.f32.mrf.mxu0 }
0x25b3   : > { %v8591_v53 = vadd.f32 %v15909_v14, %v13222_v50  ;;  %v8604_v52 = vsel %vm3618_vm6, %v8576_v58, -inf }
0x25b4   : > { %8605 = vmax.xlane.f32.xlu0 %v8604_v52  ;;  %v8585_v56 = vpop.f32.mrf.mxu0 }
0x25b5   : > { %v8586_v60 = vadd.f32 %v15913_v22, %v8585_v56  ;;  %v8613_v38 = vsel %vm3618_vm6, %v8591_v53, -inf }
0x25b6   : > { %8614 = vmax.xlane.f32.xlu1 %v8613_v38  ;;  %v13225_v62 = vpop.f32.mrf.mxu0 }
0x25b7   : > { %v8601_v5 = vadd.f32 %v15917_v49, %v13225_v62  ;;  %v8610_v42 = vsel %vm3618_vm6, %v8586_v60, -inf }
0x25b8   : > { %8611 = vmax.xlane.f32.xlu0 %v8610_v42  ;;  %v8595_v11 = vpop.f32.mrf.mxu0 }
0x25b9   : > { %v8596_v15 = vadd.f32 %v15921_v33, %v8595_v11  ;;  %v8619_v14 = vsel %vm3618_vm6, %v8601_v5, -inf }
0x25ba   : > { %8620 = vmax.xlane.f32.xlu1 %v8619_v14  ;;  %v16147_v1 = vpop.f32.mrf.mxu0  ;;  %v8784_v14 = vld [vmem:[#allocation22 + $0x30] sm:$0xff] }
0x25bb   : > { %v8616_v2 = vsel %vm3618_vm6, %v8596_v15, -inf  ;;  %13247 = vmatprep.subr.mxu1 %v8784_v14 }
0x25bc   : > { %v16150_v22 = vpop.f32.mrf.mxu0  ;;  %8617 = vmax.xlane.f32.xlu0 %v8616_v2 }
0x25be   : > { %v16152_v9 = vpop.f32.mrf.mxu0 }
0x25c0   : > { %v16154_v10 = vpop.f32.mrf.mxu0 }
0x25c2   : > { %v16156_v49 = vpop.f32.mrf.mxu0 }
0x25c4   : > { %v16158_v37 = vpop.f32.mrf.mxu0 }
0x25c6   : > { %v13290_v18 = vpop.f32.mrf.mxu0 }
0x25c8   : > { %v9169_v33 = vpop.f32.mrf.mxu0 }
0x25ca   : > { %v13293_v21 = vpop.f32.mrf.mxu0 }
0x25cc   : > { %v9179_v39 = vpop.f32.mrf.mxu0 }
0x25ce   : > { %v13296_v51 = vpop.f32.mrf.mxu0 }
0x25cf   : > { %13318 = vmatprep.subr.mxu0 %v13296_v51 }
0x25d0   : > { %v9189_v24 = vpop.f32.mrf.mxu0  ;;  %13319 = vmatpush3.msra.mxu0 %v13296_v51 }
0x25d1   : > { %13320 = vmatprep.subr.mxu0 %v9189_v24 }
0x25d2   : > { %13321 = vmatpush3.msra.mxu0 %v9189_v24 }
0x25d3   : > { %13322 = vmatprep.subr.mxu0 %v13293_v21 }
0x25d4   : > { %13323 = vmatpush3.msra.mxu0 %v13293_v21 }
0x25d5   : > { %13324 = vmatprep.subr.mxu0 %v9179_v39 }
0x25d6   : > { %13325 = vmatpush3.msra.mxu0 %v9179_v39 }
0x25d7   : > { %13326 = vmatprep.subr.mxu0 %v13290_v18 }
0x25d8   : > { %13327 = vmatpush3.msra.mxu0 %v13290_v18 }
0x25d9   : > { %13328 = vmatprep.subr.mxu0 %v9169_v33 }
0x25da   : > { %13329 = vmatpush3.msra.mxu0 %v9169_v33 }
0x263b   : > { %v8609_v6 = vpop.xlane.xlu1 %8608 }
0x263c   : > { %v8623_v12 = vsub.f32 %v8581_v47, %v8609_v6 }
0x263d   : > { %v8606_v44 = vpop.xlane.xlu0 %8605 }
0x263e   : > { %v8630_v16 = vmul.f32 1.442695, %v8623_v12  ;;  %v8622_v43 = vsub.f32 %v8576_v58, %v8606_v44 }
0x263f   : > { %v8615_v48 = vpop.xlane.xlu1 %8614 }
0x2640   : > { %13895 = vpow2.f32 %v8630_v16  ;;  %v8628_v45 = vmul.f32 1.442695, %v8622_v43  ;;  %v8625_v55 = vsub.f32 %v8591_v53, %v8615_v48 }
0x2641   : > { %v8612_v32 = vpop.xlane.xlu0 %8611 }
0x2642   : > { %13897 = vpow2.f32 %v8628_v45  ;;  %v8634_v54 = vmul.f32 1.442695, %v8625_v55  ;;  %v8624_v17 = vsub.f32 %v8586_v60, %v8612_v32 }
0x2643   : > { %v8621_v41 = vpop.xlane.xlu1 %8620 }
0x2644   : > { %13899 = vpow2.f32 %v8634_v54  ;;  %v8632_v28 = vmul.f32 1.442695, %v8624_v17  ;;  %v8627_v30 = vsub.f32 %v8601_v5, %v8621_v41  ;;  %v9004_v41 = vld [vmem:[#allocation21 + $0x78] sm:$0xff] }
0x2645   : > { %v8618_v31 = vpop.xlane.xlu0 %8617 }
0x2646   : > { %13901 = vpow2.f32 %v8632_v28  ;;  %v8638_v35 = vmul.f32 1.442695, %v8627_v30  ;;  %v8626_v20 = vsub.f32 %v8596_v15, %v8618_v31  ;;  %v9003_v31 = vld [vmem:[#allocation21 + $0x70] sm:$0xff] }
0x2648   : > { %13903 = vpow2.f32 %v8638_v35  ;;  %v8636_v47 = vmul.f32 1.442695, %v8626_v20 }
0x264a   : > { %13905 = vpow2.f32 %v8636_v47 }
0x264d   : > { %v13896_v58 = vpop.eup %13895 }
0x264e   : > { %v8643_v50 = vsel %vm3618_vm6, %v13896_v58, 0.0 }
0x264f   : > { %v13898_v52 = vpop.eup %13897  ;;  %8644 = vadd.xlane.f32.xlu1 %v8643_v50  ;;  %v8156_v50 = vadd.f32 %v16015_v23, %v16088_v25  ;;  %v8176_v23 = vadd.f32 %v16024_v46, %v16096_v27 }
0x2650   : > { %v8640_v53 = vsel %vm3618_vm6, %v13898_v52, 0.0 }
0x2651   : > { %v13900_v56 = vpop.eup %13899  ;;  %8641 = vadd.xlane.f32.xlu0 %v8640_v53  ;;  %v8151_v53 = vadd.f32 %v16018_v8, %v16090_v13  ;;  %v8171_v13 = vadd.f32 %v16026_v4, %v16098_v61  ;;  %v14015_v4 = vld [vmem:[#allocation15 + $0x8] sm:$0xff] }
0x2652   : > { %v8649_v60 = vsel %vm3618_vm6, %v13900_v56, 0.0 }
0x2653   : > { %v13902_v38 = vpop.eup %13901  ;;  %8650 = vadd.xlane.f32.xlu1 %v8649_v60 }
0x2654   : > { %v8646_v62 = vsel %vm3618_vm6, %v13902_v38, 0.0 }
0x2655   : > { %v13904_v5 = vpop.eup %13903  ;;  %8647 = vadd.xlane.f32.xlu0 %v8646_v62 }
0x2656   : > { %v8655_v42 = vsel %vm3618_vm6, %v13904_v5, 0.0 }
0x2657   : > { %v13906_v11 = vpop.eup %13905  ;;  %8656 = vadd.xlane.f32.xlu1 %v8655_v42  ;;  %v8161_v42 = vadd.f32 %v16022_v34, %v16094_v40 }
0x2658   : > { %v8652_v15 = vsel %vm3618_vm6, %v13906_v11, 0.0 }
0x2659   : > { %8653 = vadd.xlane.f32.xlu0 %v8652_v15 }
0x26d8   : > { %v8645_v2 = vpop.xlane.xlu1 %8644 }
0x26d9   : > { %13907 = vrcp.f32 %v8645_v2 }
0x26da   : > { %v8642_v18 = vpop.xlane.xlu0 %8641 }
0x26db   : > { %13909 = vrcp.f32 %v8642_v18 }
0x26dc   : > { %v8651_v33 = vpop.xlane.xlu1 %8650 }
0x26dd   : > { %13911 = vrcp.f32 %v8651_v33 }
0x26de   : > { %v8648_v21 = vpop.xlane.xlu0 %8647 }
0x26df   : > { %13913 = vrcp.f32 %v8648_v21  ;;  %v14016_v21 = vld [vmem:[#allocation15] sm:$0xff] }
0x26e0   : > { %v8657_v39 = vpop.xlane.xlu1 %8656 }
0x26e1   : > { %13915 = vrcp.f32 %v8657_v39 }
0x26e2   : > { %v8654_v51 = vpop.xlane.xlu0 %8653 }
0x26e3   : > { %13917 = vrcp.f32 %v8654_v51 }
0x26e6   : > { %v13908_v24 = vpop.eup %13907 }
0x26e7   : > { %v8665_v44 = vmul.f32 %v13908_v24, %v13896_v58 }
0x26e8   : > { %v13910_v6 = vpop.eup %13909 }
0x26e9   : > { %v8664_v12 = vmul.f32 %v13910_v6, %v13898_v52 }
0x26ea   : > { %v13912_v16 = vpop.eup %13911 }
0x26eb   : > { %13238 = vmatprep.mubr.msk.f32.mxu1 %vm3618_vm6, %v8664_v12  ;;  %v8667_v45 = vmul.f32 %v13912_v16, %v13900_v56  ;;  %v14019_v16 = vld [vmem:[#allocation15 + $0x28] sm:$0xff] }
0x26ec   : > { %v13914_v43 = vpop.eup %13913  ;;  %13239 = vmatmul.mubr.msk.f32.vlgmr.msra.gmra.mxu1 %vm3618_vm6, %v8665_v44 }
0x26ed   : > { %v8666_v48 = vmul.f32 %v13914_v43, %v13902_v38  ;;  %13248 = vmatpush3.msra.mxu1 %v8784_v14  ;;  %v8166_v38 = vadd.f32 %v16020_v59, %v16092_v29 }
0x26ee   : > { %v13916_v55 = vpop.eup %13915  ;;  %13271 = vmatprep.subr.mxu1 %v9004_v41 }
0x26ef   : > { %13241 = vmatprep.mubr.msk.f32.mxu1 %vm3618_vm6, %v8666_v48  ;;  %v8669_v17 = vmul.f32 %v13916_v55, %v13904_v5  ;;  %v14020_v55 = vld [vmem:[#allocation15 + $0x20] sm:$0xff] }
0x26f0   : > { %v13918_v32 = vpop.eup %13917  ;;  %13242 = vmatmul.mubr.msk.f32.gmra.mxu1 %vm3618_vm6, %v8667_v45 }
0x26f1   : > { %v8668_v54 = vmul.f32 %v13918_v32, %v13906_v11 }
0x26f3   : > { %13244 = vmatprep.mubr.msk.f32.mxu1 %vm3618_vm6, %v8668_v54 }
0x26f4   : > { %13245 = vmatmul.mubr.msk.f32.gmra.mxu1 %vm3618_vm6, %v8669_v17 }
0x27ac   : > { %v13240_v28 = vpop.f32.mrf.mxu1 }
0x27ae   : > { %v8754_v30 = vpop.f32.mrf.mxu1 }
0x27af   : > { %13249 = vmatprep.mubr.msk.f32.mxu1 %vm1300_vm4, %v8754_v30 }
0x27b0   : > { %v13243_v35 = vpop.f32.mrf.mxu1  ;;  %13250 = vmatmul.mubr.msk.f32.vlgmr.msra.gmra.mxu1 %vm1300_vm4, %v13240_v28 }
0x27b1   : > { %13272 = vmatpush3.msra.mxu1 %v9004_v41 }
0x27b2   : > { %v8764_v20 = vpop.f32.mrf.mxu1  ;;  %13273 = vmatprep.subr.mxu1 %v9003_v31 }
0x27b3   : > { %13252 = vmatprep.mubr.msk.f32.mxu1 %vm1300_vm4, %v8764_v20  ;;  %13274 = vmatpush3.msra.mxu1 %v9003_v31 }
0x27b4   : > { %v13246_v47 = vpop.f32.mrf.mxu1  ;;  %13253 = vmatmul.mubr.msk.f32.gmra.mxu1 %vm1300_vm4, %v13243_v35 }
0x27b6   : > { %v8774_v58 = vpop.f32.mrf.mxu1 }
0x27b7   : > { %13255 = vmatprep.mubr.msk.f32.mxu1 %vm1300_vm4, %v8774_v58 }
0x27b8   : > { %13256 = vmatmul.mubr.msk.f32.gmra.mxu1 %vm1300_vm4, %v13246_v47 }
0x27b9   : > { %13275 = vmatprep.mubr.msk.f32.mxu1 %vm1201_vm3, %v15818_v57 }
0x27bc   : > { %13276 = vmatmul.mubr.msk.f32.vlgmr.msra.gmra.mxu1 %vm1201_vm3, %v15820_v26 }
0x27bd   : > { %13278 = vmatprep.mubr.msk.f32.mxu1 %vm1201_vm3, %v15834_v36 }
0x27c0   : > { %13279 = vmatmul.mubr.msk.f32.gmra.mxu1 %vm1201_vm3, %v15836_v19 }
0x27c1   : > { %13281 = vmatprep.mubr.msk.f32.mxu1 %vm1201_vm3, %v15848_v7 }
0x27c4   : > { %13282 = vmatmul.mubr.msk.f32.gmra.mxu1 %vm1201_vm3, %v15850_v3 }
0x27c5   : > { %13309 = vmatprep.mubr.msk.f32.mxu1 %vm1300_vm4, %v16150_v22 }
0x2870   : > { %v13251_v52 = vpop.f32.mrf.mxu1 }
0x2871   : > { %v16196_v56 = vadd.f32 %v13251_v52, %v8156_v50 }
0x2872   : > { %v8869_v60 = vpop.f32.mrf.mxu1 }
0x2873   : > { %v16200_v62 = vadd.f32 %v8869_v60, %v8151_v53 }
0x2874   : > { %v13254_v5 = vpop.f32.mrf.mxu1 }
0x2875   : > { %v16204_v22 = vadd.f32 %v13254_v5, %v8166_v38 }
0x2876   : > { %v8879_v11 = vpop.f32.mrf.mxu1 }
0x2877   : > { %v16208_v25 = vadd.f32 %v8879_v11, %v8161_v42 }
0x2878   : > { %v13257_v8 = vpop.f32.mrf.mxu1 }
0x2879   : > { %v16212_v15 = vadd.f32 %v13257_v8, %v8176_v23 }
0x287a   : > { %v8889_v59 = vpop.f32.mrf.mxu1 }
0x287b   : > { %v16214_v29 = vadd.f32 %v8889_v59, %v8171_v13 }
0x287c   : > { %v13277_v14 = vpop.f32.mrf.mxu1 }
0x287e   : > { %v9071_v2 = vpop.f32.mrf.mxu1 }
0x2880   : > { %v13280_v34 = vpop.f32.mrf.mxu1 }
0x2882   : > { %v9081_v40 = vpop.f32.mrf.mxu1 }
0x2884   : > { %v13283_v18 = vpop.f32.mrf.mxu1 }
0x2885   : > { %13297 = vmatprep.subr.msk.mxu1 %vm1300_vm4, %v13283_v18 }
0x2886   : > { %v9091_v33 = vpop.f32.mrf.mxu1  ;;  %13298 = vmatpush3.xpose.msk.msra.mxu1 %vm1300_vm4, %v13283_v18 }
0x2887   : > { %13299 = vmatprep.subr.msk.mxu1 %vm1300_vm4, %v9091_v33 }
0x288a   : > { %13300 = vmatpush3.xpose.msk.msra.mxu1 %vm1300_vm4, %v9091_v33 }
0x288b   : > { %13301 = vmatprep.subr.msk.mxu1 %vm1300_vm4, %v13280_v34 }
0x288e   : > { %13302 = vmatpush3.xpose.msk.msra.mxu1 %vm1300_vm4, %v13280_v34 }
0x288f   : > { %13303 = vmatprep.subr.msk.mxu1 %vm1300_vm4, %v9081_v40 }
0x2892   : > { %13304 = vmatpush3.xpose.msk.msra.mxu1 %vm1300_vm4, %v9081_v40 }
0x2893   : > { %13305 = vmatprep.subr.msk.mxu1 %vm1300_vm4, %v13277_v14 }
0x2896   : > { %13306 = vmatpush3.xpose.msk.msra.mxu1 %vm1300_vm4, %v13277_v14 }
0x2897   : > { %13307 = vmatprep.subr.msk.mxu1 %vm1300_vm4, %v9071_v2 }
0x289a   : > { %13308 = vmatpush3.xpose.msk.msra.mxu1 %vm1300_vm4, %v9071_v2 }
0x289d   : > { %13310 = vmatmul.mubr.msk.f32.vlgmr.msra.gmra.mxu1 %vm1300_vm4, %v16147_v1 }
0x289e   : > { %13312 = vmatprep.mubr.msk.f32.mxu1 %vm1300_vm4, %v16154_v10  ;;  %v14017_v10 = vld [vmem:[#allocation15 + $0x18] sm:$0xff] }
0x28a1   : > { %13313 = vmatmul.mubr.msk.f32.gmra.mxu1 %vm1300_vm4, %v16152_v9 }
0x28a2   : > { %13315 = vmatprep.mubr.msk.f32.mxu1 %vm1300_vm4, %v16158_v37  ;;  %v14018_v37 = vld [vmem:[#allocation15 + $0x10] sm:$0xff] }
0x28a5   : > { %13316 = vmatmul.mubr.msk.f32.gmra.mxu1 %vm1300_vm4, %v16156_v49 }
0x295d   : > { %v13311_v46 = vpop.f32.mrf.mxu1 }
0x295e   : > { %v9306_v27 = vadd.f32 %v14015_v4, %v13311_v46 }
0x295f   : > { %v9300_v61 = vpop.f32.mrf.mxu1 }
0x2960   : > { %v9301_v39 = vadd.f32 %v14016_v21, %v9300_v61  ;;  %v9332_v1 = vsel %vm3618_vm6, %v9306_v27, -inf  ;;  %v9509_v21 = vld [vmem:[#allocation22 + $0x38] sm:$0xff] }
0x2961   : > { %9333 = vmax.xlane.f32.xlu1 %v9332_v1  ;;  %v13314_v51 = vpop.f32.mrf.mxu1  ;;  %13339 = vmatprep.subr.mxu0 %v9509_v21 }
0x2962   : > { %v9316_v24 = vadd.f32 %v14017_v10, %v13314_v51  ;;  %v9329_v9 = vsel %vm3618_vm6, %v9301_v39, -inf }
0x2963   : > { %v9310_v6 = vpop.f32.mrf.mxu1  ;;  %9330 = vmax.xlane.f32.xlu0 %v9329_v9 }
0x2964   : > { %v9311_v12 = vadd.f32 %v14018_v37, %v9310_v6  ;;  %v9338_v49 = vsel %vm3618_vm6, %v9316_v24, -inf }
0x2965   : > { %9339 = vmax.xlane.f32.xlu1 %v9338_v49  ;;  %v13317_v44 = vpop.f32.mrf.mxu1 }
0x2966   : > { %v9326_v43 = vadd.f32 %v14019_v16, %v13317_v44  ;;  %v9335_v48 = vsel %vm3618_vm6, %v9311_v12, -inf }
0x2967   : > { %v9320_v45 = vpop.f32.mrf.mxu1  ;;  %9336 = vmax.xlane.f32.xlu0 %v9335_v48 }
0x2968   : > { %v9321_v32 = vadd.f32 %v14020_v55, %v9320_v45  ;;  %v9344_v54 = vsel %vm3618_vm6, %v9326_v43, -inf }
0x2969   : > { %9345 = vmax.xlane.f32.xlu1 %v9344_v54 }
0x296a   : > { %v9341_v17 = vsel %vm3618_vm6, %v9321_v32, -inf }
0x296b   : > { %9342 = vmax.xlane.f32.xlu0 %v9341_v17 }
0x29ea   : > { %v9334_v41 = vpop.xlane.xlu1 %9333 }
0x29eb   : > { %v9348_v28 = vsub.f32 %v9306_v27, %v9334_v41 }
0x29ec   : > { %v9331_v30 = vpop.xlane.xlu0 %9330 }
0x29ed   : > { %v9355_v31 = vmul.f32 1.442695, %v9348_v28  ;;  %v9347_v35 = vsub.f32 %v9301_v39, %v9331_v30 }
0x29ee   : > { %v9340_v20 = vpop.xlane.xlu1 %9339 }
0x29ef   : > { %13919 = vpow2.f32 %v9355_v31  ;;  %v9353_v47 = vmul.f32 1.442695, %v9347_v35  ;;  %v9350_v58 = vsub.f32 %v9316_v24, %v9340_v20 }
0x29f0   : > { %v9337_v50 = vpop.xlane.xlu0 %9336 }
0x29f1   : > { %13921 = vpow2.f32 %v9353_v47  ;;  %v9359_v52 = vmul.f32 1.442695, %v9350_v58  ;;  %v9349_v53 = vsub.f32 %v9311_v12, %v9337_v50  ;;  %v11741_v47 = vld [vmem:[%s16637_s19 + $0x1] ss:$0 sm:$0xff] }
0x29f2   : > { %v9346_v60 = vpop.xlane.xlu1 %9345 }
0x29f3   : > { %13923 = vpow2.f32 %v9359_v52  ;;  %v9357_v38 = vmul.f32 1.442695, %v9349_v53  ;;  %v9352_v5 = vsub.f32 %v9326_v43, %v9346_v60 }
0x29f4   : > { %v9343_v42 = vpop.xlane.xlu0 %9342 }
0x29f5   : > { %13925 = vpow2.f32 %v9357_v38  ;;  %v9363_v11 = vmul.f32 1.442695, %v9352_v5  ;;  %v9351_v23 = vsub.f32 %v9321_v32, %v9343_v42 }
0x29f7   : > { %13927 = vpow2.f32 %v9363_v11  ;;  %v9361_v8 = vmul.f32 1.442695, %v9351_v23 }
0x29f9   : > { %13929 = vpow2.f32 %v9361_v8 }
0x29fc   : > { %v13920_v13 = vpop.eup %13919 }
0x29fd   : > { %v9368_v59 = vsel %vm3618_vm6, %v13920_v13, 0.0 }
0x29fe   : > { %v13922_v14 = vpop.eup %13921  ;;  %9369 = vadd.xlane.f32.xlu1 %v9368_v59 }
0x29ff   : > { %v9365_v2 = vsel %vm3618_vm6, %v13922_v14, 0.0 }
0x2a00   : > { %v13924_v34 = vpop.eup %13923  ;;  %9366 = vadd.xlane.f32.xlu0 %v9365_v2 }
0x2a01   : > { %v9374_v40 = vsel %vm3618_vm6, %v13924_v34, 0.0 }
0x2a02   : > { %v13926_v18 = vpop.eup %13925  ;;  %9375 = vadd.xlane.f32.xlu1 %v9374_v40 }
0x2a03   : > { %v9371_v33 = vsel %vm3618_vm6, %v13926_v18, 0.0 }
0x2a04   : > { %v13928_v46 = vpop.eup %13927  ;;  %9372 = vadd.xlane.f32.xlu0 %v9371_v33 }
0x2a05   : > { %v9380_v4 = vsel %vm3618_vm6, %v13928_v46, 0.0 }
0x2a06   : > { %v13930_v27 = vpop.eup %13929  ;;  %9381 = vadd.xlane.f32.xlu1 %v9380_v4 }
0x2a07   : > { %v9377_v61 = vsel %vm3618_vm6, %v13930_v27, 0.0 }
0x2a08   : > { %9378 = vadd.xlane.f32.xlu0 %v9377_v61 }
0x2a87   : > { %v9370_v39 = vpop.xlane.xlu1 %9369 }
0x2a88   : > { %13931 = vrcp.f32 %v9370_v39 }
0x2a89   : > { %v9367_v1 = vpop.xlane.xlu0 %9366 }
0x2a8a   : > { %13933 = vrcp.f32 %v9367_v1 }
0x2a8b   : > { %v9376_v51 = vpop.xlane.xlu1 %9375 }
0x2a8c   : > { %13935 = vrcp.f32 %v9376_v51 }
0x2a8d   : > { %v9373_v10 = vpop.xlane.xlu0 %9372 }
0x2a8e   : > { %13937 = vrcp.f32 %v9373_v10 }
0x2a8f   : > { %v9382_v24 = vpop.xlane.xlu1 %9381 }
0x2a90   : > { %13939 = vrcp.f32 %v9382_v24 }
0x2a91   : > { %v9379_v9 = vpop.xlane.xlu0 %9378 }
0x2a92   : > { %13941 = vrcp.f32 %v9379_v9 }
0x2a95   : > { %v13932_v6 = vpop.eup %13931 }
0x2a96   : > { %v9390_v49 = vmul.f32 %v13932_v6, %v13920_v13 }
0x2a97   : > { %v13934_v37 = vpop.eup %13933 }
0x2a98   : > { %v9389_v12 = vmul.f32 %v13934_v37, %v13922_v14 }
0x2a99   : > { %v13936_v44 = vpop.eup %13935 }
0x2a9a   : > { %13330 = vmatprep.mubr.msk.f32.mxu0 %vm3618_vm6, %v9389_v12  ;;  %v9392_v48 = vmul.f32 %v13936_v44, %v13924_v34 }
0x2a9b   : > { %v13938_v16 = vpop.eup %13937  ;;  %13331 = vmatmul.mubr.msk.f32.vlgmr.msra.gmra.mxu0 %vm3618_vm6, %v9390_v49 }
0x2a9c   : > { %v9391_v43 = vmul.f32 %v13938_v16, %v13926_v18  ;;  %13340 = vmatpush3.msra.mxu0 %v9509_v21 }
0x2a9d   : > { %v13940_v45 = vpop.eup %13939 }
0x2a9e   : > { %13333 = vmatprep.mubr.msk.f32.mxu0 %vm3618_vm6, %v9391_v43  ;;  %v9394_v54 = vmul.f32 %v13940_v45, %v13928_v46 }
0x2a9f   : > { %v13942_v55 = vpop.eup %13941  ;;  %13334 = vmatmul.mubr.msk.f32.gmra.mxu0 %vm3618_vm6, %v9392_v48 }
0x2aa0   : > { %v9393_v32 = vmul.f32 %v13942_v55, %v13930_v27 }
0x2aa2   : > { %13336 = vmatprep.mubr.msk.f32.mxu0 %vm3618_vm6, %v9393_v32 }
0x2aa3   : > { %13337 = vmatmul.mubr.msk.f32.gmra.mxu0 %vm3618_vm6, %v9394_v54 }
0x2b5b   : > { %v13332_v17 = vpop.f32.mrf.mxu0 }
0x2b5d   : > { %v9479_v41 = vpop.f32.mrf.mxu0 }
0x2b5e   : > { %13341 = vmatprep.mubr.msk.f32.mxu0 %vm1300_vm4, %v9479_v41 }
0x2b5f   : > { %v13335_v28 = vpop.f32.mrf.mxu0  ;;  %13342 = vmatmul.mubr.msk.f32.vlgmr.msra.gmra.mxu0 %vm1300_vm4, %v13332_v17 }
0x2b61   : > { %v9489_v30 = vpop.f32.mrf.mxu0 }
0x2b62   : > { %13344 = vmatprep.mubr.msk.f32.mxu0 %vm1300_vm4, %v9489_v30 }
0x2b63   : > { %v13338_v31 = vpop.f32.mrf.mxu0  ;;  %13345 = vmatmul.mubr.msk.f32.gmra.mxu0 %vm1300_vm4, %v13335_v28 }
0x2b65   : > { %v9499_v35 = vpop.f32.mrf.mxu0 }
0x2b66   : > { %13347 = vmatprep.mubr.msk.f32.mxu0 %vm1300_vm4, %v9499_v35  ;;  %v11747_v35 = vld [vmem:[%s16640_s22 + $0x18] sm:$0xff] }
0x2b67   : > { %13348 = vmatmul.mubr.msk.f32.gmra.mxu0 %vm1300_vm4, %v13338_v31  ;;  %13350 = vmatprep.subr.mxu1 %v11747_v35 }
0x2b68   : > { %13351 = vmatpush3.msra.mxu1 %v11747_v35 }
0x2c1f   : > { %v13343_v20 = vpop.f32.mrf.mxu0 }
0x2c20   : > { %v9624_v58 = vadd.f32 %v13343_v20, %v16196_v56  ;;  %v11746_v20 = vld [vmem:[%s16640_s22 + $0x10] sm:$0xff] }
0x2c21   : > { %v9594_v50 = vpop.f32.mrf.mxu0  ;;  %13352 = vmatprep.subr.mxu1 %v11746_v20 }
0x2c22   : > { %v9638_v52 = vadd.f32 %v11741_v47, %v9624_v58  ;;  %v9623_v53 = vadd.f32 %v9594_v50, %v16200_v62  ;;  %13353 = vmatpush3.msra.mxu1 %v11746_v20 }
0x2c23   : > { %v13346_v60 = vpop.f32.mrf.mxu0  ;;  %13380 = vmatprep.subr.mxu1 %v14468_v0 }
0x2c24   : > { %v9637_v38 = vadd.f32 %v11741_v47, %v9623_v53  ;;  %v9626_v5 = vadd.f32 %v13346_v60, %v16204_v22  ;;  %v9644_v42 = vadd.f32 %v9638_v52, %v15820_v26 }
0x2c25   : > { %v9604_v11 = vpop.f32.mrf.mxu0 }
0x2c26   : > { %v9640_v23 = vadd.f32 %v11741_v47, %v9626_v5  ;;  %v9625_v8 = vadd.f32 %v9604_v11, %v16208_v25  ;;  %v9656_v13 = vsel %vm1201_vm3, %v9644_v42, 0.0  ;;  %v9643_v59 = vadd.f32 %v9637_v38, %v15818_v57 }
0x2c27   : > { %9657 = vadd.xlane.f32.xlu1 %v9656_v13  ;;  %v13349_v56 = vpop.f32.mrf.mxu0 }
0x2c28   : > { %v9639_v14 = vadd.f32 %v11741_v47, %v9625_v8  ;;  %v9628_v2 = vadd.f32 %v13349_v56, %v16212_v15  ;;  %v9653_v62 = vsel %vm1201_vm3, %v9643_v59, 0.0  ;;  %v9646_v34 = vadd.f32 %v9640_v23, %v15836_v19 }
0x2c29   : > { %9654 = vadd.xlane.f32.xlu0 %v9653_v62  ;;  %v9614_v22 = vpop.f32.mrf.mxu0 }
0x2c2a   : > { %v9642_v26 = vadd.f32 %v11741_v47, %v9628_v2  ;;  %v9627_v40 = vadd.f32 %v9614_v22, %v16214_v29  ;;  %v9662_v25 = vsel %vm1201_vm3, %v9646_v34, 0.0  ;;  %v9645_v18 = vadd.f32 %v9639_v14, %v15834_v36  ;;  %v11744_v22 = vld [vmem:[%s16638_s20 + $0x1] ss:$0 sm:$0xff] }
0x2c2b   : > { %9663 = vadd.xlane.f32.xlu1 %v9662_v25 }
0x2c2c   : > { %v9641_v57 = vadd.f32 %v11741_v47, %v9627_v40  ;;  %v9659_v33 = vsel %vm1201_vm3, %v9645_v18, 0.0  ;;  %v9648_v46 = vadd.f32 %v9642_v26, %v15850_v3 }
0x2c2d   : > { %9660 = vadd.xlane.f32.xlu0 %v9659_v33 }
0x2c2e   : > { %v9668_v15 = vsel %vm1201_vm3, %v9648_v46, 0.0  ;;  %v9647_v19 = vadd.f32 %v9641_v57, %v15848_v7 }
0x2c2f   : > { %9669 = vadd.xlane.f32.xlu1 %v9668_v15 }
0x2c30   : > { %v9665_v4 = vsel %vm1201_vm3, %v9647_v19, 0.0 }
0x2c31   : > { %9666 = vadd.xlane.f32.xlu0 %v9665_v4 }
0x2cb0   : > { %v9658_v29 = vpop.xlane.xlu1 %9657 }
0x2cb1   : > { %v9672_v27 = vmul.f32 0.0625, %v9658_v29 }
0x2cb2   : > { %v9655_v61 = vpop.xlane.xlu0 %9654 }
0x2cb3   : > { %v16283_v21 = vsub.f32 %v9644_v42, %v9672_v27  ;;  %v9671_v36 = vmul.f32 0.0625, %v9655_v61 }
0x2cb4   : > { %v9664_v39 = vpop.xlane.xlu1 %9663 }
0x2cb5   : > { %v16285_v1 = vsub.f32 %v9643_v59, %v9671_v36  ;;  %v9674_v51 = vmul.f32 0.0625, %v9664_v39  ;;  %v9684_v3 = vmul.f32 %v16283_v21, %v16283_v21 }
0x2cb6   : > { %v9661_v10 = vpop.xlane.xlu0 %9660 }
0x2cb7   : > { %v16289_v24 = vsub.f32 %v9646_v34, %v9674_v51  ;;  %v9673_v7 = vmul.f32 0.0625, %v9661_v10  ;;  %v9692_v9 = vsel %vm1201_vm3, %v9684_v3, 0.0  ;;  %v9683_v6 = vmul.f32 %v16285_v1, %v16285_v1 }
0x2cb8   : > { %9693 = vadd.xlane.f32.xlu1 %v9692_v9  ;;  %v9670_v37 = vpop.xlane.xlu1 %9669 }
0x2cb9   : > { %v16294_v12 = vsub.f32 %v9645_v18, %v9673_v7  ;;  %v9676_v49 = vmul.f32 0.0625, %v9670_v37  ;;  %v9689_v44 = vsel %vm1201_vm3, %v9683_v6, 0.0  ;;  %v9686_v16 = vmul.f32 %v16289_v24, %v16289_v24  ;;  %v10045_v37 = vld [vmem:[#allocation24 + $0x38] sm:$0xff] }
0x2cba   : > { %9690 = vadd.xlane.f32.xlu0 %v9689_v44  ;;  %v9667_v43 = vpop.xlane.xlu0 %9666  ;;  %13363 = vmatprep.subr.mxu0 %v10045_v37  ;;  %v10042_v44 = vld [vmem:[#allocation24 + $0x20] sm:$0xff] }
0x2cbb   : > { %v9682_v48 = vsub.f32 %v9648_v46, %v9676_v49  ;;  %v9675_v45 = vmul.f32 0.0625, %v9667_v43  ;;  %v9698_v55 = vsel %vm1201_vm3, %v9686_v16, 0.0  ;;  %v9685_v32 = vmul.f32 %v16294_v12, %v16294_v12  ;;  %v11745_v46 = vld [vmem:[%s16639_s21 + $0x1] ss:$0 sm:$0xff]  ;;  %13364 = vmatpush3.msra.mxu0 %v10045_v37  ;;  %v10043_v49 = vld [vmem:[#allocation24 + $0x28] sm:$0xff] }
0x2cbc   : > { %9699 = vadd.xlane.f32.xlu1 %v9698_v55  ;;  %v11749_v16 = vld [vmem:[%s16641_s23 + $0x1] ss:$0 sm:$0xff] }
0x2cbd   : > { %v9681_v54 = vsub.f32 %v9647_v19, %v9675_v45  ;;  %v9695_v17 = vsel %vm1201_vm3, %v9685_v32, 0.0  ;;  %v9688_v41 = vmul.f32 %v9682_v48, %v9682_v48 }
0x2cbe   : > { %9696 = vadd.xlane.f32.xlu0 %v9695_v17 }
0x2cbf   : > { %v9704_v28 = vsel %vm1201_vm3, %v9688_v41, 0.0  ;;  %v9687_v30 = vmul.f32 %v9681_v54, %v9681_v54 }
0x2cc0   : > { %9705 = vadd.xlane.f32.xlu1 %v9704_v28 }
0x2cc1   : > { %v9701_v31 = vsel %vm1201_vm3, %v9687_v30, 0.0 }
0x2cc2   : > { %9702 = vadd.xlane.f32.xlu0 %v9701_v31 }
0x2d41   : > { %v9694_v47 = vpop.xlane.xlu1 %9693 }
0x2d42   : > { %v9708_v58 = vmul.f32 0.0625, %v9694_v47 }
0x2d43   : > { %v9691_v50 = vpop.xlane.xlu0 %9690 }
0x2d44   : > { %v9714_v52 = vadd.f32 1e-06, %v9708_v58  ;;  %v9707_v53 = vmul.f32 0.0625, %v9691_v50 }
0x2d45   : > { %v9700_v60 = vpop.xlane.xlu1 %9699 }
0x2d46   : > { %13943 = vrsqrt.f32 %v9714_v52  ;;  %v9713_v38 = vadd.f32 1e-06, %v9707_v53  ;;  %v9710_v5 = vmul.f32 0.0625, %v9700_v60 }
0x2d47   : > { %v9697_v42 = vpop.xlane.xlu0 %9696 }
0x2d48   : > { %13945 = vrsqrt.f32 %v9713_v38  ;;  %v9716_v11 = vadd.f32 1e-06, %v9710_v5  ;;  %v9709_v23 = vmul.f32 0.0625, %v9697_v42 }
0x2d49   : > { %v9706_v8 = vpop.xlane.xlu1 %9705 }
0x2d4a   : > { %13947 = vrsqrt.f32 %v9716_v11  ;;  %v9715_v13 = vadd.f32 1e-06, %v9709_v23  ;;  %v9712_v59 = vmul.f32 0.0625, %v9706_v8 }
0x2d4b   : > { %v9703_v56 = vpop.xlane.xlu0 %9702 }
0x2d4c   : > { %13949 = vrsqrt.f32 %v9715_v13  ;;  %v9718_v14 = vadd.f32 1e-06, %v9712_v59  ;;  %v9711_v2 = vmul.f32 0.0625, %v9703_v56 }
0x2d4e   : > { %13951 = vrsqrt.f32 %v9718_v14  ;;  %v9717_v62 = vadd.f32 1e-06, %v9711_v2 }
0x2d50   : > { %13953 = vrsqrt.f32 %v9717_v62 }
0x2d53   : > { %v13944_v34 = vpop.eup %13943 }
0x2d54   : > { %v9726_v26 = vmul.f32 %v13944_v34, %v16283_v21 }
0x2d55   : > { %v13946_v40 = vpop.eup %13945 }
0x2d56   : > { %v9725_v25 = vmul.f32 %v13946_v40, %v16285_v1  ;;  %v9738_v57 = vmul.f32 %v11744_v22, %v9726_v26 }
0x2d57   : > { %v13948_v18 = vpop.eup %13947 }
0x2d58   : > { %v9728_v33 = vmul.f32 %v13948_v18, %v16289_v24  ;;  %v9737_v15 = vmul.f32 %v11744_v22, %v9725_v25  ;;  %v16324_v61 = vadd.f32 %v11745_v46, %v9738_v57 }
0x2d59   : > { %v13950_v19 = vpop.eup %13949 }
0x2d5a   : > { %v16321_v4 = vadd.f32 %v11745_v46, %v9737_v15  ;;  %v9727_v29 = vmul.f32 %v13950_v19, %v16294_v12  ;;  %v9740_v21 = vmul.f32 %v11744_v22, %v9728_v33  ;;  %v10044_v12 = vld [vmem:[#allocation24 + $0x30] sm:$0xff] }
0x2d5b   : > { %v13952_v27 = vpop.eup %13951  ;;  %13365 = vmatprep.subr.mxu0 %v10044_v12 }
0x2d5c   : > { %v9730_v36 = vmul.f32 %v13952_v27, %v9682_v48  ;;  %13354 = vmatprep.mubr.msk.f32.mxu1 %vm1201_vm3, %v16321_v4  ;;  %v9739_v39 = vmul.f32 %v11744_v22, %v9727_v29  ;;  %v16332_v10 = vadd.f32 %v11745_v46, %v9740_v21  ;;  %13366 = vmatpush3.msra.mxu0 %v10044_v12 }
0x2d5d   : > { %v13954_v1 = vpop.eup %13953  ;;  %13355 = vmatmul.mubr.msk.f32.vlgmr.msra.gmra.mxu1 %vm1201_vm3, %v16324_v61  ;;  %13367 = vmatprep.subr.mxu0 %v10043_v49 }
0x2d5e   : > { %v16330_v51 = vadd.f32 %v11745_v46, %v9739_v39  ;;  %v9729_v3 = vmul.f32 %v13954_v1, %v9681_v54  ;;  %v9742_v24 = vmul.f32 %v11744_v22, %v9730_v36  ;;  %13368 = vmatpush3.msra.mxu0 %v10043_v49 }
0x2d5f   : > { %13369 = vmatprep.subr.mxu0 %v10042_v44 }
0x2d60   : > { %13357 = vmatprep.mubr.msk.f32.mxu1 %vm1201_vm3, %v16330_v51  ;;  %v9741_v7 = vmul.f32 %v11744_v22, %v9729_v3  ;;  %v16340_v6 = vadd.f32 %v11745_v46, %v9742_v24  ;;  %13370 = vmatpush3.msra.mxu0 %v10042_v44 }
0x2d61   : > { %13358 = vmatmul.mubr.msk.f32.gmra.mxu1 %vm1201_vm3, %v16332_v10  ;;  %13401 = vmatprep.subr.mxu0 %v14468_v0 }
0x2d62   : > { %v16338_v9 = vadd.f32 %v11745_v46, %v9741_v7 }
0x2d64   : > { %13360 = vmatprep.mubr.msk.f32.mxu1 %vm1201_vm3, %v16338_v9 }
0x2d65   : > { %13361 = vmatmul.mubr.msk.f32.gmra.mxu1 %vm1201_vm3, %v16340_v6 }
0x2d66   : > { %13392 = vmatprep.mubr.msk.f32.mxu1 %vm14469_vm0, %v14468_v0 }
0x2e1d   : > { %v13356_v43 = vpop.f32.mrf.mxu1 }
0x2e1e   : > { %v16352_v48 = vadd.f32 %v13356_v43, %v11749_v16 }
0x2e1f   : > { %v9850_v45 = vpop.f32.mrf.mxu1 }
0x2e20   : > { %v16355_v55 = vmul.f32 0.70710677, %v16352_v48  ;;  %v16357_v32 = vadd.f32 %v11749_v16, %v9850_v45 }
0x2e21   : > { %v13359_v54 = vpop.f32.mrf.mxu1 }
0x2e22   : > { %v9904_v17 = vand.u32 2147483647, %v16355_v55  ;;  %v16361_v41 = vmul.f32 0.70710677, %v16357_v32  ;;  %v16363_v28 = vadd.f32 %v13359_v54, %v11749_v16  ;;  %vm9892_vm4 = vcmp.lt.f32.partialorder %v16355_v55, 0.0 }
0x2e23   : > { %v9860_v30 = vpop.f32.mrf.mxu1 }
0x2e24   : > { %v9910_v31 = vmul.f32 0.3275911, %v9904_v17  ;;  %v9903_v35 = vand.u32 2147483647, %v16361_v41  ;;  %v16367_v20 = vmul.f32 0.70710677, %v16363_v28  ;;  %v16369_v47 = vadd.f32 %v11749_v16, %v9860_v30 }
0x2e25   : > { %v13362_v58 = vpop.f32.mrf.mxu1  ;;  %v9988_v14 = vsub.f32 0.0, %v9904_v17  ;;  %vm9891_vm14 = vcmp.lt.f32.partialorder %v16361_v41, 0.0 }
0x2e26   : > { %v9916_v50 = vadd.f32 1.0, %v9910_v31  ;;  %v9909_v52 = vmul.f32 0.3275911, %v9903_v35  ;;  %v9906_v53 = vand.u32 2147483647, %v16367_v20  ;;  %v16376_v8 = vadd.f32 %v13362_v58, %v11749_v16 }
0x2e27   : > { %v16373_v60 = vmul.f32 0.70710677, %v16369_v47  ;;  %v9870_v42 = vpop.f32.mrf.mxu1  ;;  %v9987_v22 = vsub.f32 0.0, %v9903_v35  ;;  %v9994_v25 = vmul.f32 %v9988_v14, %v9904_v17  ;;  %vm9894_vm15 = vcmp.lt.f32.partialorder %v16367_v20, 0.0 }
0x2e28   : > { %13955 = vrcp.f32 %v9916_v50  ;;  %v9915_v38 = vadd.f32 1.0, %v9909_v52  ;;  %v9912_v5 = vmul.f32 0.3275911, %v9906_v53  ;;  %v16378_v59 = vadd.f32 %v11749_v16, %v9870_v42 }
0x2e29   : > { %v9905_v11 = vand.u32 2147483647, %v16373_v60  ;;  %v16381_v56 = vmul.f32 0.70710677, %v16376_v8  ;;  %v9990_v18 = vsub.f32 0.0, %v9906_v53  ;;  %v9993_v15 = vmul.f32 %v9987_v22, %v9903_v35 }
0x2e2a   : > { %13957 = vrcp.f32 %v9915_v38  ;;  %v9918_v23 = vadd.f32 1.0, %v9912_v5  ;;  %v16384_v62 = vmul.f32 0.70710677, %v16378_v59  ;;  %v10001_v27 = vmul.f32 1.442695, %v9994_v25 }
0x2e2b   : > { %v9911_v13 = vmul.f32 0.3275911, %v9905_v11  ;;  %v9908_v34 = vand.u32 2147483647, %v16381_v56  ;;  %v9996_v21 = vmul.f32 %v9990_v18, %v9906_v53  ;;  %v9989_v36 = vsub.f32 0.0, %v9905_v11 }
0x2e2c   : > { %13959 = vrcp.f32 %v9918_v23  ;;  %v9907_v40 = vand.u32 2147483647, %v16384_v62  ;;  %v9999_v24 = vmul.f32 1.442695, %v9993_v15  ;;  %vm9893_vm1 = vcmp.lt.f32.partialorder %v16373_v60, 0.0 }
0x2e2d   : > { %v9917_v2 = vadd.f32 1.0, %v9911_v13  ;;  %v9914_v26 = vmul.f32 0.3275911, %v9908_v34  ;;  %v10005_v12 = vmul.f32 1.442695, %v9996_v21  ;;  %v9995_v49 = vmul.f32 %v9989_v36, %v9905_v11 }
0x2e2e   : > { %v9913_v33 = vmul.f32 0.3275911, %v9907_v40  ;;  %v9992_v43 = vsub.f32 0.0, %v9908_v34  ;;  %v9991_v50 = vsub.f32 0.0, %v9907_v40  ;;  %vm9896_vm2 = vcmp.lt.f32.partialorder %v16381_v56, 0.0 }
0x2e2f   : > { %13961 = vrcp.f32 %v9917_v2  ;;  %v9920_v57 = vadd.f32 1.0, %v9914_v26  ;;  %v10003_v58 = vmul.f32 1.442695, %v9995_v49  ;;  %vm9895_vm5 = vcmp.lt.f32.partialorder %v16384_v62, 0.0 }
0x2e30   : > { %v9919_v19 = vadd.f32 1.0, %v9913_v33  ;;  %v9998_v38 = vmul.f32 %v9992_v43, %v9908_v34  ;;  %v9997_v22 = vmul.f32 %v9991_v50, %v9907_v40  ;;  %v9898_v43 = vsel %vm9892_vm4, -1.0, %v14470_v63 }
0x2e31   : > { %13963 = vrcp.f32 %v9920_v57 }
0x2e32   : > { %13965 = vrcp.f32 %v9919_v19  ;;  %v10009_v57 = vmul.f32 1.442695, %v9998_v38 }
0x2e33   : > { %13967 = vpow2.f32 %v10001_v27 }
0x2e34   : > { %13969 = vpow2.f32 %v9999_v24 }
0x2e35   : > { %v13956_v46 = vpop.eup %13955  ;;  %13971 = vpow2.f32 %v10005_v12 }
0x2e36   : > { %v9934_v29 = vmul.f32 1.0614054, %v13956_v46  ;;  %13973 = vpow2.f32 %v10003_v58 }
0x2e37   : > { %v13958_v39 = vpop.eup %13957  ;;  %13975 = vpow2.f32 %v10009_v57 }
0x2e38   : > { %v9940_v1 = vadd.f32 -1.4531521, %v9934_v29  ;;  %v9933_v3 = vmul.f32 1.0614054, %v13958_v39 }
0x2e39   : > { %v16388_v7 = vpop.eup %13959 }
0x2e3a   : > { %v9946_v37 = vmul.f32 %v13956_v46, %v9940_v1  ;;  %v9939_v44 = vadd.f32 -1.4531521, %v9933_v3  ;;  %v9936_v16 = vmul.f32 1.0614054, %v16388_v7  ;;  %v10007_v1 = vmul.f32 1.442695, %v9997_v22 }
0x2e3c   : > { %v9952_v45 = vadd.f32 1.4214138, %v9946_v37  ;;  %v16391_v54 = vpop.eup %13961  ;;  %v9945_v17 = vmul.f32 %v13958_v39, %v9939_v44  ;;  %v9942_v30 = vadd.f32 -1.4531521, %v9936_v16  ;;  %13977 = vpow2.f32 %v10007_v1 }
0x2e3d   : > { %v9935_v35 = vmul.f32 1.0614054, %v16391_v54  ;;  %v9899_v1 = vsel %vm9893_vm1, -1.0, %v14470_v63 }
0x2e3e   : > { %v9958_v31 = vmul.f32 %v13956_v46, %v9952_v45  ;;  %v9951_v52 = vadd.f32 1.4214138, %v9945_v17  ;;  %v9948_v53 = vmul.f32 %v16388_v7, %v9942_v30  ;;  %v16395_v13 = vpop.eup %13963 }
0x2e3f   : > { %v9941_v42 = vadd.f32 -1.4531521, %v9935_v35  ;;  %v9938_v18 = vmul.f32 1.0614054, %v16395_v13  ;;  %v16400_v34 = vpop.eup %13965 }
0x2e40   : > { %v9964_v5 = vadd.f32 -0.28449672, %v9958_v31  ;;  %v9957_v11 = vmul.f32 %v13958_v39, %v9951_v52  ;;  %v9954_v23 = vadd.f32 1.4214138, %v9948_v53  ;;  %v9937_v40 = vmul.f32 1.0614054, %v16400_v34  ;;  %v13968_v3 = vpop.eup %13967 }
0x2e41   : > { %v9947_v2 = vmul.f32 %v16391_v54, %v9941_v42  ;;  %v9944_v27 = vadd.f32 -1.4531521, %v9938_v18  ;;  %v13970_v30 = vpop.eup %13969 }
0x2e42   : > { %v9970_v14 = vmul.f32 %v13956_v46, %v9964_v5  ;;  %v9963_v26 = vadd.f32 -0.28449672, %v9957_v11  ;;  %v9960_v25 = vmul.f32 %v16388_v7, %v9954_v23  ;;  %v9943_v16 = vadd.f32 -1.4531521, %v9937_v40  ;;  %v13972_v38 = vpop.eup %13971 }
0x2e43   : > { %v9953_v15 = vadd.f32 1.4214138, %v9947_v2  ;;  %v9950_v12 = vmul.f32 %v16395_v13, %v9944_v27  ;;  %v13974_v22 = vpop.eup %13973 }
0x2e44   : > { %v9976_v33 = vadd.f32 0.2548296, %v9970_v14  ;;  %v9969_v19 = vmul.f32 %v13958_v39, %v9963_v26  ;;  %v9966_v29 = vadd.f32 -0.28449672, %v9960_v25  ;;  %v9949_v58 = vmul.f32 %v16400_v34, %v9943_v16 }
0x2e45   : > { %v9959_v36 = vmul.f32 %v16391_v54, %v9953_v15  ;;  %v9956_v17 = vadd.f32 1.4214138, %v9950_v12  ;;  %v9897_v14 = vsel %vm9891_vm14, -1.0, %v14470_v63  ;;  %v9879_v15 = vmul.f32 0.5, %v16357_v32 }
0x2e46   : > { %v9982_v21 = vmul.f32 %v13956_v46, %v9976_v33  ;;  %v9975_v24 = vadd.f32 0.2548296, %v9969_v19  ;;  %v9972_v37 = vmul.f32 %v16388_v7, %v9966_v29  ;;  %v9955_v5 = vadd.f32 1.4214138, %v9949_v58 }
0x2e47   : > { %v9965_v44 = vadd.f32 -0.28449672, %v9959_v36  ;;  %v9962_v53 = vmul.f32 %v16395_v13, %v9956_v17  ;;  %v9902_v17 = vsel %vm9896_vm2, -1.0, %v14470_v63 }
0x2e48   : > { %v10012_v49 = vmul.f32 %v13968_v3, %v9982_v21  ;;  %v9981_v46 = vmul.f32 %v13958_v39, %v9975_v24  ;;  %v9978_v45 = vadd.f32 0.2548296, %v9972_v37  ;;  %v9961_v41 = vmul.f32 %v16400_v34, %v9955_v5  ;;  %v13976_v24 = vpop.eup %13975 }
0x2e49   : > { %v9971_v35 = vmul.f32 %v16391_v54, %v9965_v44  ;;  %v9968_v23 = vadd.f32 -0.28449672, %v9962_v53 }
0x2e4a   : > { %v10018_v31 = vsub.f32 1.0, %v10012_v49  ;;  %v10011_v50 = vmul.f32 %v13970_v30, %v9981_v46  ;;  %v9984_v52 = vmul.f32 %v16388_v7, %v9978_v45  ;;  %v9900_v7 = vsel %vm9894_vm15, -1.0, %v14470_v63 }
0x2e4b   : > { %v9977_v39 = vadd.f32 0.2548296, %v9971_v35  ;;  %v9974_v18 = vmul.f32 %v16395_v13, %v9968_v23  ;;  %v9967_v33 = vadd.f32 -0.28449672, %v9961_v41 }
0x2e4c   : > { %v10024_v55 = vmul.f32 %v10018_v31, %v9898_v43  ;;  %v10017_v42 = vsub.f32 1.0, %v10011_v50  ;;  %v10014_v11 = vmul.f32 %v13972_v38, %v9984_v52  ;;  %v13978_v43 = vpop.eup %13977  ;;  %v9884_v52 = vmul.f32 0.5, %v16376_v8 }
0x2e4d   : > { %v9983_v2 = vmul.f32 %v16391_v54, %v9977_v39  ;;  %v9980_v27 = vadd.f32 0.2548296, %v9974_v18  ;;  %v9880_v54 = vmul.f32 0.5, %v16352_v48  ;;  %v9973_v36 = vmul.f32 %v16400_v34, %v9967_v33 }
0x2e4e   : > { %v10023_v26 = vmul.f32 %v10017_v42, %v9897_v14  ;;  %v10020_v25 = vsub.f32 1.0, %v10014_v11  ;;  %v10030_v57 = vadd.f32 1.0, %v10024_v55  ;;  %v9881_v48 = vmul.f32 0.5, %v16369_v47 }
0x2e4f   : > { %v10013_v20 = vmul.f32 %v13974_v22, %v9983_v2  ;;  %v9986_v3 = vmul.f32 %v16395_v13, %v9980_v27  ;;  %v9979_v12 = vadd.f32 0.2548296, %v9973_v36  ;;  %v9882_v13 = vmul.f32 0.5, %v16363_v28 }
0x2e50   : > { %v10029_v19 = vadd.f32 1.0, %v10023_v26  ;;  %v10026_v29 = vmul.f32 %v10020_v25, %v9900_v7  ;;  %v10036_v37 = vmul.f32 %v10030_v57, %v9880_v54  ;;  %v9901_v47 = vsel %vm9895_vm5, -1.0, %v14470_v63 }
0x2e51   : > { %v10019_v21 = vsub.f32 1.0, %v10013_v20  ;;  %v10016_v32 = vmul.f32 %v13976_v24, %v9986_v3  ;;  %v9985_v16 = vmul.f32 %v16400_v34, %v9979_v12  ;;  %v9883_v28 = vmul.f32 0.5, %v16378_v59  ;;  %v11757_v59 = vld [vmem:[%s16643_s25 + $0x1] ss:$0 sm:$0xff] }
0x2e52   : > { %v10035_v40 = vmul.f32 %v10029_v19, %v9879_v15  ;;  %v10032_v49 = vadd.f32 1.0, %v10026_v29 }
0x2e53   : > { %v10025_v60 = vmul.f32 %v10019_v21, %v9899_v1  ;;  %v10022_v46 = vsub.f32 1.0, %v10016_v32  ;;  %v10015_v56 = vmul.f32 %v13978_v43, %v9985_v16 }
0x2e54   : > { %13371 = vmatprep.mubr.msk.f32.mxu0 %vm6499_vm11, %v10035_v40  ;;  %v10038_v30 = vmul.f32 %v10032_v49, %v9882_v13 }
0x2e55   : > { %v10031_v44 = vadd.f32 1.0, %v10025_v60  ;;  %13372 = vmatmul.mubr.msk.f32.vlgmr.msra.gmra.mxu0 %vm6499_vm11, %v10036_v37  ;;  %v10028_v31 = vmul.f32 %v10022_v46, %v9902_v17  ;;  %v10021_v35 = vsub.f32 1.0, %v10015_v56 }
0x2e57   : > { %v10037_v45 = vmul.f32 %v10031_v44, %v9881_v48  ;;  %v10027_v34 = vmul.f32 %v10021_v35, %v9901_v47  ;;  %v10034_v58 = vadd.f32 1.0, %v10028_v31 }
0x2e59   : > { %13374 = vmatprep.mubr.msk.f32.mxu0 %vm6499_vm11, %v10037_v45  ;;  %v10033_v50 = vadd.f32 1.0, %v10027_v34  ;;  %v10040_v38 = vmul.f32 %v10034_v58, %v9884_v52 }
0x2e5a   : > { %13375 = vmatmul.mubr.msk.f32.gmra.mxu0 %vm6499_vm11, %v10038_v30 }
0x2e5b   : > { %v10039_v53 = vmul.f32 %v10033_v50, %v9883_v28 }
0x2e5d   : > { %13377 = vmatprep.mubr.msk.f32.mxu0 %vm6499_vm11, %v10039_v53 }
0x2e5e   : > { %13378 = vmatmul.mubr.msk.f32.gmra.mxu0 %vm6499_vm11, %v10040_v38 }
0x2e5f   : > { %13413 = vmatprep.mubr.msk.f32.mxu0 %vm14469_vm0, %v14468_v0 }
0x2f15   : > { %v13373_v62 = vpop.f32.mrf.mxu0 }
0x2f16   : > { %v10144_v41 = vadd.f32 %v13373_v62, %v11757_v59 }
0x2f17   : > { %v10138_v63 = vpop.f32.mrf.mxu0 }
0x2f18   : > { %v10139_v25 = vadd.f32 %v11757_v59, %v10138_v63  ;;  %v10168_v20 = vadd.f32 %v10144_v41, %v16324_v61 }
0x2f1a   : > { %v13376_v55 = vpop.f32.mrf.mxu0 }
0x2f1b   : > { %v10154_v42 = vadd.f32 %v13376_v55, %v11757_v59 }
0x2f1c   : > { %v10148_v39 = vpop.f32.mrf.mxu0 }
0x2f1d   : > { %v10149_v23 = vadd.f32 %v11757_v59, %v10148_v39  ;;  %v10170_v22 = vadd.f32 %v10154_v42, %v16332_v10 }
0x2f1e   : > { %v13379_v5 = vpop.f32.mrf.mxu0 }
0x2f1f   : > { %v10164_v8 = vadd.f32 %v13379_v5, %v11757_v59  ;;  %v10169_v18 = vadd.f32 %v10149_v23, %v16330_v51  ;;  %v10186_v33 = vsel %vm1201_vm3, %v10170_v22, 0.0 }
0x2f20   : > { %v10158_v11 = vpop.f32.mrf.mxu0 }
0x2f21   : > { %v10172_v14 = vadd.f32 %v10164_v8, %v16340_v6  ;;  %v10159_v2 = vadd.f32 %v11757_v59, %v10158_v11  ;;  %v10167_v6 = vadd.f32 %v10139_v25, %v16321_v4  ;;  %v10183_v10 = vsel %vm1201_vm3, %v10169_v18, 0.0 }
0x2f23   : > { %v10171_v26 = vadd.f32 %v10159_v2, %v16338_v9  ;;  %v10192_v7 = vsel %vm1201_vm3, %v10172_v14, 0.0  ;;  %v10180_v9 = vsel %vm1201_vm3, %v10168_v20, 0.0  ;;  %v10177_v15 = vsel %vm1201_vm3, %v10167_v6, 0.0  ;;  %v11766_v2 = vld [vmem:[%s16644_s26 + $0x1] ss:$0 sm:$0xff] }
0x2f24   : > { %10193 = vadd.xlane.f32.xlu0 %v10192_v7 }
0x2f25   : > { %v10189_v57 = vsel %vm1201_vm3, %v10171_v26, 0.0 }
0x2f26   : > { %10190 = vadd.xlane.f32.xlu1 %v10189_v57 }
0x2f28   : > { %10187 = vadd.xlane.f32.xlu0 %v10186_v33 }
0x2f2a   : > { %10184 = vadd.xlane.f32.xlu1 %v10183_v10 }
0x2f2c   : > { %10181 = vadd.xlane.f32.xlu0 %v10180_v9 }
0x2f2e   : > { %10178 = vadd.xlane.f32.xlu1 %v10177_v15 }
0x2fad   : > { %v10194_v51 = vpop.xlane.xlu0 %10193 }
0x2fae   : > { %v10200_v19 = vmul.f32 0.0625, %v10194_v51 }
0x2faf   : > { %v10191_v29 = vpop.xlane.xlu1 %10190 }
0x2fb0   : > { %v10206_v27 = vsub.f32 %v10172_v14, %v10200_v19  ;;  %v10199_v54 = vmul.f32 0.0625, %v10191_v29 }
0x2fb1   : > { %v10188_v61 = vpop.xlane.xlu0 %10187 }
0x2fb2   : > { %v10205_v21 = vsub.f32 %v10171_v26, %v10199_v54  ;;  %v10198_v36 = vmul.f32 0.0625, %v10188_v61  ;;  %v10212_v40 = vmul.f32 %v10206_v27, %v10206_v27  ;;  %v11767_v26 = vld [vmem:[%s16645_s27 + $0x1] ss:$0 sm:$0xff] }
0x2fb3   : > { %v10185_v1 = vpop.xlane.xlu1 %10184 }
0x2fb4   : > { %v10204_v4 = vsub.f32 %v10170_v22, %v10198_v36  ;;  %v10197_v3 = vmul.f32 0.0625, %v10185_v1  ;;  %v10228_v24 = vsel %vm1201_vm3, %v10212_v40, 0.0  ;;  %v10211_v37 = vmul.f32 %v10205_v21, %v10205_v21 }
0x2fb5   : > { %10229 = vadd.xlane.f32.xlu0 %v10228_v24  ;;  %v10182_v60 = vpop.xlane.xlu0 %10181  ;;  %v10279_v24 = vld [vmem:[#allocation16] sm:$0xff] }
0x2fb6   : > { %v10203_v12 = vsub.f32 %v10169_v18, %v10197_v3  ;;  %v10196_v49 = vmul.f32 0.0625, %v10182_v60  ;;  %v10225_v32 = vsel %vm1201_vm3, %v10211_v37, 0.0  ;;  %v10210_v48 = vmul.f32 %v10204_v4, %v10204_v4  ;;  %v10374_v3 = vld [vmem:[#allocation16 + $0x18] sm:$0xff]  ;;  %v10375_v60 = vld [vmem:[#allocation16 + $0x20] sm:$0xff] }
0x2fb7   : > { %10226 = vadd.xlane.f32.xlu1 %v10225_v32  ;;  %v10179_v44 = vpop.xlane.xlu1 %10178  ;;  %v10468_v37 = vld [vmem:[#allocation18 + $0x18] sm:$0xff]  ;;  %v10376_v32 = vld [vmem:[#allocation16 + $0x28] sm:$0xff] }
0x2fb8   : > { %v10202_v16 = vsub.f32 %v10168_v20, %v10196_v49  ;;  %v10195_v43 = vmul.f32 0.0625, %v10179_v44  ;;  %v10222_v13 = vsel %vm1201_vm3, %v10210_v48, 0.0  ;;  %v10209_v46 = vmul.f32 %v10203_v12, %v10203_v12  ;;  %v10467_v49 = vld [vmem:[#allocation18 + $0x10] sm:$0xff]  ;;  %v10372_v44 = vld [vmem:[#allocation18 + $0x8] sm:$0xff] }
0x2fb9   : > { %10223 = vadd.xlane.f32.xlu0 %v10222_v13  ;;  %v10281_v48 = vld [vmem:[#allocation16 + $0x10] sm:$0xff] }
0x2fba   : > { %v16462_v45 = vsub.f32 %v10167_v6, %v10195_v43  ;;  %v10219_v17 = vsel %vm1201_vm3, %v10209_v46, 0.0  ;;  %v10208_v56 = vmul.f32 %v10202_v16, %v10202_v16 }
0x2fbb   : > { %10220 = vadd.xlane.f32.xlu1 %v10219_v17 }
0x2fbc   : > { %v10216_v30 = vsel %vm1201_vm3, %v10208_v56, 0.0  ;;  %v10207_v31 = vmul.f32 %v16462_v45, %v16462_v45 }
0x2fbd   : > { %10217 = vadd.xlane.f32.xlu0 %v10216_v30 }
0x2fbe   : > { %v10213_v35 = vsel %vm1201_vm3, %v10207_v31, 0.0 }
0x2fbf   : > { %10214 = vadd.xlane.f32.xlu1 %v10213_v35 }
0x303e   : > { %v10230_v47 = vpop.xlane.xlu0 %10229 }
0x303f   : > { %v10236_v34 = vmul.f32 0.0625, %v10230_v47 }
0x3040   : > { %v10227_v58 = vpop.xlane.xlu1 %10226 }
0x3041   : > { %v10242_v28 = vadd.f32 1e-06, %v10236_v34  ;;  %v10235_v50 = vmul.f32 0.0625, %v10227_v58  ;;  %v10648_v34 = vld [vmem:[#allocation16 + $0x30] sm:$0xff] }
0x3042   : > { %v10224_v52 = vpop.xlane.xlu0 %10223 }
0x3043   : > { %13979 = vrsqrt.f32 %v10242_v28  ;;  %v10241_v53 = vadd.f32 1e-06, %v10235_v50  ;;  %v10234_v38 = vmul.f32 0.0625, %v10224_v52  ;;  %v10649_v50 = vld [vmem:[#allocation16 + $0x38] sm:$0xff]  ;;  %v10650_v52 = vld [vmem:[#allocation16 + $0x40] sm:$0xff] }
0x3044   : > { %v10221_v62 = vpop.xlane.xlu1 %10220 }
0x3045   : > { %13981 = vrsqrt.f32 %v10241_v53  ;;  %v10240_v63 = vadd.f32 1e-06, %v10234_v38  ;;  %v10233_v55 = vmul.f32 0.0625, %v10221_v62  ;;  %v10836_v53 = vld [vmem:[#allocation16 + $0x48] sm:$0xff]  ;;  %v10837_v38 = vld [vmem:[#allocation16 + $0x50] sm:$0xff]  ;;  %v10838_v62 = vld [vmem:[#allocation16 + $0x58] sm:$0xff] }
0x3046   : > { %v10218_v39 = vpop.xlane.xlu0 %10217 }
0x3047   : > { %13983 = vrsqrt.f32 %v10240_v63  ;;  %v10239_v59 = vadd.f32 1e-06, %v10233_v55  ;;  %v10232_v5 = vmul.f32 0.0625, %v10218_v39  ;;  %v10742_v63 = vld [vmem:[#allocation18 + $0x28] sm:$0xff]  ;;  %v10741_v55 = vld [vmem:[#allocation18 + $0x20] sm:$0xff] }
0x3048   : > { %v10215_v42 = vpop.xlane.xlu1 %10214 }
0x3049   : > { %13985 = vrsqrt.f32 %v10239_v59  ;;  %v10238_v8 = vadd.f32 1e-06, %v10232_v5  ;;  %v10231_v11 = vmul.f32 0.0625, %v10215_v42 }
0x304b   : > { %13987 = vrsqrt.f32 %v10238_v8  ;;  %v10237_v23 = vadd.f32 1e-06, %v10231_v11 }
0x304d   : > { %13989 = vrsqrt.f32 %v10237_v23 }
0x3050   : > { %v13980_v14 = vpop.eup %13979 }
0x3051   : > { %v10254_v41 = vmul.f32 %v13980_v14, %v10206_v27 }
0x3052   : > { %v13982_v22 = vpop.eup %13981 }
0x3053   : > { %v10266_v7 = vmul.f32 %v11766_v2, %v10254_v41  ;;  %v10253_v25 = vmul.f32 %v13982_v22, %v10205_v21 }
0x3054   : > { %v13984_v18 = vpop.eup %13983 }
0x3055   : > { %v16475_v57 = vadd.f32 %v11767_v26, %v10266_v7  ;;  %v10265_v20 = vmul.f32 %v11766_v2, %v10253_v25  ;;  %v10252_v33 = vmul.f32 %v13984_v18, %v10204_v4  ;;  %v10930_v18 = vld [vmem:[#allocation18 + $0x38] sm:$0xff] }
0x3056   : > { %v13986_v6 = vpop.eup %13985 }
0x3057   : > { %13381 = vmatpush3.msra.mxu1 %v16475_v57  ;;  %13402 = vmatpush3.msra.mxu0 %v16475_v57  ;;  %v16479_v10 = vadd.f32 %v11767_v26, %v10265_v20  ;;  %v10264_v9 = vmul.f32 %v11766_v2, %v10252_v33  ;;  %v10251_v15 = vmul.f32 %v13986_v6, %v10203_v12  ;;  %v10280_v12 = vld [vmem:[#allocation16 + $0x8] sm:$0xff]  ;;  %v10929_v33 = vld [vmem:[#allocation18 + $0x30] sm:$0xff] }
0x3058   : > { %v13988_v51 = vpop.eup %13987  ;;  %13382 = vmatprep.subr.mxu1 %v14468_v0  ;;  %13403 = vmatprep.subr.mxu0 %v14468_v0 }
0x3059   : > { %13383 = vmatpush3.msra.mxu1 %v16479_v10  ;;  %13404 = vmatpush3.msra.mxu0 %v16479_v10  ;;  %v16485_v19 = vadd.f32 %v11767_v26, %v10264_v9  ;;  %v10263_v29 = vmul.f32 %v11766_v2, %v10251_v15  ;;  %v10250_v27 = vmul.f32 %v13988_v51, %v10202_v16  ;;  %v10371_v16 = vld [vmem:[#allocation18] sm:$0xff] }
0x305a   : > { %v13990_v54 = vpop.eup %13989  ;;  %13384 = vmatprep.subr.mxu1 %v14468_v0  ;;  %13405 = vmatprep.subr.mxu0 %v14468_v0 }
0x305b   : > { %13385 = vmatpush3.msra.mxu1 %v16485_v19  ;;  %13406 = vmatpush3.msra.mxu0 %v16485_v19  ;;  %v16491_v61 = vadd.f32 %v11767_v26, %v10263_v29  ;;  %v10262_v21 = vmul.f32 %v11766_v2, %v10250_v27  ;;  %v10249_v36 = vmul.f32 %v13990_v54, %v16462_v45 }
0x305c   : > { %13386 = vmatprep.subr.mxu1 %v14468_v0  ;;  %13407 = vmatprep.subr.mxu0 %v14468_v0 }
0x305d   : > { %13387 = vmatpush3.msra.mxu1 %v16491_v61  ;;  %13408 = vmatpush3.msra.mxu0 %v16491_v61  ;;  %v16498_v40 = vadd.f32 %v11767_v26, %v10262_v21  ;;  %v10261_v1 = vmul.f32 %v11766_v2, %v10249_v36 }
0x305e   : > { %13388 = vmatprep.subr.mxu1 %v14468_v0  ;;  %13409 = vmatprep.subr.mxu0 %v14468_v0 }
0x305f   : > { %13389 = vmatpush3.msra.mxu1 %v16498_v40  ;;  %13410 = vmatpush3.msra.mxu0 %v16498_v40  ;;  %v16504_v4 = vadd.f32 %v11767_v26, %v10261_v1 }
0x3060   : > { %13390 = vmatprep.subr.mxu1 %v14468_v0  ;;  %13411 = vmatprep.subr.mxu0 %v14468_v0 }
0x3061   : > { %13391 = vmatpush3.msra.mxu1 %v16504_v4  ;;  %13412 = vmatpush3.msra.mxu0 %v16504_v4 }
0x3062   : > { %13414 = vmatmul.mubr.msk.f32.vlgmr.msra.gmra.mxu0 %vm3618_vm6, %v10374_v3  ;;  %13393 = vmatmul.mubr.msk.f32.vlgmr.msra.gmra.mxu1 %vm3618_vm6, %v10279_v24 }
0x3063   : > { %13416 = vmatprep.mubr.msk.f32.mxu0 %vm14469_vm0, %v14468_v0  ;;  %13395 = vmatprep.mubr.msk.f32.mxu1 %vm14469_vm0, %v14468_v0 }
0x3064   : > { %13422 = vmatprep.subr.mxu1 %v14468_v0  ;;  %13435 = vmatprep.subr.mxu0 %v14468_v0 }
0x3065   : > { %13423 = vmatpush3.msra.mxu1 %v10468_v37  ;;  %13436 = vmatpush3.msra.mxu0 %v10372_v44 }
0x3066   : > { %13417 = vmatmul.mubr.msk.f32.gmra.mxu0 %vm3618_vm6, %v10375_v60  ;;  %13396 = vmatmul.mubr.msk.f32.gmra.mxu1 %vm3618_vm6, %v10280_v12 }
0x3067   : > { %13419 = vmatprep.mubr.msk.f32.mxu0 %vm14469_vm0, %v14468_v0  ;;  %13398 = vmatprep.mubr.msk.f32.mxu1 %vm14469_vm0, %v14468_v0 }
0x3068   : > { %13424 = vmatprep.subr.mxu1 %v14468_v0  ;;  %13437 = vmatprep.subr.mxu0 %v14468_v0 }
0x3069   : > { %13425 = vmatpush3.msra.mxu1 %v10467_v49  ;;  %13438 = vmatpush3.msra.mxu0 %v10371_v16 }
0x306a   : > { %13420 = vmatmul.mubr.msk.f32.gmra.mxu0 %vm3618_vm6, %v10376_v32  ;;  %13399 = vmatmul.mubr.msk.f32.gmra.mxu1 %vm3618_vm6, %v10281_v48 }
0x306b   : > { %13426 = vmatprep.mubr.msk.f32.mxu1 %vm14469_vm0, %v14468_v0  ;;  %13448 = vmatprep.subr.mxu1 %v14468_v0 }
0x306c   : > { %13439 = vmatprep.mubr.msk.f32.mxu0 %vm14469_vm0, %v14468_v0  ;;  %13469 = vmatprep.subr.mxu0 %v14468_v0 }
0x3122   : > { %v10452_v43 = vpop.f32.mrf.mxu0  ;;  %v10357_v13 = vpop.f32.mrf.mxu1 }
0x3123   : > { %13427 = vmatmul.mubr.msk.f32.vlgmr.msra.gmra.mxu1 %vm1201_vm3, %v10452_v43  ;;  %13440 = vmatmul.mubr.msk.f32.vlgmr.msra.gmra.mxu0 %vm1201_vm3, %v10357_v13 }
0x3124   : > { %13449 = vmatpush3.msra.mxu1 %v16475_v57  ;;  %v13415_v46 = vpop.f32.mrf.mxu0  ;;  %13429 = vmatprep.mubr.msk.f32.mxu1 %vm14469_vm0, %v14468_v0  ;;  %v13394_v45 = vpop.f32.mrf.mxu1 }
0x3125   : > { %13450 = vmatprep.subr.mxu1 %v14468_v0  ;;  %13442 = vmatprep.mubr.msk.f32.mxu0 %vm14469_vm0, %v14468_v0 }
0x3126   : > { %13451 = vmatpush3.msra.mxu1 %v16479_v10  ;;  %v10457_v17 = vpop.f32.mrf.mxu0  ;;  %v10362_v56 = vpop.f32.mrf.mxu1  ;;  %13470 = vmatpush3.msra.mxu0 %v10742_v63 }
0x3127   : > { %13452 = vmatprep.subr.mxu1 %v14468_v0  ;;  %13430 = vmatmul.mubr.msk.f32.gmra.mxu1 %vm1201_vm3, %v10457_v17 }
0x3128   : > { %13453 = vmatpush3.msra.mxu1 %v16485_v19  ;;  %v13418_v30 = vpop.f32.mrf.mxu0  ;;  %13432 = vmatprep.mubr.msk.f32.mxu1 %vm14469_vm0, %v14468_v0  ;;  %v13397_v31 = vpop.f32.mrf.mxu1 }
0x3129   : > { %13454 = vmatprep.subr.mxu1 %v14468_v0  ;;  %13443 = vmatmul.mubr.msk.f32.gmra.mxu0 %vm1201_vm3, %v10362_v56 }
0x312a   : > { %13455 = vmatpush3.msra.mxu1 %v16491_v61  ;;  %v10462_v35 = vpop.f32.mrf.mxu0  ;;  %v10367_v47 = vpop.f32.mrf.mxu1  ;;  %13445 = vmatprep.mubr.msk.f32.mxu0 %vm14469_vm0, %v14468_v0 }
0x312b   : > { %13456 = vmatprep.subr.mxu1 %v14468_v0  ;;  %13433 = vmatmul.mubr.msk.f32.gmra.mxu1 %vm1201_vm3, %v10462_v35 }
0x312c   : > { %13457 = vmatpush3.msra.mxu1 %v16498_v40  ;;  %13460 = vmatprep.mubr.msk.f32.mxu1 %vm14469_vm0, %v14468_v0  ;;  %v13421_v58 = vpop.f32.mrf.mxu0  ;;  %v13400_v28 = vpop.f32.mrf.mxu1 }
0x312d   : > { %13458 = vmatprep.subr.mxu1 %v14468_v0  ;;  %13446 = vmatmul.mubr.msk.f32.gmra.mxu0 %vm1201_vm3, %v10367_v47 }
0x312e   : > { %13459 = vmatpush3.msra.mxu1 %v16504_v4  ;;  %13473 = vmatprep.mubr.msk.f32.mxu0 %vm14469_vm0, %v14468_v0 }
0x312f   : > { %13482 = vmatprep.subr.mxu1 %v14468_v0  ;;  %13461 = vmatmul.mubr.msk.f32.vlgmr.msra.gmra.mxu1 %vm3618_vm6, %v10648_v34 }
0x3130   : > { %13483 = vmatpush3.msra.mxu1 %v16475_v57  ;;  %13463 = vmatprep.mubr.msk.f32.mxu1 %vm14469_vm0, %v14468_v0 }
0x3131   : > { %13484 = vmatprep.subr.mxu1 %v14468_v0  ;;  %13471 = vmatprep.subr.mxu0 %v14468_v0 }
0x3132   : > { %13485 = vmatpush3.msra.mxu1 %v16479_v10  ;;  %13472 = vmatpush3.msra.mxu0 %v10741_v55 }
0x3133   : > { %13486 = vmatprep.subr.mxu1 %v14468_v0  ;;  %13464 = vmatmul.mubr.msk.f32.gmra.mxu1 %vm3618_vm6, %v10649_v50 }
0x3134   : > { %13487 = vmatpush3.msra.mxu1 %v16485_v19  ;;  %13466 = vmatprep.mubr.msk.f32.mxu1 %vm14469_vm0, %v14468_v0 }
0x3135   : > { %13488 = vmatprep.subr.mxu1 %v14468_v0  ;;  %13503 = vmatprep.subr.mxu0 %v14468_v0 }
0x3136   : > { %13489 = vmatpush3.msra.mxu1 %v16491_v61 }
0x3137   : > { %13490 = vmatprep.subr.mxu1 %v14468_v0  ;;  %13467 = vmatmul.mubr.msk.f32.gmra.mxu1 %vm3618_vm6, %v10650_v52 }
0x3138   : > { %13491 = vmatpush3.msra.mxu1 %v16498_v40  ;;  %13494 = vmatprep.mubr.msk.f32.mxu1 %vm14469_vm0, %v14468_v0 }
0x3139   : > { %13492 = vmatprep.subr.mxu1 %v14468_v0 }
0x313a   : > { %13493 = vmatpush3.msra.mxu1 %v16504_v4 }
0x313b   : > { %13495 = vmatmul.mubr.msk.f32.vlgmr.msra.gmra.mxu1 %vm3618_vm6, %v10836_v53 }
0x313c   : > { %13497 = vmatprep.mubr.msk.f32.mxu1 %vm14469_vm0, %v14468_v0 }
0x313f   : > { %13498 = vmatmul.mubr.msk.f32.gmra.mxu1 %vm3618_vm6, %v10837_v38 }
0x3140   : > { %13500 = vmatprep.mubr.msk.f32.mxu1 %vm14469_vm0, %v14468_v0 }
0x3143   : > { %13501 = vmatmul.mubr.msk.f32.gmra.mxu1 %vm3618_vm6, %v10838_v62 }
0x31e3   : > { %v10544_v39 = vpop.f32.mrf.mxu1  ;;  %v10633_v59 = vpop.f32.mrf.mxu0 }
0x31e4   : > { %v10634_v5 = vadd.f32 %v10633_v59, %v10544_v39 }
0x31e5   : > { %v13428_v42 = vpop.f32.mrf.mxu1  ;;  %v13441_v8 = vpop.f32.mrf.mxu0 }
0x31e7   : > { %v10549_v11 = vpop.f32.mrf.mxu1 }
0x31e9   : > { %v13431_v23 = vpop.f32.mrf.mxu1  ;;  %v10638_v14 = vpop.f32.mrf.mxu0 }
0x31ea   : > { %v10639_v2 = vadd.f32 %v10638_v14, %v10549_v11 }
0x31eb   : > { %v10554_v41 = vpop.f32.mrf.mxu1  ;;  %v13444_v22 = vpop.f32.mrf.mxu0 }
0x31ed   : > { %v13434_v26 = vpop.f32.mrf.mxu1  ;;  %v10643_v7 = vpop.f32.mrf.mxu0 }
0x31ee   : > { %v10644_v25 = vadd.f32 %v10643_v7, %v10554_v41 }
0x31ef   : > { %v10726_v57 = vpop.f32.mrf.mxu1  ;;  %v13447_v20 = vpop.f32.mrf.mxu0 }
0x31f0   : > { %13474 = vmatmul.mubr.msk.f32.vlgmr.msra.gmra.mxu0 %vm1201_vm3, %v10726_v57 }
0x31f1   : > { %v13462_v6 = vpop.f32.mrf.mxu1  ;;  %13476 = vmatprep.mubr.msk.f32.mxu0 %vm14469_vm0, %v14468_v0  ;;  %13504 = vmatpush3.msra.mxu0 %v10930_v18 }
0x31f2   : > { %13505 = vmatprep.subr.mxu0 %v14468_v0 }
0x31f3   : > { %v10731_v10 = vpop.f32.mrf.mxu1  ;;  %13506 = vmatpush3.msra.mxu0 %v10929_v33 }
0x31f4   : > { %13477 = vmatmul.mubr.msk.f32.gmra.mxu0 %vm1201_vm3, %v10731_v10 }
0x31f5   : > { %v13465_v9 = vpop.f32.mrf.mxu1  ;;  %13479 = vmatprep.mubr.msk.f32.mxu0 %vm14469_vm0, %v14468_v0 }
0x31f7   : > { %v10736_v15 = vpop.f32.mrf.mxu1 }
0x31f8   : > { %13480 = vmatmul.mubr.msk.f32.gmra.mxu0 %vm1201_vm3, %v10736_v15 }
0x31f9   : > { %v13468_v51 = vpop.f32.mrf.mxu1  ;;  %13507 = vmatprep.mubr.msk.f32.mxu0 %vm14469_vm0, %v14468_v0 }
0x31fb   : > { %v10914_v19 = vpop.f32.mrf.mxu1 }
0x31fc   : > { %13508 = vmatmul.mubr.msk.f32.vlgmr.msra.gmra.mxu0 %vm1201_vm3, %v10914_v19 }
0x31fd   : > { %v13496_v29 = vpop.f32.mrf.mxu1  ;;  %13510 = vmatprep.mubr.msk.f32.mxu0 %vm14469_vm0, %v14468_v0 }
0x31ff   : > { %v10919_v27 = vpop.f32.mrf.mxu1 }
0x3200   : > { %13511 = vmatmul.mubr.msk.f32.gmra.mxu0 %vm1201_vm3, %v10919_v27 }
0x3201   : > { %v13499_v54 = vpop.f32.mrf.mxu1  ;;  %13513 = vmatprep.mubr.msk.f32.mxu0 %vm14469_vm0, %v14468_v0  ;;  %vm11050_vm0 = vcmask 15360  }
0x3203   : > { %v10924_v61 = vpop.f32.mrf.mxu1 }
0x3204   : > { %13514 = vmatmul.mubr.msk.f32.gmra.mxu0 %vm1201_vm3, %v10924_v61 }
0x3205   : > { %v13502_v21 = vpop.f32.mrf.mxu1 }
0x32b0   : > { %v10818_v36 = vpop.f32.mrf.mxu0 }
0x32b1   : > { %v10832_v37 = vadd.f32 %v10818_v36, %v10634_v5 }
0x32b2   : > { %v13475_v40 = vpop.f32.mrf.mxu0 }
0x32b4   : > { %v10823_v1 = vpop.f32.mrf.mxu0 }
0x32b5   : > { %v10833_v32 = vadd.f32 %v10823_v1, %v10639_v2 }
0x32b6   : > { %v13478_v4 = vpop.f32.mrf.mxu0 }
0x32b8   : > { %v10828_v3 = vpop.f32.mrf.mxu0 }
0x32b9   : > { %v10834_v13 = vadd.f32 %v10828_v3, %v10644_v25 }
0x32ba   : > { %v13481_v24 = vpop.f32.mrf.mxu0 }
0x32bc   : > { %v11006_v60 = vpop.f32.mrf.mxu0 }
0x32bd   : > { %v11020_v12 = vadd.f32 %v11006_v60, %v10832_v37 }
0x32be   : > { %v13509_v49 = vpop.f32.mrf.mxu0 }
0x32bf   : > { %v11026_v48 = vand.u32 2147483647, %v11020_v12  ;;  %v11023_v55 = vmax.f32 %v11020_v12, 0.0 }
0x32c0   : > { %v11011_v44 = vpop.f32.mrf.mxu0 }
0x32c1   : > { %v11029_v16 = vsub.f32 0.0, %v11026_v48  ;;  %v11021_v43 = vadd.f32 %v11011_v44, %v10833_v32 }
0x32c2   : > { %v13512_v0 = vpop.f32.mrf.mxu0 }
0x32c3   : > { %v11032_v46 = vmul.f32 1.442695, %v11029_v16  ;;  %v11027_v45 = vand.u32 2147483647, %v11021_v43  ;;  %v11024_v42 = vmax.f32 %v11021_v43, 0.0 }
0x32c4   : > { %v11016_v17 = vpop.f32.mrf.mxu0 }
0x32c5   : > { %13991 = vpow2.f32 %v11032_v46  ;;  %v11030_v56 = vsub.f32 0.0, %v11027_v45  ;;  %v11022_v30 = vadd.f32 %v11016_v17, %v10834_v13 }
0x32c6   : > { %v13515_v31 = vpop.f32.mrf.mxu0 }
0x32c7   : > { %v11034_v35 = vmul.f32 1.442695, %v11030_v56  ;;  %v11028_v47 = vand.u32 2147483647, %v11022_v30  ;;  %v11025_v14 = vmax.f32 %v11022_v30, 0.0 }
0x32c9   : > { %13993 = vpow2.f32 %v11034_v35  ;;  %v11031_v34 = vsub.f32 0.0, %v11028_v47 }
0x32cb   : > { %v11036_v58 = vmul.f32 1.442695, %v11031_v34 }
0x32cd   : > { %13995 = vpow2.f32 %v11036_v58 }
0x32d2   : > { %v13992_v28 = vpop.eup %13991 }
0x32d3   : > { %v11038_v50 = vadd.f32 1.0, %v13992_v28 }
0x32d5   : > { %13997 = vlog2.f32 %v11038_v50 }
0x32d6   : > { %v13994_v52 = vpop.eup %13993 }
0x32d7   : > { %v11039_v53 = vadd.f32 1.0, %v13994_v52 }
0x32d9   : > { %13999 = vlog2.f32 %v11039_v53 }
0x32da   : > { %v13996_v38 = vpop.eup %13995 }
0x32db   : > { %v11040_v62 = vadd.f32 1.0, %v13996_v38 }
0x32dd   : > { %14001 = vlog2.f32 %v11040_v62 }
0x32e2   : > { %v13998_v63 = vpop.eup %13997 }
0x32e3   : > { %v11042_v39 = vmul.f32 0.6931472, %v13998_v63 }
0x32e5   : > { %v11047_v59 = vadd.f32 %v11042_v39, %v11023_v55 }
0x32e6   : > { %v14000_v5 = vpop.eup %13999 }
0x32e7   : > { %11051 = vst.msk [vmem:[%s1053_s8] sm:$0xff] %vm11050_vm0, %v11047_v59  ;;  %v11044_v8 = vmul.f32 0.6931472, %v14000_v5 }
0x32e9   : > { %v11048_v11 = vadd.f32 %v11044_v8, %v11024_v42 }
0x32ea   : > { %v14002_v23 = vpop.eup %14001 }
0x32eb   : > { %11052 = vst.msk [vmem:[%s1053_s8 + $0x8] sm:$0xff] %vm11050_vm0, %v11048_v11  ;;  %v11046_v2 = vmul.f32 0.6931472, %v14002_v23 }
0x32ed   : > { %v11049_v41 = vadd.f32 %v11046_v2, %v11025_v14 }
0x32ef   : > { %11053 = vst.msk [vmem:[%s1053_s8 + $0x10] sm:$0xff] %vm11050_vm0, %v11049_v41 }
0x32f0 PF: > { %s16708_s4 = sld [smem:[#allocation33_spill]] }
0x32f6   : > { %s46_s8 = sadd.s32 1, %s16708_s4  }
0x32f7   : > { %p43_p8 = scmp.ge.s32.totalorder %s46_s8, 4  }
0x32f9   :  { %45 = sbr.rel (!%p43_p8) target bundleno = 24 (0x18), region = 273 }
0x32fe   :  { %11075 = vsyncpa [#allocation3], 1 }
0x32ff   :  { %11077 = vsyncpa [#allocation3 + $0x1], 1 }
0x3300   :  { %11078 = vsyncpa [#allocation5], 1 }
0x3301   :  { %11079 = vsyncpa [#allocation8], 1 }
0x3302   :  { %11080 = vsyncpa [#allocation11], 1 }
0x3303   :  { %11081 = vsyncpa [#allocation14], 1 }
0x3304   :  { %11082 = vsyncpa [#allocation17], 1 }
0x3305   :  { %11083 = vsyncpa [#allocation20], 1 }
0x3306   :  { %11084 = vsyncpa [#allocation23], 1 }

</bundles_post_ra>
